<compile_context>
chip_gen: v5e
topology: v5e:2x2
jax: 0.10.0
libtpu: 0.0.40
codegen_flags: <defaults>
</compile_context>

<pallas_src>
import math

import jax
import jax.numpy as jnp
from jax.experimental import pallas as pl
from jax.experimental.pallas import tpu as pltpu

F32 = jnp.float32
LN_EPS = 1e-5  # PyTorch nn.LayerNorm default


def _vmem():
    return pl.BlockSpec(memory_space=pltpu.MemorySpace.VMEM)


# --------------------------- in-kernel helpers ---------------------------

def _layernorm(v, g, b, eps=LN_EPS):
    """LayerNorm over the last dim of value v ([N, E]); g,b are [1, E]."""
    mu = jnp.mean(v, axis=-1, keepdims=True)
    c = v - mu
    var = jnp.mean(c * c, axis=-1, keepdims=True)
    return c * jax.lax.rsqrt(var + eps) * g + b


def _mha_block(q2d, k2d, v2d, wo, bo, *, B, Sq, Skv, H, D):
    """Multi-head scaled-dot-product attention + output projection.

    Batch-first 2D values: q2d [B*Sq, H*D], k2d/v2d [B*Skv, H*D],
    wo [H*D, E], bo [1, E]  ->  [B*Sq, E].
    Unrolled over (batch, head); heads merged via
    sum_h head_h @ wo[h*D:(h+1)*D]  ==  concat(heads) @ wo.
    """
    scale = 1.0 / math.sqrt(D)
    rows = []
    for b in range(B):
        qr = slice(b * Sq, (b + 1) * Sq)
        kr = slice(b * Skv, (b + 1) * Skv)
        proj = None
        for h in range(H):
            hc = slice(h * D, (h + 1) * D)
            q = q2d[qr, hc]                                   # [Sq, D]
            k = k2d[kr, hc]                                   # [Skv, D]
            v = v2d[kr, hc]                                   # [Skv, D]
            s = jax.lax.dot_general(q, k, (((1,), (1,)), ((), ())),
                                    preferred_element_type=jnp.float32) * scale
            m = jnp.max(s, axis=-1, keepdims=True)
            p = jnp.exp(s - m)
            p = p * pl.reciprocal(jnp.sum(p, axis=-1, keepdims=True), approx=True)
            o_h = jnp.dot(p, v, preferred_element_type=jnp.float32)       # [Sq, D]
            contrib = jnp.dot(o_h, wo[hc, :], preferred_element_type=jnp.float32)
            proj = contrib if proj is None else proj + contrib
        rows.append(proj)                                     # [Sq, E]
    return jnp.concatenate(rows, axis=0) + bo                 # [B*Sq, E]


# --------------------------- fused layer kernels ---------------------------

def encoder_layer(x2d, p, *, B, S, H):
    """One fused post-norm TransformerEncoderLayer on [B*S, E] activations."""
    N, E = x2d.shape
    D = E // H

    def kernel(x_ref, wqkv, bqkv, wo, bo, g1, b1,
               ffw1, ffb1, ffw2, ffb2, g2, b2, o_ref):
        x = x_ref[...]
        qkv = jnp.dot(x, wqkv[...], preferred_element_type=jnp.float32) + bqkv[...]
        a = _mha_block(qkv[:, :E], qkv[:, E:2 * E], qkv[:, 2 * E:],
                       wo[...], bo[...], B=B, Sq=S, Skv=S, H=H, D=D)
        h1 = _layernorm(x + a, g1[...], b1[...])
        f = jnp.maximum(
            jnp.dot(h1, ffw1[...], preferred_element_type=jnp.float32) + ffb1[...], 0.0)
        f = jnp.dot(f, ffw2[...], preferred_element_type=jnp.float32) + ffb2[...]
        o_ref[...] = _layernorm(h1 + f, g2[...], b2[...])

    args = (x2d, p['wqkv'], p['bqkv'], p['wo'], p['bo'],
            p['ln1_g'], p['ln1_b'], p['ff_w1'], p['ff_b1'],
            p['ff_w2'], p['ff_b2'], p['ln2_g'], p['ln2_b'])
    return pl.pallas_call(
        kernel,
        out_shape=jax.ShapeDtypeStruct((N, E), F32),
        in_specs=[_vmem()] * len(args),
        out_specs=_vmem(),
    )(*args)


def decoder_layer(y2d, mem2d, p, *, B, T, S, H):
    """One fused post-norm TransformerDecoderLayer (self-attn, cross-attn, FFN)."""
    N, E = y2d.shape
    D = E // H

    def kernel(y_ref, m_ref,
               sa_wqkv, sa_bqkv, sa_wo, sa_bo, g1, b1,
               ca_wq, ca_bq, ca_wkv, ca_bkv, ca_wo, ca_bo, g2, b2,
               ffw1, ffb1, ffw2, ffb2, g3, b3, o_ref):
        y = y_ref[...]
        mem = m_ref[...]
        # self attention (tgt_mask is None in the reference forward)
        qkv = jnp.dot(y, sa_wqkv[...], preferred_element_type=jnp.float32) + sa_bqkv[...]
        a = _mha_block(qkv[:, :E], qkv[:, E:2 * E], qkv[:, 2 * E:],
                       sa_wo[...], sa_bo[...], B=B, Sq=T, Skv=T, H=H, D=D)
        h1 = _layernorm(y + a, g1[...], b1[...])
        # cross attention over the channel-decoded memory
        q = jnp.dot(h1, ca_wq[...], preferred_element_type=jnp.float32) + ca_bq[...]
        kv = jnp.dot(mem, ca_wkv[...], preferred_element_type=jnp.float32) + ca_bkv[...]
        c = _mha_block(q, kv[:, :E], kv[:, E:],
                       ca_wo[...], ca_bo[...], B=B, Sq=T, Skv=S, H=H, D=D)
        h2 = _layernorm(h1 + c, g2[...], b2[...])
        # feed-forward
        f = jnp.maximum(
            jnp.dot(h2, ffw1[...], preferred_element_type=jnp.float32) + ffb1[...], 0.0)
        f = jnp.dot(f, ffw2[...], preferred_element_type=jnp.float32) + ffb2[...]
        o_ref[...] = _layernorm(h2 + f, g3[...], b3[...])

    args = (y2d, mem2d,
            p['sa_wqkv'], p['sa_bqkv'], p['sa_wo'], p['sa_bo'],
            p['ln1_g'], p['ln1_b'],
            p['ca_wq'], p['ca_bq'], p['ca_wkv'], p['ca_bkv'], p['ca_wo'], p['ca_bo'],
            p['ln2_g'], p['ln2_b'],
            p['ff_w1'], p['ff_b1'], p['ff_w2'], p['ff_b2'],
            p['ln3_g'], p['ln3_b'])
    return pl.pallas_call(
        kernel,
        out_shape=jax.ShapeDtypeStruct((N, E), F32),
        in_specs=[_vmem()] * len(args),
        out_specs=_vmem(),
    )(*args)


def channel_path(x2d, noise, p, n_std):
    """ChannelEnc -> power norm -> AWGN -> ChannelDec -> LayerNorm, one kernel."""
    N, E = x2d.shape
    half = float(n_std) * 0.5  # reference: x + randn_like(x) * (n_std / 2)

    def kernel(x_ref, n_ref, ce_w1, ce_b1, ce_w2, ce_b2,
               cd_w1, cd_b1, cd_w2, cd_b2, cd_w3, cd_b3, g, b, o_ref):
        x = x_ref[...]
        # channel encoder: Linear(E,256) -> ReLU -> Linear(256,C)
        h = jnp.maximum(
            jnp.dot(x, ce_w1[...], preferred_element_type=jnp.float32) + ce_b1[...], 0.0)
        enc = jnp.dot(h, ce_w2[...], preferred_element_type=jnp.float32) + ce_b2[...]
        # power normalization over the WHOLE tensor (matches reference powernorm)
        enc = enc * jax.lax.rsqrt(2.0 * jnp.mean(enc * enc))
        # AWGN channel
        rx = enc + n_ref[...] * half
        # channel decoder: x1 = ReLU(Lin(C,E)); x2 = Lin(512,E)(ReLU(Lin(E,512)))
        x1 = jnp.maximum(
            jnp.dot(rx, cd_w1[...], preferred_element_type=jnp.float32) + cd_b1[...], 0.0)
        x2 = jnp.maximum(
            jnp.dot(x1, cd_w2[...], preferred_element_type=jnp.float32) + cd_b2[...], 0.0)
        x2 = jnp.dot(x2, cd_w3[...], preferred_element_type=jnp.float32) + cd_b3[...]
        o_ref[...] = _layernorm(x1 + x2, g[...], b[...])

    args = (x2d, noise, p['ce_w1'], p['ce_b1'], p['ce_w2'], p['ce_b2'],
            p['cd_w1'], p['cd_b1'], p['cd_w2'], p['cd_b2'], p['cd_w3'], p['cd_b3'],
            p['cd_ln_g'], p['cd_ln_b'])
    return pl.pallas_call(
        kernel,
        out_shape=jax.ShapeDtypeStruct((N, E), F32),
        in_specs=[_vmem()] * len(args),
        out_specs=_vmem(),
    )(*args)


def generator(y2d, w_pad, b_pad):
    """Lane-dense generator matmul (weights padded to 128 output lanes)."""
    N, E = y2d.shape
    VP = w_pad.shape[1]

    def kernel(x_ref, w_ref, b_ref, o_ref):
        o_ref[...] = (jnp.dot(x_ref[...], w_ref[...],
                              preferred_element_type=jnp.float32) + b_ref[...])

    return pl.pallas_call(
        kernel,
        out_shape=jax.ShapeDtypeStruct((N, VP), F32),
        in_specs=[_vmem()] * 3,
        out_specs=_vmem(),
    )(y2d, w_pad, b_pad)


# ------------------------------ Transceiver ------------------------------

def transceiver_forward(params, cfg, src, tgt, noise_key, noise_var=0.1):
    # TODO(synk): attn/padding masks and the Rician/Rayleigh fading channel
    # branch are not implemented (reference forward uses None masks and AWGN).
    E, H = cfg['emb_size'], cfg['nhead']
    V = cfg['tgt_vocab_size']
    S, B = src.shape
    T = tgt.shape[0]
    sqrt_e = math.sqrt(E)

    # --- semantic encoder: TokenEmbedding * sqrt(E) + PositionalEncoding ---
    # (gather + scale + add fuse into one XLA op under jit)
    x = jnp.take(params['src_emb'], src, axis=0) * sqrt_e + params['pe'][:S]
    xb = jnp.transpose(x, (1, 0, 2)).reshape(B * S, E)        # batch-first rows
    for lp in params['enc_layers']:
        xb = encoder_layer(xb, lp, B=B, S=S, H=H)
    semantic_features = jnp.transpose(xb.reshape(B, S, E), (1, 0, 2))   # [S,B,E]

    # --- channel encoder + power norm + AWGN + channel decoder (one kernel) ---
    C = params['ce_w2'].shape[1]
    noise = jax.random.normal(noise_key, (B * S, C), F32)     # torch.randn_like
    memb = channel_path(xb, noise, params, noise_var)         # [B*S, E]
    channel_decoding = jnp.transpose(memb.reshape(B, S, E), (1, 0, 2))  # [S,B,E]

    # --- semantic decoder + generator ---
    y = jnp.take(params['tgt_emb'], tgt, axis=0) * sqrt_e + params['pe'][:T]
    yb = jnp.transpose(y, (1, 0, 2)).reshape(B * T, E)
    for lp in params['dec_layers']:
        yb = decoder_layer(yb, memb, lp, B=B, T=T, S=S, H=H)
    logits = generator(yb, params['gen_w'], params['gen_b'])[:, :V]
    outputs = jnp.transpose(logits.reshape(B, T, V), (1, 0, 2))         # [T,B,V]

    return outputs, channel_decoding, semantic_features


def make_forward(cfg, noise_var=0.1):
    """Jitted Transceiver forward (eval mode, AWGN channel, static noise_var)."""
    def fwd(params, src, tgt, noise_key):
        return transceiver_forward(params, cfg, src, tgt, noise_key, noise_var)
    return jax.jit(fwd)


# ------------------------- deterministic parameter init -------------------------

def init_params(key, cfg, src_vocab, tgt_vocab):
    E, FF, C = cfg['emb_size'], cfg['dim_feedforward'], cfg['coding_rate']
    keys = iter(jax.random.split(key, 256))

    def w(i, o, scale=0.1):
        return jax.random.normal(next(keys), (i, o), F32) * scale

    def b(o):
        return jnp.zeros((1, o), F32)

    def ln(o):
        return jnp.ones((1, o), F32), jnp.zeros((1, o), F32)

    def enc_layer_params():
        g1, be1 = ln(E); g2, be2 = ln(E)
        return dict(
            wqkv=w(E, 3 * E), bqkv=b(3 * E), wo=w(E, E), bo=b(E),
            ln1_g=g1, ln1_b=be1,
            ff_w1=w(E, FF), ff_b1=b(FF), ff_w2=w(FF, E), ff_b2=b(E),
            ln2_g=g2, ln2_b=be2)

    def dec_layer_params():
        g1, be1 = ln(E); g2, be2 = ln(E); g3, be3 = ln(E)
        return dict(
            sa_wqkv=w(E, 3 * E), sa_bqkv=b(3 * E), sa_wo=w(E, E), sa_bo=b(E),
            ln1_g=g1, ln1_b=be1,
            ca_wq=w(E, E), ca_bq=b(E), ca_wkv=w(E, 2 * E), ca_bkv=b(2 * E),
            ca_wo=w(E, E), ca_bo=b(E),
            ln2_g=g2, ln2_b=be2,
            ff_w1=w(E, FF), ff_b1=b(FF), ff_w2=w(FF, E), ff_b2=b(E),
            ln3_g=g3, ln3_b=be3)

    # PositionalEncoding buffer, exactly as in the PyTorch module.
    max_len = 64
    position = jnp.arange(max_len, dtype=F32)[:, None]
    div_term = jnp.exp(jnp.arange(0, E, 2, dtype=F32) * (-math.log(10000.0) / E))
    pe = jnp.zeros((max_len, 1, E), F32)
    pe = pe.at[:, 0, 0::2].set(jnp.sin(position * div_term))
    pe = pe.at[:, 0, 1::2].set(jnp.cos(position * div_term))

    # Lane-dense generator: zero-pad tgt_vocab up to a multiple of 128 lanes.
    vp = ((tgt_vocab + 127) // 128) * 128
    gen_w = jnp.zeros((E, vp), F32).at[:, :tgt_vocab].set(w(E, tgt_vocab))
    gen_b = jnp.zeros((1, vp), F32)

    cdg, cdb = ln(E)
    return dict(
        src_emb=jax.random.uniform(next(keys), (src_vocab, E), F32, -0.1, 0.1),
        tgt_emb=jax.random.uniform(next(keys), (tgt_vocab, E), F32, -0.1, 0.1),
        pe=pe,
        enc_layers=[enc_layer_params() for _ in range(cfg['num_encoder_layers'])],
        dec_layers=[dec_layer_params() for _ in range(cfg['num_decoder_layers'])],
        # ChannelEnc: Linear(E,256)->ReLU->Linear(256,C)
        ce_w1=w(E, 256), ce_b1=b(256), ce_w2=w(256, C), ce_b2=b(C),
        # ChannelDec: Linear(C,E)->ReLU; Linear(E,512)->ReLU->Linear(512,E); LayerNorm(E)
        cd_w1=w(C, E), cd_b1=b(E), cd_w2=w(E, 512), cd_b2=b(512),
        cd_w3=w(512, E), cd_b3=b(E), cd_ln_g=cdg, cd_ln_b=cdb,
        gen_w=gen_w, gen_b=gen_b,
    )


# ----------------------------------- main -----------------------------------

if __name__ == "__main__":
    SRC_VOCAB, TGT_VOCAB = 40, 48
    cfg = dict(emb_size=32, nhead=4, dim_feedforward=64, coding_rate=16,
               num_encoder_layers=2, num_decoder_layers=2, dropout=0.0,
               channel='AWGN', tgt_vocab_size=TGT_VOCAB)
    S, T, B = 8, 8, 2

    key = jax.random.PRNGKey(0)
    pkey, skey, tkey, nkey = jax.random.split(key, 4)

    params = init_params(pkey, cfg, SRC_VOCAB, TGT_VOCAB)
    src = jax.random.randint(skey, (S, B), 0, SRC_VOCAB, dtype=jnp.int32)
    tgt = jax.random.randint(tkey, (T, B), 0, TGT_VOCAB, dtype=jnp.int32)

    fwd = make_forward(cfg, noise_var=0.1)
    outputs, channel_decoding, semantic_features = fwd(params, src, tgt, nkey)

    jax.block_until_ready(outputs)
    jax.block_until_ready(channel_decoding)
    jax.block_until_ready(semantic_features)

    assert outputs.shape == (T, B, TGT_VOCAB)
    assert channel_decoding.shape == (S, B, cfg['emb_size'])
    assert semantic_features.shape == (S, B, cfg['emb_size'])
    assert bool(jnp.all(jnp.isfinite(outputs)))
    assert bool(jnp.all(jnp.isfinite(channel_decoding)))
    assert bool(jnp.all(jnp.isfinite(semantic_features)))

    print("KERNEL_OK")
</pallas_src>

<mosaic_0001>
module attributes {stable_mosaic.version = 11 : i64} {
  func.func @kernel(%arg0: memref<16x32xf32, #tpu.memory_space<vmem>>, %arg1: memref<32x96xf32, #tpu.memory_space<vmem>>, %arg2: memref<1x96xf32, #tpu.memory_space<vmem>>, %arg3: memref<32x32xf32, #tpu.memory_space<vmem>>, %arg4: memref<1x32xf32, #tpu.memory_space<vmem>>, %arg5: memref<1x32xf32, #tpu.memory_space<vmem>>, %arg6: memref<1x32xf32, #tpu.memory_space<vmem>>, %arg7: memref<32x64xf32, #tpu.memory_space<vmem>>, %arg8: memref<1x64xf32, #tpu.memory_space<vmem>>, %arg9: memref<64x32xf32, #tpu.memory_space<vmem>>, %arg10: memref<1x32xf32, #tpu.memory_space<vmem>>, %arg11: memref<1x32xf32, #tpu.memory_space<vmem>>, %arg12: memref<1x32xf32, #tpu.memory_space<vmem>>, %arg13: memref<16x32xf32, #tpu.memory_space<vmem>>) attributes {dimension_semantics = [], scalar_prefetch = 0 : i64, scratch_operands = 0 : i64, tpu.core_type = #tpu.core_type<tc>} {
    %c0 = arith.constant 0 : index
    %c0_0 = arith.constant 0 : index
    %0 = vector.load %arg0[%c0, %c0_0] : memref<16x32xf32, #tpu.memory_space<vmem>>, vector<16x32xf32>
    %c0_1 = arith.constant 0 : index
    %c0_2 = arith.constant 0 : index
    %1 = vector.load %arg1[%c0_1, %c0_2] : memref<32x96xf32, #tpu.memory_space<vmem>>, vector<32x96xf32>
    %cst = arith.constant dense<0.000000e+00> : vector<16x96xf32>
    %2 = tpu.matmul %0, %1, %cst {dimension_numbers = #tpu.dot_dimension_numbers<[1], [0], [0], [1], [0, 0, 1, 1], [], []>} : vector<16x32xf32>, vector<32x96xf32>, vector<16x96xf32> -> vector<16x96xf32>
    %c0_3 = arith.constant 0 : index
    %c0_4 = arith.constant 0 : index
    %3 = vector.load %arg2[%c0_3, %c0_4] : memref<1x96xf32, #tpu.memory_space<vmem>>, vector<1x96xf32>
    %4 = vector.broadcast %3 : vector<1x96xf32> to vector<16x96xf32>
    %5 = arith.addf %2, %4 : vector<16x96xf32>
    %6 = vector.extract_strided_slice %5 {offsets = [0, 0], sizes = [16, 32], strides = [1, 1]} : vector<16x96xf32> to vector<16x32xf32>
    %7 = vector.extract_strided_slice %5 {offsets = [0, 32], sizes = [16, 32], strides = [1, 1]} : vector<16x96xf32> to vector<16x32xf32>
    %8 = vector.extract_strided_slice %5 {offsets = [0, 64], sizes = [16, 32], strides = [1, 1]} : vector<16x96xf32> to vector<16x32xf32>
    %c0_5 = arith.constant 0 : index
    %c0_6 = arith.constant 0 : index
    %9 = vector.load %arg3[%c0_5, %c0_6] : memref<32x32xf32, #tpu.memory_space<vmem>>, vector<32x32xf32>
    %c0_7 = arith.constant 0 : index
    %c0_8 = arith.constant 0 : index
    %10 = vector.load %arg4[%c0_7, %c0_8] : memref<1x32xf32, #tpu.memory_space<vmem>>, vector<1x32xf32>
    %11 = vector.extract_strided_slice %6 {offsets = [0, 0], sizes = [8, 8], strides = [1, 1]} : vector<16x32xf32> to vector<8x8xf32>
    %12 = vector.extract_strided_slice %7 {offsets = [0, 0], sizes = [8, 8], strides = [1, 1]} : vector<16x32xf32> to vector<8x8xf32>
    %13 = vector.extract_strided_slice %8 {offsets = [0, 0], sizes = [8, 8], strides = [1, 1]} : vector<16x32xf32> to vector<8x8xf32>
    %cst_9 = arith.constant dense<0.000000e+00> : vector<8x8xf32>
    %14 = tpu.matmul %11, %12, %cst_9 {dimension_numbers = #tpu.dot_dimension_numbers<[1], [1], [0], [0], [0, 0, 1, 0], [], []>} : vector<8x8xf32>, vector<8x8xf32>, vector<8x8xf32> -> vector<8x8xf32>
    %cst_10 = arith.constant 0.353553385 : f32
    %15 = vector.broadcast %cst_10 : f32 to vector<8x8xf32>
    %16 = arith.mulf %14, %15 : vector<8x8xf32>
    %cst_11 = arith.constant dense<0xFF800000> : vector<8xf32>
    %17 = vector.multi_reduction <maximumf>, %16, %cst_11 [1] : vector<8x8xf32> to vector<8xf32>
    %18 = vector.shape_cast %17 : vector<8xf32> to vector<8x1xf32>
    %19 = vector.broadcast %18 : vector<8x1xf32> to vector<8x8xf32>
    %20 = arith.subf %16, %19 : vector<8x8xf32>
    %21 = math.exp %20 : vector<8x8xf32>
    %cst_12 = arith.constant dense<0.000000e+00> : vector<8xf32>
    %22 = vector.multi_reduction <add>, %21, %cst_12 [1] : vector<8x8xf32> to vector<8xf32>
    %23 = vector.shape_cast %22 : vector<8xf32> to vector<8x1xf32>
    %24 = tpu.reciprocal %23 {approx = true} : vector<8x1xf32> -> vector<8x1xf32>
    %25 = vector.broadcast %24 : vector<8x1xf32> to vector<8x8xf32>
    %26 = arith.mulf %21, %25 : vector<8x8xf32>
    %cst_13 = arith.constant dense<0.000000e+00> : vector<8x8xf32>
    %27 = tpu.matmul %26, %13, %cst_13 {dimension_numbers = #tpu.dot_dimension_numbers<[1], [0], [0], [1], [0, 0, 1, 1], [], []>} : vector<8x8xf32>, vector<8x8xf32>, vector<8x8xf32> -> vector<8x8xf32>
    %28 = vector.extract_strided_slice %9 {offsets = [0, 0], sizes = [8, 32], strides = [1, 1]} : vector<32x32xf32> to vector<8x32xf32>
    %cst_14 = arith.constant dense<0.000000e+00> : vector<8x32xf32>
    %29 = tpu.matmul %27, %28, %cst_14 {dimension_numbers = #tpu.dot_dimension_numbers<[1], [0], [0], [1], [0, 0, 1, 1], [], []>} : vector<8x8xf32>, vector<8x32xf32>, vector<8x32xf32> -> vector<8x32xf32>
    %30 = vector.extract_strided_slice %6 {offsets = [0, 8], sizes = [8, 8], strides = [1, 1]} : vector<16x32xf32> to vector<8x8xf32>
    %31 = vector.extract_strided_slice %7 {offsets = [0, 8], sizes = [8, 8], strides = [1, 1]} : vector<16x32xf32> to vector<8x8xf32>
    %32 = vector.extract_strided_slice %8 {offsets = [0, 8], sizes = [8, 8], strides = [1, 1]} : vector<16x32xf32> to vector<8x8xf32>
    %cst_15 = arith.constant dense<0.000000e+00> : vector<8x8xf32>
    %33 = tpu.matmul %30, %31, %cst_15 {dimension_numbers = #tpu.dot_dimension_numbers<[1], [1], [0], [0], [0, 0, 1, 0], [], []>} : vector<8x8xf32>, vector<8x8xf32>, vector<8x8xf32> -> vector<8x8xf32>
    %cst_16 = arith.constant 0.353553385 : f32
    %34 = vector.broadcast %cst_16 : f32 to vector<8x8xf32>
    %35 = arith.mulf %33, %34 : vector<8x8xf32>
    %cst_17 = arith.constant dense<0xFF800000> : vector<8xf32>
    %36 = vector.multi_reduction <maximumf>, %35, %cst_17 [1] : vector<8x8xf32> to vector<8xf32>
    %37 = vector.shape_cast %36 : vector<8xf32> to vector<8x1xf32>
    %38 = vector.broadcast %37 : vector<8x1xf32> to vector<8x8xf32>
    %39 = arith.subf %35, %38 : vector<8x8xf32>
    %40 = math.exp %39 : vector<8x8xf32>
    %cst_18 = arith.constant dense<0.000000e+00> : vector<8xf32>
    %41 = vector.multi_reduction <add>, %40, %cst_18 [1] : vector<8x8xf32> to vector<8xf32>
    %42 = vector.shape_cast %41 : vector<8xf32> to vector<8x1xf32>
    %43 = tpu.reciprocal %42 {approx = true} : vector<8x1xf32> -> vector<8x1xf32>
    %44 = vector.broadcast %43 : vector<8x1xf32> to vector<8x8xf32>
    %45 = arith.mulf %40, %44 : vector<8x8xf32>
    %cst_19 = arith.constant dense<0.000000e+00> : vector<8x8xf32>
    %46 = tpu.matmul %45, %32, %cst_19 {dimension_numbers = #tpu.dot_dimension_numbers<[1], [0], [0], [1], [0, 0, 1, 1], [], []>} : vector<8x8xf32>, vector<8x8xf32>, vector<8x8xf32> -> vector<8x8xf32>
    %47 = vector.extract_strided_slice %9 {offsets = [8, 0], sizes = [8, 32], strides = [1, 1]} : vector<32x32xf32> to vector<8x32xf32>
    %cst_20 = arith.constant dense<0.000000e+00> : vector<8x32xf32>
    %48 = tpu.matmul %46, %47, %cst_20 {dimension_numbers = #tpu.dot_dimension_numbers<[1], [0], [0], [1], [0, 0, 1, 1], [], []>} : vector<8x8xf32>, vector<8x32xf32>, vector<8x32xf32> -> vector<8x32xf32>
    %49 = arith.addf %29, %48 : vector<8x32xf32>
    %50 = vector.extract_strided_slice %6 {offsets = [0, 16], sizes = [8, 8], strides = [1, 1]} : vector<16x32xf32> to vector<8x8xf32>
    %51 = vector.extract_strided_slice %7 {offsets = [0, 16], sizes = [8, 8], strides = [1, 1]} : vector<16x32xf32> to vector<8x8xf32>
    %52 = vector.extract_strided_slice %8 {offsets = [0, 16], sizes = [8, 8], strides = [1, 1]} : vector<16x32xf32> to vector<8x8xf32>
    %cst_21 = arith.constant dense<0.000000e+00> : vector<8x8xf32>
    %53 = tpu.matmul %50, %51, %cst_21 {dimension_numbers = #tpu.dot_dimension_numbers<[1], [1], [0], [0], [0, 0, 1, 0], [], []>} : vector<8x8xf32>, vector<8x8xf32>, vector<8x8xf32> -> vector<8x8xf32>
    %cst_22 = arith.constant 0.353553385 : f32
    %54 = vector.broadcast %cst_22 : f32 to vector<8x8xf32>
    %55 = arith.mulf %53, %54 : vector<8x8xf32>
    %cst_23 = arith.constant dense<0xFF800000> : vector<8xf32>
    %56 = vector.multi_reduction <maximumf>, %55, %cst_23 [1] : vector<8x8xf32> to vector<8xf32>
    %57 = vector.shape_cast %56 : vector<8xf32> to vector<8x1xf32>
    %58 = vector.broadcast %57 : vector<8x1xf32> to vector<8x8xf32>
    %59 = arith.subf %55, %58 : vector<8x8xf32>
    %60 = math.exp %59 : vector<8x8xf32>
    %cst_24 = arith.constant dense<0.000000e+00> : vector<8xf32>
    %61 = vector.multi_reduction <add>, %60, %cst_24 [1] : vector<8x8xf32> to vector<8xf32>
    %62 = vector.shape_cast %61 : vector<8xf32> to vector<8x1xf32>
    %63 = tpu.reciprocal %62 {approx = true} : vector<8x1xf32> -> vector<8x1xf32>
    %64 = vector.broadcast %63 : vector<8x1xf32> to vector<8x8xf32>
    %65 = arith.mulf %60, %64 : vector<8x8xf32>
    %cst_25 = arith.constant dense<0.000000e+00> : vector<8x8xf32>
    %66 = tpu.matmul %65, %52, %cst_25 {dimension_numbers = #tpu.dot_dimension_numbers<[1], [0], [0], [1], [0, 0, 1, 1], [], []>} : vector<8x8xf32>, vector<8x8xf32>, vector<8x8xf32> -> vector<8x8xf32>
    %67 = vector.extract_strided_slice %9 {offsets = [16, 0], sizes = [8, 32], strides = [1, 1]} : vector<32x32xf32> to vector<8x32xf32>
    %cst_26 = arith.constant dense<0.000000e+00> : vector<8x32xf32>
    %68 = tpu.matmul %66, %67, %cst_26 {dimension_numbers = #tpu.dot_dimension_numbers<[1], [0], [0], [1], [0, 0, 1, 1], [], []>} : vector<8x8xf32>, vector<8x32xf32>, vector<8x32xf32> -> vector<8x32xf32>
    %69 = arith.addf %49, %68 : vector<8x32xf32>
    %70 = vector.extract_strided_slice %6 {offsets = [0, 24], sizes = [8, 8], strides = [1, 1]} : vector<16x32xf32> to vector<8x8xf32>
    %71 = vector.extract_strided_slice %7 {offsets = [0, 24], sizes = [8, 8], strides = [1, 1]} : vector<16x32xf32> to vector<8x8xf32>
    %72 = vector.extract_strided_slice %8 {offsets = [0, 24], sizes = [8, 8], strides = [1, 1]} : vector<16x32xf32> to vector<8x8xf32>
    %cst_27 = arith.constant dense<0.000000e+00> : vector<8x8xf32>
    %73 = tpu.matmul %70, %71, %cst_27 {dimension_numbers = #tpu.dot_dimension_numbers<[1], [1], [0], [0], [0, 0, 1, 0], [], []>} : vector<8x8xf32>, vector<8x8xf32>, vector<8x8xf32> -> vector<8x8xf32>
    %cst_28 = arith.constant 0.353553385 : f32
    %74 = vector.broadcast %cst_28 : f32 to vector<8x8xf32>
    %75 = arith.mulf %73, %74 : vector<8x8xf32>
    %cst_29 = arith.constant dense<0xFF800000> : vector<8xf32>
    %76 = vector.multi_reduction <maximumf>, %75, %cst_29 [1] : vector<8x8xf32> to vector<8xf32>
    %77 = vector.shape_cast %76 : vector<8xf32> to vector<8x1xf32>
    %78 = vector.broadcast %77 : vector<8x1xf32> to vector<8x8xf32>
    %79 = arith.subf %75, %78 : vector<8x8xf32>
    %80 = math.exp %79 : vector<8x8xf32>
    %cst_30 = arith.constant dense<0.000000e+00> : vector<8xf32>
    %81 = vector.multi_reduction <add>, %80, %cst_30 [1] : vector<8x8xf32> to vector<8xf32>
    %82 = vector.shape_cast %81 : vector<8xf32> to vector<8x1xf32>
    %83 = tpu.reciprocal %82 {approx = true} : vector<8x1xf32> -> vector<8x1xf32>
    %84 = vector.broadcast %83 : vector<8x1xf32> to vector<8x8xf32>
    %85 = arith.mulf %80, %84 : vector<8x8xf32>
    %cst_31 = arith.constant dense<0.000000e+00> : vector<8x8xf32>
    %86 = tpu.matmul %85, %72, %cst_31 {dimension_numbers = #tpu.dot_dimension_numbers<[1], [0], [0], [1], [0, 0, 1, 1], [], []>} : vector<8x8xf32>, vector<8x8xf32>, vector<8x8xf32> -> vector<8x8xf32>
    %87 = vector.extract_strided_slice %9 {offsets = [24, 0], sizes = [8, 32], strides = [1, 1]} : vector<32x32xf32> to vector<8x32xf32>
    %cst_32 = arith.constant dense<0.000000e+00> : vector<8x32xf32>
    %88 = tpu.matmul %86, %87, %cst_32 {dimension_numbers = #tpu.dot_dimension_numbers<[1], [0], [0], [1], [0, 0, 1, 1], [], []>} : vector<8x8xf32>, vector<8x32xf32>, vector<8x32xf32> -> vector<8x32xf32>
    %89 = arith.addf %69, %88 : vector<8x32xf32>
    %90 = vector.extract_strided_slice %6 {offsets = [8, 0], sizes = [8, 8], strides = [1, 1]} : vector<16x32xf32> to vector<8x8xf32>
    %91 = vector.extract_strided_slice %7 {offsets = [8, 0], sizes = [8, 8], strides = [1, 1]} : vector<16x32xf32> to vector<8x8xf32>
    %92 = vector.extract_strided_slice %8 {offsets = [8, 0], sizes = [8, 8], strides = [1, 1]} : vector<16x32xf32> to vector<8x8xf32>
    %cst_33 = arith.constant dense<0.000000e+00> : vector<8x8xf32>
    %93 = tpu.matmul %90, %91, %cst_33 {dimension_numbers = #tpu.dot_dimension_numbers<[1], [1], [0], [0], [0, 0, 1, 0], [], []>} : vector<8x8xf32>, vector<8x8xf32>, vector<8x8xf32> -> vector<8x8xf32>
    %cst_34 = arith.constant 0.353553385 : f32
    %94 = vector.broadcast %cst_34 : f32 to vector<8x8xf32>
    %95 = arith.mulf %93, %94 : vector<8x8xf32>
    %cst_35 = arith.constant dense<0xFF800000> : vector<8xf32>
    %96 = vector.multi_reduction <maximumf>, %95, %cst_35 [1] : vector<8x8xf32> to vector<8xf32>
    %97 = vector.shape_cast %96 : vector<8xf32> to vector<8x1xf32>
    %98 = vector.broadcast %97 : vector<8x1xf32> to vector<8x8xf32>
    %99 = arith.subf %95, %98 : vector<8x8xf32>
    %100 = math.exp %99 : vector<8x8xf32>
    %cst_36 = arith.constant dense<0.000000e+00> : vector<8xf32>
    %101 = vector.multi_reduction <add>, %100, %cst_36 [1] : vector<8x8xf32> to vector<8xf32>
    %102 = vector.shape_cast %101 : vector<8xf32> to vector<8x1xf32>
    %103 = tpu.reciprocal %102 {approx = true} : vector<8x1xf32> -> vector<8x1xf32>
    %104 = vector.broadcast %103 : vector<8x1xf32> to vector<8x8xf32>
    %105 = arith.mulf %100, %104 : vector<8x8xf32>
    %cst_37 = arith.constant dense<0.000000e+00> : vector<8x8xf32>
    %106 = tpu.matmul %105, %92, %cst_37 {dimension_numbers = #tpu.dot_dimension_numbers<[1], [0], [0], [1], [0, 0, 1, 1], [], []>} : vector<8x8xf32>, vector<8x8xf32>, vector<8x8xf32> -> vector<8x8xf32>
    %107 = vector.extract_strided_slice %9 {offsets = [0, 0], sizes = [8, 32], strides = [1, 1]} : vector<32x32xf32> to vector<8x32xf32>
    %cst_38 = arith.constant dense<0.000000e+00> : vector<8x32xf32>
    %108 = tpu.matmul %106, %107, %cst_38 {dimension_numbers = #tpu.dot_dimension_numbers<[1], [0], [0], [1], [0, 0, 1, 1], [], []>} : vector<8x8xf32>, vector<8x32xf32>, vector<8x32xf32> -> vector<8x32xf32>
    %109 = vector.extract_strided_slice %6 {offsets = [8, 8], sizes = [8, 8], strides = [1, 1]} : vector<16x32xf32> to vector<8x8xf32>
    %110 = vector.extract_strided_slice %7 {offsets = [8, 8], sizes = [8, 8], strides = [1, 1]} : vector<16x32xf32> to vector<8x8xf32>
    %111 = vector.extract_strided_slice %8 {offsets = [8, 8], sizes = [8, 8], strides = [1, 1]} : vector<16x32xf32> to vector<8x8xf32>
    %cst_39 = arith.constant dense<0.000000e+00> : vector<8x8xf32>
    %112 = tpu.matmul %109, %110, %cst_39 {dimension_numbers = #tpu.dot_dimension_numbers<[1], [1], [0], [0], [0, 0, 1, 0], [], []>} : vector<8x8xf32>, vector<8x8xf32>, vector<8x8xf32> -> vector<8x8xf32>
    %cst_40 = arith.constant 0.353553385 : f32
    %113 = vector.broadcast %cst_40 : f32 to vector<8x8xf32>
    %114 = arith.mulf %112, %113 : vector<8x8xf32>
    %cst_41 = arith.constant dense<0xFF800000> : vector<8xf32>
    %115 = vector.multi_reduction <maximumf>, %114, %cst_41 [1] : vector<8x8xf32> to vector<8xf32>
    %116 = vector.shape_cast %115 : vector<8xf32> to vector<8x1xf32>
    %117 = vector.broadcast %116 : vector<8x1xf32> to vector<8x8xf32>
    %118 = arith.subf %114, %117 : vector<8x8xf32>
    %119 = math.exp %118 : vector<8x8xf32>
    %cst_42 = arith.constant dense<0.000000e+00> : vector<8xf32>
    %120 = vector.multi_reduction <add>, %119, %cst_42 [1] : vector<8x8xf32> to vector<8xf32>
    %121 = vector.shape_cast %120 : vector<8xf32> to vector<8x1xf32>
    %122 = tpu.reciprocal %121 {approx = true} : vector<8x1xf32> -> vector<8x1xf32>
    %123 = vector.broadcast %122 : vector<8x1xf32> to vector<8x8xf32>
    %124 = arith.mulf %119, %123 : vector<8x8xf32>
    %cst_43 = arith.constant dense<0.000000e+00> : vector<8x8xf32>
    %125 = tpu.matmul %124, %111, %cst_43 {dimension_numbers = #tpu.dot_dimension_numbers<[1], [0], [0], [1], [0, 0, 1, 1], [], []>} : vector<8x8xf32>, vector<8x8xf32>, vector<8x8xf32> -> vector<8x8xf32>
    %126 = vector.extract_strided_slice %9 {offsets = [8, 0], sizes = [8, 32], strides = [1, 1]} : vector<32x32xf32> to vector<8x32xf32>
    %cst_44 = arith.constant dense<0.000000e+00> : vector<8x32xf32>
    %127 = tpu.matmul %125, %126, %cst_44 {dimension_numbers = #tpu.dot_dimension_numbers<[1], [0], [0], [1], [0, 0, 1, 1], [], []>} : vector<8x8xf32>, vector<8x32xf32>, vector<8x32xf32> -> vector<8x32xf32>
    %128 = arith.addf %108, %127 : vector<8x32xf32>
    %129 = vector.extract_strided_slice %6 {offsets = [8, 16], sizes = [8, 8], strides = [1, 1]} : vector<16x32xf32> to vector<8x8xf32>
    %130 = vector.extract_strided_slice %7 {offsets = [8, 16], sizes = [8, 8], strides = [1, 1]} : vector<16x32xf32> to vector<8x8xf32>
    %131 = vector.extract_strided_slice %8 {offsets = [8, 16], sizes = [8, 8], strides = [1, 1]} : vector<16x32xf32> to vector<8x8xf32>
    %cst_45 = arith.constant dense<0.000000e+00> : vector<8x8xf32>
    %132 = tpu.matmul %129, %130, %cst_45 {dimension_numbers = #tpu.dot_dimension_numbers<[1], [1], [0], [0], [0, 0, 1, 0], [], []>} : vector<8x8xf32>, vector<8x8xf32>, vector<8x8xf32> -> vector<8x8xf32>
    %cst_46 = arith.constant 0.353553385 : f32
    %133 = vector.broadcast %cst_46 : f32 to vector<8x8xf32>
    %134 = arith.mulf %132, %133 : vector<8x8xf32>
    %cst_47 = arith.constant dense<0xFF800000> : vector<8xf32>
    %135 = vector.multi_reduction <maximumf>, %134, %cst_47 [1] : vector<8x8xf32> to vector<8xf32>
    %136 = vector.shape_cast %135 : vector<8xf32> to vector<8x1xf32>
    %137 = vector.broadcast %136 : vector<8x1xf32> to vector<8x8xf32>
    %138 = arith.subf %134, %137 : vector<8x8xf32>
    %139 = math.exp %138 : vector<8x8xf32>
    %cst_48 = arith.constant dense<0.000000e+00> : vector<8xf32>
    %140 = vector.multi_reduction <add>, %139, %cst_48 [1] : vector<8x8xf32> to vector<8xf32>
    %141 = vector.shape_cast %140 : vector<8xf32> to vector<8x1xf32>
    %142 = tpu.reciprocal %141 {approx = true} : vector<8x1xf32> -> vector<8x1xf32>
    %143 = vector.broadcast %142 : vector<8x1xf32> to vector<8x8xf32>
    %144 = arith.mulf %139, %143 : vector<8x8xf32>
    %cst_49 = arith.constant dense<0.000000e+00> : vector<8x8xf32>
    %145 = tpu.matmul %144, %131, %cst_49 {dimension_numbers = #tpu.dot_dimension_numbers<[1], [0], [0], [1], [0, 0, 1, 1], [], []>} : vector<8x8xf32>, vector<8x8xf32>, vector<8x8xf32> -> vector<8x8xf32>
    %146 = vector.extract_strided_slice %9 {offsets = [16, 0], sizes = [8, 32], strides = [1, 1]} : vector<32x32xf32> to vector<8x32xf32>
    %cst_50 = arith.constant dense<0.000000e+00> : vector<8x32xf32>
    %147 = tpu.matmul %145, %146, %cst_50 {dimension_numbers = #tpu.dot_dimension_numbers<[1], [0], [0], [1], [0, 0, 1, 1], [], []>} : vector<8x8xf32>, vector<8x32xf32>, vector<8x32xf32> -> vector<8x32xf32>
    %148 = arith.addf %128, %147 : vector<8x32xf32>
    %149 = vector.extract_strided_slice %6 {offsets = [8, 24], sizes = [8, 8], strides = [1, 1]} : vector<16x32xf32> to vector<8x8xf32>
    %150 = vector.extract_strided_slice %7 {offsets = [8, 24], sizes = [8, 8], strides = [1, 1]} : vector<16x32xf32> to vector<8x8xf32>
    %151 = vector.extract_strided_slice %8 {offsets = [8, 24], sizes = [8, 8], strides = [1, 1]} : vector<16x32xf32> to vector<8x8xf32>
    %cst_51 = arith.constant dense<0.000000e+00> : vector<8x8xf32>
    %152 = tpu.matmul %149, %150, %cst_51 {dimension_numbers = #tpu.dot_dimension_numbers<[1], [1], [0], [0], [0, 0, 1, 0], [], []>} : vector<8x8xf32>, vector<8x8xf32>, vector<8x8xf32> -> vector<8x8xf32>
    %cst_52 = arith.constant 0.353553385 : f32
    %153 = vector.broadcast %cst_52 : f32 to vector<8x8xf32>
    %154 = arith.mulf %152, %153 : vector<8x8xf32>
    %cst_53 = arith.constant dense<0xFF800000> : vector<8xf32>
    %155 = vector.multi_reduction <maximumf>, %154, %cst_53 [1] : vector<8x8xf32> to vector<8xf32>
    %156 = vector.shape_cast %155 : vector<8xf32> to vector<8x1xf32>
    %157 = vector.broadcast %156 : vector<8x1xf32> to vector<8x8xf32>
    %158 = arith.subf %154, %157 : vector<8x8xf32>
    %159 = math.exp %158 : vector<8x8xf32>
    %cst_54 = arith.constant dense<0.000000e+00> : vector<8xf32>
    %160 = vector.multi_reduction <add>, %159, %cst_54 [1] : vector<8x8xf32> to vector<8xf32>
    %161 = vector.shape_cast %160 : vector<8xf32> to vector<8x1xf32>
    %162 = tpu.reciprocal %161 {approx = true} : vector<8x1xf32> -> vector<8x1xf32>
    %163 = vector.broadcast %162 : vector<8x1xf32> to vector<8x8xf32>
    %164 = arith.mulf %159, %163 : vector<8x8xf32>
    %cst_55 = arith.constant dense<0.000000e+00> : vector<8x8xf32>
    %165 = tpu.matmul %164, %151, %cst_55 {dimension_numbers = #tpu.dot_dimension_numbers<[1], [0], [0], [1], [0, 0, 1, 1], [], []>} : vector<8x8xf32>, vector<8x8xf32>, vector<8x8xf32> -> vector<8x8xf32>
    %166 = vector.extract_strided_slice %9 {offsets = [24, 0], sizes = [8, 32], strides = [1, 1]} : vector<32x32xf32> to vector<8x32xf32>
    %cst_56 = arith.constant dense<0.000000e+00> : vector<8x32xf32>
    %167 = tpu.matmul %165, %166, %cst_56 {dimension_numbers = #tpu.dot_dimension_numbers<[1], [0], [0], [1], [0, 0, 1, 1], [], []>} : vector<8x8xf32>, vector<8x32xf32>, vector<8x32xf32> -> vector<8x32xf32>
    %168 = arith.addf %148, %167 : vector<8x32xf32>
    %169 = tpu.concatenate %89, %168 in 0 : vector<8x32xf32>, vector<8x32xf32> -> vector<16x32xf32>
    %170 = vector.broadcast %10 : vector<1x32xf32> to vector<16x32xf32>
    %171 = arith.addf %169, %170 : vector<16x32xf32>
    %172 = arith.addf %0, %171 : vector<16x32xf32>
    %c0_57 = arith.constant 0 : index
    %c0_58 = arith.constant 0 : index
    %173 = vector.load %arg5[%c0_57, %c0_58] : memref<1x32xf32, #tpu.memory_space<vmem>>, vector<1x32xf32>
    %c0_59 = arith.constant 0 : index
    %c0_60 = arith.constant 0 : index
    %174 = vector.load %arg6[%c0_59, %c0_60] : memref<1x32xf32, #tpu.memory_space<vmem>>, vector<1x32xf32>
    %cst_61 = arith.constant dense<0.000000e+00> : vector<16xf32>
    %175 = vector.multi_reduction <add>, %172, %cst_61 [1] : vector<16x32xf32> to vector<16xf32>
    %176 = vector.shape_cast %175 : vector<16xf32> to vector<16x1xf32>
    %cst_62 = arith.constant 3.200000e+01 : f32
    %177 = vector.broadcast %cst_62 : f32 to vector<16x1xf32>
    %178 = arith.divf %176, %177 : vector<16x1xf32>
    %179 = vector.broadcast %178 : vector<16x1xf32> to vector<16x32xf32>
    %180 = arith.subf %172, %179 : vector<16x32xf32>
    %181 = arith.mulf %180, %180 : vector<16x32xf32>
    %cst_63 = arith.constant dense<0.000000e+00> : vector<16xf32>
    %182 = vector.multi_reduction <add>, %181, %cst_63 [1] : vector<16x32xf32> to vector<16xf32>
    %183 = vector.shape_cast %182 : vector<16xf32> to vector<16x1xf32>
    %cst_64 = arith.constant 3.200000e+01 : f32
    %184 = vector.broadcast %cst_64 : f32 to vector<16x1xf32>
    %185 = arith.divf %183, %184 : vector<16x1xf32>
    %cst_65 = arith.constant 9.99999974E-6 : f32
    %186 = vector.broadcast %cst_65 : f32 to vector<16x1xf32>
    %187 = arith.addf %185, %186 : vector<16x1xf32>
    %188 = math.rsqrt %187 : vector<16x1xf32>
    %189 = vector.broadcast %188 : vector<16x1xf32> to vector<16x32xf32>
    %190 = arith.mulf %180, %189 : vector<16x32xf32>
    %191 = vector.broadcast %173 : vector<1x32xf32> to vector<16x32xf32>
    %192 = arith.mulf %190, %191 : vector<16x32xf32>
    %193 = vector.broadcast %174 : vector<1x32xf32> to vector<16x32xf32>
    %194 = arith.addf %192, %193 : vector<16x32xf32>
    %c0_66 = arith.constant 0 : index
    %c0_67 = arith.constant 0 : index
    %195 = vector.load %arg7[%c0_66, %c0_67] : memref<32x64xf32, #tpu.memory_space<vmem>>, vector<32x64xf32>
    %cst_68 = arith.constant dense<0.000000e+00> : vector<16x64xf32>
    %196 = tpu.matmul %194, %195, %cst_68 {dimension_numbers = #tpu.dot_dimension_numbers<[1], [0], [0], [1], [0, 0, 1, 1], [], []>} : vector<16x32xf32>, vector<32x64xf32>, vector<16x64xf32> -> vector<16x64xf32>
    %c0_69 = arith.constant 0 : index
    %c0_70 = arith.constant 0 : index
    %197 = vector.load %arg8[%c0_69, %c0_70] : memref<1x64xf32, #tpu.memory_space<vmem>>, vector<1x64xf32>
    %198 = vector.broadcast %197 : vector<1x64xf32> to vector<16x64xf32>
    %199 = arith.addf %196, %198 : vector<16x64xf32>
    %cst_71 = arith.constant 0.000000e+00 : f32
    %200 = vector.broadcast %cst_71 : f32 to vector<16x64xf32>
    %201 = arith.maximumf %199, %200 : vector<16x64xf32>
    %c0_72 = arith.constant 0 : index
    %c0_73 = arith.constant 0 : index
    %202 = vector.load %arg9[%c0_72, %c0_73] : memref<64x32xf32, #tpu.memory_space<vmem>>, vector<64x32xf32>
    %cst_74 = arith.constant dense<0.000000e+00> : vector<16x32xf32>
    %203 = tpu.matmul %201, %202, %cst_74 {dimension_numbers = #tpu.dot_dimension_numbers<[1], [0], [0], [1], [0, 0, 1, 1], [], []>} : vector<16x64xf32>, vector<64x32xf32>, vector<16x32xf32> -> vector<16x32xf32>
    %c0_75 = arith.constant 0 : index
    %c0_76 = arith.constant 0 : index
    %204 = vector.load %arg10[%c0_75, %c0_76] : memref<1x32xf32, #tpu.memory_space<vmem>>, vector<1x32xf32>
    %205 = vector.broadcast %204 : vector<1x32xf32> to vector<16x32xf32>
    %206 = arith.addf %203, %205 : vector<16x32xf32>
    %207 = arith.addf %194, %206 : vector<16x32xf32>
    %c0_77 = arith.constant 0 : index
    %c0_78 = arith.constant 0 : index
    %208 = vector.load %arg11[%c0_77, %c0_78] : memref<1x32xf32, #tpu.memory_space<vmem>>, vector<1x32xf32>
    %c0_79 = arith.constant 0 : index
    %c0_80 = arith.constant 0 : index
    %209 = vector.load %arg12[%c0_79, %c0_80] : memref<1x32xf32, #tpu.memory_space<vmem>>, vector<1x32xf32>
    %cst_81 = arith.constant dense<0.000000e+00> : vector<16xf32>
    %210 = vector.multi_reduction <add>, %207, %cst_81 [1] : vector<16x32xf32> to vector<16xf32>
    %211 = vector.shape_cast %210 : vector<16xf32> to vector<16x1xf32>
    %cst_82 = arith.constant 3.200000e+01 : f32
    %212 = vector.broadcast %cst_82 : f32 to vector<16x1xf32>
    %213 = arith.divf %211, %212 : vector<16x1xf32>
    %214 = vector.broadcast %213 : vector<16x1xf32> to vector<16x32xf32>
    %215 = arith.subf %207, %214 : vector<16x32xf32>
    %216 = arith.mulf %215, %215 : vector<16x32xf32>
    %cst_83 = arith.constant dense<0.000000e+00> : vector<16xf32>
    %217 = vector.multi_reduction <add>, %216, %cst_83 [1] : vector<16x32xf32> to vector<16xf32>
    %218 = vector.shape_cast %217 : vector<16xf32> to vector<16x1xf32>
    %cst_84 = arith.constant 3.200000e+01 : f32
    %219 = vector.broadcast %cst_84 : f32 to vector<16x1xf32>
    %220 = arith.divf %218, %219 : vector<16x1xf32>
    %cst_85 = arith.constant 9.99999974E-6 : f32
    %221 = vector.broadcast %cst_85 : f32 to vector<16x1xf32>
    %222 = arith.addf %220, %221 : vector<16x1xf32>
    %223 = math.rsqrt %222 : vector<16x1xf32>
    %224 = vector.broadcast %223 : vector<16x1xf32> to vector<16x32xf32>
    %225 = arith.mulf %215, %224 : vector<16x32xf32>
    %226 = vector.broadcast %208 : vector<1x32xf32> to vector<16x32xf32>
    %227 = arith.mulf %225, %226 : vector<16x32xf32>
    %228 = vector.broadcast %209 : vector<1x32xf32> to vector<16x32xf32>
    %229 = arith.addf %227, %228 : vector<16x32xf32>
    %c0_86 = arith.constant 0 : index
    %c0_87 = arith.constant 0 : index
    %230 = vector.load %arg13[%c0_86, %c0_87] : memref<16x32xf32, #tpu.memory_space<vmem>>, vector<16x32xf32>
    tpu.vector_store %arg13[%c0_86, %c0_87], %229 {strides = array<i32>} : memref<16x32xf32, #tpu.memory_space<vmem>>, vector<16x32xf32>,
    return
  }
}

module attributes {stable_mosaic.version = 11 : i64} {
  func.func @kernel(%arg0: memref<16x32xf32, #tpu.memory_space<vmem>>, %arg1: memref<16x16xf32, #tpu.memory_space<vmem>>, %arg2: memref<32x256xf32, #tpu.memory_space<vmem>>, %arg3: memref<1x256xf32, #tpu.memory_space<vmem>>, %arg4: memref<256x16xf32, #tpu.memory_space<vmem>>, %arg5: memref<1x16xf32, #tpu.memory_space<vmem>>, %arg6: memref<16x32xf32, #tpu.memory_space<vmem>>, %arg7: memref<1x32xf32, #tpu.memory_space<vmem>>, %arg8: memref<32x512xf32, #tpu.memory_space<vmem>>, %arg9: memref<1x512xf32, #tpu.memory_space<vmem>>, %arg10: memref<512x32xf32, #tpu.memory_space<vmem>>, %arg11: memref<1x32xf32, #tpu.memory_space<vmem>>, %arg12: memref<1x32xf32, #tpu.memory_space<vmem>>, %arg13: memref<1x32xf32, #tpu.memory_space<vmem>>, %arg14: memref<16x32xf32, #tpu.memory_space<vmem>>) attributes {dimension_semantics = [], scalar_prefetch = 0 : i64, scratch_operands = 0 : i64, tpu.core_type = #tpu.core_type<tc>} {
    %c0 = arith.constant 0 : index
    %c0_0 = arith.constant 0 : index
    %0 = vector.load %arg0[%c0, %c0_0] : memref<16x32xf32, #tpu.memory_space<vmem>>, vector<16x32xf32>
    %c0_1 = arith.constant 0 : index
    %c0_2 = arith.constant 0 : index
    %1 = vector.load %arg2[%c0_1, %c0_2] : memref<32x256xf32, #tpu.memory_space<vmem>>, vector<32x256xf32>
    %cst = arith.constant dense<0.000000e+00> : vector<16x256xf32>
    %2 = tpu.matmul %0, %1, %cst {dimension_numbers = #tpu.dot_dimension_numbers<[1], [0], [0], [1], [0, 0, 1, 1], [], []>} : vector<16x32xf32>, vector<32x256xf32>, vector<16x256xf32> -> vector<16x256xf32>
    %c0_3 = arith.constant 0 : index
    %c0_4 = arith.constant 0 : index
    %3 = vector.load %arg3[%c0_3, %c0_4] : memref<1x256xf32, #tpu.memory_space<vmem>>, vector<1x256xf32>
    %4 = vector.broadcast %3 : vector<1x256xf32> to vector<16x256xf32>
    %5 = arith.addf %2, %4 : vector<16x256xf32>
    %cst_5 = arith.constant 0.000000e+00 : f32
    %6 = vector.broadcast %cst_5 : f32 to vector<16x256xf32>
    %7 = arith.maximumf %5, %6 : vector<16x256xf32>
    %c0_6 = arith.constant 0 : index
    %c0_7 = arith.constant 0 : index
    %8 = vector.load %arg4[%c0_6, %c0_7] : memref<256x16xf32, #tpu.memory_space<vmem>>, vector<256x16xf32>
    %cst_8 = arith.constant dense<0.000000e+00> : vector<16x16xf32>
    %9 = tpu.matmul %7, %8, %cst_8 {dimension_numbers = #tpu.dot_dimension_numbers<[1], [0], [0], [1], [0, 0, 1, 1], [], []>} : vector<16x256xf32>, vector<256x16xf32>, vector<16x16xf32> -> vector<16x16xf32>
    %c0_9 = arith.constant 0 : index
    %c0_10 = arith.constant 0 : index
    %10 = vector.load %arg5[%c0_9, %c0_10] : memref<1x16xf32, #tpu.memory_space<vmem>>, vector<1x16xf32>
    %11 = vector.broadcast %10 : vector<1x16xf32> to vector<16x16xf32>
    %12 = arith.addf %9, %11 : vector<16x16xf32>
    %13 = arith.mulf %12, %12 : vector<16x16xf32>
    %14 = vector.shape_cast %13 : vector<16x16xf32> to vector<1x16x16xf32>
    %cst_11 = arith.constant dense<0.000000e+00> : vector<1xf32>
    %15 = vector.multi_reduction <add>, %14, %cst_11 [1, 2] : vector<1x16x16xf32> to vector<1xf32>
    %16 = vector.shape_cast %15 : vector<1xf32> to vector<1x1x1xf32>
    %17 = vector.extract %16[0, 0, 0] : f32 from vector<1x1x1xf32>
    %cst_12 = arith.constant 2.560000e+02 : f32
    %18 = arith.divf %17, %cst_12 : f32
    %cst_13 = arith.constant 2.000000e+00 : f32
    %19 = arith.mulf %cst_13, %18 : f32
    %20 = math.rsqrt %19 : f32
    %21 = vector.broadcast %20 : f32 to vector<16x16xf32>
    %22 = arith.mulf %12, %21 : vector<16x16xf32>
    %c0_14 = arith.constant 0 : index
    %c0_15 = arith.constant 0 : index
    %23 = vector.load %arg1[%c0_14, %c0_15] : memref<16x16xf32, #tpu.memory_space<vmem>>, vector<16x16xf32>
    %cst_16 = arith.constant 5.000000e-02 : f32
    %24 = vector.broadcast %cst_16 : f32 to vector<16x16xf32>
    %25 = arith.mulf %23, %24 : vector<16x16xf32>
    %26 = arith.addf %22, %25 : vector<16x16xf32>
    %c0_17 = arith.constant 0 : index
    %c0_18 = arith.constant 0 : index
    %27 = vector.load %arg6[%c0_17, %c0_18] : memref<16x32xf32, #tpu.memory_space<vmem>>, vector<16x32xf32>
    %cst_19 = arith.constant dense<0.000000e+00> : vector<16x32xf32>
    %28 = tpu.matmul %26, %27, %cst_19 {dimension_numbers = #tpu.dot_dimension_numbers<[1], [0], [0], [1], [0, 0, 1, 1], [], []>} : vector<16x16xf32>, vector<16x32xf32>, vector<16x32xf32> -> vector<16x32xf32>
    %c0_20 = arith.constant 0 : index
    %c0_21 = arith.constant 0 : index
    %29 = vector.load %arg7[%c0_20, %c0_21] : memref<1x32xf32, #tpu.memory_space<vmem>>, vector<1x32xf32>
    %30 = vector.broadcast %29 : vector<1x32xf32> to vector<16x32xf32>
    %31 = arith.addf %28, %30 : vector<16x32xf32>
    %cst_22 = arith.constant 0.000000e+00 : f32
    %32 = vector.broadcast %cst_22 : f32 to vector<16x32xf32>
    %33 = arith.maximumf %31, %32 : vector<16x32xf32>
    %c0_23 = arith.constant 0 : index
    %c0_24 = arith.constant 0 : index
    %34 = vector.load %arg8[%c0_23, %c0_24] : memref<32x512xf32, #tpu.memory_space<vmem>>, vector<32x512xf32>
    %cst_25 = arith.constant dense<0.000000e+00> : vector<16x512xf32>
    %35 = tpu.matmul %33, %34, %cst_25 {dimension_numbers = #tpu.dot_dimension_numbers<[1], [0], [0], [1], [0, 0, 1, 1], [], []>} : vector<16x32xf32>, vector<32x512xf32>, vector<16x512xf32> -> vector<16x512xf32>
    %c0_26 = arith.constant 0 : index
    %c0_27 = arith.constant 0 : index
    %36 = vector.load %arg9[%c0_26, %c0_27] : memref<1x512xf32, #tpu.memory_space<vmem>>, vector<1x512xf32>
    %37 = vector.broadcast %36 : vector<1x512xf32> to vector<16x512xf32>
    %38 = arith.addf %35, %37 : vector<16x512xf32>
    %cst_28 = arith.constant 0.000000e+00 : f32
    %39 = vector.broadcast %cst_28 : f32 to vector<16x512xf32>
    %40 = arith.maximumf %38, %39 : vector<16x512xf32>
    %c0_29 = arith.constant 0 : index
    %c0_30 = arith.constant 0 : index
    %41 = vector.load %arg10[%c0_29, %c0_30] : memref<512x32xf32, #tpu.memory_space<vmem>>, vector<512x32xf32>
    %cst_31 = arith.constant dense<0.000000e+00> : vector<16x32xf32>
    %42 = tpu.matmul %40, %41, %cst_31 {dimension_numbers = #tpu.dot_dimension_numbers<[1], [0], [0], [1], [0, 0, 1, 1], [], []>} : vector<16x512xf32>, vector<512x32xf32>, vector<16x32xf32> -> vector<16x32xf32>
    %c0_32 = arith.constant 0 : index
    %c0_33 = arith.constant 0 : index
    %43 = vector.load %arg11[%c0_32, %c0_33] : memref<1x32xf32, #tpu.memory_space<vmem>>, vector<1x32xf32>
    %44 = vector.broadcast %43 : vector<1x32xf32> to vector<16x32xf32>
    %45 = arith.addf %42, %44 : vector<16x32xf32>
    %46 = arith.addf %33, %45 : vector<16x32xf32>
    %c0_34 = arith.constant 0 : index
    %c0_35 = arith.constant 0 : index
    %47 = vector.load %arg12[%c0_34, %c0_35] : memref<1x32xf32, #tpu.memory_space<vmem>>, vector<1x32xf32>
    %c0_36 = arith.constant 0 : index
    %c0_37 = arith.constant 0 : index
    %48 = vector.load %arg13[%c0_36, %c0_37] : memref<1x32xf32, #tpu.memory_space<vmem>>, vector<1x32xf32>
    %cst_38 = arith.constant dense<0.000000e+00> : vector<16xf32>
    %49 = vector.multi_reduction <add>, %46, %cst_38 [1] : vector<16x32xf32> to vector<16xf32>
    %50 = vector.shape_cast %49 : vector<16xf32> to vector<16x1xf32>
    %cst_39 = arith.constant 3.200000e+01 : f32
    %51 = vector.broadcast %cst_39 : f32 to vector<16x1xf32>
    %52 = arith.divf %50, %51 : vector<16x1xf32>
    %53 = vector.broadcast %52 : vector<16x1xf32> to vector<16x32xf32>
    %54 = arith.subf %46, %53 : vector<16x32xf32>
    %55 = arith.mulf %54, %54 : vector<16x32xf32>
    %cst_40 = arith.constant dense<0.000000e+00> : vector<16xf32>
    %56 = vector.multi_reduction <add>, %55, %cst_40 [1] : vector<16x32xf32> to vector<16xf32>
    %57 = vector.shape_cast %56 : vector<16xf32> to vector<16x1xf32>
    %cst_41 = arith.constant 3.200000e+01 : f32
    %58 = vector.broadcast %cst_41 : f32 to vector<16x1xf32>
    %59 = arith.divf %57, %58 : vector<16x1xf32>
    %cst_42 = arith.constant 9.99999974E-6 : f32
    %60 = vector.broadcast %cst_42 : f32 to vector<16x1xf32>
    %61 = arith.addf %59, %60 : vector<16x1xf32>
    %62 = math.rsqrt %61 : vector<16x1xf32>
    %63 = vector.broadcast %62 : vector<16x1xf32> to vector<16x32xf32>
    %64 = arith.mulf %54, %63 : vector<16x32xf32>
    %65 = vector.broadcast %47 : vector<1x32xf32> to vector<16x32xf32>
    %66 = arith.mulf %64, %65 : vector<16x32xf32>
    %67 = vector.broadcast %48 : vector<1x32xf32> to vector<16x32xf32>
    %68 = arith.addf %66, %67 : vector<16x32xf32>
    %c0_43 = arith.constant 0 : index
    %c0_44 = arith.constant 0 : index
    %69 = vector.load %arg14[%c0_43, %c0_44] : memref<16x32xf32, #tpu.memory_space<vmem>>, vector<16x32xf32>
    tpu.vector_store %arg14[%c0_43, %c0_44], %68 {strides = array<i32>} : memref<16x32xf32, #tpu.memory_space<vmem>>, vector<16x32xf32>,
    return
  }
}

module attributes {stable_mosaic.version = 11 : i64} {
  func.func @kernel(%arg0: memref<16x32xf32, #tpu.memory_space<vmem>>, %arg1: memref<16x32xf32, #tpu.memory_space<vmem>>, %arg2: memref<32x96xf32, #tpu.memory_space<vmem>>, %arg3: memref<1x96xf32, #tpu.memory_space<vmem>>, %arg4: memref<32x32xf32, #tpu.memory_space<vmem>>, %arg5: memref<1x32xf32, #tpu.memory_space<vmem>>, %arg6: memref<1x32xf32, #tpu.memory_space<vmem>>, %arg7: memref<1x32xf32, #tpu.memory_space<vmem>>, %arg8: memref<32x32xf32, #tpu.memory_space<vmem>>, %arg9: memref<1x32xf32, #tpu.memory_space<vmem>>, %arg10: memref<32x64xf32, #tpu.memory_space<vmem>>, %arg11: memref<1x64xf32, #tpu.memory_space<vmem>>, %arg12: memref<32x32xf32, #tpu.memory_space<vmem>>, %arg13: memref<1x32xf32, #tpu.memory_space<vmem>>, %arg14: memref<1x32xf32, #tpu.memory_space<vmem>>, %arg15: memref<1x32xf32, #tpu.memory_space<vmem>>, %arg16: memref<32x64xf32, #tpu.memory_space<vmem>>, %arg17: memref<1x64xf32, #tpu.memory_space<vmem>>, %arg18: memref<64x32xf32, #tpu.memory_space<vmem>>, %arg19: memref<1x32xf32, #tpu.memory_space<vmem>>, %arg20: memref<1x32xf32, #tpu.memory_space<vmem>>, %arg21: memref<1x32xf32, #tpu.memory_space<vmem>>, %arg22: memref<16x32xf32, #tpu.memory_space<vmem>>) attributes {dimension_semantics = [], scalar_prefetch = 0 : i64, scratch_operands = 0 : i64, tpu.core_type = #tpu.core_type<tc>} {
    %c0 = arith.constant 0 : index
    %c0_0 = arith.constant 0 : index
    %0 = vector.load %arg0[%c0, %c0_0] : memref<16x32xf32, #tpu.memory_space<vmem>>, vector<16x32xf32>
    %c0_1 = arith.constant 0 : index
    %c0_2 = arith.constant 0 : index
    %1 = vector.load %arg1[%c0_1, %c0_2] : memref<16x32xf32, #tpu.memory_space<vmem>>, vector<16x32xf32>
    %c0_3 = arith.constant 0 : index
    %c0_4 = arith.constant 0 : index
    %2 = vector.load %arg2[%c0_3, %c0_4] : memref<32x96xf32, #tpu.memory_space<vmem>>, vector<32x96xf32>
    %cst = arith.constant dense<0.000000e+00> : vector<16x96xf32>
    %3 = tpu.matmul %0, %2, %cst {dimension_numbers = #tpu.dot_dimension_numbers<[1], [0], [0], [1], [0, 0, 1, 1], [], []>} : vector<16x32xf32>, vector<32x96xf32>, vector<16x96xf32> -> vector<16x96xf32>
    %c0_5 = arith.constant 0 : index
    %c0_6 = arith.constant 0 : index
    %4 = vector.load %arg3[%c0_5, %c0_6] : memref<1x96xf32, #tpu.memory_space<vmem>>, vector<1x96xf32>
    %5 = vector.broadcast %4 : vector<1x96xf32> to vector<16x96xf32>
    %6 = arith.addf %3, %5 : vector<16x96xf32>
    %7 = vector.extract_strided_slice %6 {offsets = [0, 0], sizes = [16, 32], strides = [1, 1]} : vector<16x96xf32> to vector<16x32xf32>
    %8 = vector.extract_strided_slice %6 {offsets = [0, 32], sizes = [16, 32], strides = [1, 1]} : vector<16x96xf32> to vector<16x32xf32>
    %9 = vector.extract_strided_slice %6 {offsets = [0, 64], sizes = [16, 32], strides = [1, 1]} : vector<16x96xf32> to vector<16x32xf32>
    %c0_7 = arith.constant 0 : index
    %c0_8 = arith.constant 0 : index
    %10 = vector.load %arg4[%c0_7, %c0_8] : memref<32x32xf32, #tpu.memory_space<vmem>>, vector<32x32xf32>
    %c0_9 = arith.constant 0 : index
    %c0_10 = arith.constant 0 : index
    %11 = vector.load %arg5[%c0_9, %c0_10] : memref<1x32xf32, #tpu.memory_space<vmem>>, vector<1x32xf32>
    %12 = vector.extract_strided_slice %7 {offsets = [0, 0], sizes = [8, 8], strides = [1, 1]} : vector<16x32xf32> to vector<8x8xf32>
    %13 = vector.extract_strided_slice %8 {offsets = [0, 0], sizes = [8, 8], strides = [1, 1]} : vector<16x32xf32> to vector<8x8xf32>
    %14 = vector.extract_strided_slice %9 {offsets = [0, 0], sizes = [8, 8], strides = [1, 1]} : vector<16x32xf32> to vector<8x8xf32>
    %cst_11 = arith.constant dense<0.000000e+00> : vector<8x8xf32>
    %15 = tpu.matmul %12, %13, %cst_11 {dimension_numbers = #tpu.dot_dimension_numbers<[1], [1], [0], [0], [0, 0, 1, 0], [], []>} : vector<8x8xf32>, vector<8x8xf32>, vector<8x8xf32> -> vector<8x8xf32>
    %cst_12 = arith.constant 0.353553385 : f32
    %16 = vector.broadcast %cst_12 : f32 to vector<8x8xf32>
    %17 = arith.mulf %15, %16 : vector<8x8xf32>
    %cst_13 = arith.constant dense<0xFF800000> : vector<8xf32>
    %18 = vector.multi_reduction <maximumf>, %17, %cst_13 [1] : vector<8x8xf32> to vector<8xf32>
    %19 = vector.shape_cast %18 : vector<8xf32> to vector<8x1xf32>
    %20 = vector.broadcast %19 : vector<8x1xf32> to vector<8x8xf32>
    %21 = arith.subf %17, %20 : vector<8x8xf32>
    %22 = math.exp %21 : vector<8x8xf32>
    %cst_14 = arith.constant dense<0.000000e+00> : vector<8xf32>
    %23 = vector.multi_reduction <add>, %22, %cst_14 [1] : vector<8x8xf32> to vector<8xf32>
    %24 = vector.shape_cast %23 : vector<8xf32> to vector<8x1xf32>
    %25 = tpu.reciprocal %24 {approx = true} : vector<8x1xf32> -> vector<8x1xf32>
    %26 = vector.broadcast %25 : vector<8x1xf32> to vector<8x8xf32>
    %27 = arith.mulf %22, %26 : vector<8x8xf32>
    %cst_15 = arith.constant dense<0.000000e+00> : vector<8x8xf32>
    %28 = tpu.matmul %27, %14, %cst_15 {dimension_numbers = #tpu.dot_dimension_numbers<[1], [0], [0], [1], [0, 0, 1, 1], [], []>} : vector<8x8xf32>, vector<8x8xf32>, vector<8x8xf32> -> vector<8x8xf32>
    %29 = vector.extract_strided_slice %10 {offsets = [0, 0], sizes = [8, 32], strides = [1, 1]} : vector<32x32xf32> to vector<8x32xf32>
    %cst_16 = arith.constant dense<0.000000e+00> : vector<8x32xf32>
    %30 = tpu.matmul %28, %29, %cst_16 {dimension_numbers = #tpu.dot_dimension_numbers<[1], [0], [0], [1], [0, 0, 1, 1], [], []>} : vector<8x8xf32>, vector<8x32xf32>, vector<8x32xf32> -> vector<8x32xf32>
    %31 = vector.extract_strided_slice %7 {offsets = [0, 8], sizes = [8, 8], strides = [1, 1]} : vector<16x32xf32> to vector<8x8xf32>
    %32 = vector.extract_strided_slice %8 {offsets = [0, 8], sizes = [8, 8], strides = [1, 1]} : vector<16x32xf32> to vector<8x8xf32>
    %33 = vector.extract_strided_slice %9 {offsets = [0, 8], sizes = [8, 8], strides = [1, 1]} : vector<16x32xf32> to vector<8x8xf32>
    %cst_17 = arith.constant dense<0.000000e+00> : vector<8x8xf32>
    %34 = tpu.matmul %31, %32, %cst_17 {dimension_numbers = #tpu.dot_dimension_numbers<[1], [1], [0], [0], [0, 0, 1, 0], [], []>} : vector<8x8xf32>, vector<8x8xf32>, vector<8x8xf32> -> vector<8x8xf32>
    %cst_18 = arith.constant 0.353553385 : f32
    %35 = vector.broadcast %cst_18 : f32 to vector<8x8xf32>
    %36 = arith.mulf %34, %35 : vector<8x8xf32>
    %cst_19 = arith.constant dense<0xFF800000> : vector<8xf32>
    %37 = vector.multi_reduction <maximumf>, %36, %cst_19 [1] : vector<8x8xf32> to vector<8xf32>
    %38 = vector.shape_cast %37 : vector<8xf32> to vector<8x1xf32>
    %39 = vector.broadcast %38 : vector<8x1xf32> to vector<8x8xf32>
    %40 = arith.subf %36, %39 : vector<8x8xf32>
    %41 = math.exp %40 : vector<8x8xf32>
    %cst_20 = arith.constant dense<0.000000e+00> : vector<8xf32>
    %42 = vector.multi_reduction <add>, %41, %cst_20 [1] : vector<8x8xf32> to vector<8xf32>
    %43 = vector.shape_cast %42 : vector<8xf32> to vector<8x1xf32>
    %44 = tpu.reciprocal %43 {approx = true} : vector<8x1xf32> -> vector<8x1xf32>
    %45 = vector.broadcast %44 : vector<8x1xf32> to vector<8x8xf32>
    %46 = arith.mulf %41, %45 : vector<8x8xf32>
    %cst_21 = arith.constant dense<0.000000e+00> : vector<8x8xf32>
    %47 = tpu.matmul %46, %33, %cst_21 {dimension_numbers = #tpu.dot_dimension_numbers<[1], [0], [0], [1], [0, 0, 1, 1], [], []>} : vector<8x8xf32>, vector<8x8xf32>, vector<8x8xf32> -> vector<8x8xf32>
    %48 = vector.extract_strided_slice %10 {offsets = [8, 0], sizes = [8, 32], strides = [1, 1]} : vector<32x32xf32> to vector<8x32xf32>
    %cst_22 = arith.constant dense<0.000000e+00> : vector<8x32xf32>
    %49 = tpu.matmul %47, %48, %cst_22 {dimension_numbers = #tpu.dot_dimension_numbers<[1], [0], [0], [1], [0, 0, 1, 1], [], []>} : vector<8x8xf32>, vector<8x32xf32>, vector<8x32xf32> -> vector<8x32xf32>
    %50 = arith.addf %30, %49 : vector<8x32xf32>
    %51 = vector.extract_strided_slice %7 {offsets = [0, 16], sizes = [8, 8], strides = [1, 1]} : vector<16x32xf32> to vector<8x8xf32>
    %52 = vector.extract_strided_slice %8 {offsets = [0, 16], sizes = [8, 8], strides = [1, 1]} : vector<16x32xf32> to vector<8x8xf32>
    %53 = vector.extract_strided_slice %9 {offsets = [0, 16], sizes = [8, 8], strides = [1, 1]} : vector<16x32xf32> to vector<8x8xf32>
    %cst_23 = arith.constant dense<0.000000e+00> : vector<8x8xf32>
    %54 = tpu.matmul %51, %52, %cst_23 {dimension_numbers = #tpu.dot_dimension_numbers<[1], [1], [0], [0], [0, 0, 1, 0], [], []>} : vector<8x8xf32>, vector<8x8xf32>, vector<8x8xf32> -> vector<8x8xf32>
    %cst_24 = arith.constant 0.353553385 : f32
    %55 = vector.broadcast %cst_24 : f32 to vector<8x8xf32>
    %56 = arith.mulf %54, %55 : vector<8x8xf32>
    %cst_25 = arith.constant dense<0xFF800000> : vector<8xf32>
    %57 = vector.multi_reduction <maximumf>, %56, %cst_25 [1] : vector<8x8xf32> to vector<8xf32>
    %58 = vector.shape_cast %57 : vector<8xf32> to vector<8x1xf32>
    %59 = vector.broadcast %58 : vector<8x1xf32> to vector<8x8xf32>
    %60 = arith.subf %56, %59 : vector<8x8xf32>
    %61 = math.exp %60 : vector<8x8xf32>
    %cst_26 = arith.constant dense<0.000000e+00> : vector<8xf32>
    %62 = vector.multi_reduction <add>, %61, %cst_26 [1] : vector<8x8xf32> to vector<8xf32>
    %63 = vector.shape_cast %62 : vector<8xf32> to vector<8x1xf32>
    %64 = tpu.reciprocal %63 {approx = true} : vector<8x1xf32> -> vector<8x1xf32>
    %65 = vector.broadcast %64 : vector<8x1xf32> to vector<8x8xf32>
    %66 = arith.mulf %61, %65 : vector<8x8xf32>
    %cst_27 = arith.constant dense<0.000000e+00> : vector<8x8xf32>
    %67 = tpu.matmul %66, %53, %cst_27 {dimension_numbers = #tpu.dot_dimension_numbers<[1], [0], [0], [1], [0, 0, 1, 1], [], []>} : vector<8x8xf32>, vector<8x8xf32>, vector<8x8xf32> -> vector<8x8xf32>
    %68 = vector.extract_strided_slice %10 {offsets = [16, 0], sizes = [8, 32], strides = [1, 1]} : vector<32x32xf32> to vector<8x32xf32>
    %cst_28 = arith.constant dense<0.000000e+00> : vector<8x32xf32>
    %69 = tpu.matmul %67, %68, %cst_28 {dimension_numbers = #tpu.dot_dimension_numbers<[1], [0], [0], [1], [0, 0, 1, 1], [], []>} : vector<8x8xf32>, vector<8x32xf32>, vector<8x32xf32> -> vector<8x32xf32>
    %70 = arith.addf %50, %69 : vector<8x32xf32>
    %71 = vector.extract_strided_slice %7 {offsets = [0, 24], sizes = [8, 8], strides = [1, 1]} : vector<16x32xf32> to vector<8x8xf32>
    %72 = vector.extract_strided_slice %8 {offsets = [0, 24], sizes = [8, 8], strides = [1, 1]} : vector<16x32xf32> to vector<8x8xf32>
    %73 = vector.extract_strided_slice %9 {offsets = [0, 24], sizes = [8, 8], strides = [1, 1]} : vector<16x32xf32> to vector<8x8xf32>
    %cst_29 = arith.constant dense<0.000000e+00> : vector<8x8xf32>
    %74 = tpu.matmul %71, %72, %cst_29 {dimension_numbers = #tpu.dot_dimension_numbers<[1], [1], [0], [0], [0, 0, 1, 0], [], []>} : vector<8x8xf32>, vector<8x8xf32>, vector<8x8xf32> -> vector<8x8xf32>
    %cst_30 = arith.constant 0.353553385 : f32
    %75 = vector.broadcast %cst_30 : f32 to vector<8x8xf32>
    %76 = arith.mulf %74, %75 : vector<8x8xf32>
    %cst_31 = arith.constant dense<0xFF800000> : vector<8xf32>
    %77 = vector.multi_reduction <maximumf>, %76, %cst_31 [1] : vector<8x8xf32> to vector<8xf32>
    %78 = vector.shape_cast %77 : vector<8xf32> to vector<8x1xf32>
    %79 = vector.broadcast %78 : vector<8x1xf32> to vector<8x8xf32>
    %80 = arith.subf %76, %79 : vector<8x8xf32>
    %81 = math.exp %80 : vector<8x8xf32>
    %cst_32 = arith.constant dense<0.000000e+00> : vector<8xf32>
    %82 = vector.multi_reduction <add>, %81, %cst_32 [1] : vector<8x8xf32> to vector<8xf32>
    %83 = vector.shape_cast %82 : vector<8xf32> to vector<8x1xf32>
    %84 = tpu.reciprocal %83 {approx = true} : vector<8x1xf32> -> vector<8x1xf32>
    %85 = vector.broadcast %84 : vector<8x1xf32> to vector<8x8xf32>
    %86 = arith.mulf %81, %85 : vector<8x8xf32>
    %cst_33 = arith.constant dense<0.000000e+00> : vector<8x8xf32>
    %87 = tpu.matmul %86, %73, %cst_33 {dimension_numbers = #tpu.dot_dimension_numbers<[1], [0], [0], [1], [0, 0, 1, 1], [], []>} : vector<8x8xf32>, vector<8x8xf32>, vector<8x8xf32> -> vector<8x8xf32>
    %88 = vector.extract_strided_slice %10 {offsets = [24, 0], sizes = [8, 32], strides = [1, 1]} : vector<32x32xf32> to vector<8x32xf32>
    %cst_34 = arith.constant dense<0.000000e+00> : vector<8x32xf32>
    %89 = tpu.matmul %87, %88, %cst_34 {dimension_numbers = #tpu.dot_dimension_numbers<[1], [0], [0], [1], [0, 0, 1, 1], [], []>} : vector<8x8xf32>, vector<8x32xf32>, vector<8x32xf32> -> vector<8x32xf32>
    %90 = arith.addf %70, %89 : vector<8x32xf32>
    %91 = vector.extract_strided_slice %7 {offsets = [8, 0], sizes = [8, 8], strides = [1, 1]} : vector<16x32xf32> to vector<8x8xf32>
    %92 = vector.extract_strided_slice %8 {offsets = [8, 0], sizes = [8, 8], strides = [1, 1]} : vector<16x32xf32> to vector<8x8xf32>
    %93 = vector.extract_strided_slice %9 {offsets = [8, 0], sizes = [8, 8], strides = [1, 1]} : vector<16x32xf32> to vector<8x8xf32>
    %cst_35 = arith.constant dense<0.000000e+00> : vector<8x8xf32>
    %94 = tpu.matmul %91, %92, %cst_35 {dimension_numbers = #tpu.dot_dimension_numbers<[1], [1], [0], [0], [0, 0, 1, 0], [], []>} : vector<8x8xf32>, vector<8x8xf32>, vector<8x8xf32> -> vector<8x8xf32>
    %cst_36 = arith.constant 0.353553385 : f32
    %95 = vector.broadcast %cst_36 : f32 to vector<8x8xf32>
    %96 = arith.mulf %94, %95 : vector<8x8xf32>
    %cst_37 = arith.constant dense<0xFF800000> : vector<8xf32>
    %97 = vector.multi_reduction <maximumf>, %96, %cst_37 [1] : vector<8x8xf32> to vector<8xf32>
    %98 = vector.shape_cast %97 : vector<8xf32> to vector<8x1xf32>
    %99 = vector.broadcast %98 : vector<8x1xf32> to vector<8x8xf32>
    %100 = arith.subf %96, %99 : vector<8x8xf32>
    %101 = math.exp %100 : vector<8x8xf32>
    %cst_38 = arith.constant dense<0.000000e+00> : vector<8xf32>
    %102 = vector.multi_reduction <add>, %101, %cst_38 [1] : vector<8x8xf32> to vector<8xf32>
    %103 = vector.shape_cast %102 : vector<8xf32> to vector<8x1xf32>
    %104 = tpu.reciprocal %103 {approx = true} : vector<8x1xf32> -> vector<8x1xf32>
    %105 = vector.broadcast %104 : vector<8x1xf32> to vector<8x8xf32>
    %106 = arith.mulf %101, %105 : vector<8x8xf32>
    %cst_39 = arith.constant dense<0.000000e+00> : vector<8x8xf32>
    %107 = tpu.matmul %106, %93, %cst_39 {dimension_numbers = #tpu.dot_dimension_numbers<[1], [0], [0], [1], [0, 0, 1, 1], [], []>} : vector<8x8xf32>, vector<8x8xf32>, vector<8x8xf32> -> vector<8x8xf32>
    %108 = vector.extract_strided_slice %10 {offsets = [0, 0], sizes = [8, 32], strides = [1, 1]} : vector<32x32xf32> to vector<8x32xf32>
    %cst_40 = arith.constant dense<0.000000e+00> : vector<8x32xf32>
    %109 = tpu.matmul %107, %108, %cst_40 {dimension_numbers = #tpu.dot_dimension_numbers<[1], [0], [0], [1], [0, 0, 1, 1], [], []>} : vector<8x8xf32>, vector<8x32xf32>, vector<8x32xf32> -> vector<8x32xf32>
    %110 = vector.extract_strided_slice %7 {offsets = [8, 8], sizes = [8, 8], strides = [1, 1]} : vector<16x32xf32> to vector<8x8xf32>
    %111 = vector.extract_strided_slice %8 {offsets = [8, 8], sizes = [8, 8], strides = [1, 1]} : vector<16x32xf32> to vector<8x8xf32>
    %112 = vector.extract_strided_slice %9 {offsets = [8, 8], sizes = [8, 8], strides = [1, 1]} : vector<16x32xf32> to vector<8x8xf32>
    %cst_41 = arith.constant dense<0.000000e+00> : vector<8x8xf32>
    %113 = tpu.matmul %110, %111, %cst_41 {dimension_numbers = #tpu.dot_dimension_numbers<[1], [1], [0], [0], [0, 0, 1, 0], [], []>} : vector<8x8xf32>, vector<8x8xf32>, vector<8x8xf32> -> vector<8x8xf32>
    %cst_42 = arith.constant 0.353553385 : f32
    %114 = vector.broadcast %cst_42 : f32 to vector<8x8xf32>
    %115 = arith.mulf %113, %114 : vector<8x8xf32>
    %cst_43 = arith.constant dense<0xFF800000> : vector<8xf32>
    %116 = vector.multi_reduction <maximumf>, %115, %cst_43 [1] : vector<8x8xf32> to vector<8xf32>
    %117 = vector.shape_cast %116 : vector<8xf32> to vector<8x1xf32>
    %118 = vector.broadcast %117 : vector<8x1xf32> to vector<8x8xf32>
    %119 = arith.subf %115, %118 : vector<8x8xf32>
    %120 = math.exp %119 : vector<8x8xf32>
    %cst_44 = arith.constant dense<0.000000e+00> : vector<8xf32>
    %121 = vector.multi_reduction <add>, %120, %cst_44 [1] : vector<8x8xf32> to vector<8xf32>
    %122 = vector.shape_cast %121 : vector<8xf32> to vector<8x1xf32>
    %123 = tpu.reciprocal %122 {approx = true} : vector<8x1xf32> -> vector<8x1xf32>
    %124 = vector.broadcast %123 : vector<8x1xf32> to vector<8x8xf32>
    %125 = arith.mulf %120, %124 : vector<8x8xf32>
    %cst_45 = arith.constant dense<0.000000e+00> : vector<8x8xf32>
    %126 = tpu.matmul %125, %112, %cst_45 {dimension_numbers = #tpu.dot_dimension_numbers<[1], [0], [0], [1], [0, 0, 1, 1], [], []>} : vector<8x8xf32>, vector<8x8xf32>, vector<8x8xf32> -> vector<8x8xf32>
    %127 = vector.extract_strided_slice %10 {offsets = [8, 0], sizes = [8, 32], strides = [1, 1]} : vector<32x32xf32> to vector<8x32xf32>
    %cst_46 = arith.constant dense<0.000000e+00> : vector<8x32xf32>
    %128 = tpu.matmul %126, %127, %cst_46 {dimension_numbers = #tpu.dot_dimension_numbers<[1], [0], [0], [1], [0, 0, 1, 1], [], []>} : vector<8x8xf32>, vector<8x32xf32>, vector<8x32xf32> -> vector<8x32xf32>
    %129 = arith.addf %109, %128 : vector<8x32xf32>
    %130 = vector.extract_strided_slice %7 {offsets = [8, 16], sizes = [8, 8], strides = [1, 1]} : vector<16x32xf32> to vector<8x8xf32>
    %131 = vector.extract_strided_slice %8 {offsets = [8, 16], sizes = [8, 8], strides = [1, 1]} : vector<16x32xf32> to vector<8x8xf32>
    %132 = vector.extract_strided_slice %9 {offsets = [8, 16], sizes = [8, 8], strides = [1, 1]} : vector<16x32xf32> to vector<8x8xf32>
    %cst_47 = arith.constant dense<0.000000e+00> : vector<8x8xf32>
    %133 = tpu.matmul %130, %131, %cst_47 {dimension_numbers = #tpu.dot_dimension_numbers<[1], [1], [0], [0], [0, 0, 1, 0], [], []>} : vector<8x8xf32>, vector<8x8xf32>, vector<8x8xf32> -> vector<8x8xf32>
    %cst_48 = arith.constant 0.353553385 : f32
    %134 = vector.broadcast %cst_48 : f32 to vector<8x8xf32>
    %135 = arith.mulf %133, %134 : vector<8x8xf32>
    %cst_49 = arith.constant dense<0xFF800000> : vector<8xf32>
    %136 = vector.multi_reduction <maximumf>, %135, %cst_49 [1] : vector<8x8xf32> to vector<8xf32>
    %137 = vector.shape_cast %136 : vector<8xf32> to vector<8x1xf32>
    %138 = vector.broadcast %137 : vector<8x1xf32> to vector<8x8xf32>
    %139 = arith.subf %135, %138 : vector<8x8xf32>
    %140 = math.exp %139 : vector<8x8xf32>
    %cst_50 = arith.constant dense<0.000000e+00> : vector<8xf32>
    %141 = vector.multi_reduction <add>, %140, %cst_50 [1] : vector<8x8xf32> to vector<8xf32>
    %142 = vector.shape_cast %141 : vector<8xf32> to vector<8x1xf32>
    %143 = tpu.reciprocal %142 {approx = true} : vector<8x1xf32> -> vector<8x1xf32>
    %144 = vector.broadcast %143 : vector<8x1xf32> to vector<8x8xf32>
    %145 = arith.mulf %140, %144 : vector<8x8xf32>
    %cst_51 = arith.constant dense<0.000000e+00> : vector<8x8xf32>
    %146 = tpu.matmul %145, %132, %cst_51 {dimension_numbers = #tpu.dot_dimension_numbers<[1], [0], [0], [1], [0, 0, 1, 1], [], []>} : vector<8x8xf32>, vector<8x8xf32>, vector<8x8xf32> -> vector<8x8xf32>
    %147 = vector.extract_strided_slice %10 {offsets = [16, 0], sizes = [8, 32], strides = [1, 1]} : vector<32x32xf32> to vector<8x32xf32>
    %cst_52 = arith.constant dense<0.000000e+00> : vector<8x32xf32>
    %148 = tpu.matmul %146, %147, %cst_52 {dimension_numbers = #tpu.dot_dimension_numbers<[1], [0], [0], [1], [0, 0, 1, 1], [], []>} : vector<8x8xf32>, vector<8x32xf32>, vector<8x32xf32> -> vector<8x32xf32>
    %149 = arith.addf %129, %148 : vector<8x32xf32>
    %150 = vector.extract_strided_slice %7 {offsets = [8, 24], sizes = [8, 8], strides = [1, 1]} : vector<16x32xf32> to vector<8x8xf32>
    %151 = vector.extract_strided_slice %8 {offsets = [8, 24], sizes = [8, 8], strides = [1, 1]} : vector<16x32xf32> to vector<8x8xf32>
    %152 = vector.extract_strided_slice %9 {offsets = [8, 24], sizes = [8, 8], strides = [1, 1]} : vector<16x32xf32> to vector<8x8xf32>
    %cst_53 = arith.constant dense<0.000000e+00> : vector<8x8xf32>
    %153 = tpu.matmul %150, %151, %cst_53 {dimension_numbers = #tpu.dot_dimension_numbers<[1], [1], [0], [0], [0, 0, 1, 0], [], []>} : vector<8x8xf32>, vector<8x8xf32>, vector<8x8xf32> -> vector<8x8xf32>
    %cst_54 = arith.constant 0.353553385 : f32
    %154 = vector.broadcast %cst_54 : f32 to vector<8x8xf32>
    %155 = arith.mulf %153, %154 : vector<8x8xf32>
    %cst_55 = arith.constant dense<0xFF800000> : vector<8xf32>
    %156 = vector.multi_reduction <maximumf>, %155, %cst_55 [1] : vector<8x8xf32> to vector<8xf32>
    %157 = vector.shape_cast %156 : vector<8xf32> to vector<8x1xf32>
    %158 = vector.broadcast %157 : vector<8x1xf32> to vector<8x8xf32>
    %159 = arith.subf %155, %158 : vector<8x8xf32>
    %160 = math.exp %159 : vector<8x8xf32>
    %cst_56 = arith.constant dense<0.000000e+00> : vector<8xf32>
    %161 = vector.multi_reduction <add>, %160, %cst_56 [1] : vector<8x8xf32> to vector<8xf32>
    %162 = vector.shape_cast %161 : vector<8xf32> to vector<8x1xf32>
    %163 = tpu.reciprocal %162 {approx = true} : vector<8x1xf32> -> vector<8x1xf32>
    %164 = vector.broadcast %163 : vector<8x1xf32> to vector<8x8xf32>
    %165 = arith.mulf %160, %164 : vector<8x8xf32>
    %cst_57 = arith.constant dense<0.000000e+00> : vector<8x8xf32>
    %166 = tpu.matmul %165, %152, %cst_57 {dimension_numbers = #tpu.dot_dimension_numbers<[1], [0], [0], [1], [0, 0, 1, 1], [], []>} : vector<8x8xf32>, vector<8x8xf32>, vector<8x8xf32> -> vector<8x8xf32>
    %167 = vector.extract_strided_slice %10 {offsets = [24, 0], sizes = [8, 32], strides = [1, 1]} : vector<32x32xf32> to vector<8x32xf32>
    %cst_58 = arith.constant dense<0.000000e+00> : vector<8x32xf32>
    %168 = tpu.matmul %166, %167, %cst_58 {dimension_numbers = #tpu.dot_dimension_numbers<[1], [0], [0], [1], [0, 0, 1, 1], [], []>} : vector<8x8xf32>, vector<8x32xf32>, vector<8x32xf32> -> vector<8x32xf32>
    %169 = arith.addf %149, %168 : vector<8x32xf32>
    %170 = tpu.concatenate %90, %169 in 0 : vector<8x32xf32>, vector<8x32xf32> -> vector<16x32xf32>
    %171 = vector.broadcast %11 : vector<1x32xf32> to vector<16x32xf32>
    %172 = arith.addf %170, %171 : vector<16x32xf32>
    %173 = arith.addf %0, %172 : vector<16x32xf32>
    %c0_59 = arith.constant 0 : index
    %c0_60 = arith.constant 0 : index
    %174 = vector.load %arg6[%c0_59, %c0_60] : memref<1x32xf32, #tpu.memory_space<vmem>>, vector<1x32xf32>
    %c0_61 = arith.constant 0 : index
    %c0_62 = arith.constant 0 : index
    %175 = vector.load %arg7[%c0_61, %c0_62] : memref<1x32xf32, #tpu.memory_space<vmem>>, vector<1x32xf32>
    %cst_63 = arith.constant dense<0.000000e+00> : vector<16xf32>
    %176 = vector.multi_reduction <add>, %173, %cst_63 [1] : vector<16x32xf32> to vector<16xf32>
    %177 = vector.shape_cast %176 : vector<16xf32> to vector<16x1xf32>
    %cst_64 = arith.constant 3.200000e+01 : f32
    %178 = vector.broadcast %cst_64 : f32 to vector<16x1xf32>
    %179 = arith.divf %177, %178 : vector<16x1xf32>
    %180 = vector.broadcast %179 : vector<16x1xf32> to vector<16x32xf32>
    %181 = arith.subf %173, %180 : vector<16x32xf32>
    %182 = arith.mulf %181, %181 : vector<16x32xf32>
    %cst_65 = arith.constant dense<0.000000e+00> : vector<16xf32>
    %183 = vector.multi_reduction <add>, %182, %cst_65 [1] : vector<16x32xf32> to vector<16xf32>
    %184 = vector.shape_cast %183 : vector<16xf32> to vector<16x1xf32>
    %cst_66 = arith.constant 3.200000e+01 : f32
    %185 = vector.broadcast %cst_66 : f32 to vector<16x1xf32>
    %186 = arith.divf %184, %185 : vector<16x1xf32>
    %cst_67 = arith.constant 9.99999974E-6 : f32
    %187 = vector.broadcast %cst_67 : f32 to vector<16x1xf32>
    %188 = arith.addf %186, %187 : vector<16x1xf32>
    %189 = math.rsqrt %188 : vector<16x1xf32>
    %190 = vector.broadcast %189 : vector<16x1xf32> to vector<16x32xf32>
    %191 = arith.mulf %181, %190 : vector<16x32xf32>
    %192 = vector.broadcast %174 : vector<1x32xf32> to vector<16x32xf32>
    %193 = arith.mulf %191, %192 : vector<16x32xf32>
    %194 = vector.broadcast %175 : vector<1x32xf32> to vector<16x32xf32>
    %195 = arith.addf %193, %194 : vector<16x32xf32>
    %c0_68 = arith.constant 0 : index
    %c0_69 = arith.constant 0 : index
    %196 = vector.load %arg8[%c0_68, %c0_69] : memref<32x32xf32, #tpu.memory_space<vmem>>, vector<32x32xf32>
    %cst_70 = arith.constant dense<0.000000e+00> : vector<16x32xf32>
    %197 = tpu.matmul %195, %196, %cst_70 {dimension_numbers = #tpu.dot_dimension_numbers<[1], [0], [0], [1], [0, 0, 1, 1], [], []>} : vector<16x32xf32>, vector<32x32xf32>, vector<16x32xf32> -> vector<16x32xf32>
    %c0_71 = arith.constant 0 : index
    %c0_72 = arith.constant 0 : index
    %198 = vector.load %arg9[%c0_71, %c0_72] : memref<1x32xf32, #tpu.memory_space<vmem>>, vector<1x32xf32>
    %199 = vector.broadcast %198 : vector<1x32xf32> to vector<16x32xf32>
    %200 = arith.addf %197, %199 : vector<16x32xf32>
    %c0_73 = arith.constant 0 : index
    %c0_74 = arith.constant 0 : index
    %201 = vector.load %arg10[%c0_73, %c0_74] : memref<32x64xf32, #tpu.memory_space<vmem>>, vector<32x64xf32>
    %cst_75 = arith.constant dense<0.000000e+00> : vector<16x64xf32>
    %202 = tpu.matmul %1, %201, %cst_75 {dimension_numbers = #tpu.dot_dimension_numbers<[1], [0], [0], [1], [0, 0, 1, 1], [], []>} : vector<16x32xf32>, vector<32x64xf32>, vector<16x64xf32> -> vector<16x64xf32>
    %c0_76 = arith.constant 0 : index
    %c0_77 = arith.constant 0 : index
    %203 = vector.load %arg11[%c0_76, %c0_77] : memref<1x64xf32, #tpu.memory_space<vmem>>, vector<1x64xf32>
    %204 = vector.broadcast %203 : vector<1x64xf32> to vector<16x64xf32>
    %205 = arith.addf %202, %204 : vector<16x64xf32>
    %206 = vector.extract_strided_slice %205 {offsets = [0, 0], sizes = [16, 32], strides = [1, 1]} : vector<16x64xf32> to vector<16x32xf32>
    %207 = vector.extract_strided_slice %205 {offsets = [0, 32], sizes = [16, 32], strides = [1, 1]} : vector<16x64xf32> to vector<16x32xf32>
    %c0_78 = arith.constant 0 : index
    %c0_79 = arith.constant 0 : index
    %208 = vector.load %arg12[%c0_78, %c0_79] : memref<32x32xf32, #tpu.memory_space<vmem>>, vector<32x32xf32>
    %c0_80 = arith.constant 0 : index
    %c0_81 = arith.constant 0 : index
    %209 = vector.load %arg13[%c0_80, %c0_81] : memref<1x32xf32, #tpu.memory_space<vmem>>, vector<1x32xf32>
    %210 = vector.extract_strided_slice %200 {offsets = [0, 0], sizes = [8, 8], strides = [1, 1]} : vector<16x32xf32> to vector<8x8xf32>
    %211 = vector.extract_strided_slice %206 {offsets = [0, 0], sizes = [8, 8], strides = [1, 1]} : vector<16x32xf32> to vector<8x8xf32>
    %212 = vector.extract_strided_slice %207 {offsets = [0, 0], sizes = [8, 8], strides = [1, 1]} : vector<16x32xf32> to vector<8x8xf32>
    %cst_82 = arith.constant dense<0.000000e+00> : vector<8x8xf32>
    %213 = tpu.matmul %210, %211, %cst_82 {dimension_numbers = #tpu.dot_dimension_numbers<[1], [1], [0], [0], [0, 0, 1, 0], [], []>} : vector<8x8xf32>, vector<8x8xf32>, vector<8x8xf32> -> vector<8x8xf32>
    %cst_83 = arith.constant 0.353553385 : f32
    %214 = vector.broadcast %cst_83 : f32 to vector<8x8xf32>
    %215 = arith.mulf %213, %214 : vector<8x8xf32>
    %cst_84 = arith.constant dense<0xFF800000> : vector<8xf32>
    %216 = vector.multi_reduction <maximumf>, %215, %cst_84 [1] : vector<8x8xf32> to vector<8xf32>
    %217 = vector.shape_cast %216 : vector<8xf32> to vector<8x1xf32>
    %218 = vector.broadcast %217 : vector<8x1xf32> to vector<8x8xf32>
    %219 = arith.subf %215, %218 : vector<8x8xf32>
    %220 = math.exp %219 : vector<8x8xf32>
    %cst_85 = arith.constant dense<0.000000e+00> : vector<8xf32>
    %221 = vector.multi_reduction <add>, %220, %cst_85 [1] : vector<8x8xf32> to vector<8xf32>
    %222 = vector.shape_cast %221 : vector<8xf32> to vector<8x1xf32>
    %223 = tpu.reciprocal %222 {approx = true} : vector<8x1xf32> -> vector<8x1xf32>
    %224 = vector.broadcast %223 : vector<8x1xf32> to vector<8x8xf32>
    %225 = arith.mulf %220, %224 : vector<8x8xf32>
    %cst_86 = arith.constant dense<0.000000e+00> : vector<8x8xf32>
    %226 = tpu.matmul %225, %212, %cst_86 {dimension_numbers = #tpu.dot_dimension_numbers<[1], [0], [0], [1], [0, 0, 1, 1], [], []>} : vector<8x8xf32>, vector<8x8xf32>, vector<8x8xf32> -> vector<8x8xf32>
    %227 = vector.extract_strided_slice %208 {offsets = [0, 0], sizes = [8, 32], strides = [1, 1]} : vector<32x32xf32> to vector<8x32xf32>
    %cst_87 = arith.constant dense<0.000000e+00> : vector<8x32xf32>
    %228 = tpu.matmul %226, %227, %cst_87 {dimension_numbers = #tpu.dot_dimension_numbers<[1], [0], [0], [1], [0, 0, 1, 1], [], []>} : vector<8x8xf32>, vector<8x32xf32>, vector<8x32xf32> -> vector<8x32xf32>
    %229 = vector.extract_strided_slice %200 {offsets = [0, 8], sizes = [8, 8], strides = [1, 1]} : vector<16x32xf32> to vector<8x8xf32>
    %230 = vector.extract_strided_slice %206 {offsets = [0, 8], sizes = [8, 8], strides = [1, 1]} : vector<16x32xf32> to vector<8x8xf32>
    %231 = vector.extract_strided_slice %207 {offsets = [0, 8], sizes = [8, 8], strides = [1, 1]} : vector<16x32xf32> to vector<8x8xf32>
    %cst_88 = arith.constant dense<0.000000e+00> : vector<8x8xf32>
    %232 = tpu.matmul %229, %230, %cst_88 {dimension_numbers = #tpu.dot_dimension_numbers<[1], [1], [0], [0], [0, 0, 1, 0], [], []>} : vector<8x8xf32>, vector<8x8xf32>, vector<8x8xf32> -> vector<8x8xf32>
    %cst_89 = arith.constant 0.353553385 : f32
    %233 = vector.broadcast %cst_89 : f32 to vector<8x8xf32>
    %234 = arith.mulf %232, %233 : vector<8x8xf32>
    %cst_90 = arith.constant dense<0xFF800000> : vector<8xf32>
    %235 = vector.multi_reduction <maximumf>, %234, %cst_90 [1] : vector<8x8xf32> to vector<8xf32>
    %236 = vector.shape_cast %235 : vector<8xf32> to vector<8x1xf32>
    %237 = vector.broadcast %236 : vector<8x1xf32> to vector<8x8xf32>
    %238 = arith.subf %234, %237 : vector<8x8xf32>
    %239 = math.exp %238 : vector<8x8xf32>
    %cst_91 = arith.constant dense<0.000000e+00> : vector<8xf32>
    %240 = vector.multi_reduction <add>, %239, %cst_91 [1] : vector<8x8xf32> to vector<8xf32>
    %241 = vector.shape_cast %240 : vector<8xf32> to vector<8x1xf32>
    %242 = tpu.reciprocal %241 {approx = true} : vector<8x1xf32> -> vector<8x1xf32>
    %243 = vector.broadcast %242 : vector<8x1xf32> to vector<8x8xf32>
    %244 = arith.mulf %239, %243 : vector<8x8xf32>
    %cst_92 = arith.constant dense<0.000000e+00> : vector<8x8xf32>
    %245 = tpu.matmul %244, %231, %cst_92 {dimension_numbers = #tpu.dot_dimension_numbers<[1], [0], [0], [1], [0, 0, 1, 1], [], []>} : vector<8x8xf32>, vector<8x8xf32>, vector<8x8xf32> -> vector<8x8xf32>
    %246 = vector.extract_strided_slice %208 {offsets = [8, 0], sizes = [8, 32], strides = [1, 1]} : vector<32x32xf32> to vector<8x32xf32>
    %cst_93 = arith.constant dense<0.000000e+00> : vector<8x32xf32>
    %247 = tpu.matmul %245, %246, %cst_93 {dimension_numbers = #tpu.dot_dimension_numbers<[1], [0], [0], [1], [0, 0, 1, 1], [], []>} : vector<8x8xf32>, vector<8x32xf32>, vector<8x32xf32> -> vector<8x32xf32>
    %248 = arith.addf %228, %247 : vector<8x32xf32>
    %249 = vector.extract_strided_slice %200 {offsets = [0, 16], sizes = [8, 8], strides = [1, 1]} : vector<16x32xf32> to vector<8x8xf32>
    %250 = vector.extract_strided_slice %206 {offsets = [0, 16], sizes = [8, 8], strides = [1, 1]} : vector<16x32xf32> to vector<8x8xf32>
    %251 = vector.extract_strided_slice %207 {offsets = [0, 16], sizes = [8, 8], strides = [1, 1]} : vector<16x32xf32> to vector<8x8xf32>
    %cst_94 = arith.constant dense<0.000000e+00> : vector<8x8xf32>
    %252 = tpu.matmul %249, %250, %cst_94 {dimension_numbers = #tpu.dot_dimension_numbers<[1], [1], [0], [0], [0, 0, 1, 0], [], []>} : vector<8x8xf32>, vector<8x8xf32>, vector<8x8xf32> -> vector<8x8xf32>
    %cst_95 = arith.constant 0.353553385 : f32
    %253 = vector.broadcast %cst_95 : f32 to vector<8x8xf32>
    %254 = arith.mulf %252, %253 : vector<8x8xf32>
    %cst_96 = arith.constant dense<0xFF800000> : vector<8xf32>
    %255 = vector.multi_reduction <maximumf>, %254, %cst_96 [1] : vector<8x8xf32> to vector<8xf32>
    %256 = vector.shape_cast %255 : vector<8xf32> to vector<8x1xf32>
    %257 = vector.broadcast %256 : vector<8x1xf32> to vector<8x8xf32>
    %258 = arith.subf %254, %257 : vector<8x8xf32>
    %259 = math.exp %258 : vector<8x8xf32>
    %cst_97 = arith.constant dense<0.000000e+00> : vector<8xf32>
    %260 = vector.multi_reduction <add>, %259, %cst_97 [1] : vector<8x8xf32> to vector<8xf32>
    %261 = vector.shape_cast %260 : vector<8xf32> to vector<8x1xf32>
    %262 = tpu.reciprocal %261 {approx = true} : vector<8x1xf32> -> vector<8x1xf32>
    %263 = vector.broadcast %262 : vector<8x1xf32> to vector<8x8xf32>
    %264 = arith.mulf %259, %263 : vector<8x8xf32>
    %cst_98 = arith.constant dense<0.000000e+00> : vector<8x8xf32>
    %265 = tpu.matmul %264, %251, %cst_98 {dimension_numbers = #tpu.dot_dimension_numbers<[1], [0], [0], [1], [0, 0, 1, 1], [], []>} : vector<8x8xf32>, vector<8x8xf32>, vector<8x8xf32> -> vector<8x8xf32>
    %266 = vector.extract_strided_slice %208 {offsets = [16, 0], sizes = [8, 32], strides = [1, 1]} : vector<32x32xf32> to vector<8x32xf32>
    %cst_99 = arith.constant dense<0.000000e+00> : vector<8x32xf32>
    %267 = tpu.matmul %265, %266, %cst_99 {dimension_numbers = #tpu.dot_dimension_numbers<[1], [0], [0], [1], [0, 0, 1, 1], [], []>} : vector<8x8xf32>, vector<8x32xf32>, vector<8x32xf32> -> vector<8x32xf32>
    %268 = arith.addf %248, %267 : vector<8x32xf32>
    %269 = vector.extract_strided_slice %200 {offsets = [0, 24], sizes = [8, 8], strides = [1, 1]} : vector<16x32xf32> to vector<8x8xf32>
    %270 = vector.extract_strided_slice %206 {offsets = [0, 24], sizes = [8, 8], strides = [1, 1]} : vector<16x32xf32> to vector<8x8xf32>
    %271 = vector.extract_strided_slice %207 {offsets = [0, 24], sizes = [8, 8], strides = [1, 1]} : vector<16x32xf32> to vector<8x8xf32>
    %cst_100 = arith.constant dense<0.000000e+00> : vector<8x8xf32>
    %272 = tpu.matmul %269, %270, %cst_100 {dimension_numbers = #tpu.dot_dimension_numbers<[1], [1], [0], [0], [0, 0, 1, 0], [], []>} : vector<8x8xf32>, vector<8x8xf32>, vector<8x8xf32> -> vector<8x8xf32>
    %cst_101 = arith.constant 0.353553385 : f32
    %273 = vector.broadcast %cst_101 : f32 to vector<8x8xf32>
    %274 = arith.mulf %272, %273 : vector<8x8xf32>
    %cst_102 = arith.constant dense<0xFF800000> : vector<8xf32>
    %275 = vector.multi_reduction <maximumf>, %274, %cst_102 [1] : vector<8x8xf32> to vector<8xf32>
    %276 = vector.shape_cast %275 : vector<8xf32> to vector<8x1xf32>
    %277 = vector.broadcast %276 : vector<8x1xf32> to vector<8x8xf32>
    %278 = arith.subf %274, %277 : vector<8x8xf32>
    %279 = math.exp %278 : vector<8x8xf32>
    %cst_103 = arith.constant dense<0.000000e+00> : vector<8xf32>
    %280 = vector.multi_reduction <add>, %279, %cst_103 [1] : vector<8x8xf32> to vector<8xf32>
    %281 = vector.shape_cast %280 : vector<8xf32> to vector<8x1xf32>
    %282 = tpu.reciprocal %281 {approx = true} : vector<8x1xf32> -> vector<8x1xf32>
    %283 = vector.broadcast %282 : vector<8x1xf32> to vector<8x8xf32>
    %284 = arith.mulf %279, %283 : vector<8x8xf32>
    %cst_104 = arith.constant dense<0.000000e+00> : vector<8x8xf32>
    %285 = tpu.matmul %284, %271, %cst_104 {dimension_numbers = #tpu.dot_dimension_numbers<[1], [0], [0], [1], [0, 0, 1, 1], [], []>} : vector<8x8xf32>, vector<8x8xf32>, vector<8x8xf32> -> vector<8x8xf32>
    %286 = vector.extract_strided_slice %208 {offsets = [24, 0], sizes = [8, 32], strides = [1, 1]} : vector<32x32xf32> to vector<8x32xf32>
    %cst_105 = arith.constant dense<0.000000e+00> : vector<8x32xf32>
    %287 = tpu.matmul %285, %286, %cst_105 {dimension_numbers = #tpu.dot_dimension_numbers<[1], [0], [0], [1], [0, 0, 1, 1], [], []>} : vector<8x8xf32>, vector<8x32xf32>, vector<8x32xf32> -> vector<8x32xf32>
    %288 = arith.addf %268, %287 : vector<8x32xf32>
    %289 = vector.extract_strided_slice %200 {offsets = [8, 0], sizes = [8, 8], strides = [1, 1]} : vector<16x32xf32> to vector<8x8xf32>
    %290 = vector.extract_strided_slice %206 {offsets = [8, 0], sizes = [8, 8], strides = [1, 1]} : vector<16x32xf32> to vector<8x8xf32>
    %291 = vector.extract_strided_slice %207 {offsets = [8, 0], sizes = [8, 8], strides = [1, 1]} : vector<16x32xf32> to vector<8x8xf32>
    %cst_106 = arith.constant dense<0.000000e+00> : vector<8x8xf32>
    %292 = tpu.matmul %289, %290, %cst_106 {dimension_numbers = #tpu.dot_dimension_numbers<[1], [1], [0], [0], [0, 0, 1, 0], [], []>} : vector<8x8xf32>, vector<8x8xf32>, vector<8x8xf32> -> vector<8x8xf32>
    %cst_107 = arith.constant 0.353553385 : f32
    %293 = vector.broadcast %cst_107 : f32 to vector<8x8xf32>
    %294 = arith.mulf %292, %293 : vector<8x8xf32>
    %cst_108 = arith.constant dense<0xFF800000> : vector<8xf32>
    %295 = vector.multi_reduction <maximumf>, %294, %cst_108 [1] : vector<8x8xf32> to vector<8xf32>
    %296 = vector.shape_cast %295 : vector<8xf32> to vector<8x1xf32>
    %297 = vector.broadcast %296 : vector<8x1xf32> to vector<8x8xf32>
    %298 = arith.subf %294, %297 : vector<8x8xf32>
    %299 = math.exp %298 : vector<8x8xf32>
    %cst_109 = arith.constant dense<0.000000e+00> : vector<8xf32>
    %300 = vector.multi_reduction <add>, %299, %cst_109 [1] : vector<8x8xf32> to vector<8xf32>
    %301 = vector.shape_cast %300 : vector<8xf32> to vector<8x1xf32>
    %302 = tpu.reciprocal %301 {approx = true} : vector<8x1xf32> -> vector<8x1xf32>
    %303 = vector.broadcast %302 : vector<8x1xf32> to vector<8x8xf32>
    %304 = arith.mulf %299, %303 : vector<8x8xf32>
    %cst_110 = arith.constant dense<0.000000e+00> : vector<8x8xf32>
    %305 = tpu.matmul %304, %291, %cst_110 {dimension_numbers = #tpu.dot_dimension_numbers<[1], [0], [0], [1], [0, 0, 1, 1], [], []>} : vector<8x8xf32>, vector<8x8xf32>, vector<8x8xf32> -> vector<8x8xf32>
    %306 = vector.extract_strided_slice %208 {offsets = [0, 0], sizes = [8, 32], strides = [1, 1]} : vector<32x32xf32> to vector<8x32xf32>
    %cst_111 = arith.constant dense<0.000000e+00> : vector<8x32xf32>
    %307 = tpu.matmul %305, %306, %cst_111 {dimension_numbers = #tpu.dot_dimension_numbers<[1], [0], [0], [1], [0, 0, 1, 1], [], []>} : vector<8x8xf32>, vector<8x32xf32>, vector<8x32xf32> -> vector<8x32xf32>
    %308 = vector.extract_strided_slice %200 {offsets = [8, 8], sizes = [8, 8], strides = [1, 1]} : vector<16x32xf32> to vector<8x8xf32>
    %309 = vector.extract_strided_slice %206 {offsets = [8, 8], sizes = [8, 8], strides = [1, 1]} : vector<16x32xf32> to vector<8x8xf32>
    %310 = vector.extract_strided_slice %207 {offsets = [8, 8], sizes = [8, 8], strides = [1, 1]} : vector<16x32xf32> to vector<8x8xf32>
    %cst_112 = arith.constant dense<0.000000e+00> : vector<8x8xf32>
    %311 = tpu.matmul %308, %309, %cst_112 {dimension_numbers = #tpu.dot_dimension_numbers<[1], [1], [0], [0], [0, 0, 1, 0], [], []>} : vector<8x8xf32>, vector<8x8xf32>, vector<8x8xf32> -> vector<8x8xf32>
    %cst_113 = arith.constant 0.353553385 : f32
    %312 = vector.broadcast %cst_113 : f32 to vector<8x8xf32>
    %313 = arith.mulf %311, %312 : vector<8x8xf32>
    %cst_114 = arith.constant dense<0xFF800000> : vector<8xf32>
    %314 = vector.multi_reduction <maximumf>, %313, %cst_114 [1] : vector<8x8xf32> to vector<8xf32>
    %315 = vector.shape_cast %314 : vector<8xf32> to vector<8x1xf32>
    %316 = vector.broadcast %315 : vector<8x1xf32> to vector<8x8xf32>
    %317 = arith.subf %313, %316 : vector<8x8xf32>
    %318 = math.exp %317 : vector<8x8xf32>
    %cst_115 = arith.constant dense<0.000000e+00> : vector<8xf32>
    %319 = vector.multi_reduction <add>, %318, %cst_115 [1] : vector<8x8xf32> to vector<8xf32>
    %320 = vector.shape_cast %319 : vector<8xf32> to vector<8x1xf32>
    %321 = tpu.reciprocal %320 {approx = true} : vector<8x1xf32> -> vector<8x1xf32>
    %322 = vector.broadcast %321 : vector<8x1xf32> to vector<8x8xf32>
    %323 = arith.mulf %318, %322 : vector<8x8xf32>
    %cst_116 = arith.constant dense<0.000000e+00> : vector<8x8xf32>
    %324 = tpu.matmul %323, %310, %cst_116 {dimension_numbers = #tpu.dot_dimension_numbers<[1], [0], [0], [1], [0, 0, 1, 1], [], []>} : vector<8x8xf32>, vector<8x8xf32>, vector<8x8xf32> -> vector<8x8xf32>
    %325 = vector.extract_strided_slice %208 {offsets = [8, 0], sizes = [8, 32], strides = [1, 1]} : vector<32x32xf32> to vector<8x32xf32>
    %cst_117 = arith.constant dense<0.000000e+00> : vector<8x32xf32>
    %326 = tpu.matmul %324, %325, %cst_117 {dimension_numbers = #tpu.dot_dimension_numbers<[1], [0], [0], [1], [0, 0, 1, 1], [], []>} : vector<8x8xf32>, vector<8x32xf32>, vector<8x32xf32> -> vector<8x32xf32>
    %327 = arith.addf %307, %326 : vector<8x32xf32>
    %328 = vector.extract_strided_slice %200 {offsets = [8, 16], sizes = [8, 8], strides = [1, 1]} : vector<16x32xf32> to vector<8x8xf32>
    %329 = vector.extract_strided_slice %206 {offsets = [8, 16], sizes = [8, 8], strides = [1, 1]} : vector<16x32xf32> to vector<8x8xf32>
    %330 = vector.extract_strided_slice %207 {offsets = [8, 16], sizes = [8, 8], strides = [1, 1]} : vector<16x32xf32> to vector<8x8xf32>
    %cst_118 = arith.constant dense<0.000000e+00> : vector<8x8xf32>
    %331 = tpu.matmul %328, %329, %cst_118 {dimension_numbers = #tpu.dot_dimension_numbers<[1], [1], [0], [0], [0, 0, 1, 0], [], []>} : vector<8x8xf32>, vector<8x8xf32>, vector<8x8xf32> -> vector<8x8xf32>
    %cst_119 = arith.constant 0.353553385 : f32
    %332 = vector.broadcast %cst_119 : f32 to vector<8x8xf32>
    %333 = arith.mulf %331, %332 : vector<8x8xf32>
    %cst_120 = arith.constant dense<0xFF800000> : vector<8xf32>
    %334 = vector.multi_reduction <maximumf>, %333, %cst_120 [1] : vector<8x8xf32> to vector<8xf32>
    %335 = vector.shape_cast %334 : vector<8xf32> to vector<8x1xf32>
    %336 = vector.broadcast %335 : vector<8x1xf32> to vector<8x8xf32>
    %337 = arith.subf %333, %336 : vector<8x8xf32>
    %338 = math.exp %337 : vector<8x8xf32>
    %cst_121 = arith.constant dense<0.000000e+00> : vector<8xf32>
    %339 = vector.multi_reduction <add>, %338, %cst_121 [1] : vector<8x8xf32> to vector<8xf32>
    %340 = vector.shape_cast %339 : vector<8xf32> to vector<8x1xf32>
    %341 = tpu.reciprocal %340 {approx = true} : vector<8x1xf32> -> vector<8x1xf32>
    %342 = vector.broadcast %341 : vector<8x1xf32> to vector<8x8xf32>
    %343 = arith.mulf %338, %342 : vector<8x8xf32>
    %cst_122 = arith.constant dense<0.000000e+00> : vector<8x8xf32>
    %344 = tpu.matmul %343, %330, %cst_122 {dimension_numbers = #tpu.dot_dimension_numbers<[1], [0], [0], [1], [0, 0, 1, 1], [], []>} : vector<8x8xf32>, vector<8x8xf32>, vector<8x8xf32> -> vector<8x8xf32>
    %345 = vector.extract_strided_slice %208 {offsets = [16, 0], sizes = [8, 32], strides = [1, 1]} : vector<32x32xf32> to vector<8x32xf32>
    %cst_123 = arith.constant dense<0.000000e+00> : vector<8x32xf32>
    %346 = tpu.matmul %344, %345, %cst_123 {dimension_numbers = #tpu.dot_dimension_numbers<[1], [0], [0], [1], [0, 0, 1, 1], [], []>} : vector<8x8xf32>, vector<8x32xf32>, vector<8x32xf32> -> vector<8x32xf32>
    %347 = arith.addf %327, %346 : vector<8x32xf32>
    %348 = vector.extract_strided_slice %200 {offsets = [8, 24], sizes = [8, 8], strides = [1, 1]} : vector<16x32xf32> to vector<8x8xf32>
    %349 = vector.extract_strided_slice %206 {offsets = [8, 24], sizes = [8, 8], strides = [1, 1]} : vector<16x32xf32> to vector<8x8xf32>
    %350 = vector.extract_strided_slice %207 {offsets = [8, 24], sizes = [8, 8], strides = [1, 1]} : vector<16x32xf32> to vector<8x8xf32>
    %cst_124 = arith.constant dense<0.000000e+00> : vector<8x8xf32>
    %351 = tpu.matmul %348, %349, %cst_124 {dimension_numbers = #tpu.dot_dimension_numbers<[1], [1], [0], [0], [0, 0, 1, 0], [], []>} : vector<8x8xf32>, vector<8x8xf32>, vector<8x8xf32> -> vector<8x8xf32>
    %cst_125 = arith.constant 0.353553385 : f32
    %352 = vector.broadcast %cst_125 : f32 to vector<8x8xf32>
    %353 = arith.mulf %351, %352 : vector<8x8xf32>
    %cst_126 = arith.constant dense<0xFF800000> : vector<8xf32>
    %354 = vector.multi_reduction <maximumf>, %353, %cst_126 [1] : vector<8x8xf32> to vector<8xf32>
    %355 = vector.shape_cast %354 : vector<8xf32> to vector<8x1xf32>
    %356 = vector.broadcast %355 : vector<8x1xf32> to vector<8x8xf32>
    %357 = arith.subf %353, %356 : vector<8x8xf32>
    %358 = math.exp %357 : vector<8x8xf32>
    %cst_127 = arith.constant dense<0.000000e+00> : vector<8xf32>
    %359 = vector.multi_reduction <add>, %358, %cst_127 [1] : vector<8x8xf32> to vector<8xf32>
    %360 = vector.shape_cast %359 : vector<8xf32> to vector<8x1xf32>
    %361 = tpu.reciprocal %360 {approx = true} : vector<8x1xf32> -> vector<8x1xf32>
    %362 = vector.broadcast %361 : vector<8x1xf32> to vector<8x8xf32>
    %363 = arith.mulf %358, %362 : vector<8x8xf32>
    %cst_128 = arith.constant dense<0.000000e+00> : vector<8x8xf32>
    %364 = tpu.matmul %363, %350, %cst_128 {dimension_numbers = #tpu.dot_dimension_numbers<[1], [0], [0], [1], [0, 0, 1, 1], [], []>} : vector<8x8xf32>, vector<8x8xf32>, vector<8x8xf32> -> vector<8x8xf32>
    %365 = vector.extract_strided_slice %208 {offsets = [24, 0], sizes = [8, 32], strides = [1, 1]} : vector<32x32xf32> to vector<8x32xf32>
    %cst_129 = arith.constant dense<0.000000e+00> : vector<8x32xf32>
    %366 = tpu.matmul %364, %365, %cst_129 {dimension_numbers = #tpu.dot_dimension_numbers<[1], [0], [0], [1], [0, 0, 1, 1], [], []>} : vector<8x8xf32>, vector<8x32xf32>, vector<8x32xf32> -> vector<8x32xf32>
    %367 = arith.addf %347, %366 : vector<8x32xf32>
    %368 = tpu.concatenate %288, %367 in 0 : vector<8x32xf32>, vector<8x32xf32> -> vector<16x32xf32>
    %369 = vector.broadcast %209 : vector<1x32xf32> to vector<16x32xf32>
    %370 = arith.addf %368, %369 : vector<16x32xf32>
    %371 = arith.addf %195, %370 : vector<16x32xf32>
    %c0_130 = arith.constant 0 : index
    %c0_131 = arith.constant 0 : index
    %372 = vector.load %arg14[%c0_130, %c0_131] : memref<1x32xf32, #tpu.memory_space<vmem>>, vector<1x32xf32>
    %c0_132 = arith.constant 0 : index
    %c0_133 = arith.constant 0 : index
    %373 = vector.load %arg15[%c0_132, %c0_133] : memref<1x32xf32, #tpu.memory_space<vmem>>, vector<1x32xf32>
    %cst_134 = arith.constant dense<0.000000e+00> : vector<16xf32>
    %374 = vector.multi_reduction <add>, %371, %cst_134 [1] : vector<16x32xf32> to vector<16xf32>
    %375 = vector.shape_cast %374 : vector<16xf32> to vector<16x1xf32>
    %cst_135 = arith.constant 3.200000e+01 : f32
    %376 = vector.broadcast %cst_135 : f32 to vector<16x1xf32>
    %377 = arith.divf %375, %376 : vector<16x1xf32>
    %378 = vector.broadcast %377 : vector<16x1xf32> to vector<16x32xf32>
    %379 = arith.subf %371, %378 : vector<16x32xf32>
    %380 = arith.mulf %379, %379 : vector<16x32xf32>
    %cst_136 = arith.constant dense<0.000000e+00> : vector<16xf32>
    %381 = vector.multi_reduction <add>, %380, %cst_136 [1] : vector<16x32xf32> to vector<16xf32>
    %382 = vector.shape_cast %381 : vector<16xf32> to vector<16x1xf32>
    %cst_137 = arith.constant 3.200000e+01 : f32
    %383 = vector.broadcast %cst_137 : f32 to vector<16x1xf32>
    %384 = arith.divf %382, %383 : vector<16x1xf32>
    %cst_138 = arith.constant 9.99999974E-6 : f32
    %385 = vector.broadcast %cst_138 : f32 to vector<16x1xf32>
    %386 = arith.addf %384, %385 : vector<16x1xf32>
    %387 = math.rsqrt %386 : vector<16x1xf32>
    %388 = vector.broadcast %387 : vector<16x1xf32> to vector<16x32xf32>
    %389 = arith.mulf %379, %388 : vector<16x32xf32>
    %390 = vector.broadcast %372 : vector<1x32xf32> to vector<16x32xf32>
    %391 = arith.mulf %389, %390 : vector<16x32xf32>
    %392 = vector.broadcast %373 : vector<1x32xf32> to vector<16x32xf32>
    %393 = arith.addf %391, %392 : vector<16x32xf32>
    %c0_139 = arith.constant 0 : index
    %c0_140 = arith.constant 0 : index
    %394 = vector.load %arg16[%c0_139, %c0_140] : memref<32x64xf32, #tpu.memory_space<vmem>>, vector<32x64xf32>
    %cst_141 = arith.constant dense<0.000000e+00> : vector<16x64xf32>
    %395 = tpu.matmul %393, %394, %cst_141 {dimension_numbers = #tpu.dot_dimension_numbers<[1], [0], [0], [1], [0, 0, 1, 1], [], []>} : vector<16x32xf32>, vector<32x64xf32>, vector<16x64xf32> -> vector<16x64xf32>
    %c0_142 = arith.constant 0 : index
    %c0_143 = arith.constant 0 : index
    %396 = vector.load %arg17[%c0_142, %c0_143] : memref<1x64xf32, #tpu.memory_space<vmem>>, vector<1x64xf32>
    %397 = vector.broadcast %396 : vector<1x64xf32> to vector<16x64xf32>
    %398 = arith.addf %395, %397 : vector<16x64xf32>
    %cst_144 = arith.constant 0.000000e+00 : f32
    %399 = vector.broadcast %cst_144 : f32 to vector<16x64xf32>
    %400 = arith.maximumf %398, %399 : vector<16x64xf32>
    %c0_145 = arith.constant 0 : index
    %c0_146 = arith.constant 0 : index
    %401 = vector.load %arg18[%c0_145, %c0_146] : memref<64x32xf32, #tpu.memory_space<vmem>>, vector<64x32xf32>
    %cst_147 = arith.constant dense<0.000000e+00> : vector<16x32xf32>
    %402 = tpu.matmul %400, %401, %cst_147 {dimension_numbers = #tpu.dot_dimension_numbers<[1], [0], [0], [1], [0, 0, 1, 1], [], []>} : vector<16x64xf32>, vector<64x32xf32>, vector<16x32xf32> -> vector<16x32xf32>
    %c0_148 = arith.constant 0 : index
    %c0_149 = arith.constant 0 : index
    %403 = vector.load %arg19[%c0_148, %c0_149] : memref<1x32xf32, #tpu.memory_space<vmem>>, vector<1x32xf32>
    %404 = vector.broadcast %403 : vector<1x32xf32> to vector<16x32xf32>
    %405 = arith.addf %402, %404 : vector<16x32xf32>
    %406 = arith.addf %393, %405 : vector<16x32xf32>
    %c0_150 = arith.constant 0 : index
    %c0_151 = arith.constant 0 : index
    %407 = vector.load %arg20[%c0_150, %c0_151] : memref<1x32xf32, #tpu.memory_space<vmem>>, vector<1x32xf32>
    %c0_152 = arith.constant 0 : index
    %c0_153 = arith.constant 0 : index
    %408 = vector.load %arg21[%c0_152, %c0_153] : memref<1x32xf32, #tpu.memory_space<vmem>>, vector<1x32xf32>
    %cst_154 = arith.constant dense<0.000000e+00> : vector<16xf32>
    %409 = vector.multi_reduction <add>, %406, %cst_154 [1] : vector<16x32xf32> to vector<16xf32>
    %410 = vector.shape_cast %409 : vector<16xf32> to vector<16x1xf32>
    %cst_155 = arith.constant 3.200000e+01 : f32
    %411 = vector.broadcast %cst_155 : f32 to vector<16x1xf32>
    %412 = arith.divf %410, %411 : vector<16x1xf32>
    %413 = vector.broadcast %412 : vector<16x1xf32> to vector<16x32xf32>
    %414 = arith.subf %406, %413 : vector<16x32xf32>
    %415 = arith.mulf %414, %414 : vector<16x32xf32>
    %cst_156 = arith.constant dense<0.000000e+00> : vector<16xf32>
    %416 = vector.multi_reduction <add>, %415, %cst_156 [1] : vector<16x32xf32> to vector<16xf32>
    %417 = vector.shape_cast %416 : vector<16xf32> to vector<16x1xf32>
    %cst_157 = arith.constant 3.200000e+01 : f32
    %418 = vector.broadcast %cst_157 : f32 to vector<16x1xf32>
    %419 = arith.divf %417, %418 : vector<16x1xf32>
    %cst_158 = arith.constant 9.99999974E-6 : f32
    %420 = vector.broadcast %cst_158 : f32 to vector<16x1xf32>
    %421 = arith.addf %419, %420 : vector<16x1xf32>
    %422 = math.rsqrt %421 : vector<16x1xf32>
    %423 = vector.broadcast %422 : vector<16x1xf32> to vector<16x32xf32>
    %424 = arith.mulf %414, %423 : vector<16x32xf32>
    %425 = vector.broadcast %407 : vector<1x32xf32> to vector<16x32xf32>
    %426 = arith.mulf %424, %425 : vector<16x32xf32>
    %427 = vector.broadcast %408 : vector<1x32xf32> to vector<16x32xf32>
    %428 = arith.addf %426, %427 : vector<16x32xf32>
    %c0_159 = arith.constant 0 : index
    %c0_160 = arith.constant 0 : index
    %429 = vector.load %arg22[%c0_159, %c0_160] : memref<16x32xf32, #tpu.memory_space<vmem>>, vector<16x32xf32>
    tpu.vector_store %arg22[%c0_159, %c0_160], %428 {strides = array<i32>} : memref<16x32xf32, #tpu.memory_space<vmem>>, vector<16x32xf32>,
    return
  }
}

module attributes {stable_mosaic.version = 11 : i64} {
  func.func @kernel(%arg0: memref<16x32xf32, #tpu.memory_space<vmem>>, %arg1: memref<16x32xf32, #tpu.memory_space<vmem>>, %arg2: memref<32x96xf32, #tpu.memory_space<vmem>>, %arg3: memref<1x96xf32, #tpu.memory_space<vmem>>, %arg4: memref<32x32xf32, #tpu.memory_space<vmem>>, %arg5: memref<1x32xf32, #tpu.memory_space<vmem>>, %arg6: memref<1x32xf32, #tpu.memory_space<vmem>>, %arg7: memref<1x32xf32, #tpu.memory_space<vmem>>, %arg8: memref<32x32xf32, #tpu.memory_space<vmem>>, %arg9: memref<1x32xf32, #tpu.memory_space<vmem>>, %arg10: memref<32x64xf32, #tpu.memory_space<vmem>>, %arg11: memref<1x64xf32, #tpu.memory_space<vmem>>, %arg12: memref<32x32xf32, #tpu.memory_space<vmem>>, %arg13: memref<1x32xf32, #tpu.memory_space<vmem>>, %arg14: memref<1x32xf32, #tpu.memory_space<vmem>>, %arg15: memref<1x32xf32, #tpu.memory_space<vmem>>, %arg16: memref<32x64xf32, #tpu.memory_space<vmem>>, %arg17: memref<1x64xf32, #tpu.memory_space<vmem>>, %arg18: memref<64x32xf32, #tpu.memory_space<vmem>>, %arg19: memref<1x32xf32, #tpu.memory_space<vmem>>, %arg20: memref<1x32xf32, #tpu.memory_space<vmem>>, %arg21: memref<1x32xf32, #tpu.memory_space<vmem>>, %arg22: memref<16x32xf32, #tpu.memory_space<vmem>>) attributes {dimension_semantics = [], scalar_prefetch = 0 : i64, scratch_operands = 0 : i64, tpu.core_type = #tpu.core_type<tc>} {
    %c0 = arith.constant 0 : index
    %c0_0 = arith.constant 0 : index
    %0 = vector.load %arg0[%c0, %c0_0] : memref<16x32xf32, #tpu.memory_space<vmem>>, vector<16x32xf32>
    %c0_1 = arith.constant 0 : index
    %c0_2 = arith.constant 0 : index
    %1 = vector.load %arg1[%c0_1, %c0_2] : memref<16x32xf32, #tpu.memory_space<vmem>>, vector<16x32xf32>
    %c0_3 = arith.constant 0 : index
    %c0_4 = arith.constant 0 : index
    %2 = vector.load %arg2[%c0_3, %c0_4] : memref<32x96xf32, #tpu.memory_space<vmem>>, vector<32x96xf32>
    %cst = arith.constant dense<0.000000e+00> : vector<16x96xf32>
    %3 = tpu.matmul %0, %2, %cst {dimension_numbers = #tpu.dot_dimension_numbers<[1], [0], [0], [1], [0, 0, 1, 1], [], []>} : vector<16x32xf32>, vector<32x96xf32>, vector<16x96xf32> -> vector<16x96xf32>
    %c0_5 = arith.constant 0 : index
    %c0_6 = arith.constant 0 : index
    %4 = vector.load %arg3[%c0_5, %c0_6] : memref<1x96xf32, #tpu.memory_space<vmem>>, vector<1x96xf32>
    %5 = vector.broadcast %4 : vector<1x96xf32> to vector<16x96xf32>
    %6 = arith.addf %3, %5 : vector<16x96xf32>
    %7 = vector.extract_strided_slice %6 {offsets = [0, 0], sizes = [16, 32], strides = [1, 1]} : vector<16x96xf32> to vector<16x32xf32>
    %8 = vector.extract_strided_slice %6 {offsets = [0, 32], sizes = [16, 32], strides = [1, 1]} : vector<16x96xf32> to vector<16x32xf32>
    %9 = vector.extract_strided_slice %6 {offsets = [0, 64], sizes = [16, 32], strides = [1, 1]} : vector<16x96xf32> to vector<16x32xf32>
    %c0_7 = arith.constant 0 : index
    %c0_8 = arith.constant 0 : index
    %10 = vector.load %arg4[%c0_7, %c0_8] : memref<32x32xf32, #tpu.memory_space<vmem>>, vector<32x32xf32>
    %c0_9 = arith.constant 0 : index
    %c0_10 = arith.constant 0 : index
    %11 = vector.load %arg5[%c0_9, %c0_10] : memref<1x32xf32, #tpu.memory_space<vmem>>, vector<1x32xf32>
    %12 = vector.extract_strided_slice %7 {offsets = [0, 0], sizes = [8, 8], strides = [1, 1]} : vector<16x32xf32> to vector<8x8xf32>
    %13 = vector.extract_strided_slice %8 {offsets = [0, 0], sizes = [8, 8], strides = [1, 1]} : vector<16x32xf32> to vector<8x8xf32>
    %14 = vector.extract_strided_slice %9 {offsets = [0, 0], sizes = [8, 8], strides = [1, 1]} : vector<16x32xf32> to vector<8x8xf32>
    %cst_11 = arith.constant dense<0.000000e+00> : vector<8x8xf32>
    %15 = tpu.matmul %12, %13, %cst_11 {dimension_numbers = #tpu.dot_dimension_numbers<[1], [1], [0], [0], [0, 0, 1, 0], [], []>} : vector<8x8xf32>, vector<8x8xf32>, vector<8x8xf32> -> vector<8x8xf32>
    %cst_12 = arith.constant 0.353553385 : f32
    %16 = vector.broadcast %cst_12 : f32 to vector<8x8xf32>
    %17 = arith.mulf %15, %16 : vector<8x8xf32>
    %cst_13 = arith.constant dense<0xFF800000> : vector<8xf32>
    %18 = vector.multi_reduction <maximumf>, %17, %cst_13 [1] : vector<8x8xf32> to vector<8xf32>
    %19 = vector.shape_cast %18 : vector<8xf32> to vector<8x1xf32>
    %20 = vector.broadcast %19 : vector<8x1xf32> to vector<8x8xf32>
    %21 = arith.subf %17, %20 : vector<8x8xf32>
    %22 = math.exp %21 : vector<8x8xf32>
    %cst_14 = arith.constant dense<0.000000e+00> : vector<8xf32>
    %23 = vector.multi_reduction <add>, %22, %cst_14 [1] : vector<8x8xf32> to vector<8xf32>
    %24 = vector.shape_cast %23 : vector<8xf32> to vector<8x1xf32>
    %25 = tpu.reciprocal %24 {approx = true} : vector<8x1xf32> -> vector<8x1xf32>
    %26 = vector.broadcast %25 : vector<8x1xf32> to vector<8x8xf32>
    %27 = arith.mulf %22, %26 : vector<8x8xf32>
    %cst_15 = arith.constant dense<0.000000e+00> : vector<8x8xf32>
    %28 = tpu.matmul %27, %14, %cst_15 {dimension_numbers = #tpu.dot_dimension_numbers<[1], [0], [0], [1], [0, 0, 1, 1], [], []>} : vector<8x8xf32>, vector<8x8xf32>, vector<8x8xf32> -> vector<8x8xf32>
    %29 = vector.extract_strided_slice %10 {offsets = [0, 0], sizes = [8, 32], strides = [1, 1]} : vector<32x32xf32> to vector<8x32xf32>
    %cst_16 = arith.constant dense<0.000000e+00> : vector<8x32xf32>
    %30 = tpu.matmul %28, %29, %cst_16 {dimension_numbers = #tpu.dot_dimension_numbers<[1], [0], [0], [1], [0, 0, 1, 1], [], []>} : vector<8x8xf32>, vector<8x32xf32>, vector<8x32xf32> -> vector<8x32xf32>
    %31 = vector.extract_strided_slice %7 {offsets = [0, 8], sizes = [8, 8], strides = [1, 1]} : vector<16x32xf32> to vector<8x8xf32>
    %32 = vector.extract_strided_slice %8 {offsets = [0, 8], sizes = [8, 8], strides = [1, 1]} : vector<16x32xf32> to vector<8x8xf32>
    %33 = vector.extract_strided_slice %9 {offsets = [0, 8], sizes = [8, 8], strides = [1, 1]} : vector<16x32xf32> to vector<8x8xf32>
    %cst_17 = arith.constant dense<0.000000e+00> : vector<8x8xf32>
    %34 = tpu.matmul %31, %32, %cst_17 {dimension_numbers = #tpu.dot_dimension_numbers<[1], [1], [0], [0], [0, 0, 1, 0], [], []>} : vector<8x8xf32>, vector<8x8xf32>, vector<8x8xf32> -> vector<8x8xf32>
    %cst_18 = arith.constant 0.353553385 : f32
    %35 = vector.broadcast %cst_18 : f32 to vector<8x8xf32>
    %36 = arith.mulf %34, %35 : vector<8x8xf32>
    %cst_19 = arith.constant dense<0xFF800000> : vector<8xf32>
    %37 = vector.multi_reduction <maximumf>, %36, %cst_19 [1] : vector<8x8xf32> to vector<8xf32>
    %38 = vector.shape_cast %37 : vector<8xf32> to vector<8x1xf32>
    %39 = vector.broadcast %38 : vector<8x1xf32> to vector<8x8xf32>
    %40 = arith.subf %36, %39 : vector<8x8xf32>
    %41 = math.exp %40 : vector<8x8xf32>
    %cst_20 = arith.constant dense<0.000000e+00> : vector<8xf32>
    %42 = vector.multi_reduction <add>, %41, %cst_20 [1] : vector<8x8xf32> to vector<8xf32>
    %43 = vector.shape_cast %42 : vector<8xf32> to vector<8x1xf32>
    %44 = tpu.reciprocal %43 {approx = true} : vector<8x1xf32> -> vector<8x1xf32>
    %45 = vector.broadcast %44 : vector<8x1xf32> to vector<8x8xf32>
    %46 = arith.mulf %41, %45 : vector<8x8xf32>
    %cst_21 = arith.constant dense<0.000000e+00> : vector<8x8xf32>
    %47 = tpu.matmul %46, %33, %cst_21 {dimension_numbers = #tpu.dot_dimension_numbers<[1], [0], [0], [1], [0, 0, 1, 1], [], []>} : vector<8x8xf32>, vector<8x8xf32>, vector<8x8xf32> -> vector<8x8xf32>
    %48 = vector.extract_strided_slice %10 {offsets = [8, 0], sizes = [8, 32], strides = [1, 1]} : vector<32x32xf32> to vector<8x32xf32>
    %cst_22 = arith.constant dense<0.000000e+00> : vector<8x32xf32>
    %49 = tpu.matmul %47, %48, %cst_22 {dimension_numbers = #tpu.dot_dimension_numbers<[1], [0], [0], [1], [0, 0, 1, 1], [], []>} : vector<8x8xf32>, vector<8x32xf32>, vector<8x32xf32> -> vector<8x32xf32>
    %50 = arith.addf %30, %49 : vector<8x32xf32>
    %51 = vector.extract_strided_slice %7 {offsets = [0, 16], sizes = [8, 8], strides = [1, 1]} : vector<16x32xf32> to vector<8x8xf32>
    %52 = vector.extract_strided_slice %8 {offsets = [0, 16], sizes = [8, 8], strides = [1, 1]} : vector<16x32xf32> to vector<8x8xf32>
    %53 = vector.extract_strided_slice %9 {offsets = [0, 16], sizes = [8, 8], strides = [1, 1]} : vector<16x32xf32> to vector<8x8xf32>
    %cst_23 = arith.constant dense<0.000000e+00> : vector<8x8xf32>
    %54 = tpu.matmul %51, %52, %cst_23 {dimension_numbers = #tpu.dot_dimension_numbers<[1], [1], [0], [0], [0, 0, 1, 0], [], []>} : vector<8x8xf32>, vector<8x8xf32>, vector<8x8xf32> -> vector<8x8xf32>
    %cst_24 = arith.constant 0.353553385 : f32
    %55 = vector.broadcast %cst_24 : f32 to vector<8x8xf32>
    %56 = arith.mulf %54, %55 : vector<8x8xf32>
    %cst_25 = arith.constant dense<0xFF800000> : vector<8xf32>
    %57 = vector.multi_reduction <maximumf>, %56, %cst_25 [1] : vector<8x8xf32> to vector<8xf32>
    %58 = vector.shape_cast %57 : vector<8xf32> to vector<8x1xf32>
    %59 = vector.broadcast %58 : vector<8x1xf32> to vector<8x8xf32>
    %60 = arith.subf %56, %59 : vector<8x8xf32>
    %61 = math.exp %60 : vector<8x8xf32>
    %cst_26 = arith.constant dense<0.000000e+00> : vector<8xf32>
    %62 = vector.multi_reduction <add>, %61, %cst_26 [1] : vector<8x8xf32> to vector<8xf32>
    %63 = vector.shape_cast %62 : vector<8xf32> to vector<8x1xf32>
    %64 = tpu.reciprocal %63 {approx = true} : vector<8x1xf32> -> vector<8x1xf32>
    %65 = vector.broadcast %64 : vector<8x1xf32> to vector<8x8xf32>
    %66 = arith.mulf %61, %65 : vector<8x8xf32>
    %cst_27 = arith.constant dense<0.000000e+00> : vector<8x8xf32>
    %67 = tpu.matmul %66, %53, %cst_27 {dimension_numbers = #tpu.dot_dimension_numbers<[1], [0], [0], [1], [0, 0, 1, 1], [], []>} : vector<8x8xf32>, vector<8x8xf32>, vector<8x8xf32> -> vector<8x8xf32>
    %68 = vector.extract_strided_slice %10 {offsets = [16, 0], sizes = [8, 32], strides = [1, 1]} : vector<32x32xf32> to vector<8x32xf32>
    %cst_28 = arith.constant dense<0.000000e+00> : vector<8x32xf32>
    %69 = tpu.matmul %67, %68, %cst_28 {dimension_numbers = #tpu.dot_dimension_numbers<[1], [0], [0], [1], [0, 0, 1, 1], [], []>} : vector<8x8xf32>, vector<8x32xf32>, vector<8x32xf32> -> vector<8x32xf32>
    %70 = arith.addf %50, %69 : vector<8x32xf32>
    %71 = vector.extract_strided_slice %7 {offsets = [0, 24], sizes = [8, 8], strides = [1, 1]} : vector<16x32xf32> to vector<8x8xf32>
    %72 = vector.extract_strided_slice %8 {offsets = [0, 24], sizes = [8, 8], strides = [1, 1]} : vector<16x32xf32> to vector<8x8xf32>
    %73 = vector.extract_strided_slice %9 {offsets = [0, 24], sizes = [8, 8], strides = [1, 1]} : vector<16x32xf32> to vector<8x8xf32>
    %cst_29 = arith.constant dense<0.000000e+00> : vector<8x8xf32>
    %74 = tpu.matmul %71, %72, %cst_29 {dimension_numbers = #tpu.dot_dimension_numbers<[1], [1], [0], [0], [0, 0, 1, 0], [], []>} : vector<8x8xf32>, vector<8x8xf32>, vector<8x8xf32> -> vector<8x8xf32>
    %cst_30 = arith.constant 0.353553385 : f32
    %75 = vector.broadcast %cst_30 : f32 to vector<8x8xf32>
    %76 = arith.mulf %74, %75 : vector<8x8xf32>
    %cst_31 = arith.constant dense<0xFF800000> : vector<8xf32>
    %77 = vector.multi_reduction <maximumf>, %76, %cst_31 [1] : vector<8x8xf32> to vector<8xf32>
    %78 = vector.shape_cast %77 : vector<8xf32> to vector<8x1xf32>
    %79 = vector.broadcast %78 : vector<8x1xf32> to vector<8x8xf32>
    %80 = arith.subf %76, %79 : vector<8x8xf32>
    %81 = math.exp %80 : vector<8x8xf32>
    %cst_32 = arith.constant dense<0.000000e+00> : vector<8xf32>
    %82 = vector.multi_reduction <add>, %81, %cst_32 [1] : vector<8x8xf32> to vector<8xf32>
    %83 = vector.shape_cast %82 : vector<8xf32> to vector<8x1xf32>
    %84 = tpu.reciprocal %83 {approx = true} : vector<8x1xf32> -> vector<8x1xf32>
    %85 = vector.broadcast %84 : vector<8x1xf32> to vector<8x8xf32>
    %86 = arith.mulf %81, %85 : vector<8x8xf32>
    %cst_33 = arith.constant dense<0.000000e+00> : vector<8x8xf32>
    %87 = tpu.matmul %86, %73, %cst_33 {dimension_numbers = #tpu.dot_dimension_numbers<[1], [0], [0], [1], [0, 0, 1, 1], [], []>} : vector<8x8xf32>, vector<8x8xf32>, vector<8x8xf32> -> vector<8x8xf32>
    %88 = vector.extract_strided_slice %10 {offsets = [24, 0], sizes = [8, 32], strides = [1, 1]} : vector<32x32xf32> to vector<8x32xf32>
    %cst_34 = arith.constant dense<0.000000e+00> : vector<8x32xf32>
    %89 = tpu.matmul %87, %88, %cst_34 {dimension_numbers = #tpu.dot_dimension_numbers<[1], [0], [0], [1], [0, 0, 1, 1], [], []>} : vector<8x8xf32>, vector<8x32xf32>, vector<8x32xf32> -> vector<8x32xf32>
    %90 = arith.addf %70, %89 : vector<8x32xf32>
    %91 = vector.extract_strided_slice %7 {offsets = [8, 0], sizes = [8, 8], strides = [1, 1]} : vector<16x32xf32> to vector<8x8xf32>
    %92 = vector.extract_strided_slice %8 {offsets = [8, 0], sizes = [8, 8], strides = [1, 1]} : vector<16x32xf32> to vector<8x8xf32>
    %93 = vector.extract_strided_slice %9 {offsets = [8, 0], sizes = [8, 8], strides = [1, 1]} : vector<16x32xf32> to vector<8x8xf32>
    %cst_35 = arith.constant dense<0.000000e+00> : vector<8x8xf32>
    %94 = tpu.matmul %91, %92, %cst_35 {dimension_numbers = #tpu.dot_dimension_numbers<[1], [1], [0], [0], [0, 0, 1, 0], [], []>} : vector<8x8xf32>, vector<8x8xf32>, vector<8x8xf32> -> vector<8x8xf32>
    %cst_36 = arith.constant 0.353553385 : f32
    %95 = vector.broadcast %cst_36 : f32 to vector<8x8xf32>
    %96 = arith.mulf %94, %95 : vector<8x8xf32>
    %cst_37 = arith.constant dense<0xFF800000> : vector<8xf32>
    %97 = vector.multi_reduction <maximumf>, %96, %cst_37 [1] : vector<8x8xf32> to vector<8xf32>
    %98 = vector.shape_cast %97 : vector<8xf32> to vector<8x1xf32>
    %99 = vector.broadcast %98 : vector<8x1xf32> to vector<8x8xf32>
    %100 = arith.subf %96, %99 : vector<8x8xf32>
    %101 = math.exp %100 : vector<8x8xf32>
    %cst_38 = arith.constant dense<0.000000e+00> : vector<8xf32>
    %102 = vector.multi_reduction <add>, %101, %cst_38 [1] : vector<8x8xf32> to vector<8xf32>
    %103 = vector.shape_cast %102 : vector<8xf32> to vector<8x1xf32>
    %104 = tpu.reciprocal %103 {approx = true} : vector<8x1xf32> -> vector<8x1xf32>
    %105 = vector.broadcast %104 : vector<8x1xf32> to vector<8x8xf32>
    %106 = arith.mulf %101, %105 : vector<8x8xf32>
    %cst_39 = arith.constant dense<0.000000e+00> : vector<8x8xf32>
    %107 = tpu.matmul %106, %93, %cst_39 {dimension_numbers = #tpu.dot_dimension_numbers<[1], [0], [0], [1], [0, 0, 1, 1], [], []>} : vector<8x8xf32>, vector<8x8xf32>, vector<8x8xf32> -> vector<8x8xf32>
    %108 = vector.extract_strided_slice %10 {offsets = [0, 0], sizes = [8, 32], strides = [1, 1]} : vector<32x32xf32> to vector<8x32xf32>
    %cst_40 = arith.constant dense<0.000000e+00> : vector<8x32xf32>
    %109 = tpu.matmul %107, %108, %cst_40 {dimension_numbers = #tpu.dot_dimension_numbers<[1], [0], [0], [1], [0, 0, 1, 1], [], []>} : vector<8x8xf32>, vector<8x32xf32>, vector<8x32xf32> -> vector<8x32xf32>
    %110 = vector.extract_strided_slice %7 {offsets = [8, 8], sizes = [8, 8], strides = [1, 1]} : vector<16x32xf32> to vector<8x8xf32>
    %111 = vector.extract_strided_slice %8 {offsets = [8, 8], sizes = [8, 8], strides = [1, 1]} : vector<16x32xf32> to vector<8x8xf32>
    %112 = vector.extract_strided_slice %9 {offsets = [8, 8], sizes = [8, 8], strides = [1, 1]} : vector<16x32xf32> to vector<8x8xf32>
    %cst_41 = arith.constant dense<0.000000e+00> : vector<8x8xf32>
    %113 = tpu.matmul %110, %111, %cst_41 {dimension_numbers = #tpu.dot_dimension_numbers<[1], [1], [0], [0], [0, 0, 1, 0], [], []>} : vector<8x8xf32>, vector<8x8xf32>, vector<8x8xf32> -> vector<8x8xf32>
    %cst_42 = arith.constant 0.353553385 : f32
    %114 = vector.broadcast %cst_42 : f32 to vector<8x8xf32>
    %115 = arith.mulf %113, %114 : vector<8x8xf32>
    %cst_43 = arith.constant dense<0xFF800000> : vector<8xf32>
    %116 = vector.multi_reduction <maximumf>, %115, %cst_43 [1] : vector<8x8xf32> to vector<8xf32>
    %117 = vector.shape_cast %116 : vector<8xf32> to vector<8x1xf32>
    %118 = vector.broadcast %117 : vector<8x1xf32> to vector<8x8xf32>
    %119 = arith.subf %115, %118 : vector<8x8xf32>
    %120 = math.exp %119 : vector<8x8xf32>
    %cst_44 = arith.constant dense<0.000000e+00> : vector<8xf32>
    %121 = vector.multi_reduction <add>, %120, %cst_44 [1] : vector<8x8xf32> to vector<8xf32>
    %122 = vector.shape_cast %121 : vector<8xf32> to vector<8x1xf32>
    %123 = tpu.reciprocal %122 {approx = true} : vector<8x1xf32> -> vector<8x1xf32>
    %124 = vector.broadcast %123 : vector<8x1xf32> to vector<8x8xf32>
    %125 = arith.mulf %120, %124 : vector<8x8xf32>
    %cst_45 = arith.constant dense<0.000000e+00> : vector<8x8xf32>
    %126 = tpu.matmul %125, %112, %cst_45 {dimension_numbers = #tpu.dot_dimension_numbers<[1], [0], [0], [1], [0, 0, 1, 1], [], []>} : vector<8x8xf32>, vector<8x8xf32>, vector<8x8xf32> -> vector<8x8xf32>
    %127 = vector.extract_strided_slice %10 {offsets = [8, 0], sizes = [8, 32], strides = [1, 1]} : vector<32x32xf32> to vector<8x32xf32>
    %cst_46 = arith.constant dense<0.000000e+00> : vector<8x32xf32>
    %128 = tpu.matmul %126, %127, %cst_46 {dimension_numbers = #tpu.dot_dimension_numbers<[1], [0], [0], [1], [0, 0, 1, 1], [], []>} : vector<8x8xf32>, vector<8x32xf32>, vector<8x32xf32> -> vector<8x32xf32>
    %129 = arith.addf %109, %128 : vector<8x32xf32>
    %130 = vector.extract_strided_slice %7 {offsets = [8, 16], sizes = [8, 8], strides = [1, 1]} : vector<16x32xf32> to vector<8x8xf32>
    %131 = vector.extract_strided_slice %8 {offsets = [8, 16], sizes = [8, 8], strides = [1, 1]} : vector<16x32xf32> to vector<8x8xf32>
    %132 = vector.extract_strided_slice %9 {offsets = [8, 16], sizes = [8, 8], strides = [1, 1]} : vector<16x32xf32> to vector<8x8xf32>
    %cst_47 = arith.constant dense<0.000000e+00> : vector<8x8xf32>
    %133 = tpu.matmul %130, %131, %cst_47 {dimension_numbers = #tpu.dot_dimension_numbers<[1], [1], [0], [0], [0, 0, 1, 0], [], []>} : vector<8x8xf32>, vector<8x8xf32>, vector<8x8xf32> -> vector<8x8xf32>
    %cst_48 = arith.constant 0.353553385 : f32
    %134 = vector.broadcast %cst_48 : f32 to vector<8x8xf32>
    %135 = arith.mulf %133, %134 : vector<8x8xf32>
    %cst_49 = arith.constant dense<0xFF800000> : vector<8xf32>
    %136 = vector.multi_reduction <maximumf>, %135, %cst_49 [1] : vector<8x8xf32> to vector<8xf32>
    %137 = vector.shape_cast %136 : vector<8xf32> to vector<8x1xf32>
    %138 = vector.broadcast %137 : vector<8x1xf32> to vector<8x8xf32>
    %139 = arith.subf %135, %138 : vector<8x8xf32>
    %140 = math.exp %139 : vector<8x8xf32>
    %cst_50 = arith.constant dense<0.000000e+00> : vector<8xf32>
    %141 = vector.multi_reduction <add>, %140, %cst_50 [1] : vector<8x8xf32> to vector<8xf32>
    %142 = vector.shape_cast %141 : vector<8xf32> to vector<8x1xf32>
    %143 = tpu.reciprocal %142 {approx = true} : vector<8x1xf32> -> vector<8x1xf32>
    %144 = vector.broadcast %143 : vector<8x1xf32> to vector<8x8xf32>
    %145 = arith.mulf %140, %144 : vector<8x8xf32>
    %cst_51 = arith.constant dense<0.000000e+00> : vector<8x8xf32>
    %146 = tpu.matmul %145, %132, %cst_51 {dimension_numbers = #tpu.dot_dimension_numbers<[1], [0], [0], [1], [0, 0, 1, 1], [], []>} : vector<8x8xf32>, vector<8x8xf32>, vector<8x8xf32> -> vector<8x8xf32>
    %147 = vector.extract_strided_slice %10 {offsets = [16, 0], sizes = [8, 32], strides = [1, 1]} : vector<32x32xf32> to vector<8x32xf32>
    %cst_52 = arith.constant dense<0.000000e+00> : vector<8x32xf32>
    %148 = tpu.matmul %146, %147, %cst_52 {dimension_numbers = #tpu.dot_dimension_numbers<[1], [0], [0], [1], [0, 0, 1, 1], [], []>} : vector<8x8xf32>, vector<8x32xf32>, vector<8x32xf32> -> vector<8x32xf32>
    %149 = arith.addf %129, %148 : vector<8x32xf32>
    %150 = vector.extract_strided_slice %7 {offsets = [8, 24], sizes = [8, 8], strides = [1, 1]} : vector<16x32xf32> to vector<8x8xf32>
    %151 = vector.extract_strided_slice %8 {offsets = [8, 24], sizes = [8, 8], strides = [1, 1]} : vector<16x32xf32> to vector<8x8xf32>
    %152 = vector.extract_strided_slice %9 {offsets = [8, 24], sizes = [8, 8], strides = [1, 1]} : vector<16x32xf32> to vector<8x8xf32>
    %cst_53 = arith.constant dense<0.000000e+00> : vector<8x8xf32>
    %153 = tpu.matmul %150, %151, %cst_53 {dimension_numbers = #tpu.dot_dimension_numbers<[1], [1], [0], [0], [0, 0, 1, 0], [], []>} : vector<8x8xf32>, vector<8x8xf32>, vector<8x8xf32> -> vector<8x8xf32>
    %cst_54 = arith.constant 0.353553385 : f32
    %154 = vector.broadcast %cst_54 : f32 to vector<8x8xf32>
    %155 = arith.mulf %153, %154 : vector<8x8xf32>
    %cst_55 = arith.constant dense<0xFF800000> : vector<8xf32>
    %156 = vector.multi_reduction <maximumf>, %155, %cst_55 [1] : vector<8x8xf32> to vector<8xf32>
    %157 = vector.shape_cast %156 : vector<8xf32> to vector<8x1xf32>
    %158 = vector.broadcast %157 : vector<8x1xf32> to vector<8x8xf32>
    %159 = arith.subf %155, %158 : vector<8x8xf32>
    %160 = math.exp %159 : vector<8x8xf32>
    %cst_56 = arith.constant dense<0.000000e+00> : vector<8xf32>
    %161 = vector.multi_reduction <add>, %160, %cst_56 [1] : vector<8x8xf32> to vector<8xf32>
    %162 = vector.shape_cast %161 : vector<8xf32> to vector<8x1xf32>
    %163 = tpu.reciprocal %162 {approx = true} : vector<8x1xf32> -> vector<8x1xf32>
    %164 = vector.broadcast %163 : vector<8x1xf32> to vector<8x8xf32>
    %165 = arith.mulf %160, %164 : vector<8x8xf32>
    %cst_57 = arith.constant dense<0.000000e+00> : vector<8x8xf32>
    %166 = tpu.matmul %165, %152, %cst_57 {dimension_numbers = #tpu.dot_dimension_numbers<[1], [0], [0], [1], [0, 0, 1, 1], [], []>} : vector<8x8xf32>, vector<8x8xf32>, vector<8x8xf32> -> vector<8x8xf32>
    %167 = vector.extract_strided_slice %10 {offsets = [24, 0], sizes = [8, 32], strides = [1, 1]} : vector<32x32xf32> to vector<8x32xf32>
    %cst_58 = arith.constant dense<0.000000e+00> : vector<8x32xf32>
    %168 = tpu.matmul %166, %167, %cst_58 {dimension_numbers = #tpu.dot_dimension_numbers<[1], [0], [0], [1], [0, 0, 1, 1], [], []>} : vector<8x8xf32>, vector<8x32xf32>, vector<8x32xf32> -> vector<8x32xf32>
    %169 = arith.addf %149, %168 : vector<8x32xf32>
    %170 = tpu.concatenate %90, %169 in 0 : vector<8x32xf32>, vector<8x32xf32> -> vector<16x32xf32>
    %171 = vector.broadcast %11 : vector<1x32xf32> to vector<16x32xf32>
    %172 = arith.addf %170, %171 : vector<16x32xf32>
    %173 = arith.addf %0, %172 : vector<16x32xf32>
    %c0_59 = arith.constant 0 : index
    %c0_60 = arith.constant 0 : index
    %174 = vector.load %arg6[%c0_59, %c0_60] : memref<1x32xf32, #tpu.memory_space<vmem>>, vector<1x32xf32>
    %c0_61 = arith.constant 0 : index
    %c0_62 = arith.constant 0 : index
    %175 = vector.load %arg7[%c0_61, %c0_62] : memref<1x32xf32, #tpu.memory_space<vmem>>, vector<1x32xf32>
    %cst_63 = arith.constant dense<0.000000e+00> : vector<16xf32>
    %176 = vector.multi_reduction <add>, %173, %cst_63 [1] : vector<16x32xf32> to vector<16xf32>
    %177 = vector.shape_cast %176 : vector<16xf32> to vector<16x1xf32>
    %cst_64 = arith.constant 3.200000e+01 : f32
    %178 = vector.broadcast %cst_64 : f32 to vector<16x1xf32>
    %179 = arith.divf %177, %178 : vector<16x1xf32>
    %180 = vector.broadcast %179 : vector<16x1xf32> to vector<16x32xf32>
    %181 = arith.subf %173, %180 : vector<16x32xf32>
    %182 = arith.mulf %181, %181 : vector<16x32xf32>
    %cst_65 = arith.constant dense<0.000000e+00> : vector<16xf32>
    %183 = vector.multi_reduction <add>, %182, %cst_65 [1] : vector<16x32xf32> to vector<16xf32>
    %184 = vector.shape_cast %183 : vector<16xf32> to vector<16x1xf32>
    %cst_66 = arith.constant 3.200000e+01 : f32
    %185 = vector.broadcast %cst_66 : f32 to vector<16x1xf32>
    %186 = arith.divf %184, %185 : vector<16x1xf32>
    %cst_67 = arith.constant 9.99999974E-6 : f32
    %187 = vector.broadcast %cst_67 : f32 to vector<16x1xf32>
    %188 = arith.addf %186, %187 : vector<16x1xf32>
    %189 = math.rsqrt %188 : vector<16x1xf32>
    %190 = vector.broadcast %189 : vector<16x1xf32> to vector<16x32xf32>
    %191 = arith.mulf %181, %190 : vector<16x32xf32>
    %192 = vector.broadcast %174 : vector<1x32xf32> to vector<16x32xf32>
    %193 = arith.mulf %191, %192 : vector<16x32xf32>
    %194 = vector.broadcast %175 : vector<1x32xf32> to vector<16x32xf32>
    %195 = arith.addf %193, %194 : vector<16x32xf32>
    %c0_68 = arith.constant 0 : index
    %c0_69 = arith.constant 0 : index
    %196 = vector.load %arg8[%c0_68, %c0_69] : memref<32x32xf32, #tpu.memory_space<vmem>>, vector<32x32xf32>
    %cst_70 = arith.constant dense<0.000000e+00> : vector<16x32xf32>
    %197 = tpu.matmul %195, %196, %cst_70 {dimension_numbers = #tpu.dot_dimension_numbers<[1], [0], [0], [1], [0, 0, 1, 1], [], []>} : vector<16x32xf32>, vector<32x32xf32>, vector<16x32xf32> -> vector<16x32xf32>
    %c0_71 = arith.constant 0 : index
    %c0_72 = arith.constant 0 : index
    %198 = vector.load %arg9[%c0_71, %c0_72] : memref<1x32xf32, #tpu.memory_space<vmem>>, vector<1x32xf32>
    %199 = vector.broadcast %198 : vector<1x32xf32> to vector<16x32xf32>
    %200 = arith.addf %197, %199 : vector<16x32xf32>
    %c0_73 = arith.constant 0 : index
    %c0_74 = arith.constant 0 : index
    %201 = vector.load %arg10[%c0_73, %c0_74] : memref<32x64xf32, #tpu.memory_space<vmem>>, vector<32x64xf32>
    %cst_75 = arith.constant dense<0.000000e+00> : vector<16x64xf32>
    %202 = tpu.matmul %1, %201, %cst_75 {dimension_numbers = #tpu.dot_dimension_numbers<[1], [0], [0], [1], [0, 0, 1, 1], [], []>} : vector<16x32xf32>, vector<32x64xf32>, vector<16x64xf32> -> vector<16x64xf32>
    %c0_76 = arith.constant 0 : index
    %c0_77 = arith.constant 0 : index
    %203 = vector.load %arg11[%c0_76, %c0_77] : memref<1x64xf32, #tpu.memory_space<vmem>>, vector<1x64xf32>
    %204 = vector.broadcast %203 : vector<1x64xf32> to vector<16x64xf32>
    %205 = arith.addf %202, %204 : vector<16x64xf32>
    %206 = vector.extract_strided_slice %205 {offsets = [0, 0], sizes = [16, 32], strides = [1, 1]} : vector<16x64xf32> to vector<16x32xf32>
    %207 = vector.extract_strided_slice %205 {offsets = [0, 32], sizes = [16, 32], strides = [1, 1]} : vector<16x64xf32> to vector<16x32xf32>
    %c0_78 = arith.constant 0 : index
    %c0_79 = arith.constant 0 : index
    %208 = vector.load %arg12[%c0_78, %c0_79] : memref<32x32xf32, #tpu.memory_space<vmem>>, vector<32x32xf32>
    %c0_80 = arith.constant 0 : index
    %c0_81 = arith.constant 0 : index
    %209 = vector.load %arg13[%c0_80, %c0_81] : memref<1x32xf32, #tpu.memory_space<vmem>>, vector<1x32xf32>
    %210 = vector.extract_strided_slice %200 {offsets = [0, 0], sizes = [8, 8], strides = [1, 1]} : vector<16x32xf32> to vector<8x8xf32>
    %211 = vector.extract_strided_slice %206 {offsets = [0, 0], sizes = [8, 8], strides = [1, 1]} : vector<16x32xf32> to vector<8x8xf32>
    %212 = vector.extract_strided_slice %207 {offsets = [0, 0], sizes = [8, 8], strides = [1, 1]} : vector<16x32xf32> to vector<8x8xf32>
    %cst_82 = arith.constant dense<0.000000e+00> : vector<8x8xf32>
    %213 = tpu.matmul %210, %211, %cst_82 {dimension_numbers = #tpu.dot_dimension_numbers<[1], [1], [0], [0], [0, 0, 1, 0], [], []>} : vector<8x8xf32>, vector<8x8xf32>, vector<8x8xf32> -> vector<8x8xf32>
    %cst_83 = arith.constant 0.353553385 : f32
    %214 = vector.broadcast %cst_83 : f32 to vector<8x8xf32>
    %215 = arith.mulf %213, %214 : vector<8x8xf32>
    %cst_84 = arith.constant dense<0xFF800000> : vector<8xf32>
    %216 = vector.multi_reduction <maximumf>, %215, %cst_84 [1] : vector<8x8xf32> to vector<8xf32>
    %217 = vector.shape_cast %216 : vector<8xf32> to vector<8x1xf32>
    %218 = vector.broadcast %217 : vector<8x1xf32> to vector<8x8xf32>
    %219 = arith.subf %215, %218 : vector<8x8xf32>
    %220 = math.exp %219 : vector<8x8xf32>
    %cst_85 = arith.constant dense<0.000000e+00> : vector<8xf32>
    %221 = vector.multi_reduction <add>, %220, %cst_85 [1] : vector<8x8xf32> to vector<8xf32>
    %222 = vector.shape_cast %221 : vector<8xf32> to vector<8x1xf32>
    %223 = tpu.reciprocal %222 {approx = true} : vector<8x1xf32> -> vector<8x1xf32>
    %224 = vector.broadcast %223 : vector<8x1xf32> to vector<8x8xf32>
    %225 = arith.mulf %220, %224 : vector<8x8xf32>
    %cst_86 = arith.constant dense<0.000000e+00> : vector<8x8xf32>
    %226 = tpu.matmul %225, %212, %cst_86 {dimension_numbers = #tpu.dot_dimension_numbers<[1], [0], [0], [1], [0, 0, 1, 1], [], []>} : vector<8x8xf32>, vector<8x8xf32>, vector<8x8xf32> -> vector<8x8xf32>
    %227 = vector.extract_strided_slice %208 {offsets = [0, 0], sizes = [8, 32], strides = [1, 1]} : vector<32x32xf32> to vector<8x32xf32>
    %cst_87 = arith.constant dense<0.000000e+00> : vector<8x32xf32>
    %228 = tpu.matmul %226, %227, %cst_87 {dimension_numbers = #tpu.dot_dimension_numbers<[1], [0], [0], [1], [0, 0, 1, 1], [], []>} : vector<8x8xf32>, vector<8x32xf32>, vector<8x32xf32> -> vector<8x32xf32>
    %229 = vector.extract_strided_slice %200 {offsets = [0, 8], sizes = [8, 8], strides = [1, 1]} : vector<16x32xf32> to vector<8x8xf32>
    %230 = vector.extract_strided_slice %206 {offsets = [0, 8], sizes = [8, 8], strides = [1, 1]} : vector<16x32xf32> to vector<8x8xf32>
    %231 = vector.extract_strided_slice %207 {offsets = [0, 8], sizes = [8, 8], strides = [1, 1]} : vector<16x32xf32> to vector<8x8xf32>
    %cst_88 = arith.constant dense<0.000000e+00> : vector<8x8xf32>
    %232 = tpu.matmul %229, %230, %cst_88 {dimension_numbers = #tpu.dot_dimension_numbers<[1], [1], [0], [0], [0, 0, 1, 0], [], []>} : vector<8x8xf32>, vector<8x8xf32>, vector<8x8xf32> -> vector<8x8xf32>
    %cst_89 = arith.constant 0.353553385 : f32
    %233 = vector.broadcast %cst_89 : f32 to vector<8x8xf32>
    %234 = arith.mulf %232, %233 : vector<8x8xf32>
    %cst_90 = arith.constant dense<0xFF800000> : vector<8xf32>
    %235 = vector.multi_reduction <maximumf>, %234, %cst_90 [1] : vector<8x8xf32> to vector<8xf32>
    %236 = vector.shape_cast %235 : vector<8xf32> to vector<8x1xf32>
    %237 = vector.broadcast %236 : vector<8x1xf32> to vector<8x8xf32>
    %238 = arith.subf %234, %237 : vector<8x8xf32>
    %239 = math.exp %238 : vector<8x8xf32>
    %cst_91 = arith.constant dense<0.000000e+00> : vector<8xf32>
    %240 = vector.multi_reduction <add>, %239, %cst_91 [1] : vector<8x8xf32> to vector<8xf32>
    %241 = vector.shape_cast %240 : vector<8xf32> to vector<8x1xf32>
    %242 = tpu.reciprocal %241 {approx = true} : vector<8x1xf32> -> vector<8x1xf32>
    %243 = vector.broadcast %242 : vector<8x1xf32> to vector<8x8xf32>
    %244 = arith.mulf %239, %243 : vector<8x8xf32>
    %cst_92 = arith.constant dense<0.000000e+00> : vector<8x8xf32>
    %245 = tpu.matmul %244, %231, %cst_92 {dimension_numbers = #tpu.dot_dimension_numbers<[1], [0], [0], [1], [0, 0, 1, 1], [], []>} : vector<8x8xf32>, vector<8x8xf32>, vector<8x8xf32> -> vector<8x8xf32>
    %246 = vector.extract_strided_slice %208 {offsets = [8, 0], sizes = [8, 32], strides = [1, 1]} : vector<32x32xf32> to vector<8x32xf32>
    %cst_93 = arith.constant dense<0.000000e+00> : vector<8x32xf32>
    %247 = tpu.matmul %245, %246, %cst_93 {dimension_numbers = #tpu.dot_dimension_numbers<[1], [0], [0], [1], [0, 0, 1, 1], [], []>} : vector<8x8xf32>, vector<8x32xf32>, vector<8x32xf32> -> vector<8x32xf32>
    %248 = arith.addf %228, %247 : vector<8x32xf32>
    %249 = vector.extract_strided_slice %200 {offsets = [0, 16], sizes = [8, 8], strides = [1, 1]} : vector<16x32xf32> to vector<8x8xf32>
    %250 = vector.extract_strided_slice %206 {offsets = [0, 16], sizes = [8, 8], strides = [1, 1]} : vector<16x32xf32> to vector<8x8xf32>
    %251 = vector.extract_strided_slice %207 {offsets = [0, 16], sizes = [8, 8], strides = [1, 1]} : vector<16x32xf32> to vector<8x8xf32>
    %cst_94 = arith.constant dense<0.000000e+00> : vector<8x8xf32>
    %252 = tpu.matmul %249, %250, %cst_94 {dimension_numbers = #tpu.dot_dimension_numbers<[1], [1], [0], [0], [0, 0, 1, 0], [], []>} : vector<8x8xf32>, vector<8x8xf32>, vector<8x8xf32> -> vector<8x8xf32>
    %cst_95 = arith.constant 0.353553385 : f32
    %253 = vector.broadcast %cst_95 : f32 to vector<8x8xf32>
    %254 = arith.mulf %252, %253 : vector<8x8xf32>
    %cst_96 = arith.constant dense<0xFF800000> : vector<8xf32>
    %255 = vector.multi_reduction <maximumf>, %254, %cst_96 [1] : vector<8x8xf32> to vector<8xf32>
    %256 = vector.shape_cast %255 : vector<8xf32> to vector<8x1xf32>
    %257 = vector.broadcast %256 : vector<8x1xf32> to vector<8x8xf32>
    %258 = arith.subf %254, %257 : vector<8x8xf32>
    %259 = math.exp %258 : vector<8x8xf32>
    %cst_97 = arith.constant dense<0.000000e+00> : vector<8xf32>
    %260 = vector.multi_reduction <add>, %259, %cst_97 [1] : vector<8x8xf32> to vector<8xf32>
    %261 = vector.shape_cast %260 : vector<8xf32> to vector<8x1xf32>
    %262 = tpu.reciprocal %261 {approx = true} : vector<8x1xf32> -> vector<8x1xf32>
    %263 = vector.broadcast %262 : vector<8x1xf32> to vector<8x8xf32>
    %264 = arith.mulf %259, %263 : vector<8x8xf32>
    %cst_98 = arith.constant dense<0.000000e+00> : vector<8x8xf32>
    %265 = tpu.matmul %264, %251, %cst_98 {dimension_numbers = #tpu.dot_dimension_numbers<[1], [0], [0], [1], [0, 0, 1, 1], [], []>} : vector<8x8xf32>, vector<8x8xf32>, vector<8x8xf32> -> vector<8x8xf32>
    %266 = vector.extract_strided_slice %208 {offsets = [16, 0], sizes = [8, 32], strides = [1, 1]} : vector<32x32xf32> to vector<8x32xf32>
    %cst_99 = arith.constant dense<0.000000e+00> : vector<8x32xf32>
    %267 = tpu.matmul %265, %266, %cst_99 {dimension_numbers = #tpu.dot_dimension_numbers<[1], [0], [0], [1], [0, 0, 1, 1], [], []>} : vector<8x8xf32>, vector<8x32xf32>, vector<8x32xf32> -> vector<8x32xf32>
    %268 = arith.addf %248, %267 : vector<8x32xf32>
    %269 = vector.extract_strided_slice %200 {offsets = [0, 24], sizes = [8, 8], strides = [1, 1]} : vector<16x32xf32> to vector<8x8xf32>
    %270 = vector.extract_strided_slice %206 {offsets = [0, 24], sizes = [8, 8], strides = [1, 1]} : vector<16x32xf32> to vector<8x8xf32>
    %271 = vector.extract_strided_slice %207 {offsets = [0, 24], sizes = [8, 8], strides = [1, 1]} : vector<16x32xf32> to vector<8x8xf32>
    %cst_100 = arith.constant dense<0.000000e+00> : vector<8x8xf32>
    %272 = tpu.matmul %269, %270, %cst_100 {dimension_numbers = #tpu.dot_dimension_numbers<[1], [1], [0], [0], [0, 0, 1, 0], [], []>} : vector<8x8xf32>, vector<8x8xf32>, vector<8x8xf32> -> vector<8x8xf32>
    %cst_101 = arith.constant 0.353553385 : f32
    %273 = vector.broadcast %cst_101 : f32 to vector<8x8xf32>
    %274 = arith.mulf %272, %273 : vector<8x8xf32>
    %cst_102 = arith.constant dense<0xFF800000> : vector<8xf32>
    %275 = vector.multi_reduction <maximumf>, %274, %cst_102 [1] : vector<8x8xf32> to vector<8xf32>
    %276 = vector.shape_cast %275 : vector<8xf32> to vector<8x1xf32>
    %277 = vector.broadcast %276 : vector<8x1xf32> to vector<8x8xf32>
    %278 = arith.subf %274, %277 : vector<8x8xf32>
    %279 = math.exp %278 : vector<8x8xf32>
    %cst_103 = arith.constant dense<0.000000e+00> : vector<8xf32>
    %280 = vector.multi_reduction <add>, %279, %cst_103 [1] : vector<8x8xf32> to vector<8xf32>
    %281 = vector.shape_cast %280 : vector<8xf32> to vector<8x1xf32>
    %282 = tpu.reciprocal %281 {approx = true} : vector<8x1xf32> -> vector<8x1xf32>
    %283 = vector.broadcast %282 : vector<8x1xf32> to vector<8x8xf32>
    %284 = arith.mulf %279, %283 : vector<8x8xf32>
    %cst_104 = arith.constant dense<0.000000e+00> : vector<8x8xf32>
    %285 = tpu.matmul %284, %271, %cst_104 {dimension_numbers = #tpu.dot_dimension_numbers<[1], [0], [0], [1], [0, 0, 1, 1], [], []>} : vector<8x8xf32>, vector<8x8xf32>, vector<8x8xf32> -> vector<8x8xf32>
    %286 = vector.extract_strided_slice %208 {offsets = [24, 0], sizes = [8, 32], strides = [1, 1]} : vector<32x32xf32> to vector<8x32xf32>
    %cst_105 = arith.constant dense<0.000000e+00> : vector<8x32xf32>
    %287 = tpu.matmul %285, %286, %cst_105 {dimension_numbers = #tpu.dot_dimension_numbers<[1], [0], [0], [1], [0, 0, 1, 1], [], []>} : vector<8x8xf32>, vector<8x32xf32>, vector<8x32xf32> -> vector<8x32xf32>
    %288 = arith.addf %268, %287 : vector<8x32xf32>
    %289 = vector.extract_strided_slice %200 {offsets = [8, 0], sizes = [8, 8], strides = [1, 1]} : vector<16x32xf32> to vector<8x8xf32>
    %290 = vector.extract_strided_slice %206 {offsets = [8, 0], sizes = [8, 8], strides = [1, 1]} : vector<16x32xf32> to vector<8x8xf32>
    %291 = vector.extract_strided_slice %207 {offsets = [8, 0], sizes = [8, 8], strides = [1, 1]} : vector<16x32xf32> to vector<8x8xf32>
    %cst_106 = arith.constant dense<0.000000e+00> : vector<8x8xf32>
    %292 = tpu.matmul %289, %290, %cst_106 {dimension_numbers = #tpu.dot_dimension_numbers<[1], [1], [0], [0], [0, 0, 1, 0], [], []>} : vector<8x8xf32>, vector<8x8xf32>, vector<8x8xf32> -> vector<8x8xf32>
    %cst_107 = arith.constant 0.353553385 : f32
    %293 = vector.broadcast %cst_107 : f32 to vector<8x8xf32>
    %294 = arith.mulf %292, %293 : vector<8x8xf32>
    %cst_108 = arith.constant dense<0xFF800000> : vector<8xf32>
    %295 = vector.multi_reduction <maximumf>, %294, %cst_108 [1] : vector<8x8xf32> to vector<8xf32>
    %296 = vector.shape_cast %295 : vector<8xf32> to vector<8x1xf32>
    %297 = vector.broadcast %296 : vector<8x1xf32> to vector<8x8xf32>
    %298 = arith.subf %294, %297 : vector<8x8xf32>
    %299 = math.exp %298 : vector<8x8xf32>
    %cst_109 = arith.constant dense<0.000000e+00> : vector<8xf32>
    %300 = vector.multi_reduction <add>, %299, %cst_109 [1] : vector<8x8xf32> to vector<8xf32>
    %301 = vector.shape_cast %300 : vector<8xf32> to vector<8x1xf32>
    %302 = tpu.reciprocal %301 {approx = true} : vector<8x1xf32> -> vector<8x1xf32>
    %303 = vector.broadcast %302 : vector<8x1xf32> to vector<8x8xf32>
    %304 = arith.mulf %299, %303 : vector<8x8xf32>
    %cst_110 = arith.constant dense<0.000000e+00> : vector<8x8xf32>
    %305 = tpu.matmul %304, %291, %cst_110 {dimension_numbers = #tpu.dot_dimension_numbers<[1], [0], [0], [1], [0, 0, 1, 1], [], []>} : vector<8x8xf32>, vector<8x8xf32>, vector<8x8xf32> -> vector<8x8xf32>
    %306 = vector.extract_strided_slice %208 {offsets = [0, 0], sizes = [8, 32], strides = [1, 1]} : vector<32x32xf32> to vector<8x32xf32>
    %cst_111 = arith.constant dense<0.000000e+00> : vector<8x32xf32>
    %307 = tpu.matmul %305, %306, %cst_111 {dimension_numbers = #tpu.dot_dimension_numbers<[1], [0], [0], [1], [0, 0, 1, 1], [], []>} : vector<8x8xf32>, vector<8x32xf32>, vector<8x32xf32> -> vector<8x32xf32>
    %308 = vector.extract_strided_slice %200 {offsets = [8, 8], sizes = [8, 8], strides = [1, 1]} : vector<16x32xf32> to vector<8x8xf32>
    %309 = vector.extract_strided_slice %206 {offsets = [8, 8], sizes = [8, 8], strides = [1, 1]} : vector<16x32xf32> to vector<8x8xf32>
    %310 = vector.extract_strided_slice %207 {offsets = [8, 8], sizes = [8, 8], strides = [1, 1]} : vector<16x32xf32> to vector<8x8xf32>
    %cst_112 = arith.constant dense<0.000000e+00> : vector<8x8xf32>
    %311 = tpu.matmul %308, %309, %cst_112 {dimension_numbers = #tpu.dot_dimension_numbers<[1], [1], [0], [0], [0, 0, 1, 0], [], []>} : vector<8x8xf32>, vector<8x8xf32>, vector<8x8xf32> -> vector<8x8xf32>
    %cst_113 = arith.constant 0.353553385 : f32
    %312 = vector.broadcast %cst_113 : f32 to vector<8x8xf32>
    %313 = arith.mulf %311, %312 : vector<8x8xf32>
    %cst_114 = arith.constant dense<0xFF800000> : vector<8xf32>
    %314 = vector.multi_reduction <maximumf>, %313, %cst_114 [1] : vector<8x8xf32> to vector<8xf32>
    %315 = vector.shape_cast %314 : vector<8xf32> to vector<8x1xf32>
    %316 = vector.broadcast %315 : vector<8x1xf32> to vector<8x8xf32>
    %317 = arith.subf %313, %316 : vector<8x8xf32>
    %318 = math.exp %317 : vector<8x8xf32>
    %cst_115 = arith.constant dense<0.000000e+00> : vector<8xf32>
    %319 = vector.multi_reduction <add>, %318, %cst_115 [1] : vector<8x8xf32> to vector<8xf32>
    %320 = vector.shape_cast %319 : vector<8xf32> to vector<8x1xf32>
    %321 = tpu.reciprocal %320 {approx = true} : vector<8x1xf32> -> vector<8x1xf32>
    %322 = vector.broadcast %321 : vector<8x1xf32> to vector<8x8xf32>
    %323 = arith.mulf %318, %322 : vector<8x8xf32>
    %cst_116 = arith.constant dense<0.000000e+00> : vector<8x8xf32>
    %324 = tpu.matmul %323, %310, %cst_116 {dimension_numbers = #tpu.dot_dimension_numbers<[1], [0], [0], [1], [0, 0, 1, 1], [], []>} : vector<8x8xf32>, vector<8x8xf32>, vector<8x8xf32> -> vector<8x8xf32>
    %325 = vector.extract_strided_slice %208 {offsets = [8, 0], sizes = [8, 32], strides = [1, 1]} : vector<32x32xf32> to vector<8x32xf32>
    %cst_117 = arith.constant dense<0.000000e+00> : vector<8x32xf32>
    %326 = tpu.matmul %324, %325, %cst_117 {dimension_numbers = #tpu.dot_dimension_numbers<[1], [0], [0], [1], [0, 0, 1, 1], [], []>} : vector<8x8xf32>, vector<8x32xf32>, vector<8x32xf32> -> vector<8x32xf32>
    %327 = arith.addf %307, %326 : vector<8x32xf32>
    %328 = vector.extract_strided_slice %200 {offsets = [8, 16], sizes = [8, 8], strides = [1, 1]} : vector<16x32xf32> to vector<8x8xf32>
    %329 = vector.extract_strided_slice %206 {offsets = [8, 16], sizes = [8, 8], strides = [1, 1]} : vector<16x32xf32> to vector<8x8xf32>
    %330 = vector.extract_strided_slice %207 {offsets = [8, 16], sizes = [8, 8], strides = [1, 1]} : vector<16x32xf32> to vector<8x8xf32>
    %cst_118 = arith.constant dense<0.000000e+00> : vector<8x8xf32>
    %331 = tpu.matmul %328, %329, %cst_118 {dimension_numbers = #tpu.dot_dimension_numbers<[1], [1], [0], [0], [0, 0, 1, 0], [], []>} : vector<8x8xf32>, vector<8x8xf32>, vector<8x8xf32> -> vector<8x8xf32>
    %cst_119 = arith.constant 0.353553385 : f32
    %332 = vector.broadcast %cst_119 : f32 to vector<8x8xf32>
    %333 = arith.mulf %331, %332 : vector<8x8xf32>
    %cst_120 = arith.constant dense<0xFF800000> : vector<8xf32>
    %334 = vector.multi_reduction <maximumf>, %333, %cst_120 [1] : vector<8x8xf32> to vector<8xf32>
    %335 = vector.shape_cast %334 : vector<8xf32> to vector<8x1xf32>
    %336 = vector.broadcast %335 : vector<8x1xf32> to vector<8x8xf32>
    %337 = arith.subf %333, %336 : vector<8x8xf32>
    %338 = math.exp %337 : vector<8x8xf32>
    %cst_121 = arith.constant dense<0.000000e+00> : vector<8xf32>
    %339 = vector.multi_reduction <add>, %338, %cst_121 [1] : vector<8x8xf32> to vector<8xf32>
    %340 = vector.shape_cast %339 : vector<8xf32> to vector<8x1xf32>
    %341 = tpu.reciprocal %340 {approx = true} : vector<8x1xf32> -> vector<8x1xf32>
    %342 = vector.broadcast %341 : vector<8x1xf32> to vector<8x8xf32>
    %343 = arith.mulf %338, %342 : vector<8x8xf32>
    %cst_122 = arith.constant dense<0.000000e+00> : vector<8x8xf32>
    %344 = tpu.matmul %343, %330, %cst_122 {dimension_numbers = #tpu.dot_dimension_numbers<[1], [0], [0], [1], [0, 0, 1, 1], [], []>} : vector<8x8xf32>, vector<8x8xf32>, vector<8x8xf32> -> vector<8x8xf32>
    %345 = vector.extract_strided_slice %208 {offsets = [16, 0], sizes = [8, 32], strides = [1, 1]} : vector<32x32xf32> to vector<8x32xf32>
    %cst_123 = arith.constant dense<0.000000e+00> : vector<8x32xf32>
    %346 = tpu.matmul %344, %345, %cst_123 {dimension_numbers = #tpu.dot_dimension_numbers<[1], [0], [0], [1], [0, 0, 1, 1], [], []>} : vector<8x8xf32>, vector<8x32xf32>, vector<8x32xf32> -> vector<8x32xf32>
    %347 = arith.addf %327, %346 : vector<8x32xf32>
    %348 = vector.extract_strided_slice %200 {offsets = [8, 24], sizes = [8, 8], strides = [1, 1]} : vector<16x32xf32> to vector<8x8xf32>
    %349 = vector.extract_strided_slice %206 {offsets = [8, 24], sizes = [8, 8], strides = [1, 1]} : vector<16x32xf32> to vector<8x8xf32>
    %350 = vector.extract_strided_slice %207 {offsets = [8, 24], sizes = [8, 8], strides = [1, 1]} : vector<16x32xf32> to vector<8x8xf32>
    %cst_124 = arith.constant dense<0.000000e+00> : vector<8x8xf32>
    %351 = tpu.matmul %348, %349, %cst_124 {dimension_numbers = #tpu.dot_dimension_numbers<[1], [1], [0], [0], [0, 0, 1, 0], [], []>} : vector<8x8xf32>, vector<8x8xf32>, vector<8x8xf32> -> vector<8x8xf32>
    %cst_125 = arith.constant 0.353553385 : f32
    %352 = vector.broadcast %cst_125 : f32 to vector<8x8xf32>
    %353 = arith.mulf %351, %352 : vector<8x8xf32>
    %cst_126 = arith.constant dense<0xFF800000> : vector<8xf32>
    %354 = vector.multi_reduction <maximumf>, %353, %cst_126 [1] : vector<8x8xf32> to vector<8xf32>
    %355 = vector.shape_cast %354 : vector<8xf32> to vector<8x1xf32>
    %356 = vector.broadcast %355 : vector<8x1xf32> to vector<8x8xf32>
    %357 = arith.subf %353, %356 : vector<8x8xf32>
    %358 = math.exp %357 : vector<8x8xf32>
    %cst_127 = arith.constant dense<0.000000e+00> : vector<8xf32>
    %359 = vector.multi_reduction <add>, %358, %cst_127 [1] : vector<8x8xf32> to vector<8xf32>
    %360 = vector.shape_cast %359 : vector<8xf32> to vector<8x1xf32>
    %361 = tpu.reciprocal %360 {approx = true} : vector<8x1xf32> -> vector<8x1xf32>
    %362 = vector.broadcast %361 : vector<8x1xf32> to vector<8x8xf32>
    %363 = arith.mulf %358, %362 : vector<8x8xf32>
    %cst_128 = arith.constant dense<0.000000e+00> : vector<8x8xf32>
    %364 = tpu.matmul %363, %350, %cst_128 {dimension_numbers = #tpu.dot_dimension_numbers<[1], [0], [0], [1], [0, 0, 1, 1], [], []>} : vector<8x8xf32>, vector<8x8xf32>, vector<8x8xf32> -> vector<8x8xf32>
    %365 = vector.extract_strided_slice %208 {offsets = [24, 0], sizes = [8, 32], strides = [1, 1]} : vector<32x32xf32> to vector<8x32xf32>
    %cst_129 = arith.constant dense<0.000000e+00> : vector<8x32xf32>
    %366 = tpu.matmul %364, %365, %cst_129 {dimension_numbers = #tpu.dot_dimension_numbers<[1], [0], [0], [1], [0, 0, 1, 1], [], []>} : vector<8x8xf32>, vector<8x32xf32>, vector<8x32xf32> -> vector<8x32xf32>
    %367 = arith.addf %347, %366 : vector<8x32xf32>
    %368 = tpu.concatenate %288, %367 in 0 : vector<8x32xf32>, vector<8x32xf32> -> vector<16x32xf32>
    %369 = vector.broadcast %209 : vector<1x32xf32> to vector<16x32xf32>
    %370 = arith.addf %368, %369 : vector<16x32xf32>
    %371 = arith.addf %195, %370 : vector<16x32xf32>
    %c0_130 = arith.constant 0 : index
    %c0_131 = arith.constant 0 : index
    %372 = vector.load %arg14[%c0_130, %c0_131] : memref<1x32xf32, #tpu.memory_space<vmem>>, vector<1x32xf32>
    %c0_132 = arith.constant 0 : index
    %c0_133 = arith.constant 0 : index
    %373 = vector.load %arg15[%c0_132, %c0_133] : memref<1x32xf32, #tpu.memory_space<vmem>>, vector<1x32xf32>
    %cst_134 = arith.constant dense<0.000000e+00> : vector<16xf32>
    %374 = vector.multi_reduction <add>, %371, %cst_134 [1] : vector<16x32xf32> to vector<16xf32>
    %375 = vector.shape_cast %374 : vector<16xf32> to vector<16x1xf32>
    %cst_135 = arith.constant 3.200000e+01 : f32
    %376 = vector.broadcast %cst_135 : f32 to vector<16x1xf32>
    %377 = arith.divf %375, %376 : vector<16x1xf32>
    %378 = vector.broadcast %377 : vector<16x1xf32> to vector<16x32xf32>
    %379 = arith.subf %371, %378 : vector<16x32xf32>
    %380 = arith.mulf %379, %379 : vector<16x32xf32>
    %cst_136 = arith.constant dense<0.000000e+00> : vector<16xf32>
    %381 = vector.multi_reduction <add>, %380, %cst_136 [1] : vector<16x32xf32> to vector<16xf32>
    %382 = vector.shape_cast %381 : vector<16xf32> to vector<16x1xf32>
    %cst_137 = arith.constant 3.200000e+01 : f32
    %383 = vector.broadcast %cst_137 : f32 to vector<16x1xf32>
    %384 = arith.divf %382, %383 : vector<16x1xf32>
    %cst_138 = arith.constant 9.99999974E-6 : f32
    %385 = vector.broadcast %cst_138 : f32 to vector<16x1xf32>
    %386 = arith.addf %384, %385 : vector<16x1xf32>
    %387 = math.rsqrt %386 : vector<16x1xf32>
    %388 = vector.broadcast %387 : vector<16x1xf32> to vector<16x32xf32>
    %389 = arith.mulf %379, %388 : vector<16x32xf32>
    %390 = vector.broadcast %372 : vector<1x32xf32> to vector<16x32xf32>
    %391 = arith.mulf %389, %390 : vector<16x32xf32>
    %392 = vector.broadcast %373 : vector<1x32xf32> to vector<16x32xf32>
    %393 = arith.addf %391, %392 : vector<16x32xf32>
    %c0_139 = arith.constant 0 : index
    %c0_140 = arith.constant 0 : index
    %394 = vector.load %arg16[%c0_139, %c0_140] : memref<32x64xf32, #tpu.memory_space<vmem>>, vector<32x64xf32>
    %cst_141 = arith.constant dense<0.000000e+00> : vector<16x64xf32>
    %395 = tpu.matmul %393, %394, %cst_141 {dimension_numbers = #tpu.dot_dimension_numbers<[1], [0], [0], [1], [0, 0, 1, 1], [], []>} : vector<16x32xf32>, vector<32x64xf32>, vector<16x64xf32> -> vector<16x64xf32>
    %c0_142 = arith.constant 0 : index
    %c0_143 = arith.constant 0 : index
    %396 = vector.load %arg17[%c0_142, %c0_143] : memref<1x64xf32, #tpu.memory_space<vmem>>, vector<1x64xf32>
    %397 = vector.broadcast %396 : vector<1x64xf32> to vector<16x64xf32>
    %398 = arith.addf %395, %397 : vector<16x64xf32>
    %cst_144 = arith.constant 0.000000e+00 : f32
    %399 = vector.broadcast %cst_144 : f32 to vector<16x64xf32>
    %400 = arith.maximumf %398, %399 : vector<16x64xf32>
    %c0_145 = arith.constant 0 : index
    %c0_146 = arith.constant 0 : index
    %401 = vector.load %arg18[%c0_145, %c0_146] : memref<64x32xf32, #tpu.memory_space<vmem>>, vector<64x32xf32>
    %cst_147 = arith.constant dense<0.000000e+00> : vector<16x32xf32>
    %402 = tpu.matmul %400, %401, %cst_147 {dimension_numbers = #tpu.dot_dimension_numbers<[1], [0], [0], [1], [0, 0, 1, 1], [], []>} : vector<16x64xf32>, vector<64x32xf32>, vector<16x32xf32> -> vector<16x32xf32>
    %c0_148 = arith.constant 0 : index
    %c0_149 = arith.constant 0 : index
    %403 = vector.load %arg19[%c0_148, %c0_149] : memref<1x32xf32, #tpu.memory_space<vmem>>, vector<1x32xf32>
    %404 = vector.broadcast %403 : vector<1x32xf32> to vector<16x32xf32>
    %405 = arith.addf %402, %404 : vector<16x32xf32>
    %406 = arith.addf %393, %405 : vector<16x32xf32>
    %c0_150 = arith.constant 0 : index
    %c0_151 = arith.constant 0 : index
    %407 = vector.load %arg20[%c0_150, %c0_151] : memref<1x32xf32, #tpu.memory_space<vmem>>, vector<1x32xf32>
    %c0_152 = arith.constant 0 : index
    %c0_153 = arith.constant 0 : index
    %408 = vector.load %arg21[%c0_152, %c0_153] : memref<1x32xf32, #tpu.memory_space<vmem>>, vector<1x32xf32>
    %cst_154 = arith.constant dense<0.000000e+00> : vector<16xf32>
    %409 = vector.multi_reduction <add>, %406, %cst_154 [1] : vector<16x32xf32> to vector<16xf32>
    %410 = vector.shape_cast %409 : vector<16xf32> to vector<16x1xf32>
    %cst_155 = arith.constant 3.200000e+01 : f32
    %411 = vector.broadcast %cst_155 : f32 to vector<16x1xf32>
    %412 = arith.divf %410, %411 : vector<16x1xf32>
    %413 = vector.broadcast %412 : vector<16x1xf32> to vector<16x32xf32>
    %414 = arith.subf %406, %413 : vector<16x32xf32>
    %415 = arith.mulf %414, %414 : vector<16x32xf32>
    %cst_156 = arith.constant dense<0.000000e+00> : vector<16xf32>
    %416 = vector.multi_reduction <add>, %415, %cst_156 [1] : vector<16x32xf32> to vector<16xf32>
    %417 = vector.shape_cast %416 : vector<16xf32> to vector<16x1xf32>
    %cst_157 = arith.constant 3.200000e+01 : f32
    %418 = vector.broadcast %cst_157 : f32 to vector<16x1xf32>
    %419 = arith.divf %417, %418 : vector<16x1xf32>
    %cst_158 = arith.constant 9.99999974E-6 : f32
    %420 = vector.broadcast %cst_158 : f32 to vector<16x1xf32>
    %421 = arith.addf %419, %420 : vector<16x1xf32>
    %422 = math.rsqrt %421 : vector<16x1xf32>
    %423 = vector.broadcast %422 : vector<16x1xf32> to vector<16x32xf32>
    %424 = arith.mulf %414, %423 : vector<16x32xf32>
    %425 = vector.broadcast %407 : vector<1x32xf32> to vector<16x32xf32>
    %426 = arith.mulf %424, %425 : vector<16x32xf32>
    %427 = vector.broadcast %408 : vector<1x32xf32> to vector<16x32xf32>
    %428 = arith.addf %426, %427 : vector<16x32xf32>
    %c0_159 = arith.constant 0 : index
    %c0_160 = arith.constant 0 : index
    %429 = vector.load %arg22[%c0_159, %c0_160] : memref<16x32xf32, #tpu.memory_space<vmem>>, vector<16x32xf32>
    tpu.vector_store %arg22[%c0_159, %c0_160], %428 {strides = array<i32>} : memref<16x32xf32, #tpu.memory_space<vmem>>, vector<16x32xf32>,
    return
  }
}

module attributes {stable_mosaic.version = 11 : i64} {
  func.func @kernel(%arg0: memref<16x32xf32, #tpu.memory_space<vmem>>, %arg1: memref<32x128xf32, #tpu.memory_space<vmem>>, %arg2: memref<1x128xf32, #tpu.memory_space<vmem>>, %arg3: memref<16x128xf32, #tpu.memory_space<vmem>>) attributes {dimension_semantics = [], scalar_prefetch = 0 : i64, scratch_operands = 0 : i64, tpu.core_type = #tpu.core_type<tc>} {
    %c0 = arith.constant 0 : index
    %c0_0 = arith.constant 0 : index
    %0 = vector.load %arg0[%c0, %c0_0] : memref<16x32xf32, #tpu.memory_space<vmem>>, vector<16x32xf32>
    %c0_1 = arith.constant 0 : index
    %c0_2 = arith.constant 0 : index
    %1 = vector.load %arg1[%c0_1, %c0_2] : memref<32x128xf32, #tpu.memory_space<vmem>>, vector<32x128xf32>
    %cst = arith.constant dense<0.000000e+00> : vector<16x128xf32>
    %2 = tpu.matmul %0, %1, %cst {dimension_numbers = #tpu.dot_dimension_numbers<[1], [0], [0], [1], [0, 0, 1, 1], [], []>} : vector<16x32xf32>, vector<32x128xf32>, vector<16x128xf32> -> vector<16x128xf32>
    %c0_3 = arith.constant 0 : index
    %c0_4 = arith.constant 0 : index
    %3 = vector.load %arg2[%c0_3, %c0_4] : memref<1x128xf32, #tpu.memory_space<vmem>>, vector<1x128xf32>
    %4 = vector.broadcast %3 : vector<1x128xf32> to vector<16x128xf32>
    %5 = arith.addf %2, %4 : vector<16x128xf32>
    %c0_5 = arith.constant 0 : index
    %c0_6 = arith.constant 0 : index
    %6 = vector.load %arg3[%c0_5, %c0_6] : memref<16x128xf32, #tpu.memory_space<vmem>>, vector<16x128xf32>
    tpu.vector_store %arg3[%c0_5, %c0_6], %5 {strides = array<i32>} : memref<16x128xf32, #tpu.memory_space<vmem>>, vector<16x128xf32>,
    return
  }
}

</mosaic_0001>

<bundles_post_ra>
// kernel: fwd.8
= control target key start
LH: loop header
LB: loop body
LE: loop exit
PB: predicated region body
PF: predicated region fallthrough
CT: control target
= control target key end

     0   :  { %vm63_vm0 = vcmask 261120   ;;  %vm204_vm1 = vcmask 130048   ;;  %s1213_s2 = inlined_call_operand.vmem [shape: f32[32,256], index: 2, kind: input, shape index: {}]   ;;  %s1214_s4 = inlined_call_operand.vmem [shape: f32[256,16], index: 4, kind: input, shape index: {}]   ;;  %s1215_s0 = inlined_call_operand.vmem [shape: f32[16,32], index: 0, kind: input, shape index: {}]   ;;  %s1216_s5 = inlined_call_operand.vmem [shape: f32[1,16], index: 5, kind: input, shape index: {}]   ;;  %s1217_s3 = inlined_call_operand.vmem [shape: f32[1,256], index: 3, kind: input, shape index: {}]   ;;  %s1218_s7 = inlined_call_operand.vmem [shape: f32[1,32], index: 7, kind: input, shape index: {}]   ;;  %s1219_s6 = inlined_call_operand.vmem [shape: f32[16,32], index: 6, kind: input, shape index: {}]   ;;  %s1220_s8 = inlined_call_operand.vmem [shape: f32[32,512], index: 8, kind: input, shape index: {}]   ;;  %s1221_s1 = inlined_call_operand.vmem [shape: f32[16,16], index: 1, kind: input, shape index: {}]   ;;  %s1222_s10 = inlined_call_operand.vmem [shape: f32[512,32], index: 10, kind: input, shape index: {}]   ;;  %s1223_s9 = inlined_call_operand.vmem [shape: f32[1,512], index: 9, kind: input, shape index: {}]   ;;  %s1224_s11 = inlined_call_operand.vmem [shape: f32[1,32], index: 11, kind: input, shape index: {}]   ;;  %s1225_s12 = inlined_call_operand.vmem [shape: f32[1,32], index: 12, kind: input, shape index: {}]   ;;  %s1226_s13 = inlined_call_operand.vmem [shape: f32[1,32], index: 13, kind: input, shape index: {}]   ;;  %s1227_s14 = inlined_call_operand.vmem [shape: f32[16,32], index: 14, kind: output, shape index: {}]  }
   0x1   :  { %v55_v0 = vld [vmem:[%s1213_s2 + $0x30] sm:$0xff]  ;;  %v53_v1 = vld [vmem:[%s1213_s2 + $0x20] sm:$0xff]  ;;  %v56_v2 = vld [vmem:[%s1213_s2 + $0x38] sm:$0xff] }
   0x2   :  { %82 = vmatpush.msra.mxu0 %v55_v0  ;;  %105 = vmatpush.msra.mxu1 %v56_v2  ;;  %v54_v3 = vld [vmem:[%s1213_s2 + $0x28] sm:$0xff]  ;;  %v51_v4 = vld [vmem:[%s1213_s2 + $0x10] sm:$0xff]  ;;  %v52_v5 = vld [vmem:[%s1213_s2 + $0x18] sm:$0xff] }
   0x3   :  { %v135_v6 = vld [vmem:[%s1214_s4 + $0x78] sm:$0xff]  ;;  %v134_v7 = vld [vmem:[%s1214_s4 + $0x70] sm:$0xff]  ;;  %v49_v8 = vld [vmem:[%s1213_s2] sm:$0xff] }
   0x4   :  { %83 = vmatpush.msra.mxu0 %v53_v1  ;;  %106 = vmatpush.msra.mxu1 %v54_v3  ;;  %v50_v9 = vld [vmem:[%s1213_s2 + $0x8] sm:$0xff]  ;;  %v151_v10 = vld [vmem:[%s1214_s4 + $0xf8] sm:$0xff]  ;;  %v47_v11 = vld [vmem:[%s1215_s0] sm:$0xff] }
   0x5   :  { %156 = vmatpush.msra.mxu2 %v135_v6  ;;  %179 = vmatpush.msra.mxu3 %v151_v10  ;;  %v133_v12 = vld [vmem:[%s1214_s4 + $0x68] sm:$0xff]  ;;  %v150_v13 = vld [vmem:[%s1214_s4 + $0xf0] sm:$0xff]  ;;  %v132_v14 = vld [vmem:[%s1214_s4 + $0x60] sm:$0xff] }
   0x6   :  { %84 = vmatpush.msra.mxu0 %v51_v4  ;;  %107 = vmatpush.msra.mxu1 %v52_v5  ;;  %v149_v15 = vld [vmem:[%s1214_s4 + $0xe8] sm:$0xff]  ;;  %v131_v16 = vld [vmem:[%s1214_s4 + $0x58] sm:$0xff]  ;;  %v148_v17 = vld [vmem:[%s1214_s4 + $0xe0] sm:$0xff] }
   0x7   :  { %157 = vmatpush.msra.mxu2 %v134_v7  ;;  %180 = vmatpush.msra.mxu3 %v150_v13  ;;  %v130_v18 = vld [vmem:[%s1214_s4 + $0x50] sm:$0xff]  ;;  %v147_v19 = vld [vmem:[%s1214_s4 + $0xd8] sm:$0xff]  ;;  %v48_v20 = vld [vmem:[%s1215_s0 + $0x8] sm:$0xff]  ;;  %v685_v7 = vmov 256.0  }
   0x8   :  { %85 = vmatpush.msra.mxu0 %v49_v8  ;;  %108 = vmatpush.msra.mxu1 %v50_v9  ;;  %v129_v21 = vld [vmem:[%s1214_s4 + $0x48] sm:$0xff]  ;;  %v146_v22 = vld [vmem:[%s1214_s4 + $0xd0] sm:$0xff]  ;;  %v128_v23 = vld [vmem:[%s1214_s4 + $0x40] sm:$0xff]  ;;  %675 = vrcp.f32 %v685_v7 }
   0x9   :  { %648 = vmatmul.msk.f32.vlgmr.msra.gmra.mxu0 %vm63_vm0, %v47_v11  ;;  %650 = vmatmul.msk.f32.vlgmr.msra.gmra.mxu1 %vm63_vm0, %v47_v11  ;;  %v145_v24 = vld [vmem:[%s1214_s4 + $0xc8] sm:$0xff]  ;;  %v127_v25 = vld [vmem:[%s1214_s4 + $0x38] sm:$0xff]  ;;  %v144_v26 = vld [vmem:[%s1214_s4 + $0xc0] sm:$0xff] }
   0xa   :  { %158 = vmatpush.msra.mxu2 %v133_v12  ;;  %181 = vmatpush.msra.mxu3 %v149_v15  ;;  %v126_v27 = vld [vmem:[%s1214_s4 + $0x30] sm:$0xff]  ;;  %v143_v28 = vld [vmem:[%s1214_s4 + $0xb8] sm:$0xff]  ;;  %v125_v29 = vld [vmem:[%s1214_s4 + $0x28] sm:$0xff] }
   0xb   :  { %v142_v30 = vld [vmem:[%s1214_s4 + $0xb0] sm:$0xff]  ;;  %v124_v31 = vld [vmem:[%s1214_s4 + $0x20] sm:$0xff]  ;;  %v141_v32 = vld [vmem:[%s1214_s4 + $0xa8] sm:$0xff] }
   0xc   :  { %159 = vmatpush.msra.mxu2 %v132_v14  ;;  %182 = vmatpush.msra.mxu3 %v148_v17  ;;  %v123_v33 = vld [vmem:[%s1214_s4 + $0x18] sm:$0xff]  ;;  %v140_v34 = vld [vmem:[%s1214_s4 + $0xa0] sm:$0xff]  ;;  %v122_v35 = vld [vmem:[%s1214_s4 + $0x10] sm:$0xff] }
   0xd   :  { %v139_v36 = vld [vmem:[%s1214_s4 + $0x98] sm:$0xff]  ;;  %v121_v37 = vld [vmem:[%s1214_s4 + $0x8] sm:$0xff]  ;;  %v138_v38 = vld [vmem:[%s1214_s4 + $0x90] sm:$0xff] }
   0xe   :  { %160 = vmatpush.msra.mxu2 %v131_v16  ;;  %183 = vmatpush.msra.mxu3 %v147_v19  ;;  %v120_v39 = vld [vmem:[%s1214_s4] sm:$0xff]  ;;  %v137_v40 = vld [vmem:[%s1214_s4 + $0x88] sm:$0xff]  ;;  %v676_v8 = vpop.eup %675  ;;  %v444_v7 = vld [vmem:[%s1222_s10 + $0xd8] sm:$0xff] }
   0xf   :  { %v136_v41 = vld [vmem:[%s1214_s4 + $0x80] sm:$0xff]  ;;  %v218_v9 = vmul.f32 256.0, %v676_v8  ;;  %vm222_vm2 = vweird.f32 %v676_v8 }
  0x10   :  { %161 = vmatpush.msra.mxu2 %v130_v18  ;;  %184 = vmatpush.msra.mxu3 %v146_v22  ;;  %v57_v42 = vld [vmem:[%s1217_s3] sm:$0x3] }
  0x11   :  { %649 = vmatmul.msk.f32.gmra.mxu0 %vm63_vm0, %v48_v20  ;;  %651 = vmatmul.msk.f32.gmra.mxu1 %vm63_vm0, %v48_v20  ;;  %v59_v43 = vperm.slane %v57_v42, 0  ;;  %v60_v44 = vperm.slane %v57_v42, 1  ;;  %v670_v57 = vld [vmem:[%s1216_s5] ss:$0 sm:$0xff]  ;;  %v219_v10 = vsub.f32 1.0, %v218_v9  ;;  %v243_v42 = vld [vmem:[%s1221_s1 + $0x8] sm:$0xff] }
  0x12   :  { %162 = vmatpush.msra.mxu2 %v129_v21  ;;  %185 = vmatpush.msra.mxu3 %v145_v24  ;;  %v249_v21 = vld [vmem:[%s1219_s6 + $0x8] sm:$0xff]  ;;  %v248_v22 = vld [vmem:[%s1219_s6] sm:$0xff]  ;;  %v427_v9 = vld [vmem:[%s1222_s10 + $0x50] sm:$0xff] }
  0x13   :  { %v220_v14 = vmul.f32 %v676_v8, %v219_v10  ;;  %274 = vmatpush.msrb.mxu0 %v249_v21  ;;  %v464_v10 = vld [vmem:[%s1222_s10 + $0x178] sm:$0xff] }
  0x14   :  { %163 = vmatpush.msra.mxu2 %v128_v23  ;;  %186 = vmatpush.msra.mxu3 %v144_v26 }
  0x15   :  { %v221_v17 = vadd.f32 %v676_v8, %v220_v14  ;;  %275 = vmatpush.msrb.mxu0 %v248_v22  ;;  %v463_v14 = vld [vmem:[%s1222_s10 + $0x170] sm:$0xff]  ;;  %v441_v22 = vld [vmem:[%s1222_s10 + $0xc0] sm:$0xff] }
  0x16   :  { %164 = vmatpush.msra.mxu2 %v127_v25  ;;  %187 = vmatpush.msra.mxu3 %v143_v28 }
  0x17   :  { %v223_v20 = vsel %vm222_vm2, %v676_v8, %v221_v17  ;;  %v478_v8 = vld [vmem:[%s1222_s10 + $0x1e8] sm:$0xff]  ;;  %v476_v17 = vld [vmem:[%s1222_s10 + $0x1d8] sm:$0xff] }
  0x18   :  { %165 = vmatpush.msra.mxu2 %v126_v27  ;;  %188 = vmatpush.msra.mxu3 %v142_v30 }
  0x1a   :  { %166 = vmatpush.msra.mxu2 %v125_v29  ;;  %189 = vmatpush.msra.mxu3 %v141_v32  ;;  %v293_v32 = vld [vmem:[%s1220_s8 + $0x40] sm:$0xff] }
  0x1c   :  { %167 = vmatpush.msra.mxu2 %v124_v31  ;;  %190 = vmatpush.msra.mxu3 %v140_v34  ;;  %v297_v31 = vld [vmem:[%s1220_s8 + $0x60] sm:$0xff]  ;;  %v298_v34 = vld [vmem:[%s1220_s8 + $0x68] sm:$0xff] }
  0x1d   :  { %329 = vmatpush.msrb.mxu1 %v297_v31  ;;  %352 = vmatpush.msra.mxu0 %v298_v34  ;;  %v422_v31 = vld [vmem:[%s1222_s10 + $0x28] sm:$0xff]  ;;  %v421_v34 = vld [vmem:[%s1222_s10 + $0x20] sm:$0xff] }
  0x1e   :  { %168 = vmatpush.msra.mxu2 %v123_v33  ;;  %191 = vmatpush.msra.mxu3 %v139_v36  ;;  %v300_v33 = vld [vmem:[%s1220_s8 + $0x78] sm:$0xff]  ;;  %v289_v36 = vld [vmem:[%s1220_s8 + $0x20] sm:$0xff] }
  0x1f   :  { %330 = vmatpush.msrb.mxu1 %v293_v32  ;;  %v473_v32 = vld [vmem:[%s1222_s10 + $0x1c0] sm:$0xff] }
  0x20   :  { %169 = vmatpush.msra.mxu2 %v122_v35  ;;  %192 = vmatpush.msra.mxu3 %v138_v38  ;;  %v296_v35 = vld [vmem:[%s1220_s8 + $0x58] sm:$0xff] }
  0x21   :  { %331 = vmatpush.msrb.mxu1 %v289_v36  ;;  %v472_v36 = vld [vmem:[%s1222_s10 + $0x1b8] sm:$0xff] }
  0x22   :  { %170 = vmatpush.msra.mxu2 %v121_v37  ;;  %193 = vmatpush.msra.mxu3 %v137_v40  ;;  %v242_v37 = vld [vmem:[%s1221_s1] sm:$0xff] }
  0x23   :  { %v244_v38 = vmul.f32 0.05, %v242_v37  ;;  %v420_v37 = vld [vmem:[%s1222_s10 + $0x18] sm:$0xff] }
  0x24   :  { %171 = vmatpush.msra.mxu2 %v120_v39  ;;  %194 = vmatpush.msra.mxu3 %v136_v41 }
  0x26   :  { %398 = vmatpush.msrb.mxu2 %v300_v33  ;;  %v438_v33 = vld [vmem:[%s1222_s10 + $0xa8] sm:$0xff] }
  0x28   :  { %399 = vmatpush.msrb.mxu2 %v296_v35  ;;  %v437_v35 = vld [vmem:[%s1222_s10 + $0xa0] sm:$0xff] }
  0x86   :  { %v87_v45 = vpop.f32.mrf.mxu0  ;;  %v110_v46 = vpop.f32.mrf.mxu1 }
  0x87   :  { %v88_v47 = vadd.f32 %v87_v45, %v59_v43  ;;  %v111_v48 = vadd.f32 %v110_v46, %v60_v44  ;;  %v294_v46 = vld [vmem:[%s1220_s8 + $0x48] sm:$0xff] }
  0x88   :  { %353 = vmatpush.msra.mxu0 %v294_v46  ;;  %v458_v46 = vld [vmem:[%s1222_s10 + $0x148] sm:$0xff] }
  0x89   :  { %v116_v49 = vmax.f32 %v88_v47, 0.0  ;;  %v117_v50 = vmax.f32 %v111_v48, 0.0  ;;  %v290_v47 = vld [vmem:[%s1220_s8 + $0x28] sm:$0xff]  ;;  %v292_v48 = vld [vmem:[%s1220_s8 + $0x38] sm:$0xff] }
  0x8a   :  { %354 = vmatpush.msra.mxu0 %v290_v47  ;;  %400 = vmatpush.msrb.mxu2 %v292_v48  ;;  %v469_v47 = vld [vmem:[%s1222_s10 + $0x1a0] sm:$0xff] }
  0x8b   :  { %172 = vmatmul.f32.vlgmr.msra.gmra.mxu2 %v116_v49  ;;  %195 = vmatmul.f32.vlgmr.msra.gmra.mxu3 %v117_v50  ;;  %v285_v49 = vld [vmem:[%s1220_s8] sm:$0xff]  ;;  %v286_v50 = vld [vmem:[%s1220_s8 + $0x8] sm:$0xff] }
  0x8c   :  { %332 = vmatpush.msrb.mxu1 %v285_v49  ;;  %355 = vmatpush.msra.mxu0 %v286_v50  ;;  %v417_v48 = vld [vmem:[%s1222_s10] sm:$0xff] }
  0x8d   :  { %v433_v49 = vld [vmem:[%s1222_s10 + $0x80] sm:$0xff] }
  0x8e   :  { %v90_v51 = vpop.f32.mrf.mxu0  ;;  %v113_v52 = vpop.f32.mrf.mxu1  ;;  %v457_v50 = vld [vmem:[%s1222_s10 + $0x140] sm:$0xff] }
  0x8f   :  { %v91_v53 = vadd.f32 %v90_v51, %v59_v43  ;;  %v114_v54 = vadd.f32 %v113_v52, %v60_v44  ;;  %v245_v44 = vmul.f32 0.05, %v243_v42  ;;  %v288_v51 = vld [vmem:[%s1220_s8 + $0x18] sm:$0xff]  ;;  %v299_v52 = vld [vmem:[%s1220_s8 + $0x70] sm:$0xff] }
  0x90   :  { %401 = vmatpush.msrb.mxu2 %v288_v51  ;;  %375 = vmatpush.msra.mxu1 %v299_v52  ;;  %v459_v42 = vld [vmem:[%s1222_s10 + $0x150] sm:$0xff]  ;;  %v468_v51 = vld [vmem:[%s1222_s10 + $0x198] sm:$0xff] }
  0x91   :  { %v118_v55 = vmax.f32 %v91_v53, 0.0  ;;  %v119_v56 = vmax.f32 %v114_v54, 0.0  ;;  %v295_v53 = vld [vmem:[%s1220_s8 + $0x50] sm:$0xff]  ;;  %v456_v52 = vld [vmem:[%s1222_s10 + $0x138] sm:$0xff] }
  0x92   :  { %376 = vmatpush.msra.mxu1 %v295_v53  ;;  %v291_v54 = vld [vmem:[%s1220_s8 + $0x30] sm:$0xff] }
  0x93   :  { %175 = vmatmul.f32.gmra.mxu2 %v118_v55  ;;  %198 = vmatmul.f32.gmra.mxu3 %v119_v56  ;;  %v287_v55 = vld [vmem:[%s1220_s8 + $0x10] sm:$0xff]  ;;  %v671_v56 = vld [vmem:[%s1218_s7] ss:$0 sm:$0xff] }
  0x94   :  { %377 = vmatpush.msra.mxu1 %v291_v54  ;;  %v467_v53 = vld [vmem:[%s1222_s10 + $0x190] sm:$0xff] }
  0x95   :  { %v455_v54 = vld [vmem:[%s1222_s10 + $0x130] sm:$0xff] }
  0x96   :  { %378 = vmatpush.msra.mxu1 %v287_v55  ;;  %v466_v55 = vld [vmem:[%s1222_s10 + $0x188] sm:$0xff] }
 0x10e   :  { %v173_v58 = vpop.f32.mrf.mxu2  ;;  %v196_v59 = vpop.f32.mrf.mxu3 }
 0x10f   :  { %v174_v60 = vadd.f32 %v670_v57, %v173_v58  ;;  %v448_v58 = vld [vmem:[%s1222_s10 + $0xf8] sm:$0xff] }
 0x111   :  { %v898_v61 = vadd.f32 %v196_v59, %v174_v60  ;;  %v431_v59 = vld [vmem:[%s1222_s10 + $0x70] sm:$0xff] }
 0x112   :  { %v447_v60 = vld [vmem:[%s1222_s10 + $0xf0] sm:$0xff] }
 0x113   :  { %v202_v1 = vmul.f32 %v898_v61, %v898_v61 }
 0x115   :  { %v205_v4 = vsel %vm204_vm1, %v202_v1, 0.0  ;;  %v479_v1 = vld [vmem:[%s1222_s10 + $0x1f0] sm:$0xff] }
 0x116   :  { %v176_v62 = vpop.f32.mrf.mxu2  ;;  %v199_v63 = vpop.f32.mrf.mxu3 }
 0x117   :  { %v177_v0 = vadd.f32 %v670_v57, %v176_v62  ;;  %v432_v57 = vld [vmem:[%s1222_s10 + $0x78] sm:$0xff]  ;;  %v446_v62 = vld [vmem:[%s1222_s10 + $0xe8] sm:$0xff] }
 0x118   :  { %485 = vmatpush.msrb.mxu3 %v432_v57  ;;  %v465_v57 = vld [vmem:[%s1222_s10 + $0x180] sm:$0xff] }
 0x119   :  { %v902_v2 = vadd.f32 %v199_v63, %v177_v0  ;;  %v480_v63 = vld [vmem:[%s1222_s10 + $0x1f8] sm:$0xff] }
 0x11a   :  { %486 = vmatpush.msrb.mxu3 %v431_v59  ;;  %554 = vmatpush.msra.mxu2 %v480_v63  ;;  %v452_v59 = vld [vmem:[%s1222_s10 + $0x118] sm:$0xff]  ;;  %v301_v63 = vld [vmem:[%s1223_s9] sm:$0xf] }
 0x11b   :  { %v203_v3 = vmul.f32 %v902_v2, %v902_v2 }
 0x11c   :  { %555 = vmatpush.msra.mxu2 %v479_v1  ;;  %v304_v1 = vperm.slane %v301_v63, 1 }
 0x11d   :  { %v206_v5 = vsel %vm204_vm1, %v203_v3, 0.0  ;;  %v429_v3 = vld [vmem:[%s1222_s10 + $0x60] sm:$0xff] }
 0x11e   :  { %v207_v6 = vadd.f32 %v206_v5, %v205_v4  ;;  %v445_v4 = vld [vmem:[%s1222_s10 + $0xe0] sm:$0xff]  ;;  %556 = vmatpush.msra.mxu2 %v478_v8 }
 0x120   :  { %208 = vadd.xlane.f32.xlu0 %v207_v6  ;;  %v428_v6 = vld [vmem:[%s1222_s10 + $0x58] sm:$0xff] }
 0x193   :  { %v209_v11 = vpop.xlane.xlu0 %208 }
 0x194   :  { %v210_v12 = vrot.slane %v209_v11, 4 }
 0x196   :  { %v211_v13 = vadd.f32 %v210_v12, %v209_v11  ;;  %v443_v11 = vld [vmem:[%s1222_s10 + $0xd0] sm:$0xff]  ;;  %v477_v12 = vld [vmem:[%s1222_s10 + $0x1e0] sm:$0xff] }
 0x197   :  { %557 = vmatpush.msra.mxu2 %v477_v12 }
 0x198   :  { %v212_v15 = vrot.slane %v211_v13, 2 }
 0x199   :  { %558 = vmatpush.msra.mxu2 %v476_v17 }
 0x19a   :  { %v213_v16 = vadd.f32 %v212_v15, %v211_v13  ;;  %v426_v13 = vld [vmem:[%s1222_s10 + $0x48] sm:$0xff] }
 0x19c   :  { %v214_v18 = vrot.slane %v213_v16, 1 }
 0x19e   :  { %v215_v19 = vadd.f32 %v214_v18, %v213_v16  ;;  %v442_v16 = vld [vmem:[%s1222_s10 + $0xc8] sm:$0xff] }
 0x1a0   :  { %662 = vpush %v215_v19  ;;  %v425_v19 = vld [vmem:[%s1222_s10 + $0x40] sm:$0xff] }
 0x1a1   :  { %664 = vpush %v223_v20  ;;  %v462_v20 = vld [vmem:[%s1222_s10 + $0x168] sm:$0xff] }
 0x1d1   :  { %s663_s15 = spop %662 }
 0x1d2   :  { %s665_s16 = spop %664 }
 0x1d3   :  { %s225_s17 = smul.f32 %s665_s16, %s663_s15 }
 0x1d5   :  { %s226_s18 = smul.f32 2.0, %s225_s17 }
 0x1d7   :  { %v227_v23 = vstv %s226_s18 }
 0x1d8   :  { %677 = vrsqrt.f32 %v227_v23  ;;  %vm234_vm4 = vweird.f32 %v227_v23 }
 0x1de   :  { %v678_v24 = vpop.eup %677 }
 0x1df   :  { %v229_v25 = vmul.f32 %v678_v24, %v227_v23  ;;  %vm235_vm3 = vweird.f32 %v678_v24  ;;  %v424_v23 = vld [vmem:[%s1222_s10 + $0x38] sm:$0xff] }
 0x1e0   :  { %vm236_vm5 = vmor %vm234_vm4, %vm235_vm3 }
 0x1e1   :  { %v230_v26 = vmul.f32 %v678_v24, %v229_v25  ;;  %v440_v25 = vld [vmem:[%s1222_s10 + $0xb8] sm:$0xff] }
 0x1e3   :  { %v231_v27 = vmul.f32 0.5, %v230_v26  ;;  %v461_v26 = vld [vmem:[%s1222_s10 + $0x160] sm:$0xff] }
 0x1e5   :  { %v232_v28 = vsub.f32 1.5, %v231_v27  ;;  %v423_v27 = vld [vmem:[%s1222_s10 + $0x30] sm:$0xff] }
 0x1e7   :  { %v233_v29 = vmul.f32 %v678_v24, %v232_v28  ;;  %v474_v28 = vld [vmem:[%s1222_s10 + $0x1c8] sm:$0xff] }
 0x1e9   :  { %v237_v30 = vsel %vm236_vm5, %v678_v24, %v233_v29  ;;  %v475_v24 = vld [vmem:[%s1222_s10 + $0x1d0] sm:$0xff] }
 0x1ea   :  { %666 = vpush %v237_v30  ;;  %559 = vmatpush.msra.mxu2 %v475_v24  ;;  %v439_v29 = vld [vmem:[%s1222_s10 + $0xb0] sm:$0xff]  ;;  %v460_v30 = vld [vmem:[%s1222_s10 + $0x158] sm:$0xff] }
 0x1ec   :  { %560 = vmatpush.msra.mxu2 %v474_v28 }
 0x1ee   :  { %561 = vmatpush.msra.mxu2 %v473_v32 }
 0x1f0   :  { %562 = vmatpush.msra.mxu2 %v472_v36 }
 0x21b   :  { %s667_s5 = spop %666 }
 0x21c   :  { %v239_v39 = vstv %s667_s5 }
 0x21d   :  { %v240_v40 = vmul.f32 %v239_v39, %v898_v61  ;;  %v241_v43 = vmul.f32 %v239_v39, %v902_v2  ;;  %v430_v61 = vld [vmem:[%s1222_s10 + $0x68] sm:$0xff]  ;;  %v471_v39 = vld [vmem:[%s1222_s10 + $0x1b0] sm:$0xff] }
 0x21e   :  { %487 = vmatpush.msrb.mxu3 %v430_v61  ;;  %563 = vmatpush.msra.mxu2 %v471_v39  ;;  %v450_v61 = vld [vmem:[%s1222_s10 + $0x108] sm:$0xff] }
 0x21f   :  { %v246_v41 = vadd.f32 %v244_v38, %v240_v40  ;;  %v247_v45 = vadd.f32 %v245_v44, %v241_v43  ;;  %v436_v38 = vld [vmem:[%s1222_s10 + $0x98] sm:$0xff]  ;;  %v419_v40 = vld [vmem:[%s1222_s10 + $0x10] sm:$0xff]  ;;  %v470_v43 = vld [vmem:[%s1222_s10 + $0x1a8] sm:$0xff] }
 0x220   :  { %488 = vmatpush.msrb.mxu3 %v429_v3  ;;  %564 = vmatpush.msra.mxu2 %v470_v43  ;;  %v418_v44 = vld [vmem:[%s1222_s10 + $0x8] sm:$0xff] }
 0x221   :  { %652 = vmatmul.msk.f32.vlgmr.msrb.gmra.mxu0 %vm204_vm1, %v246_v41  ;;  %v435_v41 = vld [vmem:[%s1222_s10 + $0x90] sm:$0xff] }
 0x222   :  { %508 = vmatpush.msrb.mxu0 %v448_v58  ;;  %489 = vmatpush.msrb.mxu3 %v428_v6  ;;  %v453_v58 = vld [vmem:[%s1222_s10 + $0x120] sm:$0xff] }
 0x223   :  { %565 = vmatpush.msra.mxu2 %v469_v47 }
 0x224   :  { %509 = vmatpush.msrb.mxu0 %v447_v60  ;;  %490 = vmatpush.msrb.mxu3 %v427_v9  ;;  %v451_v60 = vld [vmem:[%s1222_s10 + $0x110] sm:$0xff]  ;;  %v306_v9 = vperm.slane %v301_v63, 3 }
 0x225   :  { %566 = vmatpush.msra.mxu2 %v468_v51  ;;  %v686_v51 = vmov 32.0  }
 0x226   :  { %510 = vmatpush.msrb.mxu0 %v446_v62  ;;  %491 = vmatpush.msrb.mxu3 %v426_v13  ;;  %v449_v62 = vld [vmem:[%s1222_s10 + $0x100] sm:$0xff]  ;;  %679 = vrcp.f32 %v686_v51 }
 0x227   :  { %567 = vmatpush.msra.mxu2 %v467_v53 }
 0x228   :  { %511 = vmatpush.msrb.mxu0 %v445_v4  ;;  %492 = vmatpush.msrb.mxu3 %v425_v19  ;;  %v305_v19 = vperm.slane %v301_v63, 2 }
 0x229   :  { %653 = vmatmul.msk.f32.gmra.mxu0 %vm204_vm1, %v247_v45  ;;  %v434_v45 = vld [vmem:[%s1222_s10 + $0x88] sm:$0xff]  ;;  %568 = vmatpush.msra.mxu2 %v466_v55 }
 0x22a   :  { %512 = vmatpush.msrb.mxu0 %v444_v7  ;;  %493 = vmatpush.msrb.mxu3 %v424_v23 }
 0x22b   :  { %569 = vmatpush.msra.mxu2 %v465_v57 }
 0x22c   :  { %513 = vmatpush.msrb.mxu0 %v443_v11  ;;  %494 = vmatpush.msrb.mxu3 %v423_v27 }
 0x22e   :  { %514 = vmatpush.msrb.mxu0 %v442_v16  ;;  %495 = vmatpush.msrb.mxu3 %v422_v31  ;;  %v672_v31 = vld [vmem:[%s1224_s11] ss:$0 sm:$0xff] }
 0x230   :  { %515 = vmatpush.msrb.mxu0 %v441_v22  ;;  %496 = vmatpush.msrb.mxu3 %v421_v34 }
 0x232   :  { %516 = vmatpush.msrb.mxu0 %v440_v25  ;;  %497 = vmatpush.msrb.mxu3 %v420_v37 }
 0x234   :  { %517 = vmatpush.msrb.mxu0 %v439_v29  ;;  %498 = vmatpush.msrb.mxu3 %v419_v40 }
 0x236   :  { %518 = vmatpush.msrb.mxu0 %v438_v33  ;;  %499 = vmatpush.msrb.mxu3 %v418_v44 }
 0x238   :  { %519 = vmatpush.msrb.mxu0 %v437_v35  ;;  %500 = vmatpush.msrb.mxu3 %v417_v48 }
 0x23a   :  { %520 = vmatpush.msrb.mxu0 %v436_v38 }
 0x23c   :  { %521 = vmatpush.msrb.mxu0 %v435_v41 }
 0x23e   :  { %522 = vmatpush.msrb.mxu0 %v434_v45 }
 0x240   :  { %523 = vmatpush.msrb.mxu0 %v433_v49 }
 0x29e   :  { %v277_v0 = vpop.f32.mrf.mxu0 }
 0x29f   :  { %v278_v2 = vadd.f32 %v671_v56, %v277_v0  ;;  %v303_v0 = vperm.slane %v301_v63, 0 }
 0x2a1   :  { %v1005_v5 = vmax.f32 %v278_v2, 0.0 }
 0x2a3   :  { %654 = vmatmul.msk.f32.vlgmr.msrb.gmra.mxu1 %vm63_vm0, %v1005_v5  ;;  %656 = vmatmul.msk.f32.vlgmr.msra.gmra.mxu0 %vm63_vm0, %v1005_v5 }
 0x2a4   :  { %660 = vmatmul.msk.f32.vlgmr.msrb.gmra.mxu2 %vm63_vm0, %v1005_v5  ;;  %531 = vmatpush.msrb.mxu1 %v464_v10 }
 0x2a6   :  { %v280_v15 = vpop.f32.mrf.mxu0  ;;  %532 = vmatpush.msrb.mxu1 %v463_v14 }
 0x2a7   :  { %v281_v18 = vadd.f32 %v671_v56, %v280_v15  ;;  %v454_v56 = vld [vmem:[%s1222_s10 + $0x128] sm:$0xff] }
 0x2a8   :  { %533 = vmatpush.msrb.mxu1 %v462_v20 }
 0x2a9   :  { %v1052_v21 = vmax.f32 %v281_v18, 0.0 }
 0x2aa   :  { %534 = vmatpush.msrb.mxu1 %v461_v26 }
 0x2ab   :  { %655 = vmatmul.msk.f32.gmra.mxu1 %vm63_vm0, %v1052_v21  ;;  %657 = vmatmul.msk.f32.gmra.mxu0 %vm63_vm0, %v1052_v21 }
 0x2ac   :  { %661 = vmatmul.msk.f32.gmra.mxu2 %vm63_vm0, %v1052_v21  ;;  %535 = vmatpush.msrb.mxu1 %v460_v30 }
 0x2ae   :  { %536 = vmatpush.msrb.mxu1 %v459_v42 }
 0x2b0   :  { %537 = vmatpush.msrb.mxu1 %v458_v46 }
 0x2b2   :  { %538 = vmatpush.msrb.mxu1 %v457_v50 }
 0x2b3   :  { %658 = vmatmul.msk.f32.vlgmr.msra.gmra.mxu1 %vm63_vm0, %v1005_v5 }
 0x2b4   :  { %539 = vmatpush.msrb.mxu1 %v456_v52  ;;  %v680_v52 = vpop.eup %679 }
 0x2b5   :  { %v588_v53 = vmul.f32 32.0, %v680_v52  ;;  %vm592_vm6 = vweird.f32 %v680_v52 }
 0x2b6   :  { %540 = vmatpush.msrb.mxu1 %v455_v54 }
 0x2b7   :  { %v589_v54 = vsub.f32 1.0, %v588_v53 }
 0x2b8   :  { %541 = vmatpush.msrb.mxu1 %v454_v56 }
 0x2ba   :  { %542 = vmatpush.msrb.mxu1 %v453_v58 }
 0x2bb   :  { %659 = vmatmul.msk.f32.gmra.mxu1 %vm63_vm0, %v1052_v21 }
 0x2bc   :  { %543 = vmatpush.msrb.mxu1 %v452_v59 }
 0x2be   :  { %544 = vmatpush.msrb.mxu1 %v451_v60 }
 0x2c0   :  { %545 = vmatpush.msrb.mxu1 %v450_v61 }
 0x2c2   :  { %546 = vmatpush.msrb.mxu1 %v449_v62 }
 0x320   :  { %v334_v2 = vpop.f32.mrf.mxu1  ;;  %v357_v3 = vpop.f32.mrf.mxu0 }
 0x321   :  { %v335_v4 = vadd.f32 %v334_v2, %v303_v0  ;;  %v358_v6 = vadd.f32 %v357_v3, %v304_v1 }
 0x323   :  { %v409_v7 = vmax.f32 %v335_v4, 0.0  ;;  %v410_v8 = vmax.f32 %v358_v6, 0.0 }
 0x325   :  { %501 = vmatmul.f32.vlgmr.msrb.gmra.mxu3 %v409_v7  ;;  %524 = vmatmul.f32.vlgmr.msrb.gmra.mxu0 %v410_v8 }
 0x327   :  { %v403_v10 = vpop.f32.mrf.mxu2 }
 0x328   :  { %v404_v11 = vadd.f32 %v403_v10, %v306_v9  ;;  %v337_v12 = vpop.f32.mrf.mxu1  ;;  %v360_v13 = vpop.f32.mrf.mxu0 }
 0x329   :  { %v338_v14 = vadd.f32 %v337_v12, %v303_v0  ;;  %v361_v15 = vadd.f32 %v360_v13, %v304_v1 }
 0x32a   :  { %v412_v16 = vmax.f32 %v404_v11, 0.0 }
 0x32b   :  { %v413_v17 = vmax.f32 %v338_v14, 0.0  ;;  %v414_v18 = vmax.f32 %v361_v15, 0.0 }
 0x32c   :  { %570 = vmatmul.f32.vlgmr.msra.gmra.mxu2 %v412_v16 }
 0x32d   :  { %504 = vmatmul.f32.gmra.mxu3 %v413_v17  ;;  %527 = vmatmul.f32.gmra.mxu0 %v414_v18  ;;  %v673_v17 = vld [vmem:[%s1225_s12] ss:$0 sm:$0xff] }
 0x32f   :  { %v406_v20 = vpop.f32.mrf.mxu2 }
 0x330   :  { %v407_v22 = vadd.f32 %v406_v20, %v306_v9  ;;  %v380_v23 = vpop.f32.mrf.mxu1  ;;  %v674_v20 = vld [vmem:[%s1226_s13] ss:$0 sm:$0xff] }
 0x331   :  { %v381_v24 = vadd.f32 %v380_v23, %v305_v19 }
 0x332   :  { %v416_v25 = vmax.f32 %v407_v22, 0.0 }
 0x333   :  { %v411_v26 = vmax.f32 %v381_v24, 0.0 }
 0x334   :  { %573 = vmatmul.f32.gmra.mxu2 %v416_v25 }
 0x335   :  { %547 = vmatmul.f32.vlgmr.msrb.gmra.mxu1 %v411_v26 }
 0x338   :  { %v383_v27 = vpop.f32.mrf.mxu1 }
 0x339   :  { %v384_v28 = vadd.f32 %v383_v27, %v305_v19 }
 0x33b   :  { %v415_v29 = vmax.f32 %v384_v28, 0.0 }
 0x33d   :  { %550 = vmatmul.f32.gmra.mxu1 %v415_v29 }
 0x3a2   :  { %v525_v33 = vpop.f32.mrf.mxu0 }
 0x3a8   :  { %v502_v30 = vpop.f32.mrf.mxu3 }
 0x3a9   :  { %v503_v32 = vadd.f32 %v672_v31, %v502_v30 }
 0x3aa   :  { %v528_v42 = vpop.f32.mrf.mxu0 }
 0x3ab   :  { %v526_v35 = vadd.f32 %v525_v33, %v503_v32 }
 0x3af   :  { %v571_v34 = vpop.f32.mrf.mxu2 }
 0x3b0   :  { %v505_v36 = vpop.f32.mrf.mxu3 }
 0x3b1   :  { %v506_v39 = vadd.f32 %v672_v31, %v505_v36 }
 0x3b2   :  { %v548_v37 = vpop.f32.mrf.mxu1 }
 0x3b3   :  { %v549_v38 = vadd.f32 %v548_v37, %v526_v35  ;;  %v529_v43 = vadd.f32 %v528_v42, %v506_v39 }
 0x3b5   :  { %v572_v40 = vadd.f32 %v571_v34, %v549_v38 }
 0x3b7   :  { %v577_v41 = vadd.f32 %v572_v40, %v1005_v5  ;;  %v574_v47 = vpop.f32.mrf.mxu2  ;;  %v590_v5 = vmul.f32 %v680_v52, %v589_v54 }
 0x3b9   :  { %v581_v44 = vsel %vm63_vm0, %v577_v41, 0.0  ;;  %v591_v55 = vadd.f32 %v680_v52, %v590_v5 }
 0x3ba   :  { %v551_v45 = vpop.f32.mrf.mxu1  ;;  %582 = vadd.xlane.f32.xlu0 %v581_v44 }
 0x3bb   :  { %v552_v46 = vadd.f32 %v551_v45, %v529_v43  ;;  %v593_v56 = vsel %vm592_vm6, %v680_v52, %v591_v55 }
 0x3bd   :  { %v575_v48 = vadd.f32 %v574_v47, %v552_v46 }
 0x3bf   :  { %v578_v49 = vadd.f32 %v575_v48, %v1052_v21 }
 0x3c1   :  { %v584_v50 = vsel %vm63_vm0, %v578_v49, 0.0 }
 0x3c2   :  { %585 = vadd.xlane.f32.xlu1 %v584_v50 }
 0x42d   :  { %v583_v57 = vpop.xlane.xlu0 %582 }
 0x42e   :  { %v594_v58 = vmul.f32 %v593_v56, %v583_v57 }
 0x430   :  { %v596_v59 = vsub.f32 %v577_v41, %v594_v58 }
 0x432   :  { %v598_v60 = vmul.f32 %v596_v59, %v596_v59 }
 0x434   :  { %v600_v61 = vsel %vm63_vm0, %v598_v60, 0.0 }
 0x435   :  { %v586_v62 = vpop.xlane.xlu1 %585  ;;  %601 = vadd.xlane.f32.xlu1 %v600_v61 }
 0x436   :  { %v595_v21 = vmul.f32 %v593_v56, %v586_v62 }
 0x438   :  { %v597_v63 = vsub.f32 %v578_v49, %v595_v21 }
 0x43a   :  { %v599_v0 = vmul.f32 %v597_v63, %v597_v63 }
 0x43c   :  { %v603_v1 = vsel %vm63_vm0, %v599_v0, 0.0 }
 0x43d   :  { %604 = vadd.xlane.f32.xlu2 %v603_v1 }
 0x4a8   :  { %v602_v2 = vpop.xlane.xlu1 %601 }
 0x4a9   :  { %v606_v3 = vmul.f32 %v602_v2, %v593_v56 }
 0x4ab   :  { %v608_v4 = vadd.f32 1e-05, %v606_v3 }
 0x4ad   :  { %681 = vrsqrt.f32 %v608_v4  ;;  %vm616_vm8 = vweird.f32 %v608_v4 }
 0x4b0   :  { %v605_v6 = vpop.xlane.xlu2 %604 }
 0x4b1   :  { %v607_v7 = vmul.f32 %v605_v6, %v593_v56 }
 0x4b3   :  { %v682_v8 = vpop.eup %681  ;;  %v609_v9 = vadd.f32 1e-05, %v607_v7 }
 0x4b4   :  { %v611_v10 = vmul.f32 %v682_v8, %v608_v4  ;;  %vm617_vm7 = vweird.f32 %v682_v8 }
 0x4b5   :  { %683 = vrsqrt.f32 %v609_v9  ;;  %vm618_vm9 = vmor %vm616_vm8, %vm617_vm7  ;;  %vm626_vm11 = vweird.f32 %v609_v9 }
 0x4b6   :  { %v612_v11 = vmul.f32 %v682_v8, %v611_v10 }
 0x4b8   :  { %v613_v12 = vmul.f32 0.5, %v612_v11 }
 0x4ba   :  { %v614_v13 = vsub.f32 1.5, %v613_v12 }
 0x4bb   :  { %v684_v14 = vpop.eup %683 }
 0x4bc   :  { %v615_v15 = vmul.f32 %v682_v8, %v614_v13  ;;  %v621_v16 = vmul.f32 %v684_v14, %v609_v9  ;;  %vm627_vm10 = vweird.f32 %v684_v14 }
 0x4bd   :  { %vm628_vm12 = vmor %vm626_vm11, %vm627_vm10 }
 0x4be   :  { %v619_v18 = vsel %vm618_vm9, %v682_v8, %v615_v15  ;;  %v622_v19 = vmul.f32 %v684_v14, %v621_v16 }
 0x4bf   :  { %v630_v22 = vmul.f32 %v619_v18, %v596_v59 }
 0x4c0   :  { %v623_v23 = vmul.f32 0.5, %v622_v19 }
 0x4c1   :  { %v635_v24 = vmul.f32 %v673_v17, %v630_v22 }
 0x4c2   :  { %v624_v25 = vsub.f32 1.5, %v623_v23 }
 0x4c3   :  { %v640_v26 = vadd.f32 %v674_v20, %v635_v24 }
 0x4c4   :  { %v625_v27 = vmul.f32 %v684_v14, %v624_v25 }
 0x4c5   :  { %642 = vst.msk [vmem:[%s1227_s14] sm:$0xff] %vm63_vm0, %v640_v26 }
 0x4c6   :  { %v629_v28 = vsel %vm628_vm12, %v684_v14, %v625_v27 }
 0x4c7   :  { %v631_v29 = vmul.f32 %v629_v28, %v597_v63 }
 0x4c9   :  { %v636_v30 = vmul.f32 %v673_v17, %v631_v29 }
 0x4cb   :  { %v641_v31 = vadd.f32 %v674_v20, %v636_v30 }
 0x4cd   :  { %643 = vst.msk [vmem:[%s1227_s14 + $0x8] sm:$0xff] %vm63_vm0, %v641_v31 }

// kernel: fwd.6
= control target key start
LH: loop header
LB: loop body
LE: loop exit
PB: predicated region body
PF: predicated region fallthrough
CT: control target
= control target key end

     0   :  { %vm54_vm0 = vcmask 261120   ;;  %s1124_s20 = smov 96   ;;  %s1125_s21 = smov 88   ;;  %vm92_vm1 = vcmask 64512   ;;  %vm925_vm6 = vcmask 523264   ;;  %s1467_s1 = inlined_call_operand.vmem [shape: f32[32,96], index: 1, kind: input, shape index: {}]   ;;  %s1468_s2 = inlined_call_operand.vmem [shape: f32[1,96], index: 2, kind: input, shape index: {}]   ;;  %s1469_s0 = inlined_call_operand.vmem [shape: f32[16,32], index: 0, kind: input, shape index: {}]   ;;  %s1470_s3 = inlined_call_operand.vmem [shape: f32[32,32], index: 3, kind: input, shape index: {}]   ;;  %s1471_s4 = inlined_call_operand.vmem [shape: f32[1,32], index: 4, kind: input, shape index: {}]   ;;  %s1472_s5 = inlined_call_operand.vmem [shape: f32[1,32], index: 5, kind: input, shape index: {}]   ;;  %s1473_s6 = inlined_call_operand.vmem [shape: f32[1,32], index: 6, kind: input, shape index: {}]   ;;  %s1474_s8 = inlined_call_operand.vmem [shape: f32[1,64], index: 8, kind: input, shape index: {}]   ;;  %s1475_s7 = inlined_call_operand.vmem [shape: f32[32,64], index: 7, kind: input, shape index: {}]   ;;  %s1476_s10 = inlined_call_operand.vmem [shape: f32[1,32], index: 10, kind: input, shape index: {}]   ;;  %s1477_s9 = inlined_call_operand.vmem [shape: f32[64,32], index: 9, kind: input, shape index: {}]   ;;  %s1478_s11 = inlined_call_operand.vmem [shape: f32[1,32], index: 11, kind: input, shape index: {}]   ;;  %s1479_s12 = inlined_call_operand.vmem [shape: f32[1,32], index: 12, kind: input, shape index: {}]   ;;  %s1480_s13 = inlined_call_operand.vmem [shape: f32[16,32], index: 13, kind: output, shape index: {}]  }
   0x1   :  { %v49_v0 = vld [vmem:[%s1467_s1 + $0x18] sm:$0xff]  ;;  %v48_v1 = vld [vmem:[%s1467_s1 + $0x10] sm:$0xff]  ;;  %v47_v2 = vld [vmem:[%s1467_s1 + $0x8] sm:$0xff]  ;;  %s1128_s24 = smov 64   ;;  %s1129_s25 = smov 56  }
   0x2   :  { %73 = vmatpush.msra.mxu0 %v49_v0  ;;  %1057 = vmatpush.msra.mxu2 %v49_v0  ;;  %v46_v3 = vld [vmem:[%s1467_s1] sm:$0xff]  ;;  %s1123_s1 = smov 120   ;;  %v1237_v8 = vld [vmem:[%s1469_s0 + $0x8] sm:$0xff]  ;;  %s1130_s26 = smov 80   ;;  %v86_v44 = vld [vmem:[%s1470_s3 + $0x10] sm:$0xff] }
   0x3   :  { %v1220_v4 = vld [vmem:[%s1469_s0] sm:$0xff]  ;;  %s1126_s0 = smov 112   ;;  %v85_v41 = vld [vmem:[%s1470_s3 + $0x8] sm:$0xff]  ;;  %s1131_s16 = smov 48  }
   0x4   :  { %74 = vmatpush.msra.mxu0 %v48_v1  ;;  %1058 = vmatpush.msra.mxu2 %v48_v1  ;;  %v1073_v5 = vld [vmem:[%s1468_s2] ss:$0 sm:$0xff]  ;;  %s1127_s2 = smov 72   ;;  %s1132_s17 = smov 104  }
   0x5   :  { %v84_v40 = vld [vmem:[%s1470_s3] sm:$0xff]  ;;  %s1133_s18 = smov 40  }
   0x6   :  { %75 = vmatpush.msra.mxu0 %v47_v2  ;;  %1059 = vmatpush.msra.mxu2 %v47_v2 }
   0x8   :  { %76 = vmatpush.msra.mxu0 %v46_v3  ;;  %1060 = vmatpush.msra.mxu2 %v46_v3 }
   0x9   :  { %1019 = vmatmul.msk.f32.vlgmr.msra.gmra.mxu0 %vm54_vm0, %v1220_v4  ;;  %1020 = vmatmul.msk.f32.vlgmr.msra.gmra.mxu2 %vm54_vm0, %v1237_v8 }
  0x86   :  { %v78_v6 = vpop.f32.mrf.mxu0 }
  0x87   :  { %v1227_v7 = vadd.f32 %v1073_v5, %v78_v6 }
  0x89   :  { %155 = vrot.lane.b32.xlu1 %v1227_v7, %s1123_s1  ;;  %90 = vrot.lane.b32.xlu0 %v1227_v7, %s1124_s20 }
  0x8c   :  { %v81_v18 = vpop.f32.mrf.mxu2 }
  0x8d   :  { %v1250_v19 = vadd.f32 %v1073_v5, %v81_v18 }
  0x91   :  { %157 = vrot.lane.b32.xlu0 %v1227_v7, %s1125_s21 }
  0xfb   :  { %v91_v9 = vpop.permute.xlu0 %90  ;;  %v156_v11 = vpop.permute.xlu1 %155 }
  0xfc   :  { %1021 = vmatpush.xpose.msk.msra.mxu1 %vm92_vm1, %v91_v9 }
  0xff   :  { %1022 = vmatmul.msk.f32.vlgmr.msra.gmra.mxu1 %vm92_vm1, %v1227_v7 }
 0x100   :  { %239 = vmatpush.msrb.mxu1 %v85_v41 }
 0x103   :  { %v158_v10 = vpop.permute.xlu0 %157 }
 0x104   :  { %1024 = vmatpush.xpose.msk.msra.mxu3 %vm92_vm1, %v158_v10 }
 0x107   :  { %1025 = vmatmul.msk.f32.vlgmr.msra.gmra.mxu3 %vm92_vm1, %v156_v11 }
 0x108   :  { %262 = vmatpush.msrb.mxu3 %v84_v40 }
 0x10a   :  { %351 = vmatpush.msra.mxu3 %v86_v44 }
 0x17c   :  { %v114_v12 = vpop.f32.mrf.mxu1 }
 0x17d   :  { %v117_v13 = vmul.f32 0.35355338, %v114_v12 }
 0x17f   :  { %v118_v14 = vsel %vm92_vm1, %v117_v13, -inf }
 0x180   :  { %119 = vmax.xlane.f32.xlu1 %v118_v14 }
 0x18a   :  { %v180_v15 = vpop.f32.mrf.mxu3 }
 0x18b   :  { %v183_v16 = vmul.f32 0.35355338, %v180_v15 }
 0x18d   :  { %v184_v17 = vsel %vm92_vm1, %v183_v16, -inf }
 0x18e   :  { %185 = vmax.xlane.f32.xlu2 %v184_v17 }
 0x199   :  { %267 = vrot.lane.b32.xlu1 %v1227_v7, %s1126_s0 }
 0x1a1   :  { %448 = vrot.lane.b32.xlu1 %v1250_v19, %s1124_s20 }
 0x1a9   :  { %359 = vrot.lane.b32.xlu1 %v1227_v7, %s1127_s2 }
 0x1f3   :  { %v120_v20 = vpop.xlane.xlu1 %119 }
 0x1f4   :  { %v121_v21 = vsub.f32 %v117_v13, %v120_v20 }
 0x1f6   :  { %v122_v22 = vmul.f32 1.442695, %v121_v21 }
 0x1f8   :  { %1081 = vpow2.f32 %v122_v22 }
 0x1fe   :  { %v1082_v23 = vpop.eup %1081 }
 0x1ff   :  { %v124_v24 = vsel %vm92_vm1, %v1082_v23, 0.0 }
 0x200   :  { %125 = vadd.xlane.f32.xlu2 %v124_v24 }
 0x201   :  { %v186_v25 = vpop.xlane.xlu2 %185 }
 0x202   :  { %v187_v26 = vsub.f32 %v183_v16, %v186_v25 }
 0x204   :  { %v188_v27 = vmul.f32 1.442695, %v187_v26 }
 0x206   :  { %1083 = vpow2.f32 %v188_v27 }
 0x20b   :  { %v268_v39 = vpop.permute.xlu1 %267 }
 0x20c   :  { %v1084_v28 = vpop.eup %1083 }
 0x20d   :  { %v190_v29 = vsel %vm92_vm1, %v1084_v28, 0.0 }
 0x20e   :  { %191 = vadd.xlane.f32.xlu0 %v190_v29 }
 0x213   :  { %v449_v45 = vpop.permute.xlu1 %448 }
 0x218   :  { %129 = vrot.lane.b32.xlu2 %v1227_v7, %s1128_s24 }
 0x21b   :  { %v360_v59 = vpop.permute.xlu1 %359 }
 0x220   :  { %195 = vrot.lane.b32.xlu2 %v1227_v7, %s1129_s25 }
 0x228   :  { %269 = vrot.lane.b32.xlu2 %v1227_v7, %s1130_s26 }
 0x273   :  { %v126_v30 = vpop.xlane.xlu2 %125 }
 0x274   :  { %1085 = vrcp.f32 %v126_v30 }
 0x27a   :  { %v1086_v31 = vpop.eup %1085 }
 0x27b   :  { %v130_v32 = vpop.permute.xlu2 %129  ;;  %v128_v33 = vmul.f32 %v1086_v31, %v1082_v23 }
 0x27c   :  { %150 = vmatpush.msrb.mxu2 %v130_v32  ;;  %v1327_v32 = vld [vmem:[%s1470_s3 + $0x18] sm:$0xff] }
 0x27d   :  { %1023 = vmatmul.msk.f32.vlgmr.msrb.gmra.mxu2 %vm92_vm1, %v128_v33 }
 0x281   :  { %v192_v34 = vpop.xlane.xlu0 %191 }
 0x282   :  { %1087 = vrcp.f32 %v192_v34 }
 0x283   :  { %v196_v35 = vpop.permute.xlu2 %195 }
 0x284   :  { %216 = vmatpush.msra.mxu2 %v196_v35 }
 0x288   :  { %v1088_v36 = vpop.eup %1087 }
 0x289   :  { %v194_v37 = vmul.f32 %v1088_v36, %v1084_v28 }
 0x28b   :  { %1026 = vmatmul.msk.f32.vlgmr.msra.gmra.mxu2 %vm92_vm1, %v194_v37  ;;  %v270_v38 = vpop.permute.xlu2 %269 }
 0x28c   :  { %1029 = vmatpush.xpose.msk.msrb.mxu2 %vm92_vm1, %v270_v38 }
 0x293   :  { %1030 = vmatmul.msk.f32.vlgmr.msrb.gmra.mxu2 %vm92_vm1, %v268_v39 }
 0x300   :  { %v152_v42 = vpop.f32.mrf.mxu2 }
 0x301   :  { %1028 = vmatmul.msk.f32.vlgmr.msrb.gmra.mxu3 %vm92_vm1, %v152_v42 }
 0x302   :  { %1037 = vmatpush.xpose.msk.msrb.mxu3 %vm92_vm1, %v449_v45 }
 0x30e   :  { %v218_v43 = vpop.f32.mrf.mxu2 }
 0x30f   :  { %1027 = vmatmul.msk.f32.vlgmr.msrb.gmra.mxu1 %vm92_vm1, %v218_v43 }
 0x316   :  { %v292_v46 = vpop.f32.mrf.mxu2 }
 0x317   :  { %v295_v47 = vmul.f32 0.35355338, %v292_v46 }
 0x319   :  { %v296_v48 = vsel %vm92_vm1, %v295_v47, -inf }
 0x31a   :  { %297 = vmax.xlane.f32.xlu2 %v296_v48 }
 0x332   :  { %486 = vrot.lane.b32.xlu2 %v1250_v19, %s1128_s24 }
 0x384   :  { %v1298_v2 = vpop.f32.mrf.mxu3 }
 0x38c   :  { %v1290_v61 = vpop.f32.mrf.mxu1 }
 0x38d   :  { %v298_v49 = vpop.xlane.xlu2 %297 }
 0x38e   :  { %v299_v50 = vsub.f32 %v295_v47, %v298_v49 }
 0x390   :  { %v300_v51 = vmul.f32 1.442695, %v299_v50 }
 0x392   :  { %1089 = vpow2.f32 %v300_v51 }
 0x395   :  { %v487_v52 = vpop.permute.xlu2 %486 }
 0x396   :  { %507 = vmatpush.msrb.mxu0 %v487_v52 }
 0x398   :  { %619 = vmatpush.msra.mxu0 %v84_v40  ;;  %v1090_v53 = vpop.eup %1089 }
 0x399   :  { %v302_v54 = vsel %vm92_vm1, %v1090_v53, 0.0 }
 0x39a   :  { %303 = vadd.xlane.f32.xlu0 %v302_v54 }
 0x3ae   :  { %307 = vrot.lane.b32.xlu0 %v1227_v7, %s1131_s16 }
 0x3b6   :  { %357 = vrot.lane.b32.xlu0 %v1227_v7, %s1132_s17 }
 0x40d   :  { %v304_v55 = vpop.xlane.xlu0 %303 }
 0x40e   :  { %1091 = vrcp.f32 %v304_v55 }
 0x414   :  { %v1092_v56 = vpop.eup %1091 }
 0x415   :  { %v306_v57 = vmul.f32 %v1092_v56, %v1090_v53  ;;  %v265_v56 = vadd.f32 %v1298_v2, %v1290_v61 }
 0x420   :  { %v308_v58 = vpop.permute.xlu0 %307 }
 0x421   :  { %328 = vmatpush.msra.mxu1 %v308_v58 }
 0x422   :  { %1031 = vmatmul.msk.f32.vlgmr.msra.gmra.mxu1 %vm92_vm1, %v306_v57 }
 0x423   :  { %1033 = vmatpush.xpose.msk.msrb.mxu1 %vm92_vm1, %v360_v59 }
 0x427   :  { %441 = vmatpush.msra.mxu1 %v1327_v32 }
 0x428   :  { %v358_v60 = vpop.permute.xlu0 %357 }
 0x42a   :  { %1034 = vmatmul.msk.f32.vlgmr.msrb.gmra.mxu1 %vm92_vm1, %v358_v60  ;;  %v1350_v60 = vld [vmem:[%s1471_s4] ss:$0 sm:$0xff] }
 0x49f   :  { %v330_v62 = vpop.f32.mrf.mxu1 }
 0x4a0   :  { %1032 = vmatmul.msk.f32.vlgmr.msra.gmra.mxu3 %vm92_vm1, %v330_v62 }
 0x4a1   :  { %596 = vmatpush.msra.mxu3 %v85_v41 }
 0x4a7   :  { %v382_v63 = vpop.f32.mrf.mxu1 }
 0x4a8   :  { %v385_v0 = vmul.f32 0.35355338, %v382_v63  ;;  %1038 = vmatmul.msk.f32.vlgmr.msrb.gmra.mxu3 %vm92_vm1, %v1250_v19 }
 0x4a9   :  { %708 = vmatpush.msrb.mxu3 %v86_v44 }
 0x4aa   :  { %v386_v1 = vsel %vm92_vm1, %v385_v0, -inf }
 0x4ab   :  { %387 = vmax.xlane.f32.xlu2 %v386_v1 }
 0x4c3   :  { %626 = vrot.lane.b32.xlu2 %v1250_v19, %s1130_s26 }
 0x51e   :  { %v388_v3 = vpop.xlane.xlu2 %387 }
 0x51f   :  { %v389_v6 = vsub.f32 %v385_v0, %v388_v3 }
 0x521   :  { %v390_v9 = vmul.f32 1.442695, %v389_v6 }
 0x523   :  { %v1300_v5 = vpop.f32.mrf.mxu3  ;;  %1093 = vpow2.f32 %v390_v9 }
 0x524   :  { %v356_v58 = vadd.f32 %v1300_v5, %v265_v56  ;;  %v917_v56 = vld [vmem:[%s1477_s9 + $0x20] sm:$0xff] }
 0x526   :  { %v627_v29 = vpop.permute.xlu2 %626 }
 0x529   :  { %v1094_v13 = vpop.eup %1093 }
 0x52a   :  { %v392_v14 = vsel %vm92_vm1, %v1094_v13, 0.0 }
 0x52b   :  { %v471_v10 = vpop.f32.mrf.mxu3 }
 0x52c   :  { %v474_v11 = vmul.f32 0.35355338, %v471_v10 }
 0x52e   :  { %v475_v12 = vsel %vm92_vm1, %v474_v11, -inf }
 0x52f   :  { %476 = vmax.xlane.f32.xlu1 %v475_v12 }
 0x537   :  { %393 = vadd.xlane.f32.xlu1 %v392_v14 }
 0x550   :  { %514 = vrot.lane.b32.xlu1 %v1250_v19, %s1125_s21 }
 0x558   :  { %716 = vrot.lane.b32.xlu1 %v1250_v19, %s1127_s2 }
 0x5a2   :  { %v477_v15 = vpop.xlane.xlu1 %476 }
 0x5a3   :  { %v478_v16 = vsub.f32 %v474_v11, %v477_v15  ;;  %v1134_v15 = vmov 32.0  }
 0x5a5   :  { %v479_v17 = vmul.f32 1.442695, %v478_v16 }
 0x5a7   :  { %1095 = vpow2.f32 %v479_v17 }
 0x5aa   :  { %v394_v21 = vpop.xlane.xlu1 %393 }
 0x5ad   :  { %v1096_v18 = vpop.eup %1095 }
 0x5ae   :  { %v481_v20 = vsel %vm92_vm1, %v1096_v18, 0.0 }
 0x5af   :  { %482 = vadd.xlane.f32.xlu0 %v481_v20 }
 0x5c2   :  { %v515_v22 = vpop.permute.xlu1 %514 }
 0x5c3   :  { %397 = vrot.lane.b32.xlu0 %v1227_v7, %s1133_s18 }
 0x5ca   :  { %v717_v26 = vpop.permute.xlu1 %716 }
 0x5cb   :  { %512 = vrot.lane.b32.xlu0 %v1250_v19, %s1123_s1 }
 0x5d3   :  { %624 = vrot.lane.b32.xlu0 %v1250_v19, %s1126_s0 }
 0x5db   :  { %714 = vrot.lane.b32.xlu0 %v1250_v19, %s1132_s17 }
 0x622   :  { %v483_v23 = vpop.xlane.xlu0 %482 }
 0x623   :  { %1097 = vrcp.f32 %v483_v23 }
 0x624   :  { %1099 = vrcp.f32 %v394_v21 }
 0x629   :  { %v1098_v24 = vpop.eup %1097 }
 0x62a   :  { %v485_v25 = vmul.f32 %v1098_v24, %v1096_v18  ;;  %v1100_v7 = vpop.eup %1099 }
 0x62b   :  { %v396_v27 = vmul.f32 %v1100_v7, %v1094_v13 }
 0x62c   :  { %1039 = vmatmul.msk.f32.vlgmr.msrb.gmra.mxu0 %vm92_vm1, %v485_v25 }
 0x62d   :  { %1049 = vmatpush.xpose.msk.msrb.mxu0 %vm92_vm1, %v717_v26 }
 0x635   :  { %v398_v28 = vpop.permute.xlu0 %397 }
 0x636   :  { %418 = vmatpush.msra.mxu2 %v398_v28 }
 0x637   :  { %1035 = vmatmul.msk.f32.vlgmr.msra.gmra.mxu2 %vm92_vm1, %v396_v27 }
 0x638   :  { %1040 = vmatpush.xpose.msk.msrb.mxu2 %vm92_vm1, %v515_v22 }
 0x63c   :  { %1045 = vmatpush.xpose.msk.msra.mxu2 %vm92_vm1, %v627_v29 }
 0x63d   :  { %v513_v30 = vpop.permute.xlu0 %512 }
 0x63f   :  { %1041 = vmatmul.msk.f32.vlgmr.msrb.gmra.mxu2 %vm92_vm1, %v513_v30 }
 0x645   :  { %v625_v31 = vpop.permute.xlu0 %624 }
 0x647   :  { %1046 = vmatmul.msk.f32.vlgmr.msra.gmra.mxu2 %vm92_vm1, %v625_v31 }
 0x64d   :  { %v715_v34 = vpop.permute.xlu0 %714 }
 0x6a9   :  { %v509_v33 = vpop.f32.mrf.mxu0 }
 0x6aa   :  { %1044 = vmatmul.msk.f32.vlgmr.msra.gmra.mxu0 %vm92_vm1, %v509_v33  ;;  %v876_v33 = vld [vmem:[%s1475_s7 + $0x10] sm:$0xff] }
 0x6b2   :  { %1050 = vmatmul.msk.f32.vlgmr.msrb.gmra.mxu0 %vm92_vm1, %v715_v34  ;;  %v875_v34 = vld [vmem:[%s1475_s7 + $0x8] sm:$0xff] }
 0x6ba   :  { %v420_v35 = vpop.f32.mrf.mxu2 }
 0x6bb   :  { %1036 = vmatmul.msk.f32.vlgmr.msra.gmra.mxu1 %vm92_vm1, %v420_v35  ;;  %v874_v35 = vld [vmem:[%s1475_s7] sm:$0xff] }
 0x6c2   :  { %v537_v36 = vpop.f32.mrf.mxu2 }
 0x6c3   :  { %v540_v37 = vmul.f32 0.35355338, %v537_v36 }
 0x6c5   :  { %v541_v38 = vsel %vm92_vm1, %v540_v37, -inf }
 0x6c6   :  { %542 = vmax.xlane.f32.xlu1 %v541_v38 }
 0x6ca   :  { %v649_v39 = vpop.f32.mrf.mxu2 }
 0x6cb   :  { %v652_v40 = vmul.f32 0.35355338, %v649_v39 }
 0x6cd   :  { %v653_v41 = vsel %vm92_vm1, %v652_v40, -inf }
 0x6ce   :  { %654 = vmax.xlane.f32.xlu0 %v653_v41 }
 0x727   :  { %v1335_v42 = vpop.f32.mrf.mxu0 }
 0x72f   :  { %v739_v43 = vpop.f32.mrf.mxu0 }
 0x730   :  { %v742_v44 = vmul.f32 0.35355338, %v739_v43 }
 0x732   :  { %v743_v45 = vsel %vm92_vm1, %v742_v44, -inf }
 0x733   :  { %744 = vmax.xlane.f32.xlu2 %v743_v45 }
 0x738   :  { %v443_v57 = vpop.f32.mrf.mxu1 }
 0x739   :  { %v543_v46 = vpop.xlane.xlu1 %542  ;;  %v446_v59 = vadd.f32 %v443_v57, %v356_v58  ;;  %v916_v57 = vld [vmem:[%s1477_s9 + $0x18] sm:$0xff]  ;;  %v915_v58 = vld [vmem:[%s1477_s9 + $0x10] sm:$0xff] }
 0x73a   :  { %v544_v47 = vsub.f32 %v540_v37, %v543_v46  ;;  %v1384_v46 = vld [vmem:[%s1472_s5] ss:$0 sm:$0xff] }
 0x73b   :  { %v807_v62 = vadd.f32 %v1350_v60, %v446_v59  ;;  %v914_v59 = vld [vmem:[%s1477_s9 + $0x8] sm:$0xff] }
 0x73c   :  { %v545_v48 = vmul.f32 1.442695, %v544_v47 }
 0x73d   :  { %v809_v63 = vadd.f32 %v807_v62, %v1220_v4  ;;  %v913_v62 = vld [vmem:[%s1477_s9] sm:$0xff] }
 0x73e   :  { %1101 = vpow2.f32 %v545_v48 }
 0x73f   :  { %v813_v0 = vsel %vm54_vm0, %v809_v63, 0.0 }
 0x741   :  { %v655_v49 = vpop.xlane.xlu0 %654 }
 0x742   :  { %v656_v50 = vsub.f32 %v652_v40, %v655_v49  ;;  %v1389_v49 = vld [vmem:[%s1473_s6] ss:$0 sm:$0xff] }
 0x744   :  { %v1102_v51 = vpop.eup %1101  ;;  %v657_v52 = vmul.f32 1.442695, %v656_v50 }
 0x745   :  { %v547_v53 = vsel %vm92_vm1, %v1102_v51, 0.0 }
 0x746   :  { %1103 = vpow2.f32 %v657_v52  ;;  %548 = vadd.xlane.f32.xlu1 %v547_v53  ;;  %v920_v53 = vld [vmem:[%s1477_s9 + $0x38] sm:$0xff] }
 0x747   :  { %940 = vmatpush.msra.mxu0 %v920_v53 }
 0x74c   :  { %v1104_v54 = vpop.eup %1103 }
 0x74d   :  { %v659_v55 = vsel %vm92_vm1, %v1104_v54, 0.0 }
 0x74e   :  { %660 = vadd.xlane.f32.xlu0 %v659_v55  ;;  %v918_v55 = vld [vmem:[%s1477_s9 + $0x28] sm:$0xff] }
 0x75f   :  { %552 = vrot.lane.b32.xlu1 %v1250_v19, %s1129_s25 }
 0x762   :  { %664 = vrot.lane.b32.xlu0 %v1250_v19, %s1131_s16 }
 0x789   :  { %814 = vadd.xlane.f32.xlu1 %v813_v0 }
 0x7a6   :  { %v745_v1 = vpop.xlane.xlu2 %744 }
 0x7a7   :  { %v746_v3 = vsub.f32 %v742_v44, %v745_v1  ;;  %v1422_v1 = vld [vmem:[%s1474_s8] ss:$0 sm:$0xff] }
 0x7a9   :  { %v747_v6 = vmul.f32 1.442695, %v746_v3 }
 0x7ab   :  { %1105 = vpow2.f32 %v747_v6 }
 0x7b1   :  { %v1106_v61 = vpop.eup %1105 }
 0x7b2   :  { %v749_v2 = vsel %vm92_vm1, %v1106_v61, 0.0 }
 0x7b3   :  { %750 = vadd.xlane.f32.xlu2 %v749_v2 }
 0x7b9   :  { %v549_v5 = vpop.xlane.xlu1 %548 }
 0x7ba   :  { %1107 = vrcp.f32 %v549_v5 }
 0x7c0   :  { %v1108_v10 = vpop.eup %1107 }
 0x7c1   :  { %v661_v9 = vpop.xlane.xlu0 %660  ;;  %v551_v4 = vmul.f32 %v1108_v10, %v1102_v51 }
 0x7c2   :  { %1109 = vrcp.f32 %v661_v9 }
 0x7c3   :  { %1111 = vrcp.f32 %v1134_v15 }
 0x7c8   :  { %v1110_v13 = vpop.eup %1109 }
 0x7c9   :  { %v663_v14 = vmul.f32 %v1110_v13, %v1104_v54  ;;  %v1112_v16 = vpop.eup %1111  ;;  %v919_v54 = vld [vmem:[%s1477_s9 + $0x30] sm:$0xff]  ;;  %v1433_v13 = vld [vmem:[%s1476_s10] ss:$0 sm:$0xff] }
 0x7ca   :  { %vm824_vm2 = vweird.f32 %v1112_v16  ;;  %941 = vmatpush.msra.mxu0 %v919_v54 }
 0x7cb   :  { %754 = vrot.lane.b32.xlu2 %v1250_v19, %s1133_s18  ;;  %v820_v19 = vmul.f32 32.0, %v1112_v16 }
 0x7cc   :  { %942 = vmatpush.msra.mxu0 %v918_v55 }
 0x7cd   :  { %v821_v17 = vsub.f32 1.0, %v820_v19 }
 0x7ce   :  { %943 = vmatpush.msra.mxu0 %v917_v56 }
 0x7cf   :  { %v822_v18 = vmul.f32 %v1112_v16, %v821_v17 }
 0x7d0   :  { %944 = vmatpush.msra.mxu0 %v916_v57 }
 0x7d1   :  { %v553_v11 = vpop.permute.xlu1 %552  ;;  %v823_v20 = vadd.f32 %v1112_v16, %v822_v18 }
 0x7d2   :  { %573 = vmatpush.msrb.mxu1 %v553_v11  ;;  %945 = vmatpush.msra.mxu0 %v915_v58 }
 0x7d3   :  { %1042 = vmatmul.msk.f32.vlgmr.msrb.gmra.mxu1 %vm92_vm1, %v551_v4  ;;  %v1361_v21 = vsel %vm824_vm2, %v1112_v16, %v823_v20 }
 0x7d4   :  { %v665_v12 = vpop.permute.xlu0 %664  ;;  %946 = vmatpush.msra.mxu0 %v914_v59 }
 0x7d5   :  { %685 = vmatpush.msra.mxu1 %v665_v12 }
 0x7d6   :  { %947 = vmatpush.msra.mxu0 %v913_v62 }
 0x7d7   :  { %798 = vmatpush.msrb.mxu1 %v1327_v32  ;;  %v877_v32 = vld [vmem:[%s1475_s7 + $0x18] sm:$0xff] }
 0x7db   :  { %1047 = vmatmul.msk.f32.vlgmr.msra.gmra.mxu1 %vm92_vm1, %v663_v14 }
 0x7fc   :  { %v815_v22 = vpop.xlane.xlu1 %814 }
 0x7fd   :  { %v826_v23 = vmul.f32 %v1361_v21, %v815_v22 }
 0x7ff   :  { %v828_v24 = vsub.f32 %v809_v63, %v826_v23 }
 0x801   :  { %v830_v25 = vmul.f32 %v828_v24, %v828_v24 }
 0x803   :  { %v832_v26 = vsel %vm54_vm0, %v830_v25, 0.0 }
 0x804   :  { %833 = vadd.xlane.f32.xlu2 %v832_v26 }
 0x826   :  { %v751_v7 = vpop.xlane.xlu2 %750 }
 0x827   :  { %1113 = vrcp.f32 %v751_v7 }
 0x82d   :  { %v1114_v27 = vpop.eup %1113 }
 0x82e   :  { %v753_v28 = vmul.f32 %v1114_v27, %v1106_v61  ;;  %v755_v29 = vpop.permute.xlu2 %754 }
 0x82f   :  { %775 = vmatpush.msrb.mxu2 %v755_v29 }
 0x830   :  { %1051 = vmatmul.msk.f32.vlgmr.msrb.gmra.mxu2 %vm92_vm1, %v753_v28 }
 0x850   :  { %v575_v30 = vpop.f32.mrf.mxu1 }
 0x851   :  { %1043 = vmatmul.msk.f32.vlgmr.msra.gmra.mxu3 %vm92_vm1, %v575_v30 }
 0x852   :  { %900 = vmatpush.msra.mxu3 %v877_v32 }
 0x854   :  { %901 = vmatpush.msra.mxu3 %v876_v33 }
 0x856   :  { %902 = vmatpush.msra.mxu3 %v875_v34 }
 0x858   :  { %v687_v31 = vpop.f32.mrf.mxu1  ;;  %903 = vmatpush.msra.mxu3 %v874_v35 }
 0x859   :  { %1048 = vmatmul.msk.f32.vlgmr.msrb.gmra.mxu3 %vm92_vm1, %v687_v31 }
 0x877   :  { %v834_v36 = vpop.xlane.xlu2 %833 }
 0x878   :  { %v838_v37 = vmul.f32 %v834_v36, %v1361_v21 }
 0x87a   :  { %v840_v38 = vadd.f32 1e-05, %v838_v37 }
 0x87c   :  { %1115 = vrsqrt.f32 %v840_v38  ;;  %vm848_vm4 = vweird.f32 %v840_v38 }
 0x882   :  { %v1116_v39 = vpop.eup %1115 }
 0x883   :  { %v843_v40 = vmul.f32 %v1116_v39, %v840_v38  ;;  %vm849_vm3 = vweird.f32 %v1116_v39 }
 0x884   :  { %vm850_vm5 = vmor %vm848_vm4, %vm849_vm3 }
 0x885   :  { %v844_v41 = vmul.f32 %v1116_v39, %v843_v40 }
 0x887   :  { %v845_v43 = vmul.f32 0.5, %v844_v41 }
 0x889   :  { %v846_v44 = vsub.f32 1.5, %v845_v43 }
 0x88b   :  { %v847_v45 = vmul.f32 %v1116_v39, %v846_v44 }
 0x88d   :  { %v851_v47 = vsel %vm850_vm5, %v1116_v39, %v847_v45 }
 0x88e   :  { %v862_v48 = vmul.f32 %v851_v47, %v828_v24 }
 0x890   :  { %v867_v50 = vmul.f32 %v1384_v46, %v862_v48 }
 0x892   :  { %v872_v51 = vadd.f32 %v1389_v49, %v867_v50  ;;  %v1080_v50 = vld [vmem:[%s1479_s12] ss:$0 sm:$0xff] }
 0x894   :  { %1053 = vmatmul.msk.f32.vlgmr.msra.gmra.mxu3 %vm54_vm0, %v872_v51 }
 0x8b3   :  { %v777_v52 = vpop.f32.mrf.mxu2 }
 0x8b4   :  { %1052 = vmatmul.msk.f32.vlgmr.msrb.gmra.mxu1 %vm92_vm1, %v777_v52 }
 0x8d4   :  { %v598_v63 = vpop.f32.mrf.mxu3 }
 0x8d5   :  { %v622_v2 = vadd.f32 %v1335_v42, %v598_v63 }
 0x8dc   :  { %v710_v0 = vpop.f32.mrf.mxu3 }
 0x8dd   :  { %v713_v5 = vadd.f32 %v710_v0, %v622_v2 }
 0x917   :  { %v905_v3 = vpop.f32.mrf.mxu3 }
 0x918   :  { %v906_v6 = vadd.f32 %v1422_v1, %v905_v3 }
 0x91a   :  { %v911_v61 = vmax.f32 %v906_v6, 0.0 }
 0x91c   :  { %1055 = vmatmul.msk.f32.vlgmr.msra.gmra.mxu0 %vm925_vm6, %v911_v61 }
 0x931   :  { %v800_v9 = vpop.f32.mrf.mxu1 }
 0x932   :  { %v803_v10 = vadd.f32 %v800_v9, %v713_v5 }
 0x934   :  { %v808_v4 = vadd.f32 %v1350_v60, %v803_v10 }
 0x936   :  { %v810_v11 = vadd.f32 %v808_v4, %v1237_v8 }
 0x938   :  { %v816_v12 = vsel %vm54_vm0, %v810_v11, 0.0 }
 0x939   :  { %817 = vadd.xlane.f32.xlu0 %v816_v12 }
 0x999   :  { %v949_v14 = vpop.f32.mrf.mxu0 }
 0x99a   :  { %v950_v15 = vadd.f32 %v1433_v13, %v949_v14 }
 0x99c   :  { %v955_v16 = vadd.f32 %v950_v15, %v872_v51 }
 0x99e   :  { %v959_v42 = vsel %vm54_vm0, %v955_v16, 0.0 }
 0x99f   :  { %960 = vadd.xlane.f32.xlu0 %v959_v42 }
 0x9ac   :  { %v818_v19 = vpop.xlane.xlu0 %817 }
 0x9ad   :  { %v827_v60 = vmul.f32 %v1361_v21, %v818_v19 }
 0x9af   :  { %v829_v17 = vsub.f32 %v810_v11, %v827_v60 }
 0x9b1   :  { %v831_v8 = vmul.f32 %v829_v17, %v829_v17 }
 0x9b3   :  { %v835_v18 = vsel %vm54_vm0, %v831_v8, 0.0 }
 0x9b4   :  { %836 = vadd.xlane.f32.xlu1 %v835_v18 }
 0xa12   :  { %v961_v20 = vpop.xlane.xlu0 %960 }
 0xa13   :  { %v965_v22 = vmul.f32 %v961_v20, %v1361_v21 }
 0xa15   :  { %v967_v23 = vsub.f32 %v955_v16, %v965_v22 }
 0xa17   :  { %v969_v24 = vmul.f32 %v967_v23, %v967_v23 }
 0xa19   :  { %v971_v25 = vsel %vm54_vm0, %v969_v24, 0.0 }
 0xa1a   :  { %972 = vadd.xlane.f32.xlu0 %v971_v25 }
 0xa27   :  { %v837_v26 = vpop.xlane.xlu1 %836 }
 0xa28   :  { %v839_v7 = vmul.f32 %v837_v26, %v1361_v21 }
 0xa2a   :  { %v841_v27 = vadd.f32 1e-05, %v839_v7 }
 0xa2c   :  { %1117 = vrsqrt.f32 %v841_v27  ;;  %vm858_vm8 = vweird.f32 %v841_v27 }
 0xa32   :  { %v1118_v28 = vpop.eup %1117 }
 0xa33   :  { %v853_v29 = vmul.f32 %v1118_v28, %v841_v27  ;;  %vm859_vm7 = vweird.f32 %v1118_v28 }
 0xa34   :  { %vm860_vm9 = vmor %vm858_vm8, %vm859_vm7 }
 0xa35   :  { %v854_v30 = vmul.f32 %v1118_v28, %v853_v29 }
 0xa37   :  { %v855_v31 = vmul.f32 0.5, %v854_v30 }
 0xa39   :  { %v856_v32 = vsub.f32 1.5, %v855_v31 }
 0xa3b   :  { %v857_v33 = vmul.f32 %v1118_v28, %v856_v32 }
 0xa3d   :  { %v861_v34 = vsel %vm860_vm9, %v1118_v28, %v857_v33 }
 0xa3e   :  { %v863_v35 = vmul.f32 %v861_v34, %v829_v17 }
 0xa40   :  { %v868_v36 = vmul.f32 %v1384_v46, %v863_v35  ;;  %v1079_v46 = vld [vmem:[%s1478_s11] ss:$0 sm:$0xff] }
 0xa42   :  { %v873_v37 = vadd.f32 %v1389_v49, %v868_v36 }
 0xa44   :  { %1054 = vmatmul.msk.f32.gmra.mxu3 %vm54_vm0, %v873_v37 }
 0xa8d   :  { %v973_v38 = vpop.xlane.xlu0 %972 }
 0xa8e   :  { %v977_v39 = vmul.f32 %v973_v38, %v1361_v21 }
 0xa90   :  { %v979_v40 = vadd.f32 1e-05, %v977_v39 }
 0xa92   :  { %1119 = vrsqrt.f32 %v979_v40  ;;  %vm987_vm11 = vweird.f32 %v979_v40 }
 0xa98   :  { %v1120_v41 = vpop.eup %1119 }
 0xa99   :  { %v982_v43 = vmul.f32 %v1120_v41, %v979_v40  ;;  %vm988_vm10 = vweird.f32 %v1120_v41 }
 0xa9a   :  { %vm989_vm12 = vmor %vm987_vm11, %vm988_vm10 }
 0xa9b   :  { %v983_v44 = vmul.f32 %v1120_v41, %v982_v43 }
 0xa9d   :  { %v984_v45 = vmul.f32 0.5, %v983_v44 }
 0xa9f   :  { %v985_v47 = vsub.f32 1.5, %v984_v45 }
 0xaa1   :  { %v986_v48 = vmul.f32 %v1120_v41, %v985_v47 }
 0xaa3   :  { %v990_v49 = vsel %vm989_vm12, %v1120_v41, %v986_v48 }
 0xaa4   :  { %v1001_v51 = vmul.f32 %v990_v49, %v967_v23 }
 0xaa6   :  { %v1006_v52 = vmul.f32 %v1079_v46, %v1001_v51 }
 0xaa8   :  { %v1011_v53 = vadd.f32 %v1080_v50, %v1006_v52 }
 0xaaa   :  { %1013 = vst.msk [vmem:[%s1480_s13] sm:$0xff] %vm54_vm0, %v1011_v53 }
 0xac7   :  { %v908_v54 = vpop.f32.mrf.mxu3 }
 0xac8   :  { %v909_v55 = vadd.f32 %v1422_v1, %v908_v54 }
 0xaca   :  { %v912_v56 = vmax.f32 %v909_v55, 0.0 }
 0xacc   :  { %1056 = vmatmul.msk.f32.gmra.mxu0 %vm925_vm6, %v912_v56 }
 0xb49   :  { %v952_v57 = vpop.f32.mrf.mxu0 }
 0xb4a   :  { %v953_v58 = vadd.f32 %v1433_v13, %v952_v57 }
 0xb4c   :  { %v956_v59 = vadd.f32 %v953_v58, %v873_v37 }
 0xb4e   :  { %v962_v62 = vsel %vm54_vm0, %v956_v59, 0.0 }
 0xb4f   :  { %963 = vadd.xlane.f32.xlu1 %v962_v62 }
 0xbc2   :  { %v964_v63 = vpop.xlane.xlu1 %963 }
 0xbc3   :  { %v966_v0 = vmul.f32 %v964_v63, %v1361_v21 }
 0xbc5   :  { %v968_v3 = vsub.f32 %v956_v59, %v966_v0 }
 0xbc7   :  { %v970_v6 = vmul.f32 %v968_v3, %v968_v3 }
 0xbc9   :  { %v974_v61 = vsel %vm54_vm0, %v970_v6, 0.0 }
 0xbca   :  { %975 = vadd.xlane.f32.xlu2 %v974_v61 }
 0xc3d   :  { %v976_v2 = vpop.xlane.xlu2 %975 }
 0xc3e   :  { %v978_v1 = vmul.f32 %v976_v2, %v1361_v21 }
 0xc40   :  { %v980_v5 = vadd.f32 1e-05, %v978_v1 }
 0xc42   :  { %1121 = vrsqrt.f32 %v980_v5  ;;  %vm997_vm14 = vweird.f32 %v980_v5 }
 0xc48   :  { %v1122_v9 = vpop.eup %1121 }
 0xc49   :  { %v992_v10 = vmul.f32 %v1122_v9, %v980_v5  ;;  %vm998_vm13 = vweird.f32 %v1122_v9 }
 0xc4a   :  { %vm999_vm15 = vmor %vm997_vm14, %vm998_vm13 }
 0xc4b   :  { %v993_v4 = vmul.f32 %v1122_v9, %v992_v10 }
 0xc4d   :  { %v994_v11 = vmul.f32 0.5, %v993_v4 }
 0xc4f   :  { %v995_v12 = vsub.f32 1.5, %v994_v11 }
 0xc51   :  { %v996_v13 = vmul.f32 %v1122_v9, %v995_v12 }
 0xc53   :  { %v1000_v14 = vsel %vm999_vm15, %v1122_v9, %v996_v13 }
 0xc54   :  { %v1002_v15 = vmul.f32 %v1000_v14, %v968_v3 }
 0xc56   :  { %v1007_v16 = vmul.f32 %v1079_v46, %v1002_v15 }
 0xc58   :  { %v1012_v42 = vadd.f32 %v1080_v50, %v1007_v16 }
 0xc5a   :  { %1014 = vst.msk [vmem:[%s1480_s13 + $0x8] sm:$0xff] %vm54_vm0, %v1012_v42 }

// kernel: fwd.9
= control target key start
LH: loop header
LB: loop body
LE: loop exit
PB: predicated region body
PF: predicated region fallthrough
CT: control target
= control target key end

     0   :  { %vm83_vm0 = vcmask 261120   ;;  %s2084_s28 = smov 96   ;;  %vm121_vm1 = vcmask 64512   ;;  %s2086_s30 = smov 112   ;;  %vm1808_vm12 = vcmask 523264   ;;  %s2676_s2 = inlined_call_operand.vmem [shape: f32[32,96], index: 2, kind: input, shape index: {}]   ;;  %s2677_s3 = inlined_call_operand.vmem [shape: f32[1,96], index: 3, kind: input, shape index: {}]   ;;  %s2678_s0 = inlined_call_operand.vmem [shape: f32[16,32], index: 0, kind: input, shape index: {}]   ;;  %s2679_s4 = inlined_call_operand.vmem [shape: f32[32,32], index: 4, kind: input, shape index: {}]   ;;  %s2680_s5 = inlined_call_operand.vmem [shape: f32[1,32], index: 5, kind: input, shape index: {}]   ;;  %s2681_s6 = inlined_call_operand.vmem [shape: f32[1,32], index: 6, kind: input, shape index: {}]   ;;  %s2682_s7 = inlined_call_operand.vmem [shape: f32[1,32], index: 7, kind: input, shape index: {}]   ;;  %s2683_s10 = inlined_call_operand.vmem [shape: f32[32,64], index: 10, kind: input, shape index: {}]   ;;  %s2684_s1 = inlined_call_operand.vmem [shape: f32[16,32], index: 1, kind: input, shape index: {}]   ;;  %s2685_s8 = inlined_call_operand.vmem [shape: f32[32,32], index: 8, kind: input, shape index: {}]   ;;  %s2686_s11 = inlined_call_operand.vmem [shape: f32[1,64], index: 11, kind: input, shape index: {}]   ;;  %s2687_s9 = inlined_call_operand.vmem [shape: f32[1,32], index: 9, kind: input, shape index: {}]   ;;  %s2688_s12 = inlined_call_operand.vmem [shape: f32[32,32], index: 12, kind: input, shape index: {}]   ;;  %s2689_s13 = inlined_call_operand.vmem [shape: f32[1,32], index: 13, kind: input, shape index: {}]   ;;  %s2690_s14 = inlined_call_operand.vmem [shape: f32[1,32], index: 14, kind: input, shape index: {}]   ;;  %s2691_s15 = inlined_call_operand.vmem [shape: f32[1,32], index: 15, kind: input, shape index: {}]   ;;  %s2692_s16 = inlined_call_operand.vmem [shape: f32[32,64], index: 16, kind: input, shape index: {}]   ;;  %s2693_s17 = inlined_call_operand.vmem [shape: f32[1,64], index: 17, kind: input, shape index: {}]   ;;  %s2694_s19 = inlined_call_operand.vmem [shape: f32[1,32], index: 19, kind: input, shape index: {}]   ;;  %s2695_s18 = inlined_call_operand.vmem [shape: f32[64,32], index: 18, kind: input, shape index: {}]   ;;  %s2696_s20 = inlined_call_operand.vmem [shape: f32[1,32], index: 20, kind: input, shape index: {}]   ;;  %s2697_s21 = inlined_call_operand.vmem [shape: f32[1,32], index: 21, kind: input, shape index: {}]   ;;  %s2698_s22 = inlined_call_operand.vmem [shape: f32[16,32], index: 22, kind: output, shape index: {}]  }
   0x1   :  { %2708 = sst [smem:[#allocation2_spill]] %s2676_s2  ;;  %s2706_s2 = smov 104  }
   0x2   :  { %2709 = sst [smem:[#allocation3_spill]] %s2677_s3  ;;  %s2089_s23 = smov 64  }
   0x3   :  { %2710 = sst [smem:[#allocation4_spill]] %s2678_s0  ;;  %s2090_s3 = smov 56  }
   0x4   :  { %2711 = sst [smem:[#allocation5_spill]] %s2679_s4  ;;  %s2083_s4 = smov 120  }
   0x5   :  { %2712 = sst [smem:[#allocation6_spill]] %s2680_s5  ;;  %s2702_s5 = smov 72  }
   0x6   :  { %2713 = sst [smem:[#allocation7_spill]] %s2681_s6  ;;  %s2704_s6 = smov 80  }
   0x7   :  { %2714 = sst [smem:[#allocation8_spill]] %s2682_s7  ;;  %s2092_s7 = smov 40  }
   0x8   :  { %s2715_s29 = sld [smem:[#allocation2_spill]] }
   0x9   :  { %s2716_s25 = sld [smem:[#allocation4_spill]] }
   0xa   :  { %s2717_s27 = sld [smem:[#allocation3_spill]] }
   0xb   :  { %s2718_s0 = sld [smem:[#allocation5_spill]] }
   0xe   :  { %v78_v0 = vld [vmem:[%s2715_s29 + $0x18] sm:$0xff]  ;;  %v77_v1 = vld [vmem:[%s2715_s29 + $0x10] sm:$0xff]  ;;  %v76_v2 = vld [vmem:[%s2715_s29 + $0x8] sm:$0xff] }
   0xf   :  { %102 = vmatpush.msra.mxu0 %v78_v0  ;;  %1976 = vmatpush.msra.mxu2 %v78_v0  ;;  %v75_v3 = vld [vmem:[%s2715_s29] sm:$0xff]  ;;  %s2085_s29 = smov 88   ;;  %v2267_v27 = vld [vmem:[%s2716_s25 + $0x8] sm:$0xff] }
  0x10   :  { %v2225_v4 = vld [vmem:[%s2716_s25] sm:$0xff]  ;;  %s2093_s25 = smov 48  }
  0x11   :  { %103 = vmatpush.msra.mxu0 %v77_v1  ;;  %1977 = vmatpush.msra.mxu2 %v77_v1  ;;  %v2232_v5 = vld [vmem:[%s2717_s27] ss:$0 sm:$0xff]  ;;  %v114_v39 = vld [vmem:[%s2718_s0 + $0x8] sm:$0xff]  ;;  %v115_v54 = vld [vmem:[%s2718_s0 + $0x10] sm:$0xff]  ;;  %s2719_s27 = sld [smem:[#allocation6_spill]] }
  0x12   :  { %v2278_v38 = vld [vmem:[%s2718_s0] sm:$0xff] }
  0x13   :  { %104 = vmatpush.msra.mxu0 %v76_v2  ;;  %1978 = vmatpush.msra.mxu2 %v76_v2 }
  0x15   :  { %105 = vmatpush.msra.mxu0 %v75_v3  ;;  %1979 = vmatpush.msra.mxu2 %v75_v3 }
  0x16   :  { %1902 = vmatmul.msk.f32.vlgmr.msra.gmra.mxu0 %vm83_vm0, %v2225_v4  ;;  %1903 = vmatmul.msk.f32.vlgmr.msra.gmra.mxu2 %vm83_vm0, %v2267_v27 }
  0x93   :  { %v107_v6 = vpop.f32.mrf.mxu0 }
  0x94   :  { %v2235_v7 = vadd.f32 %v2232_v5, %v107_v6 }
  0x96   :  { %184 = vrot.lane.b32.xlu1 %v2235_v7, %s2083_s4  ;;  %119 = vrot.lane.b32.xlu0 %v2235_v7, %s2084_s28 }
  0x99   :  { %v110_v40 = vpop.f32.mrf.mxu2 }
  0x9a   :  { %v2290_v46 = vadd.f32 %v2232_v5, %v110_v40 }
  0x9e   :  { %186 = vrot.lane.b32.xlu0 %v2235_v7, %s2085_s29 }
 0x108   :  { %v120_v8 = vpop.permute.xlu0 %119  ;;  %v185_v10 = vpop.permute.xlu1 %184 }
 0x109   :  { %1904 = vmatpush.xpose.msk.msra.mxu1 %vm121_vm1, %v120_v8 }
 0x10c   :  { %1905 = vmatmul.msk.f32.vlgmr.msra.gmra.mxu1 %vm121_vm1, %v2235_v7 }
 0x10d   :  { %268 = vmatpush.msrb.mxu1 %v114_v39 }
 0x110   :  { %v187_v9 = vpop.permute.xlu0 %186 }
 0x111   :  { %1907 = vmatpush.xpose.msk.msra.mxu3 %vm121_vm1, %v187_v9 }
 0x114   :  { %1908 = vmatmul.msk.f32.vlgmr.msra.gmra.mxu3 %vm121_vm1, %v185_v10 }
 0x115   :  { %291 = vmatpush.msrb.mxu3 %v2278_v38 }
 0x117   :  { %380 = vmatpush.msra.mxu3 %v115_v54 }
 0x189   :  { %v143_v11 = vpop.f32.mrf.mxu1 }
 0x18a   :  { %v146_v12 = vmul.f32 0.35355338, %v143_v11 }
 0x18c   :  { %v147_v13 = vsel %vm121_vm1, %v146_v12, -inf }
 0x18d   :  { %148 = vmax.xlane.f32.xlu1 %v147_v13 }
 0x197   :  { %v209_v14 = vpop.f32.mrf.mxu3 }
 0x198   :  { %v212_v15 = vmul.f32 0.35355338, %v209_v14 }
 0x19a   :  { %v213_v16 = vsel %vm121_vm1, %v212_v15, -inf }
 0x19b   :  { %214 = vmax.xlane.f32.xlu2 %v213_v16 }
 0x1a6   :  { %296 = vrot.lane.b32.xlu1 %v2235_v7, %s2086_s30 }
 0x1ae   :  { %388 = vrot.lane.b32.xlu1 %v2235_v7, %s2702_s5 }
 0x1b6   :  { %386 = vrot.lane.b32.xlu1 %v2235_v7, %s2706_s2 }
 0x200   :  { %v149_v17 = vpop.xlane.xlu1 %148 }
 0x201   :  { %v150_v18 = vsub.f32 %v146_v12, %v149_v17 }
 0x203   :  { %v151_v19 = vmul.f32 1.442695, %v150_v18 }
 0x205   :  { %2005 = vpow2.f32 %v151_v19 }
 0x20b   :  { %v2006_v20 = vpop.eup %2005 }
 0x20c   :  { %v153_v21 = vsel %vm121_vm1, %v2006_v20, 0.0 }
 0x20d   :  { %154 = vadd.xlane.f32.xlu2 %v153_v21 }
 0x20e   :  { %v215_v22 = vpop.xlane.xlu2 %214 }
 0x20f   :  { %v216_v23 = vsub.f32 %v212_v15, %v215_v22 }
 0x211   :  { %v217_v24 = vmul.f32 1.442695, %v216_v23 }
 0x213   :  { %2007 = vpow2.f32 %v217_v24 }
 0x218   :  { %v297_v37 = vpop.permute.xlu1 %296 }
 0x219   :  { %v2008_v25 = vpop.eup %2007 }
 0x21a   :  { %v219_v26 = vsel %vm121_vm1, %v2008_v25, 0.0 }
 0x21b   :  { %220 = vadd.xlane.f32.xlu0 %v219_v26  ;;  %v2334_v26 = vld [vmem:[%s2718_s0 + $0x18] sm:$0xff] }
 0x220   :  { %v389_v57 = vpop.permute.xlu1 %388 }
 0x225   :  { %158 = vrot.lane.b32.xlu2 %v2235_v7, %s2089_s23 }
 0x228   :  { %v387_v61 = vpop.permute.xlu1 %386 }
 0x22d   :  { %224 = vrot.lane.b32.xlu2 %v2235_v7, %s2090_s3 }
 0x235   :  { %298 = vrot.lane.b32.xlu2 %v2235_v7, %s2704_s6 }
 0x280   :  { %v155_v28 = vpop.xlane.xlu2 %154 }
 0x281   :  { %2009 = vrcp.f32 %v155_v28 }
 0x287   :  { %v2010_v29 = vpop.eup %2009 }
 0x288   :  { %v159_v30 = vpop.permute.xlu2 %158  ;;  %v157_v31 = vmul.f32 %v2010_v29, %v2006_v20 }
 0x289   :  { %179 = vmatpush.msrb.mxu2 %v159_v30 }
 0x28a   :  { %1906 = vmatmul.msk.f32.vlgmr.msrb.gmra.mxu2 %vm121_vm1, %v157_v31 }
 0x28e   :  { %v221_v32 = vpop.xlane.xlu0 %220 }
 0x28f   :  { %2011 = vrcp.f32 %v221_v32 }
 0x290   :  { %v225_v33 = vpop.permute.xlu2 %224 }
 0x291   :  { %245 = vmatpush.msra.mxu2 %v225_v33 }
 0x295   :  { %v2012_v34 = vpop.eup %2011 }
 0x296   :  { %v223_v35 = vmul.f32 %v2012_v34, %v2008_v25 }
 0x298   :  { %1909 = vmatmul.msk.f32.vlgmr.msra.gmra.mxu2 %vm121_vm1, %v223_v35  ;;  %v299_v36 = vpop.permute.xlu2 %298 }
 0x299   :  { %1912 = vmatpush.xpose.msk.msrb.mxu2 %vm121_vm1, %v299_v36 }
 0x2a0   :  { %1913 = vmatmul.msk.f32.vlgmr.msrb.gmra.mxu2 %vm121_vm1, %v297_v37 }
 0x30d   :  { %v181_v41 = vpop.f32.mrf.mxu2 }
 0x30e   :  { %1911 = vmatmul.msk.f32.vlgmr.msrb.gmra.mxu3 %vm121_vm1, %v181_v41  ;;  %v2350_v41 = vld [vmem:[%s2719_s27] ss:$0 sm:$0xff]  ;;  %s2720_s27 = sld [smem:[#allocation7_spill]] }
 0x31b   :  { %v247_v42 = vpop.f32.mrf.mxu2 }
 0x31c   :  { %1910 = vmatmul.msk.f32.vlgmr.msrb.gmra.mxu1 %vm121_vm1, %v247_v42 }
 0x323   :  { %v321_v43 = vpop.f32.mrf.mxu2 }
 0x324   :  { %v324_v44 = vmul.f32 0.35355338, %v321_v43 }
 0x326   :  { %v325_v45 = vsel %vm121_vm1, %v324_v44, -inf }
 0x327   :  { %326 = vmax.xlane.f32.xlu2 %v325_v45 }
 0x33f   :  { %426 = vrot.lane.b32.xlu2 %v2235_v7, %s2092_s7 }
 0x347   :  { %543 = vrot.lane.b32.xlu2 %v2290_v46, %s2085_s29 }
 0x391   :  { %v293_v3 = vpop.f32.mrf.mxu3 }
 0x399   :  { %v2307_v62 = vpop.f32.mrf.mxu1 }
 0x39a   :  { %v327_v47 = vpop.xlane.xlu2 %326 }
 0x39b   :  { %v328_v48 = vsub.f32 %v324_v44, %v327_v47 }
 0x39d   :  { %v329_v49 = vmul.f32 1.442695, %v328_v48 }
 0x39f   :  { %2013 = vpow2.f32 %v329_v49 }
 0x3a2   :  { %v427_v50 = vpop.permute.xlu2 %426 }
 0x3a3   :  { %447 = vmatpush.msra.mxu2 %v427_v50 }
 0x3a5   :  { %v2014_v51 = vpop.eup %2013 }
 0x3a6   :  { %v331_v52 = vsel %vm121_vm1, %v2014_v51, 0.0 }
 0x3a7   :  { %332 = vadd.xlane.f32.xlu0 %v331_v52 }
 0x3aa   :  { %v544_v53 = vpop.permute.xlu2 %543 }
 0x3ab   :  { %1923 = vmatpush.xpose.msk.msrb.mxu2 %vm121_vm1, %v544_v53 }
 0x3bb   :  { %336 = vrot.lane.b32.xlu0 %v2235_v7, %s2093_s25 }
 0x3c3   :  { %477 = vrot.lane.b32.xlu0 %v2290_v46, %s2084_s28 }
 0x41a   :  { %v333_v55 = vpop.xlane.xlu0 %332 }
 0x41b   :  { %2015 = vrcp.f32 %v333_v55 }
 0x421   :  { %v2016_v56 = vpop.eup %2015 }
 0x422   :  { %v335_v58 = vmul.f32 %v2016_v56, %v2014_v51 }
 0x42d   :  { %v337_v59 = vpop.permute.xlu0 %336 }
 0x42e   :  { %357 = vmatpush.msra.mxu1 %v337_v59 }
 0x42f   :  { %1914 = vmatmul.msk.f32.vlgmr.msra.gmra.mxu1 %vm121_vm1, %v335_v58 }
 0x430   :  { %1916 = vmatpush.xpose.msk.msrb.mxu1 %vm121_vm1, %v389_v57 }
 0x434   :  { %470 = vmatpush.msra.mxu1 %v2334_v26 }
 0x435   :  { %v478_v60 = vpop.permute.xlu0 %477 }
 0x436   :  { %1920 = vmatpush.xpose.msk.msrb.mxu3 %vm121_vm1, %v478_v60 }
 0x437   :  { %1917 = vmatmul.msk.f32.vlgmr.msrb.gmra.mxu1 %vm121_vm1, %v387_v61 }
 0x4ac   :  { %v359_v63 = vpop.f32.mrf.mxu1 }
 0x4ad   :  { %1915 = vmatmul.msk.f32.vlgmr.msra.gmra.mxu3 %vm121_vm1, %v359_v63 }
 0x4ae   :  { %625 = vmatpush.msra.mxu3 %v114_v39  ;;  %v294_v39 = vadd.f32 %v293_v3, %v2307_v62 }
 0x4b4   :  { %v411_v0 = vpop.f32.mrf.mxu1 }
 0x4b5   :  { %v414_v1 = vmul.f32 0.35355338, %v411_v0  ;;  %1921 = vmatmul.msk.f32.vlgmr.msrb.gmra.mxu3 %vm121_vm1, %v2290_v46 }
 0x4b6   :  { %737 = vmatpush.msrb.mxu3 %v115_v54 }
 0x4b7   :  { %v415_v2 = vsel %vm121_vm1, %v414_v1, -inf }
 0x4b8   :  { %416 = vmax.xlane.f32.xlu1 %v415_v2 }
 0x4d1   :  { %541 = vrot.lane.b32.xlu1 %v2290_v46, %s2083_s4 }
 0x52b   :  { %v417_v5 = vpop.xlane.xlu1 %416 }
 0x52c   :  { %v418_v6 = vsub.f32 %v414_v1, %v417_v5 }
 0x52e   :  { %v419_v7 = vmul.f32 1.442695, %v418_v6 }
 0x530   :  { %2017 = vpow2.f32 %v419_v7  ;;  %v382_v8 = vpop.f32.mrf.mxu3 }
 0x531   :  { %v385_v40 = vadd.f32 %v382_v8, %v294_v39 }
 0x536   :  { %v2018_v9 = vpop.eup %2017 }
 0x537   :  { %v421_v10 = vsel %vm121_vm1, %v2018_v9, 0.0 }
 0x538   :  { %422 = vadd.xlane.f32.xlu0 %v421_v10  ;;  %v500_v11 = vpop.f32.mrf.mxu3 }
 0x539   :  { %v503_v12 = vmul.f32 0.35355338, %v500_v11 }
 0x53b   :  { %v504_v13 = vsel %vm121_vm1, %v503_v12, -inf }
 0x53c   :  { %505 = vmax.xlane.f32.xlu2 %v504_v13 }
 0x543   :  { %v542_v22 = vpop.permute.xlu1 %541 }
 0x54c   :  { %655 = vrot.lane.b32.xlu0 %v2290_v46, %s2704_s6 }
 0x554   :  { %515 = vrot.lane.b32.xlu0 %v2290_v46, %s2089_s23  ;;  %653 = vrot.lane.b32.xlu2 %v2290_v46, %s2086_s30 }
 0x5ab   :  { %v423_v14 = vpop.xlane.xlu0 %422 }
 0x5ac   :  { %2019 = vrcp.f32 %v423_v14 }
 0x5af   :  { %v506_v15 = vpop.xlane.xlu2 %505 }
 0x5b0   :  { %v507_v16 = vsub.f32 %v503_v12, %v506_v15 }
 0x5b2   :  { %v2020_v17 = vpop.eup %2019  ;;  %v508_v18 = vmul.f32 1.442695, %v507_v16 }
 0x5b3   :  { %v425_v19 = vmul.f32 %v2020_v17, %v2018_v9 }
 0x5b4   :  { %2021 = vpow2.f32 %v508_v18 }
 0x5b5   :  { %1918 = vmatmul.msk.f32.vlgmr.msra.gmra.mxu2 %vm121_vm1, %v425_v19 }
 0x5b7   :  { %v654_v24 = vpop.permute.xlu2 %653 }
 0x5ba   :  { %v2022_v20 = vpop.eup %2021 }
 0x5bb   :  { %v510_v21 = vsel %vm121_vm1, %v2022_v20, 0.0 }
 0x5bc   :  { %511 = vadd.xlane.f32.xlu2 %v510_v21  ;;  %v942_v21 = vld [vmem:[%s2683_s10 + $0x10] sm:$0xff] }
 0x5bd   :  { %1924 = vmatmul.msk.f32.vlgmr.msrb.gmra.mxu2 %vm121_vm1, %v542_v22  ;;  %v941_v22 = vld [vmem:[%s2683_s10 + $0x8] sm:$0xff] }
 0x5be   :  { %v656_v23 = vpop.permute.xlu0 %655 }
 0x5bf   :  { %1928 = vmatpush.xpose.msk.msra.mxu2 %vm121_vm1, %v656_v23  ;;  %v940_v23 = vld [vmem:[%s2683_s10] sm:$0xff] }
 0x5c5   :  { %1929 = vmatmul.msk.f32.vlgmr.msra.gmra.mxu2 %vm121_vm1, %v654_v24  ;;  %v73_v24 = vld [vmem:[%s2684_s1] sm:$0xff] }
 0x5c6   :  { %v516_v25 = vpop.permute.xlu0 %515 }
 0x5c7   :  { %536 = vmatpush.msrb.mxu0 %v516_v25 }
 0x5c9   :  { %648 = vmatpush.msra.mxu0 %v2278_v38 }
 0x5d4   :  { %745 = vrot.lane.b32.xlu2 %v2290_v46, %s2702_s5  ;;  %s2721_s5 = sld [smem:[#allocation8_spill]] }
 0x62f   :  { %v512_v28 = vpop.xlane.xlu2 %511 }
 0x630   :  { %2023 = vrcp.f32 %v512_v28 }
 0x636   :  { %v2024_v29 = vpop.eup %2023 }
 0x637   :  { %v746_v30 = vpop.permute.xlu2 %745  ;;  %v514_v31 = vmul.f32 %v2024_v29, %v2022_v20  ;;  %v943_v20 = vld [vmem:[%s2683_s10 + $0x18] sm:$0xff] }
 0x638   :  { %v449_v32 = vpop.f32.mrf.mxu2 }
 0x639   :  { %1919 = vmatmul.msk.f32.vlgmr.msra.gmra.mxu1 %vm121_vm1, %v449_v32  ;;  %1922 = vmatmul.msk.f32.vlgmr.msrb.gmra.mxu0 %vm121_vm1, %v514_v31 }
 0x63a   :  { %1932 = vmatpush.xpose.msk.msrb.mxu0 %vm121_vm1, %v746_v30 }
 0x640   :  { %v566_v33 = vpop.f32.mrf.mxu2 }
 0x641   :  { %v569_v34 = vmul.f32 0.35355338, %v566_v33 }
 0x643   :  { %v570_v35 = vsel %vm121_vm1, %v569_v34, -inf }
 0x644   :  { %571 = vmax.xlane.f32.xlu1 %v570_v35 }
 0x648   :  { %v678_v36 = vpop.f32.mrf.mxu2 }
 0x649   :  { %v681_v37 = vmul.f32 0.35355338, %v678_v36 }
 0x64b   :  { %v682_v38 = vsel %vm121_vm1, %v681_v37, -inf }
 0x64c   :  { %683 = vmax.xlane.f32.xlu0 %v682_v38 }
 0x65d   :  { %743 = vrot.lane.b32.xlu1 %v2290_v46, %s2706_s2 }
 0x665   :  { %693 = vrot.lane.b32.xlu1 %v2290_v46, %s2093_s25 }
 0x6b6   :  { %v472_v42 = vpop.f32.mrf.mxu1  ;;  %v538_v43 = vpop.f32.mrf.mxu0 }
 0x6b7   :  { %v475_v44 = vadd.f32 %v472_v42, %v385_v40  ;;  %v572_v45 = vpop.xlane.xlu1 %571  ;;  %1927 = vmatmul.msk.f32.vlgmr.msra.gmra.mxu0 %vm121_vm1, %v538_v43  ;;  %v905_v40 = vld [vmem:[%s2685_s8 + $0x10] sm:$0xff]  ;;  %v904_v42 = vld [vmem:[%s2685_s8 + $0x8] sm:$0xff] }
 0x6b8   :  { %v573_v47 = vsub.f32 %v569_v34, %v572_v45  ;;  %966 = vmatpush.msra.mxu0 %v943_v20 }
 0x6b9   :  { %v836_v48 = vadd.f32 %v2350_v41, %v475_v44  ;;  %v903_v44 = vld [vmem:[%s2685_s8] sm:$0xff] }
 0x6ba   :  { %v574_v49 = vmul.f32 1.442695, %v573_v47  ;;  %967 = vmatpush.msra.mxu0 %v942_v21  ;;  %v2408_v47 = vld [vmem:[%s2720_s27] ss:$0 sm:$0xff] }
 0x6bb   :  { %v838_v50 = vadd.f32 %v836_v48, %v2225_v4  ;;  %v2094_v4 = vmov 32.0  }
 0x6bc   :  { %2025 = vpow2.f32 %v574_v49  ;;  %968 = vmatpush.msra.mxu0 %v941_v22 }
 0x6bd   :  { %v842_v51 = vsel %vm83_vm0, %v838_v50, 0.0 }
 0x6be   :  { %843 = vadd.xlane.f32.xlu1 %v842_v51  ;;  %969 = vmatpush.msra.mxu0 %v940_v23 }
 0x6bf   :  { %v684_v52 = vpop.xlane.xlu0 %683 }
 0x6c0   :  { %v685_v53 = vsub.f32 %v681_v37, %v684_v52  ;;  %v906_v37 = vld [vmem:[%s2685_s8 + $0x18] sm:$0xff]  ;;  %v2417_v52 = vld [vmem:[%s2721_s5] ss:$0 sm:$0xff] }
 0x6c2   :  { %v2026_v54 = vpop.eup %2025  ;;  %v686_v55 = vmul.f32 1.442695, %v685_v53 }
 0x6c3   :  { %v576_v56 = vsel %vm121_vm1, %v2026_v54, 0.0 }
 0x6c4   :  { %2027 = vpow2.f32 %v686_v55  ;;  %577 = vadd.xlane.f32.xlu0 %v576_v56 }
 0x6c5   :  { %2029 = vrcp.f32 %v2094_v4 }
 0x6ca   :  { %v2028_v57 = vpop.eup %2027 }
 0x6cb   :  { %v688_v58 = vsel %vm121_vm1, %v2028_v57, 0.0  ;;  %v2030_v60 = vpop.eup %2029 }
 0x6cc   :  { %689 = vadd.xlane.f32.xlu2 %v688_v58  ;;  %v849_v61 = vmul.f32 32.0, %v2030_v60  ;;  %vm853_vm2 = vweird.f32 %v2030_v60 }
 0x6ce   :  { %v850_v62 = vsub.f32 1.0, %v849_v61 }
 0x6cf   :  { %v744_v59 = vpop.permute.xlu1 %743 }
 0x6d0   :  { %1933 = vmatmul.msk.f32.vlgmr.msrb.gmra.mxu0 %vm121_vm1, %v744_v59  ;;  %v851_v63 = vmul.f32 %v2030_v60, %v850_v62 }
 0x6d2   :  { %v852_v1 = vadd.f32 %v2030_v60, %v851_v63  ;;  %v2445_v63 = vld [vmem:[%s2687_s9] ss:$0 sm:$0xff]  ;;  %s2722_s9 = smov 104  }
 0x6d4   :  { %v2361_v2 = vsel %vm853_vm2, %v2030_v60, %v852_v1 }
 0x6d7   :  { %v694_v0 = vpop.permute.xlu1 %693 }
 0x6d8   :  { %581 = vrot.lane.b32.xlu0 %v2290_v46, %s2090_s3  ;;  %1938 = vmatmul.msk.f32.vlgmr.msra.gmra.mxu0 %vm83_vm0, %v73_v24  ;;  %s2723_s3 = smov 80  }
 0x731   :  { %v844_v3 = vpop.xlane.xlu1 %843 }
 0x732   :  { %v855_v5 = vmul.f32 %v2361_v2, %v844_v3 }
 0x734   :  { %v2364_v6 = vsub.f32 %v838_v50, %v855_v5  ;;  %v2369_v10 = vpop.f32.mrf.mxu0 }
 0x736   :  { %v859_v7 = vmul.f32 %v2364_v6, %v2364_v6 }
 0x737   :  { %v578_v9 = vpop.xlane.xlu0 %577 }
 0x738   :  { %v861_v8 = vsel %vm83_vm0, %v859_v7, 0.0  ;;  %2031 = vrcp.f32 %v578_v9 }
 0x739   :  { %862 = vadd.xlane.f32.xlu0 %v861_v8 }
 0x73e   :  { %v2032_v12 = vpop.eup %2031 }
 0x73f   :  { %v690_v11 = vpop.xlane.xlu2 %689  ;;  %v580_v13 = vmul.f32 %v2032_v12, %v2026_v54  ;;  %v2429_v54 = vld [vmem:[%s2686_s11] ss:$0 sm:$0xff] }
 0x740   :  { %2033 = vrcp.f32 %v690_v11 }
 0x746   :  { %v2034_v17 = vpop.eup %2033 }
 0x747   :  { %v692_v19 = vmul.f32 %v2034_v17, %v2028_v57 }
 0x74a   :  { %v582_v14 = vpop.permute.xlu0 %581 }
 0x74b   :  { %602 = vmatpush.msrb.mxu1 %v582_v14 }
 0x74c   :  { %1925 = vmatmul.msk.f32.vlgmr.msrb.gmra.mxu1 %vm121_vm1, %v580_v13 }
 0x74d   :  { %714 = vmatpush.msra.mxu1 %v694_v0  ;;  %v768_v15 = vpop.f32.mrf.mxu0 }
 0x74e   :  { %v771_v16 = vmul.f32 0.35355338, %v768_v15 }
 0x74f   :  { %827 = vmatpush.msrb.mxu1 %v2334_v26 }
 0x750   :  { %v772_v18 = vsel %vm121_vm1, %v771_v16, -inf }
 0x751   :  { %773 = vmax.xlane.f32.xlu2 %v772_v18 }
 0x754   :  { %1930 = vmatmul.msk.f32.vlgmr.msra.gmra.mxu1 %vm121_vm1, %v692_v19 }
 0x755   :  { %v971_v55 = vpop.f32.mrf.mxu0 }
 0x756   :  { %v2432_v56 = vadd.f32 %v2429_v54, %v971_v55 }
 0x758   :  { %1048 = vrot.lane.b32.xlu1 %v2432_v56, %s2083_s4 }
 0x7ac   :  { %v863_v25 = vpop.xlane.xlu0 %862 }
 0x7ad   :  { %v867_v26 = vmul.f32 %v863_v25, %v2361_v2 }
 0x7af   :  { %v869_v28 = vadd.f32 1e-05, %v867_v26 }
 0x7b1   :  { %2035 = vrsqrt.f32 %v869_v28  ;;  %vm877_vm4 = vweird.f32 %v869_v28 }
 0x7b7   :  { %v2036_v29 = vpop.eup %2035 }
 0x7b8   :  { %v872_v30 = vmul.f32 %v2036_v29, %v869_v28  ;;  %vm878_vm3 = vweird.f32 %v2036_v29 }
 0x7b9   :  { %vm879_vm5 = vmor %vm877_vm4, %vm878_vm3 }
 0x7ba   :  { %v873_v31 = vmul.f32 %v2036_v29, %v872_v30 }
 0x7bc   :  { %v874_v32 = vmul.f32 0.5, %v873_v31 }
 0x7be   :  { %v875_v34 = vsub.f32 1.5, %v874_v32 }
 0x7c0   :  { %v876_v38 = vmul.f32 %v2036_v29, %v875_v34 }
 0x7c2   :  { %v880_v43 = vsel %vm879_vm5, %v2036_v29, %v876_v38 }
 0x7c3   :  { %v891_v48 = vmul.f32 %v880_v43, %v2364_v6  ;;  %v2479_v43 = vld [vmem:[%s2688_s12] sm:$0xff] }
 0x7c4   :  { %v774_v33 = vpop.xlane.xlu2 %773  ;;  %1153 = vmatpush.msrb.mxu0 %v2479_v43 }
 0x7c5   :  { %v775_v35 = vsub.f32 %v771_v16, %v774_v33  ;;  %v896_v51 = vmul.f32 %v2408_v47, %v891_v48 }
 0x7c7   :  { %v776_v36 = vmul.f32 1.442695, %v775_v35  ;;  %v2420_v53 = vadd.f32 %v2417_v52, %v896_v51 }
 0x7c9   :  { %2037 = vpow2.f32 %v776_v36  ;;  %v604_v39 = vpop.f32.mrf.mxu1 }
 0x7ca   :  { %1926 = vmatmul.msk.f32.vlgmr.msra.gmra.mxu3 %vm121_vm1, %v604_v39  ;;  %v1049_v5 = vpop.permute.xlu1 %1048 }
 0x7cb   :  { %929 = vmatpush.msra.mxu3 %v906_v37 }
 0x7cd   :  { %930 = vmatpush.msra.mxu3 %v905_v40 }
 0x7cf   :  { %v2038_v45 = vpop.eup %2037  ;;  %931 = vmatpush.msra.mxu3 %v904_v42 }
 0x7d0   :  { %v778_v49 = vsel %vm121_vm1, %v2038_v45, 0.0 }
 0x7d1   :  { %v716_v50 = vpop.f32.mrf.mxu1  ;;  %779 = vadd.xlane.f32.xlu2 %v778_v49  ;;  %932 = vmatpush.msra.mxu3 %v903_v44  ;;  %v74_v49 = vld [vmem:[%s2684_s1 + $0x8] sm:$0xff] }
 0x7d2   :  { %1931 = vmatmul.msk.f32.vlgmr.msrb.gmra.mxu3 %vm121_vm1, %v716_v50  ;;  %1939 = vmatmul.msk.f32.gmra.mxu0 %vm83_vm0, %v74_v49 }
 0x7da   :  { %1936 = vmatmul.msk.f32.vlgmr.msra.gmra.mxu3 %vm83_vm0, %v2420_v53 }
 0x7e9   :  { %783 = vrot.lane.b32.xlu2 %v2290_v46, %s2092_s7 }
 0x7f1   :  { %1160 = vrot.lane.b32.xlu2 %v2432_v56, %s2086_s30 }
 0x844   :  { %v780_v57 = vpop.xlane.xlu2 %779 }
 0x845   :  { %2039 = vrcp.f32 %v780_v57 }
 0x84b   :  { %v2040_v58 = vpop.eup %2039 }
 0x84c   :  { %v782_v59 = vmul.f32 %v2040_v58, %v2038_v45  ;;  %v784_v46 = vpop.permute.xlu2 %783 }
 0x84d   :  { %v627_v4 = vpop.f32.mrf.mxu3  ;;  %804 = vmatpush.msrb.mxu2 %v784_v46 }
 0x84e   :  { %1934 = vmatmul.msk.f32.vlgmr.msrb.gmra.mxu2 %vm121_vm1, %v782_v59  ;;  %v651_v60 = vadd.f32 %v2369_v10, %v627_v4 }
 0x84f   :  { %1940 = vmatpush.xpose.msk.msra.mxu2 %vm121_vm1, %v2432_v56 }
 0x853   :  { %1943 = vmatpush.xpose.msk.msrb.mxu2 %vm121_vm1, %v1049_v5 }
 0x854   :  { %v1161_v3 = vpop.permute.xlu2 %1160 }
 0x855   :  { %v739_v61 = vpop.f32.mrf.mxu3 }
 0x856   :  { %v742_v62 = vadd.f32 %v739_v61, %v651_v60 }
 0x85d   :  { %v934_v0 = vpop.f32.mrf.mxu3 }
 0x85e   :  { %v935_v1 = vadd.f32 %v2445_v63, %v934_v0 }
 0x860   :  { %1046 = vrot.lane.b32.xlu0 %v935_v1, %s2083_s4  ;;  %1941 = vmatmul.msk.f32.vlgmr.msra.gmra.mxu2 %vm121_vm1, %v935_v1 }
 0x861   :  { %1948 = vmatpush.xpose.msk.msra.mxu2 %vm121_vm1, %v1161_v3 }
 0x868   :  { %1158 = vrot.lane.b32.xlu0 %v935_v1, %s2086_s30 }
 0x8d1   :  { %v806_v6 = vpop.f32.mrf.mxu2 }
 0x8d2   :  { %v1047_v7 = vpop.permute.xlu0 %1046  ;;  %1935 = vmatmul.msk.f32.vlgmr.msrb.gmra.mxu1 %vm121_vm1, %v806_v6 }
 0x8d3   :  { %1944 = vmatmul.msk.f32.vlgmr.msrb.gmra.mxu2 %vm121_vm1, %v1047_v7 }
 0x8da   :  { %v1159_v8 = vpop.permute.xlu0 %1158 }
 0x8db   :  { %1949 = vmatmul.msk.f32.vlgmr.msra.gmra.mxu2 %vm121_vm1, %v1159_v8 }
 0x8e3   :  { %v1005_v9 = vpop.f32.mrf.mxu2 }
 0x8e4   :  { %v1008_v10 = vmul.f32 0.35355338, %v1005_v9 }
 0x8e6   :  { %v1009_v11 = vsel %vm121_vm1, %v1008_v10, -inf }
 0x8e7   :  { %1010 = vmax.xlane.f32.xlu2 %v1009_v11 }
 0x94f   :  { %v829_v12 = vpop.f32.mrf.mxu1 }
 0x950   :  { %v832_v13 = vadd.f32 %v829_v12, %v742_v62 }
 0x952   :  { %v837_v14 = vadd.f32 %v2350_v41, %v832_v13  ;;  %v979_v13 = vld [vmem:[%s2688_s12 + $0x10] sm:$0xff] }
 0x954   :  { %v839_v15 = vadd.f32 %v837_v14, %v2267_v27  ;;  %v974_v14 = vpop.f32.mrf.mxu0 }
 0x956   :  { %v1071_v16 = vpop.f32.mrf.mxu2  ;;  %v845_v17 = vsel %vm83_vm0, %v839_v15, 0.0 }
 0x957   :  { %v1074_v18 = vmul.f32 0.35355338, %v1071_v16  ;;  %846 = vadd.xlane.f32.xlu1 %v845_v17 }
 0x959   :  { %v1075_v19 = vsel %vm121_vm1, %v1074_v18, -inf }
 0x95a   :  { %1076 = vmax.xlane.f32.xlu0 %v1075_v19  ;;  %v1011_v20 = vpop.xlane.xlu2 %1010 }
 0x95b   :  { %v1012_v21 = vsub.f32 %v1008_v10, %v1011_v20 }
 0x95d   :  { %v1013_v22 = vmul.f32 1.442695, %v1012_v21 }
 0x95e   :  { %v1183_v23 = vpop.f32.mrf.mxu2 }
 0x95f   :  { %2041 = vpow2.f32 %v1013_v22  ;;  %v1186_v24 = vmul.f32 0.35355338, %v1183_v23 }
 0x961   :  { %v1187_v25 = vsel %vm121_vm1, %v1186_v24, -inf }
 0x962   :  { %1188 = vmax.xlane.f32.xlu2 %v1187_v25 }
 0x965   :  { %v2042_v41 = vpop.eup %2041 }
 0x966   :  { %v1015_v27 = vsel %vm121_vm1, %v2042_v41, 0.0 }
 0x967   :  { %1016 = vadd.xlane.f32.xlu0 %v1015_v27 }
 0x9ca   :  { %v847_v26 = vpop.xlane.xlu1 %846 }
 0x9cb   :  { %v856_v28 = vmul.f32 %v2361_v2, %v847_v26 }
 0x9cd   :  { %v858_v29 = vsub.f32 %v839_v15, %v856_v28  ;;  %v1077_v30 = vpop.xlane.xlu0 %1076  ;;  %v2504_v15 = vadd.f32 %v2429_v54, %v974_v14 }
 0x9ce   :  { %v1078_v31 = vsub.f32 %v1074_v18, %v1077_v30 }
 0x9cf   :  { %v860_v32 = vmul.f32 %v858_v29, %v858_v29 }
 0x9d0   :  { %v1079_v33 = vmul.f32 1.442695, %v1078_v31 }
 0x9d1   :  { %v864_v34 = vsel %vm83_vm0, %v860_v32, 0.0 }
 0x9d2   :  { %2043 = vpow2.f32 %v1079_v33  ;;  %865 = vadd.xlane.f32.xlu1 %v864_v34 }
 0x9d5   :  { %v1189_v35 = vpop.xlane.xlu2 %1188 }
 0x9d6   :  { %v1190_v36 = vsub.f32 %v1186_v24, %v1189_v35 }
 0x9d8   :  { %v2044_v37 = vpop.eup %2043  ;;  %v1191_v38 = vmul.f32 1.442695, %v1190_v36 }
 0x9d9   :  { %v1081_v39 = vsel %vm121_vm1, %v2044_v37, 0.0 }
 0x9da   :  { %2045 = vpow2.f32 %v1191_v38  ;;  %1082 = vadd.xlane.f32.xlu2 %v1081_v39  ;;  %v1017_v51 = vpop.xlane.xlu0 %1016 }
 0x9e0   :  { %v2046_v40 = vpop.eup %2045 }
 0x9e1   :  { %v1193_v42 = vsel %vm121_vm1, %v2046_v40, 0.0 }
 0x9e2   :  { %1194 = vadd.xlane.f32.xlu0 %v1193_v42 }
 0x9eb   :  { %1020 = vrot.lane.b32.xlu1 %v2432_v56, %s2084_s28 }
 0x9f2   :  { %1086 = vrot.lane.b32.xlu2 %v2432_v56, %s2085_s29 }
 0x9f3   :  { %1250 = vrot.lane.b32.xlu1 %v2432_v56, %s2722_s9 }
 0x9f6   :  { %1198 = vrot.lane.b32.xlu0 %v2432_v56, %s2723_s3 }
 0x9fa   :  { %1248 = vrot.lane.b32.xlu2 %v935_v1, %s2722_s9 }
 0xa02   :  { %1376 = vrot.lane.b32.xlu2 %v2504_v15, %s2084_s28  ;;  %s2724_s28 = smov 72  }
 0xa45   :  { %v866_v44 = vpop.xlane.xlu1 %865 }
 0xa46   :  { %v868_v45 = vmul.f32 %v866_v44, %v2361_v2 }
 0xa48   :  { %v870_v48 = vadd.f32 1e-05, %v868_v45 }
 0xa4a   :  { %2047 = vrsqrt.f32 %v870_v48  ;;  %vm887_vm7 = vweird.f32 %v870_v48 }
 0xa4b   :  { %2049 = vrcp.f32 %v1017_v51 }
 0xa4d   :  { %v1083_v59 = vpop.xlane.xlu2 %1082 }
 0xa4e   :  { %2051 = vrcp.f32 %v1083_v59  ;;  %v2544_v59 = vld [vmem:[%s2688_s12 + $0x18] sm:$0xff] }
 0xa50   :  { %v2048_v50 = vpop.eup %2047 }
 0xa51   :  { %v882_v55 = vmul.f32 %v2048_v50, %v870_v48  ;;  %vm888_vm6 = vweird.f32 %v2048_v50  ;;  %v2050_v60 = vpop.eup %2049 }
 0xa52   :  { %vm889_vm8 = vmor %vm887_vm7, %vm888_vm6  ;;  %v1019_v0 = vmul.f32 %v2050_v60, %v2042_v41 }
 0xa53   :  { %v883_v57 = vmul.f32 %v2048_v50, %v882_v55 }
 0xa54   :  { %v2052_v8 = vpop.eup %2051 }
 0xa55   :  { %v884_v58 = vmul.f32 0.5, %v883_v57  ;;  %v1087_v5 = vpop.permute.xlu2 %1086  ;;  %v1195_v6 = vpop.xlane.xlu0 %1194  ;;  %v1085_v9 = vmul.f32 %v2052_v8, %v2044_v37 }
 0xa56   :  { %2053 = vrcp.f32 %v1195_v6 }
 0xa57   :  { %v885_v46 = vsub.f32 1.5, %v884_v58 }
 0xa59   :  { %v886_v4 = vmul.f32 %v2048_v50, %v885_v46 }
 0xa5b   :  { %v890_v61 = vsel %vm889_vm8, %v2048_v50, %v886_v4 }
 0xa5c   :  { %v892_v62 = vmul.f32 %v890_v61, %v858_v29  ;;  %v2054_v11 = vpop.eup %2053 }
 0xa5d   :  { %v1021_v1 = vpop.permute.xlu1 %1020  ;;  %v1197_v12 = vmul.f32 %v2054_v11, %v2046_v40  ;;  %v1249_v17 = vpop.permute.xlu2 %1248 }
 0xa5e   :  { %1041 = vmatpush.msra.mxu1 %v1021_v1  ;;  %v897_v3 = vmul.f32 %v2408_v47, %v892_v62 }
 0xa5f   :  { %1942 = vmatmul.msk.f32.vlgmr.msra.gmra.mxu1 %vm121_vm1, %v1019_v0 }
 0xa60   :  { %1107 = vmatpush.msrb.mxu1 %v1087_v5  ;;  %v2490_v7 = vadd.f32 %v2417_v52, %v897_v3  ;;  %v978_v52 = vld [vmem:[%s2688_s12 + $0x8] sm:$0xff] }
 0xa61   :  { %1130 = vmatpush.msrb.mxu3 %v978_v52 }
 0xa62   :  { %1937 = vmatmul.msk.f32.gmra.mxu3 %vm83_vm0, %v2490_v7 }
 0xa63   :  { %1242 = vmatpush.msra.mxu3 %v979_v13 }
 0xa65   :  { %v1251_v10 = vpop.permute.xlu1 %1250  ;;  %v1377_v21 = vpop.permute.xlu2 %1376 }
 0xa66   :  { %1952 = vmatpush.xpose.msk.msra.mxu0 %vm121_vm1, %v1251_v10 }
 0xa67   :  { %1945 = vmatmul.msk.f32.vlgmr.msrb.gmra.mxu1 %vm121_vm1, %v1085_v9 }
 0xa68   :  { %v1199_v47 = vpop.permute.xlu0 %1198 }
 0xa69   :  { %1219 = vmatpush.msra.mxu1 %v1199_v47 }
 0xa6b   :  { %1332 = vmatpush.msrb.mxu1 %v2544_v59 }
 0xa6f   :  { %1950 = vmatmul.msk.f32.vlgmr.msra.gmra.mxu1 %vm121_vm1, %v1197_v12 }
 0xadc   :  { %v1043_v16 = vpop.f32.mrf.mxu1 }
 0xadd   :  { %1947 = vmatmul.msk.f32.vlgmr.msrb.gmra.mxu0 %vm121_vm1, %v1043_v16 }
 0xade   :  { %1397 = vmatpush.msrb.mxu0 %v1377_v21  ;;  %v2563_v21 = vld [vmem:[%s2689_s13] ss:$0 sm:$0xff] }
 0xae4   :  { %v1109_v18 = vpop.f32.mrf.mxu1 }
 0xae5   :  { %1946 = vmatmul.msk.f32.vlgmr.msrb.gmra.mxu3 %vm121_vm1, %v1109_v18  ;;  %1953 = vmatmul.msk.f32.vlgmr.msra.gmra.mxu0 %vm121_vm1, %v1249_v17  ;;  %v937_v54 = vpop.f32.mrf.mxu3 }
 0xae6   :  { %1956 = vmatpush.xpose.msk.msrb.mxu3 %vm121_vm1, %v2504_v15  ;;  %v938_v20 = vadd.f32 %v2445_v63, %v937_v54  ;;  %1509 = vmatpush.msra.mxu0 %v2479_v43 }
 0xaec   :  { %v1221_v19 = vpop.f32.mrf.mxu1 }
 0xaed   :  { %1951 = vmatmul.msk.f32.vlgmr.msra.gmra.mxu3 %vm121_vm1, %v1221_v19 }
 0xaee   :  { %1486 = vmatpush.msra.mxu3 %v978_v52 }
 0xaf5   :  { %1957 = vmatmul.msk.f32.vlgmr.msrb.gmra.mxu3 %vm121_vm1, %v938_v20 }
 0xaf6   :  { %1598 = vmatpush.msrb.mxu3 %v979_v13 }
 0xb5a   :  { %v1155_v22 = vpop.f32.mrf.mxu0 }
 0xb62   :  { %v1273_v23 = vpop.f32.mrf.mxu0 }
 0xb63   :  { %v1276_v24 = vmul.f32 0.35355338, %v1273_v23 }
 0xb65   :  { %v1277_v25 = vsel %vm121_vm1, %v1276_v24, -inf }
 0xb66   :  { %1278 = vmax.xlane.f32.xlu2 %v1277_v25 }
 0xb68   :  { %v1132_v41 = vpop.f32.mrf.mxu3 }
 0xb69   :  { %v1156_v27 = vadd.f32 %v1155_v22, %v1132_v41 }
 0xb70   :  { %v1244_v26 = vpop.f32.mrf.mxu3 }
 0xb71   :  { %v2518_v28 = vadd.f32 %v1244_v26, %v1156_v27 }
 0xb78   :  { %v1361_v29 = vpop.f32.mrf.mxu3 }
 0xb79   :  { %v1364_v63 = vmul.f32 0.35355338, %v1361_v29 }
 0xb7b   :  { %v1365_v30 = vsel %vm121_vm1, %v1364_v63, -inf }
 0xb7c   :  { %1366 = vmax.xlane.f32.xlu0 %v1365_v30 }
 0xb7e   :  { %1402 = vrot.lane.b32.xlu2 %v938_v20, %s2083_s4 }
 0xbd9   :  { %v1279_v31 = vpop.xlane.xlu2 %1278 }
 0xbda   :  { %v1280_v32 = vsub.f32 %v1276_v24, %v1279_v31 }
 0xbdc   :  { %v1281_v33 = vmul.f32 1.442695, %v1280_v32 }
 0xbde   :  { %2055 = vpow2.f32 %v1281_v33 }
 0xbe1   :  { %v1403_v55 = vpop.permute.xlu2 %1402 }
 0xbe4   :  { %v2056_v34 = vpop.eup %2055 }
 0xbe5   :  { %v1283_v35 = vsel %vm121_vm1, %v2056_v34, 0.0 }
 0xbe6   :  { %1284 = vadd.xlane.f32.xlu0 %v1283_v35 }
 0xbef   :  { %v1367_v36 = vpop.xlane.xlu0 %1366 }
 0xbf0   :  { %v1368_v37 = vsub.f32 %v1364_v63, %v1367_v36 }
 0xbf2   :  { %v1369_v38 = vmul.f32 1.442695, %v1368_v37 }
 0xbf4   :  { %2057 = vpow2.f32 %v1369_v38 }
 0xbfa   :  { %v2058_v39 = vpop.eup %2057  ;;  %1404 = vrot.lane.b32.xlu0 %v2504_v15, %s2083_s4 }
 0xbfb   :  { %v1371_v40 = vsel %vm121_vm1, %v2058_v39, 0.0 }
 0xbfc   :  { %1372 = vadd.xlane.f32.xlu1 %v1371_v40 }
 0xc02   :  { %1514 = vrot.lane.b32.xlu0 %v938_v20, %s2086_s30 }
 0xc0a   :  { %1604 = vrot.lane.b32.xlu0 %v938_v20, %s2722_s9 }
 0xc15   :  { %1288 = vrot.lane.b32.xlu1 %v2432_v56, %s2724_s28 }
 0xc1d   :  { %1516 = vrot.lane.b32.xlu1 %v2504_v15, %s2086_s30 }
 0xc25   :  { %1606 = vrot.lane.b32.xlu1 %v2504_v15, %s2722_s9 }
 0xc59   :  { %v1285_v45 = vpop.xlane.xlu0 %1284 }
 0xc6c   :  { %v1405_v51 = vpop.permute.xlu0 %1404 }
 0xc6f   :  { %v1373_v42 = vpop.xlane.xlu1 %1372 }
 0xc70   :  { %2059 = vrcp.f32 %v1373_v42 }
 0xc71   :  { %2061 = vrcp.f32 %v1285_v45 }
 0xc74   :  { %v1515_v58 = vpop.permute.xlu0 %1514 }
 0xc76   :  { %v2060_v43 = vpop.eup %2059 }
 0xc77   :  { %v1375_v44 = vmul.f32 %v2060_v43, %v2058_v39  ;;  %v2062_v48 = vpop.eup %2061 }
 0xc78   :  { %v1287_v49 = vmul.f32 %v2062_v48, %v2056_v34  ;;  %v1760_v48 = vld [vmem:[%s2692_s16 + $0x18] sm:$0xff] }
 0xc79   :  { %1958 = vmatmul.msk.f32.vlgmr.msrb.gmra.mxu0 %vm121_vm1, %v1375_v44 }
 0xc7c   :  { %v1605_v4 = vpop.permute.xlu0 %1604 }
 0xc87   :  { %v1289_v50 = vpop.permute.xlu1 %1288 }
 0xc88   :  { %1309 = vmatpush.msrb.mxu2 %v1289_v50  ;;  %v1758_v50 = vld [vmem:[%s2692_s16 + $0x8] sm:$0xff] }
 0xc89   :  { %1954 = vmatmul.msk.f32.vlgmr.msrb.gmra.mxu2 %vm121_vm1, %v1287_v49  ;;  %v1759_v49 = vld [vmem:[%s2692_s16 + $0x10] sm:$0xff] }
 0xc8a   :  { %1959 = vmatpush.xpose.msk.msra.mxu2 %vm121_vm1, %v1405_v51  ;;  %v1757_v51 = vld [vmem:[%s2692_s16] sm:$0xff] }
 0xc8f   :  { %v1517_v56 = vpop.permute.xlu1 %1516 }
 0xc90   :  { %1964 = vmatpush.xpose.msk.msrb.mxu2 %vm121_vm1, %v1517_v56 }
 0xc91   :  { %1960 = vmatmul.msk.f32.vlgmr.msra.gmra.mxu2 %vm121_vm1, %v1403_v55 }
 0xc97   :  { %v1607_v57 = vpop.permute.xlu1 %1606 }
 0xc98   :  { %1968 = vmatpush.xpose.msk.msrb.mxu0 %vm121_vm1, %v1607_v57 }
 0xc99   :  { %1965 = vmatmul.msk.f32.vlgmr.msrb.gmra.mxu2 %vm121_vm1, %v1515_v58 }
 0xcf6   :  { %v1399_v46 = vpop.f32.mrf.mxu0 }
 0xcf7   :  { %1963 = vmatmul.msk.f32.vlgmr.msra.gmra.mxu0 %vm121_vm1, %v1399_v46 }
 0xcff   :  { %1969 = vmatmul.msk.f32.vlgmr.msrb.gmra.mxu0 %vm121_vm1, %v1605_v4 }
 0xd0c   :  { %v1311_v60 = vpop.f32.mrf.mxu2 }
 0xd0d   :  { %1955 = vmatmul.msk.f32.vlgmr.msrb.gmra.mxu1 %vm121_vm1, %v1311_v60 }
 0xd14   :  { %v1427_v61 = vpop.f32.mrf.mxu2 }
 0xd15   :  { %v1430_v62 = vmul.f32 0.35355338, %v1427_v61 }
 0xd17   :  { %v1431_v0 = vsel %vm121_vm1, %v1430_v62, -inf }
 0xd18   :  { %1432 = vmax.xlane.f32.xlu2 %v1431_v0 }
 0xd1c   :  { %v1539_v1 = vpop.f32.mrf.mxu2 }
 0xd1d   :  { %v1542_v3 = vmul.f32 0.35355338, %v1539_v1 }
 0xd1f   :  { %v1543_v5 = vsel %vm121_vm1, %v1542_v3, -inf }
 0xd20   :  { %1544 = vmax.xlane.f32.xlu1 %v1543_v5 }
 0xd74   :  { %v2552_v6 = vpop.f32.mrf.mxu0 }
 0xd7c   :  { %v1629_v8 = vpop.f32.mrf.mxu0 }
 0xd7d   :  { %v1632_v9 = vmul.f32 0.35355338, %v1629_v8 }
 0xd7f   :  { %v1633_v10 = vsel %vm121_vm1, %v1632_v9, -inf }
 0xd80   :  { %1634 = vmax.xlane.f32.xlu0 %v1633_v10  ;;  %v1803_v10 = vld [vmem:[%s2695_s18 + $0x38] sm:$0xff] }
 0xd81   :  { %1823 = vmatpush.msra.mxu0 %v1803_v10 }
 0xd8a   :  { %v1334_v54 = vpop.f32.mrf.mxu1 }
 0xd8b   :  { %v1433_v47 = vpop.xlane.xlu2 %1432  ;;  %v1337_v20 = vadd.f32 %v1334_v54, %v2518_v28 }
 0xd8c   :  { %v1434_v11 = vsub.f32 %v1430_v62, %v1433_v47  ;;  %v2597_v62 = vld [vmem:[%s2690_s14] ss:$0 sm:$0xff]  ;;  %v1802_v47 = vld [vmem:[%s2695_s18 + $0x30] sm:$0xff] }
 0xd8d   :  { %v1697_v22 = vadd.f32 %v2563_v21, %v1337_v20  ;;  %1824 = vmatpush.msra.mxu0 %v1802_v47 }
 0xd8e   :  { %v1435_v12 = vmul.f32 1.442695, %v1434_v11  ;;  %v1801_v11 = vld [vmem:[%s2695_s18 + $0x28] sm:$0xff] }
 0xd8f   :  { %v1699_v23 = vadd.f32 %v1697_v22, %v2420_v53  ;;  %1825 = vmatpush.msra.mxu0 %v1801_v11 }
 0xd90   :  { %2063 = vpow2.f32 %v1435_v12  ;;  %v1800_v12 = vld [vmem:[%s2695_s18 + $0x20] sm:$0xff] }
 0xd91   :  { %v1703_v24 = vsel %vm83_vm0, %v1699_v23, 0.0  ;;  %1826 = vmatpush.msra.mxu0 %v1800_v12 }
 0xd93   :  { %v1545_v52 = vpop.xlane.xlu1 %1544 }
 0xd94   :  { %v1546_v13 = vsub.f32 %v1542_v3, %v1545_v52  ;;  %1442 = vrot.lane.b32.xlu0 %v2504_v15, %s2085_s29  ;;  %v2602_v3 = vld [vmem:[%s2691_s15] ss:$0 sm:$0xff]  ;;  %v1799_v52 = vld [vmem:[%s2695_s18 + $0x18] sm:$0xff] }
 0xd95   :  { %1827 = vmatpush.msra.mxu0 %v1799_v52 }
 0xd96   :  { %v2064_v14 = vpop.eup %2063  ;;  %v1547_v16 = vmul.f32 1.442695, %v1546_v13  ;;  %v1798_v13 = vld [vmem:[%s2695_s18 + $0x10] sm:$0xff] }
 0xd97   :  { %v1437_v17 = vsel %vm121_vm1, %v2064_v14, 0.0  ;;  %1828 = vmatpush.msra.mxu0 %v1798_v13 }
 0xd98   :  { %2065 = vpow2.f32 %v1547_v16  ;;  %1438 = vadd.xlane.f32.xlu2 %v1437_v17  ;;  %v1796_v16 = vld [vmem:[%s2695_s18] sm:$0xff] }
 0xd9e   :  { %v2066_v18 = vpop.eup %2065 }
 0xd9f   :  { %v1549_v19 = vsel %vm121_vm1, %v2066_v18, 0.0 }
 0xda0   :  { %1550 = vadd.xlane.f32.xlu1 %v1549_v19  ;;  %v2635_v19 = vld [vmem:[%s2693_s17] ss:$0 sm:$0xff] }
 0xdb9   :  { %1554 = vrot.lane.b32.xlu1 %v2504_v15, %s2723_s3 }
 0xdbe   :  { %1704 = vadd.xlane.f32.xlu0 %v1703_v24 }
 0xdf3   :  { %v1635_v25 = vpop.xlane.xlu0 %1634 }
 0xdf4   :  { %v1636_v41 = vsub.f32 %v1632_v9, %v1635_v25 }
 0xdf6   :  { %v1637_v27 = vmul.f32 1.442695, %v1636_v41 }
 0xdf8   :  { %2067 = vpow2.f32 %v1637_v27 }
 0xdfe   :  { %v2068_v26 = vpop.eup %2067 }
 0xdff   :  { %v1639_v28 = vsel %vm121_vm1, %v2068_v26, 0.0 }
 0xe00   :  { %1640 = vadd.xlane.f32.xlu2 %v1639_v28 }
 0xe06   :  { %v1443_v29 = vpop.permute.xlu0 %1442 }
 0xe07   :  { %1463 = vmatpush.msra.mxu1 %v1443_v29 }
 0xe0b   :  { %v1439_v63 = vpop.xlane.xlu2 %1438 }
 0xe0c   :  { %2069 = vrcp.f32 %v1439_v63 }
 0xe12   :  { %v2070_v30 = vpop.eup %2069 }
 0xe13   :  { %v1441_v31 = vmul.f32 %v2070_v30, %v2064_v14  ;;  %v1551_v53 = vpop.xlane.xlu1 %1550  ;;  %v1797_v14 = vld [vmem:[%s2695_s18 + $0x8] sm:$0xff]  ;;  %v2002_v30 = vld [vmem:[%s2694_s19] ss:$0 sm:$0xff] }
 0xe14   :  { %2071 = vrcp.f32 %v1551_v53  ;;  %1829 = vmatpush.msra.mxu0 %v1797_v14 }
 0xe15   :  { %1961 = vmatmul.msk.f32.vlgmr.msra.gmra.mxu1 %vm121_vm1, %v1441_v31 }
 0xe16   :  { %1830 = vmatpush.msra.mxu0 %v1796_v16 }
 0xe18   :  { %1644 = vrot.lane.b32.xlu2 %v2504_v15, %s2724_s28 }
 0xe1a   :  { %v2072_v32 = vpop.eup %2071 }
 0xe1b   :  { %v1553_v33 = vmul.f32 %v2072_v32, %v2066_v18 }
 0xe2b   :  { %v1555_v34 = vpop.permute.xlu1 %1554 }
 0xe2c   :  { %1575 = vmatpush.msrb.mxu1 %v1555_v34 }
 0xe2d   :  { %1966 = vmatmul.msk.f32.vlgmr.msrb.gmra.mxu1 %vm121_vm1, %v1553_v33 }
 0xe2e   :  { %1688 = vmatpush.msra.mxu1 %v2544_v59 }
 0xe31   :  { %v1705_v35 = vpop.xlane.xlu0 %1704 }
 0xe32   :  { %v1709_v36 = vmul.f32 %v1705_v35, %v2361_v2 }
 0xe34   :  { %v1711_v37 = vsub.f32 %v1699_v23, %v1709_v36 }
 0xe36   :  { %v1713_v38 = vmul.f32 %v1711_v37, %v1711_v37 }
 0xe38   :  { %v1715_v39 = vsel %vm83_vm0, %v1713_v38, 0.0 }
 0xe41   :  { %1716 = vadd.xlane.f32.xlu2 %v1715_v39 }
 0xe73   :  { %v1641_v40 = vpop.xlane.xlu2 %1640 }
 0xe74   :  { %2073 = vrcp.f32 %v1641_v40 }
 0xe7a   :  { %v2074_v15 = vpop.eup %2073 }
 0xe7b   :  { %v1643_v42 = vmul.f32 %v2074_v15, %v2068_v26  ;;  %v1645_v43 = vpop.permute.xlu2 %1644 }
 0xe7c   :  { %1665 = vmatpush.msra.mxu2 %v1645_v43 }
 0xe7d   :  { %1970 = vmatmul.msk.f32.vlgmr.msra.gmra.mxu2 %vm121_vm1, %v1643_v42 }
 0xe92   :  { %v1465_v44 = vpop.f32.mrf.mxu1 }
 0xe93   :  { %1962 = vmatmul.msk.f32.vlgmr.msra.gmra.mxu3 %vm121_vm1, %v1465_v44 }
 0xe94   :  { %1783 = vmatpush.msra.mxu3 %v1760_v48 }
 0xe96   :  { %1784 = vmatpush.msra.mxu3 %v1759_v49 }
 0xe98   :  { %1785 = vmatpush.msra.mxu3 %v1758_v50 }
 0xe9a   :  { %1786 = vmatpush.msra.mxu3 %v1757_v51 }
 0xeaa   :  { %v1577_v45 = vpop.f32.mrf.mxu1 }
 0xeab   :  { %1967 = vmatmul.msk.f32.vlgmr.msrb.gmra.mxu3 %vm121_vm1, %v1577_v45 }
 0xeb4   :  { %v1717_v56 = vpop.xlane.xlu2 %1716 }
 0xeb5   :  { %v1721_v55 = vmul.f32 %v1717_v56, %v2361_v2 }
 0xeb7   :  { %v1723_v57 = vadd.f32 1e-05, %v1721_v55 }
 0xeb9   :  { %2075 = vrsqrt.f32 %v1723_v57  ;;  %vm1731_vm10 = vweird.f32 %v1723_v57 }
 0xebf   :  { %v2076_v58 = vpop.eup %2075 }
 0xec0   :  { %v1726_v59 = vmul.f32 %v2076_v58, %v1723_v57  ;;  %vm1732_vm9 = vweird.f32 %v2076_v58 }
 0xec1   :  { %vm1733_vm11 = vmor %vm1731_vm10, %vm1732_vm9 }
 0xec2   :  { %v1727_v46 = vmul.f32 %v2076_v58, %v1726_v59 }
 0xec4   :  { %v1728_v4 = vmul.f32 0.5, %v1727_v46 }
 0xec6   :  { %v1729_v60 = vsub.f32 1.5, %v1728_v4 }
 0xec8   :  { %v1730_v61 = vmul.f32 %v2076_v58, %v1729_v60 }
 0xeca   :  { %v1734_v0 = vsel %vm1733_vm11, %v2076_v58, %v1730_v61 }
 0xecb   :  { %v1745_v1 = vmul.f32 %v1734_v0, %v1711_v37 }
 0xecd   :  { %v1750_v5 = vmul.f32 %v2597_v62, %v1745_v1 }
 0xecf   :  { %v1755_v8 = vadd.f32 %v2602_v3, %v1750_v5  ;;  %v2004_v5 = vld [vmem:[%s2697_s21] ss:$0 sm:$0xff] }
 0xed1   :  { %1972 = vmatmul.msk.f32.vlgmr.msra.gmra.mxu3 %vm83_vm0, %v1755_v8 }
 0xf00   :  { %v1667_v9 = vpop.f32.mrf.mxu2 }
 0xf01   :  { %1971 = vmatmul.msk.f32.vlgmr.msra.gmra.mxu1 %vm121_vm1, %v1667_v9 }
 0xf16   :  { %v1488_v17 = vpop.f32.mrf.mxu3 }
 0xf17   :  { %v1512_v23 = vadd.f32 %v2552_v6, %v1488_v17 }
 0xf2e   :  { %v1600_v18 = vpop.f32.mrf.mxu3 }
 0xf2f   :  { %v1603_v24 = vadd.f32 %v1600_v18, %v1512_v23 }
 0xf54   :  { %v1788_v54 = vpop.f32.mrf.mxu3 }
 0xf55   :  { %v1789_v20 = vadd.f32 %v2635_v19, %v1788_v54 }
 0xf57   :  { %v1794_v22 = vmax.f32 %v1789_v20, 0.0 }
 0xf59   :  { %1974 = vmatmul.msk.f32.vlgmr.msra.gmra.mxu0 %vm1808_vm12, %v1794_v22 }
 0xf7e   :  { %v1690_v25 = vpop.f32.mrf.mxu1 }
 0xf7f   :  { %v1693_v41 = vadd.f32 %v1690_v25, %v1603_v24 }
 0xf81   :  { %v1698_v27 = vadd.f32 %v2563_v21, %v1693_v41 }
 0xf83   :  { %v1700_v26 = vadd.f32 %v1698_v27, %v2490_v7 }
 0xf85   :  { %v1706_v28 = vsel %vm83_vm0, %v1700_v26, 0.0 }
 0xf86   :  { %1707 = vadd.xlane.f32.xlu1 %v1706_v28 }
 0xfd6   :  { %v1832_v53 = vpop.f32.mrf.mxu0 }
 0xfd7   :  { %v1833_v32 = vadd.f32 %v2002_v30, %v1832_v53 }
 0xfd9   :  { %v1838_v21 = vadd.f32 %v1833_v32, %v1755_v8 }
 0xfdb   :  { %v1842_v7 = vsel %vm83_vm0, %v1838_v21, 0.0 }
 0xff9   :  { %v1708_v29 = vpop.xlane.xlu1 %1707 }
 0xffa   :  { %v1710_v63 = vmul.f32 %v1708_v29, %v2361_v2 }
 0xffc   :  { %v1712_v31 = vsub.f32 %v1700_v26, %v1710_v63 }
 0xffe   :  { %v1714_v6 = vmul.f32 %v1712_v31, %v1712_v31 }
0x1000   :  { %v1718_v33 = vsel %vm83_vm0, %v1714_v6, 0.0 }
0x1001   :  { %1719 = vadd.xlane.f32.xlu0 %v1718_v33 }
0x1009   :  { %1843 = vadd.xlane.f32.xlu0 %v1842_v7 }
0x1074   :  { %v1720_v34 = vpop.xlane.xlu0 %1719 }
0x1075   :  { %v1722_v35 = vmul.f32 %v1720_v34, %v2361_v2 }
0x1077   :  { %v1724_v36 = vadd.f32 1e-05, %v1722_v35 }
0x1079   :  { %2077 = vrsqrt.f32 %v1724_v36  ;;  %vm1741_vm14 = vweird.f32 %v1724_v36 }
0x107c   :  { %v1844_v37 = vpop.xlane.xlu0 %1843 }
0x107d   :  { %v1848_v38 = vmul.f32 %v1844_v37, %v2361_v2 }
0x107f   :  { %v2078_v39 = vpop.eup %2077  ;;  %v1850_v40 = vsub.f32 %v1838_v21, %v1848_v38 }
0x1080   :  { %v1736_v15 = vmul.f32 %v2078_v39, %v1724_v36  ;;  %vm1742_vm13 = vweird.f32 %v2078_v39 }
0x1081   :  { %v1852_v42 = vmul.f32 %v1850_v40, %v1850_v40  ;;  %vm1743_vm15 = vmor %vm1741_vm14, %vm1742_vm13 }
0x1082   :  { %v1737_v43 = vmul.f32 %v2078_v39, %v1736_v15 }
0x1083   :  { %v1854_v44 = vsel %vm83_vm0, %v1852_v42, 0.0 }
0x1084   :  { %v1738_v45 = vmul.f32 0.5, %v1737_v43  ;;  %1855 = vadd.xlane.f32.xlu2 %v1854_v44 }
0x1086   :  { %v1739_v48 = vsub.f32 1.5, %v1738_v45 }
0x1088   :  { %v1740_v49 = vmul.f32 %v2078_v39, %v1739_v48 }
0x108a   :  { %v1744_v50 = vsel %vm1743_vm15, %v2078_v39, %v1740_v49 }
0x108b   :  { %v1746_v51 = vmul.f32 %v1744_v50, %v1712_v31 }
0x108d   :  { %v1751_v56 = vmul.f32 %v2597_v62, %v1746_v51  ;;  %v2003_v62 = vld [vmem:[%s2696_s20] ss:$0 sm:$0xff] }
0x108f   :  { %v1756_v55 = vadd.f32 %v2602_v3, %v1751_v56 }
0x1091   :  { %1973 = vmatmul.msk.f32.gmra.mxu3 %vm83_vm0, %v1756_v55 }
0x10f7   :  { %v1856_v57 = vpop.xlane.xlu2 %1855 }
0x10f8   :  { %v1860_v58 = vmul.f32 %v1856_v57, %v2361_v2 }
0x10fa   :  { %v1862_v59 = vadd.f32 1e-05, %v1860_v58 }
0x10fc   :  { %2079 = vrsqrt.f32 %v1862_v59  ;;  %vm1870_vm2 = vweird.f32 %v1862_v59 }
0x1102   :  { %v2080_v46 = vpop.eup %2079 }
0x1103   :  { %v1865_v4 = vmul.f32 %v2080_v46, %v1862_v59  ;;  %vm1871_vm1 = vweird.f32 %v2080_v46 }
0x1104   :  { %vm1872_vm3 = vmor %vm1870_vm2, %vm1871_vm1 }
0x1105   :  { %v1866_v60 = vmul.f32 %v2080_v46, %v1865_v4 }
0x1107   :  { %v1867_v61 = vmul.f32 0.5, %v1866_v60 }
0x1109   :  { %v1868_v0 = vsub.f32 1.5, %v1867_v61 }
0x110b   :  { %v1869_v1 = vmul.f32 %v2080_v46, %v1868_v0 }
0x110d   :  { %v1873_v3 = vsel %vm1872_vm3, %v2080_v46, %v1869_v1 }
0x110e   :  { %v1884_v8 = vmul.f32 %v1873_v3, %v1850_v40 }
0x1110   :  { %v1889_v9 = vmul.f32 %v2003_v62, %v1884_v8 }
0x1112   :  { %v1894_v10 = vadd.f32 %v2004_v5, %v1889_v9 }
0x1114   :  { %1896 = vst.msk [vmem:[%s2698_s22] sm:$0xff] %vm83_vm0, %v1894_v10  ;;  %v1791_v47 = vpop.f32.mrf.mxu3 }
0x1115   :  { %v1792_v11 = vadd.f32 %v2635_v19, %v1791_v47 }
0x1117   :  { %v1795_v12 = vmax.f32 %v1792_v11, 0.0 }
0x1119   :  { %1975 = vmatmul.msk.f32.gmra.mxu0 %vm1808_vm12, %v1795_v12 }
0x1196   :  { %v1835_v52 = vpop.f32.mrf.mxu0 }
0x1197   :  { %v1836_v13 = vadd.f32 %v2002_v30, %v1835_v52 }
0x1199   :  { %v1839_v14 = vadd.f32 %v1836_v13, %v1756_v55 }
0x119b   :  { %v1845_v16 = vsel %vm83_vm0, %v1839_v14, 0.0 }
0x119c   :  { %1846 = vadd.xlane.f32.xlu1 %v1845_v16 }
0x120f   :  { %v1847_v17 = vpop.xlane.xlu1 %1846 }
0x1210   :  { %v1849_v18 = vmul.f32 %v1847_v17, %v2361_v2 }
0x1212   :  { %v1851_v54 = vsub.f32 %v1839_v14, %v1849_v18 }
0x1214   :  { %v1853_v20 = vmul.f32 %v1851_v54, %v1851_v54 }
0x1216   :  { %v1857_v22 = vsel %vm83_vm0, %v1853_v20, 0.0 }
0x1217   :  { %1858 = vadd.xlane.f32.xlu0 %v1857_v22 }
0x128a   :  { %v1859_v23 = vpop.xlane.xlu0 %1858 }
0x128b   :  { %v1861_v19 = vmul.f32 %v1859_v23, %v2361_v2 }
0x128d   :  { %v1863_v24 = vadd.f32 1e-05, %v1861_v19 }
0x128f   :  { %2081 = vrsqrt.f32 %v1863_v24  ;;  %vm1880_vm5 = vweird.f32 %v1863_v24 }
0x1295   :  { %v2082_v25 = vpop.eup %2081 }
0x1296   :  { %v1875_v41 = vmul.f32 %v2082_v25, %v1863_v24  ;;  %vm1881_vm4 = vweird.f32 %v2082_v25 }
0x1297   :  { %vm1882_vm6 = vmor %vm1880_vm5, %vm1881_vm4 }
0x1298   :  { %v1876_v27 = vmul.f32 %v2082_v25, %v1875_v41 }
0x129a   :  { %v1877_v26 = vmul.f32 0.5, %v1876_v27 }
0x129c   :  { %v1878_v28 = vsub.f32 1.5, %v1877_v26 }
0x129e   :  { %v1879_v29 = vmul.f32 %v2082_v25, %v1878_v28 }
0x12a0   :  { %v1883_v63 = vsel %vm1882_vm6, %v2082_v25, %v1879_v29 }
0x12a1   :  { %v1885_v30 = vmul.f32 %v1883_v63, %v1851_v54 }
0x12a3   :  { %v1890_v31 = vmul.f32 %v2003_v62, %v1885_v30 }
0x12a5   :  { %v1895_v53 = vadd.f32 %v2004_v5, %v1890_v31 }
0x12a7   :  { %1897 = vst.msk [vmem:[%s2698_s22 + $0x8] sm:$0xff] %vm83_vm0, %v1895_v53 }

// kernel: fwd.11
= control target key start
LH: loop header
LB: loop body
LE: loop exit
PB: predicated region body
PF: predicated region fallthrough
CT: control target
= control target key end

     0   :  { %8 = vsyncpa [#allocation3], 0  ;;  %s109_s15 = smov [#allocation2]   ;;  %s157_s0 = inlined_call_operand.vmem [shape: f32[16,32], index: 0, kind: input, shape index: {}]   ;;  %s158_s1 = inlined_call_operand.vmem [shape: f32[32,128], index: 1, kind: input, shape index: {}]   ;;  %s159_s2 = inlined_call_operand.hbm [shape: f32[1,128], index: 2, kind: input, shape index: {}]   ;;  %s160_s3 = inlined_call_operand.vmem [shape: f32[16,128], index: 3, kind: output, shape index: {}]  }
   0x1   :  { %s18_s14 = sshll.u32 %s159_s2, 4  ;;  %s20_s16 = sshll.u32 %s109_s15, 4  ;;  %s19_s14 = int_to_ptr.hbm [resolvable:$true] %s18_s14  ;;  %s21_s16 = int_to_ptr.vmem [resolvable:$true] %s20_s16 }
   0x2   :  { %23 = dma.hbm_to_vmem [thread:$0]  %s19_s14, 16, %s21_s16, [#allocation3]  }
   0x3   :  { %107 = dma.done.wait [#allocation3], 16  }
   0x4   :  { %108 = vsyncadd [#allocation3], 4294967280  ;;  %v33_v0 = vld [vmem:[%s158_s1 + $0x18] sm:$0xff]  ;;  %v32_v1 = vld [vmem:[%s158_s1 + $0x10] sm:$0xff]  ;;  %vm38_vm0 = vcmask 261120  }
   0x5   :  { %57 = vmatpush.msra.mxu0 %v33_v0  ;;  %77 = vmatpush.msra.mxu1 %v33_v0  ;;  %v31_v2 = vld [vmem:[%s158_s1 + $0x8] sm:$0xff]  ;;  %v30_v3 = vld [vmem:[%s158_s1] sm:$0xff] }
   0x6   :  { %v28_v4 = vld [vmem:[%s157_s0] sm:$0xff]  ;;  %v29_v5 = vld [vmem:[%s157_s0 + $0x8] sm:$0xff] }
   0x7   :  { %58 = vmatpush.msra.mxu0 %v32_v1  ;;  %78 = vmatpush.msra.mxu1 %v32_v1  ;;  %v82_v6 = vld [vmem:[#allocation2] ss:$0 sm:$0xff] }
   0x9   :  { %59 = vmatpush.msra.mxu0 %v31_v2  ;;  %79 = vmatpush.msra.mxu1 %v31_v2 }
   0xb   :  { %60 = vmatpush.msra.mxu0 %v30_v3  ;;  %80 = vmatpush.msra.mxu1 %v30_v3 }
   0xc   :  { %75 = vmatmul.msk.f32.vlgmr.msra.gmra.mxu0 %vm38_vm0, %v28_v4  ;;  %76 = vmatmul.msk.f32.vlgmr.msra.gmra.mxu1 %vm38_vm0, %v29_v5 }
  0x89   :  { %v62_v7 = vpop.f32.mrf.mxu0  ;;  %v65_v8 = vpop.f32.mrf.mxu1 }
  0x8a   :  { %v63_v9 = vadd.f32 %v82_v6, %v62_v7  ;;  %v66_v10 = vadd.f32 %v82_v6, %v65_v8 }
  0x8c   :  { %68 = vst [vmem:[%s160_s3] sm:$0xff] %v63_v9 }
  0x8d   :  { %69 = vst [vmem:[%s160_s3 + $0x8] sm:$0xff] %v66_v10 }
  0x8e   :  { %74 = vsyncpa [#allocation3], 1 }

// kernel: fwd.10
= control target key start
LH: loop header
LB: loop body
LE: loop exit
PB: predicated region body
PF: predicated region fallthrough
CT: control target
= control target key end

     0   :  { %s3206_s0 = inlined_call_operand.vmem [shape: f32[16,32], index: 0, kind: input, shape index: {}]   ;;  %s3207_s1 = inlined_call_operand.vmem [shape: f32[16,32], index: 1, kind: input, shape index: {}]   ;;  %s3208_s2 = inlined_call_operand.vmem [shape: f32[32,96], index: 2, kind: input, shape index: {}]   ;;  %s3209_s3 = inlined_call_operand.hbm [shape: f32[1,96], index: 3, kind: input, shape index: {}]   ;;  %s3210_s4 = inlined_call_operand.vmem [shape: f32[32,32], index: 4, kind: input, shape index: {}]   ;;  %s3211_s5 = inlined_call_operand.hbm [shape: f32[1,32], index: 5, kind: input, shape index: {}]   ;;  %s3212_s6 = inlined_call_operand.hbm [shape: f32[1,32], index: 6, kind: input, shape index: {}]   ;;  %s3213_s7 = inlined_call_operand.hbm [shape: f32[1,32], index: 7, kind: input, shape index: {}]   ;;  %s3214_s8 = inlined_call_operand.vmem [shape: f32[32,32], index: 8, kind: input, shape index: {}]   ;;  %s3215_s9 = inlined_call_operand.hbm [shape: f32[1,32], index: 9, kind: input, shape index: {}]   ;;  %s3216_s10 = inlined_call_operand.vmem [shape: f32[32,64], index: 10, kind: input, shape index: {}]   ;;  %s3217_s11 = inlined_call_operand.hbm [shape: f32[1,64], index: 11, kind: input, shape index: {}]   ;;  %s3218_s12 = inlined_call_operand.vmem [shape: f32[32,32], index: 12, kind: input, shape index: {}]   ;;  %s3219_s13 = inlined_call_operand.hbm [shape: f32[1,32], index: 13, kind: input, shape index: {}]   ;;  %s3220_s14 = inlined_call_operand.hbm [shape: f32[1,32], index: 14, kind: input, shape index: {}]   ;;  %s3221_s15 = inlined_call_operand.hbm [shape: f32[1,32], index: 15, kind: input, shape index: {}]   ;;  %s3222_s16 = inlined_call_operand.vmem [shape: f32[32,64], index: 16, kind: input, shape index: {}]   ;;  %s3223_s17 = inlined_call_operand.hbm [shape: f32[1,64], index: 17, kind: input, shape index: {}]   ;;  %s3224_s18 = inlined_call_operand.vmem [shape: f32[64,32], index: 18, kind: input, shape index: {}]   ;;  %s3225_s19 = inlined_call_operand.hbm [shape: f32[1,32], index: 19, kind: input, shape index: {}]   ;;  %s3226_s20 = inlined_call_operand.hbm [shape: f32[1,32], index: 20, kind: input, shape index: {}]   ;;  %s3227_s21 = inlined_call_operand.hbm [shape: f32[1,32], index: 21, kind: input, shape index: {}]   ;;  %s3228_s22 = inlined_call_operand.vmem [shape: f32[16,32], index: 22, kind: output, shape index: {}]  }
   0x1   :  { %3233 = sst [smem:[#allocation29_spill]] %s3206_s0 }
   0x2   :  { %3234 = sst [smem:[#allocation30_spill]] %s3207_s1 }
   0x3   :  { %3235 = sst [smem:[#allocation31_spill]] %s3208_s2 }
   0x4   :  { %3236 = sst [smem:[#allocation32_spill]] %s3209_s3 }
   0x5   :  { %3237 = sst [smem:[#allocation33_spill]] %s3210_s4 }
   0x6   :  { %3238 = sst [smem:[#allocation34_spill]] %s3211_s5 }
   0x7   :  { %3239 = sst [smem:[#allocation35_spill]] %s3212_s6 }
   0x8   :  { %27 = vsyncpa [#allocation3], 0 }
   0x9   :  { %28 = vsyncpa [#allocation5], 0 }
   0xa   :  { %29 = vsyncpa [#allocation8], 0 }
   0xb   :  { %30 = vsyncpa [#allocation11], 0 }
   0xc   :  { %31 = vsyncpa [#allocation14], 0 }
   0xd   :  { %32 = vsyncpa [#allocation17], 0  ;;  %s3240_s29 = sld [smem:[#allocation34_spill]] }
  0x13   :  { %s58_s30 = sshll.u32 %s3240_s29, 4  ;;  %s59_s30 = int_to_ptr.hbm [resolvable:$true] %s58_s30 }
  0x14   :  { %33 = vsyncpa [#allocation20], 0  ;;  %s2605_s4 = smov [#allocation4]   ;;  %s80_s5 = sshll.u32 %s3213_s7, 4  ;;  %s81_s5 = int_to_ptr.hbm [resolvable:$true] %s80_s5 }
  0x15   :  { %s60_s0 = sshll.u32 %s2605_s4, 4  ;;  %s2606_s24 = smov [#allocation7]   ;;  %s61_s0 = int_to_ptr.vmem [resolvable:$true] %s60_s0 }
  0x16   :  { %63 = dma.hbm_to_vmem [thread:$0]  %s59_s30, 16, %s61_s0, [#allocation5]  }
  0x17   :  { %s82_s6 = sshll.u32 %s2606_s24, 4  ;;  %s106_s2 = sshll.u32 %s3217_s11, 4  ;;  %s83_s6 = int_to_ptr.vmem [resolvable:$true] %s82_s6  ;;  %s107_s2 = int_to_ptr.hbm [resolvable:$true] %s106_s2 }
  0x18   :  { %85 = dma.hbm_to_vmem [thread:$0]  %s81_s5, 16, %s83_s6, [#allocation8]  }
  0x19   :  { %s130_s28 = sshll.u32 %s3220_s14, 4  ;;  %s2607_s29 = smov [#allocation10]   ;;  %s131_s28 = int_to_ptr.hbm [resolvable:$true] %s130_s28 }
  0x1a   :  { %s108_s4 = sshll.u32 %s2607_s29, 4  ;;  %s2608_s7 = smov [#allocation13]   ;;  %s109_s4 = int_to_ptr.vmem [resolvable:$true] %s108_s4 }
  0x1b   :  { %111 = dma.hbm_to_vmem [thread:$0]  %s107_s2, 16, %s109_s4, [#allocation11]  }
  0x1c   :  { %s132_s30 = sshll.u32 %s2608_s7, 4  ;;  %s154_s1 = sshll.u32 %s3223_s17, 4  ;;  %s133_s30 = int_to_ptr.vmem [resolvable:$true] %s132_s30  ;;  %s155_s1 = int_to_ptr.hbm [resolvable:$true] %s154_s1 }
  0x1d   :  { %135 = dma.hbm_to_vmem [thread:$0]  %s131_s28, 16, %s133_s30, [#allocation14]  }
  0x1e   :  { %s178_s24 = sshll.u32 %s3226_s20, 4  ;;  %s2609_s6 = smov [#allocation16]   ;;  %s179_s24 = int_to_ptr.hbm [resolvable:$true] %s178_s24 }
  0x1f   :  { %s156_s14 = sshll.u32 %s2609_s6, 4  ;;  %s2610_s25 = smov [#allocation19]   ;;  %s157_s14 = int_to_ptr.vmem [resolvable:$true] %s156_s14 }
  0x20   :  { %159 = dma.hbm_to_vmem [thread:$0]  %s155_s1, 16, %s157_s14, [#allocation17]  }
  0x21   :  { %s180_s26 = sshll.u32 %s2610_s25, 4  ;;  %s3241_s3 = sld [smem:[#allocation32_spill]]  ;;  %s181_s26 = int_to_ptr.vmem [resolvable:$true] %s180_s26 }
  0x22   :  { %183 = dma.hbm_to_vmem [thread:$0]  %s179_s24, 16, %s181_s26, [#allocation20]  }
  0x23   :  { %s3242_s4 = sld [smem:[#allocation35_spill]]  ;;  %s2611_s30 = smov [#allocation2]  }
  0x24   :  { %s47_s20 = sshll.u32 %s2611_s30, 4  ;;  %s2612_s0 = smov [#allocation6]   ;;  %s48_s20 = int_to_ptr.vmem [resolvable:$true] %s47_s20 }
  0x25   :  { %s71_s23 = sshll.u32 %s2612_s0, 4  ;;  %s93_s5 = sshll.u32 %s3215_s9, 4  ;;  %s72_s23 = int_to_ptr.vmem [resolvable:$true] %s71_s23  ;;  %s94_s5 = int_to_ptr.hbm [resolvable:$true] %s93_s5 }
  0x26   :  { %s119_s14 = sshll.u32 %s3219_s13, 4  ;;  %s2613_s25 = smov [#allocation9]   ;;  %s120_s14 = int_to_ptr.hbm [resolvable:$true] %s119_s14 }
  0x27   :  { %s45_s29 = sshll.u32 %s3241_s3, 4  ;;  %s95_s26 = sshll.u32 %s2613_s25, 4  ;;  %s46_s29 = int_to_ptr.hbm [resolvable:$true] %s45_s29  ;;  %s96_s26 = int_to_ptr.vmem [resolvable:$true] %s95_s26 }
  0x28   :  { %50 = dma.hbm_to_vmem [thread:$0]  %s46_s29, 16, %s48_s20, [#allocation3]  }
  0x29   :  { %s69_s7 = sshll.u32 %s3242_s4, 4  ;;  %s2614_s2 = smov [#allocation12]   ;;  %s70_s7 = int_to_ptr.hbm [resolvable:$true] %s69_s7 }
  0x2a   :  { %74 = dma.hbm_to_vmem [thread:$0]  %s70_s7, 16, %s72_s23, [#allocation5]  }
  0x2b   :  { %98 = dma.hbm_to_vmem [thread:$0]  %s94_s5, 16, %s96_s26, [#allocation8]  }
  0x2c   :  { %s121_s27 = sshll.u32 %s2614_s2, 4  ;;  %s141_s17 = sshll.u32 %s3221_s15, 4  ;;  %s122_s27 = int_to_ptr.vmem [resolvable:$true] %s121_s27  ;;  %s142_s17 = int_to_ptr.hbm [resolvable:$true] %s141_s17 }
  0x2d   :  { %124 = dma.hbm_to_vmem [thread:$0]  %s120_s14, 16, %s122_s27, [#allocation11]  }
  0x2e   :  { %s167_s4 = sshll.u32 %s3225_s19, 4  ;;  %s2615_s7 = smov [#allocation15]   ;;  %s168_s4 = int_to_ptr.hbm [resolvable:$true] %s167_s4 }
  0x2f   :  { %s143_s13 = sshll.u32 %s2615_s7, 4  ;;  %s2616_s30 = smov [#allocation18]   ;;  %s144_s13 = int_to_ptr.vmem [resolvable:$true] %s143_s13 }
  0x30   :  { %146 = dma.hbm_to_vmem [thread:$0]  %s142_s17, 16, %s144_s13, [#allocation14]  }
  0x31   :  { %s169_s20 = sshll.u32 %s2616_s30, 4  ;;  %s189_s1 = sshll.u32 %s3227_s21, 4  ;;  %s170_s20 = int_to_ptr.vmem [resolvable:$true] %s169_s20  ;;  %s190_s1 = int_to_ptr.hbm [resolvable:$true] %s189_s1 }
  0x32   :  { %172 = dma.hbm_to_vmem [thread:$0]  %s168_s4, 16, %s170_s20, [#allocation17]  }
  0x33   :  { %s2617_s15 = smov [#allocation21]  }
  0x34   :  { %s191_s11 = sshll.u32 %s2617_s15, 4  ;;  %s192_s11 = int_to_ptr.vmem [resolvable:$true] %s191_s11 }
  0x35   :  { %194 = dma.hbm_to_vmem [thread:$0]  %s190_s1, 16, %s192_s11, [#allocation20]  }
  0x36   :  { %2591 = dma.done.wait [#allocation3], 16  }
  0x37   :  { %2592 = vsyncadd [#allocation3], 4294967280 }
  0x38   :  { %2593 = dma.done.wait [#allocation5], 32  }
  0x39   :  { %2594 = vsyncadd [#allocation5], 4294967264 }
  0x3a   :  { %2595 = dma.done.wait [#allocation8], 32  }
  0x3b   :  { %2596 = vsyncadd [#allocation8], 4294967264 }
  0x3c   :  { %2597 = dma.done.wait [#allocation11], 32  }
  0x3d   :  { %2598 = vsyncadd [#allocation11], 4294967264 }
  0x3e   :  { %2599 = dma.done.wait [#allocation14], 32  }
  0x3f   :  { %2600 = vsyncadd [#allocation14], 4294967264 }
  0x40   :  { %2601 = dma.done.wait [#allocation17], 32  }
  0x41   :  { %2602 = vsyncadd [#allocation17], 4294967264 }
  0x42   :  { %2603 = dma.done.wait [#allocation20], 32  }
  0x43   :  { %2604 = vsyncadd [#allocation20], 4294967264  ;;  %s3243_s5 = sld [smem:[#allocation31_spill]]  ;;  %vm259_vm0 = vcmask 261120   ;;  %v2803_v5 = vld [vmem:[#allocation2] ss:$0 sm:$0xff] }
  0x44   :  { %s3244_s29 = sld [smem:[#allocation29_spill]]  ;;  %s2618_s17 = smov 120   ;;  %vm297_vm1 = vcmask 64512   ;;  %vm1984_vm12 = vcmask 523264  }
  0x45   :  { %s2619_s9 = smov 96   ;;  %s2620_s28 = smov 88  }
  0x46   :  { %s2621_s4 = smov 112   ;;  %s2622_s7 = smov 72  }
  0x47   :  { %s2623_s13 = smov 104   ;;  %s2624_s30 = smov 64  }
  0x48   :  { %s2625_s20 = smov 56   ;;  %s2626_s0 = smov 80  }
  0x49   :  { %v254_v0 = vld [vmem:[%s3243_s5 + $0x18] sm:$0xff]  ;;  %v253_v1 = vld [vmem:[%s3243_s5 + $0x10] sm:$0xff]  ;;  %v252_v2 = vld [vmem:[%s3243_s5 + $0x8] sm:$0xff]  ;;  %s3245_s19 = sld [smem:[#allocation33_spill]]  ;;  %s2627_s6 = smov 40  }
  0x4a   :  { %278 = vmatpush.msra.mxu0 %v254_v0  ;;  %2159 = vmatpush.msra.mxu2 %v254_v0  ;;  %v251_v3 = vld [vmem:[%s3243_s5] sm:$0xff]  ;;  %v2838_v27 = vld [vmem:[%s3244_s29 + $0x8] sm:$0xff]  ;;  %s2628_s24 = smov 48   ;;  %s3246_s21 = sld [smem:[#allocation30_spill]] }
  0x4b   :  { %v2799_v4 = vld [vmem:[%s3244_s29] sm:$0xff] }
  0x4c   :  { %279 = vmatpush.msra.mxu0 %v253_v1  ;;  %2160 = vmatpush.msra.mxu2 %v253_v1 }
  0x4e   :  { %280 = vmatpush.msra.mxu0 %v252_v2  ;;  %2161 = vmatpush.msra.mxu2 %v252_v2 }
  0x4f   :  { %v2849_v38 = vld [vmem:[%s3245_s19] sm:$0xff]  ;;  %v290_v39 = vld [vmem:[%s3245_s19 + $0x8] sm:$0xff]  ;;  %v291_v54 = vld [vmem:[%s3245_s19 + $0x10] sm:$0xff] }
  0x50   :  { %281 = vmatpush.msra.mxu0 %v251_v3  ;;  %2162 = vmatpush.msra.mxu2 %v251_v3 }
  0x51   :  { %2085 = vmatmul.msk.f32.vlgmr.msra.gmra.mxu0 %vm259_vm0, %v2799_v4  ;;  %2086 = vmatmul.msk.f32.vlgmr.msra.gmra.mxu2 %vm259_vm0, %v2838_v27 }
  0xce   :  { %v283_v6 = vpop.f32.mrf.mxu0 }
  0xcf   :  { %v2806_v7 = vadd.f32 %v2803_v5, %v283_v6 }
  0xd1   :  { %360 = vrot.lane.b32.xlu1 %v2806_v7, %s2618_s17  ;;  %295 = vrot.lane.b32.xlu0 %v2806_v7, %s2619_s9 }
  0xd4   :  { %v286_v40 = vpop.f32.mrf.mxu2 }
  0xd5   :  { %v2861_v46 = vadd.f32 %v2803_v5, %v286_v40 }
  0xd9   :  { %362 = vrot.lane.b32.xlu0 %v2806_v7, %s2620_s28 }
 0x143   :  { %v296_v8 = vpop.permute.xlu0 %295  ;;  %v361_v10 = vpop.permute.xlu1 %360 }
 0x144   :  { %2087 = vmatpush.xpose.msk.msra.mxu1 %vm297_vm1, %v296_v8 }
 0x147   :  { %2088 = vmatmul.msk.f32.vlgmr.msra.gmra.mxu1 %vm297_vm1, %v2806_v7 }
 0x148   :  { %444 = vmatpush.msrb.mxu1 %v290_v39 }
 0x14b   :  { %v363_v9 = vpop.permute.xlu0 %362 }
 0x14c   :  { %2090 = vmatpush.xpose.msk.msra.mxu3 %vm297_vm1, %v363_v9 }
 0x14f   :  { %2091 = vmatmul.msk.f32.vlgmr.msra.gmra.mxu3 %vm297_vm1, %v361_v10 }
 0x150   :  { %467 = vmatpush.msrb.mxu3 %v2849_v38 }
 0x152   :  { %556 = vmatpush.msra.mxu3 %v291_v54 }
 0x1c4   :  { %v319_v11 = vpop.f32.mrf.mxu1 }
 0x1c5   :  { %v322_v12 = vmul.f32 0.35355338, %v319_v11 }
 0x1c7   :  { %v323_v13 = vsel %vm297_vm1, %v322_v12, -inf }
 0x1c8   :  { %324 = vmax.xlane.f32.xlu1 %v323_v13 }
 0x1d2   :  { %v385_v14 = vpop.f32.mrf.mxu3 }
 0x1d3   :  { %v388_v15 = vmul.f32 0.35355338, %v385_v14 }
 0x1d5   :  { %v389_v16 = vsel %vm297_vm1, %v388_v15, -inf }
 0x1d6   :  { %390 = vmax.xlane.f32.xlu2 %v389_v16 }
 0x1e1   :  { %472 = vrot.lane.b32.xlu1 %v2806_v7, %s2621_s4 }
 0x1e9   :  { %564 = vrot.lane.b32.xlu1 %v2806_v7, %s2622_s7 }
 0x1f1   :  { %562 = vrot.lane.b32.xlu1 %v2806_v7, %s2623_s13 }
 0x23b   :  { %v325_v17 = vpop.xlane.xlu1 %324 }
 0x23c   :  { %v326_v18 = vsub.f32 %v322_v12, %v325_v17 }
 0x23e   :  { %v327_v19 = vmul.f32 1.442695, %v326_v18 }
 0x240   :  { %2201 = vpow2.f32 %v327_v19 }
 0x246   :  { %v2202_v20 = vpop.eup %2201 }
 0x247   :  { %v329_v21 = vsel %vm297_vm1, %v2202_v20, 0.0 }
 0x248   :  { %330 = vadd.xlane.f32.xlu2 %v329_v21 }
 0x249   :  { %v391_v22 = vpop.xlane.xlu2 %390 }
 0x24a   :  { %v392_v23 = vsub.f32 %v388_v15, %v391_v22 }
 0x24c   :  { %v393_v24 = vmul.f32 1.442695, %v392_v23 }
 0x24e   :  { %2203 = vpow2.f32 %v393_v24 }
 0x253   :  { %v473_v37 = vpop.permute.xlu1 %472 }
 0x254   :  { %v2204_v25 = vpop.eup %2203 }
 0x255   :  { %v395_v26 = vsel %vm297_vm1, %v2204_v25, 0.0 }
 0x256   :  { %396 = vadd.xlane.f32.xlu0 %v395_v26  ;;  %v2905_v26 = vld [vmem:[%s3245_s19 + $0x18] sm:$0xff] }
 0x25b   :  { %v565_v57 = vpop.permute.xlu1 %564 }
 0x260   :  { %334 = vrot.lane.b32.xlu2 %v2806_v7, %s2624_s30 }
 0x263   :  { %v563_v61 = vpop.permute.xlu1 %562 }
 0x268   :  { %400 = vrot.lane.b32.xlu2 %v2806_v7, %s2625_s20 }
 0x270   :  { %474 = vrot.lane.b32.xlu2 %v2806_v7, %s2626_s0 }
 0x2bb   :  { %v331_v28 = vpop.xlane.xlu2 %330 }
 0x2bc   :  { %2205 = vrcp.f32 %v331_v28 }
 0x2c2   :  { %v2206_v29 = vpop.eup %2205 }
 0x2c3   :  { %v335_v30 = vpop.permute.xlu2 %334  ;;  %v333_v31 = vmul.f32 %v2206_v29, %v2202_v20 }
 0x2c4   :  { %355 = vmatpush.msrb.mxu2 %v335_v30 }
 0x2c5   :  { %2089 = vmatmul.msk.f32.vlgmr.msrb.gmra.mxu2 %vm297_vm1, %v333_v31 }
 0x2c9   :  { %v397_v32 = vpop.xlane.xlu0 %396 }
 0x2ca   :  { %2207 = vrcp.f32 %v397_v32 }
 0x2cb   :  { %v401_v33 = vpop.permute.xlu2 %400 }
 0x2cc   :  { %421 = vmatpush.msra.mxu2 %v401_v33 }
 0x2d0   :  { %v2208_v34 = vpop.eup %2207 }
 0x2d1   :  { %v399_v35 = vmul.f32 %v2208_v34, %v2204_v25 }
 0x2d3   :  { %2092 = vmatmul.msk.f32.vlgmr.msra.gmra.mxu2 %vm297_vm1, %v399_v35  ;;  %v475_v36 = vpop.permute.xlu2 %474 }
 0x2d4   :  { %2095 = vmatpush.xpose.msk.msrb.mxu2 %vm297_vm1, %v475_v36 }
 0x2db   :  { %2096 = vmatmul.msk.f32.vlgmr.msrb.gmra.mxu2 %vm297_vm1, %v473_v37 }
 0x348   :  { %v357_v41 = vpop.f32.mrf.mxu2 }
 0x349   :  { %2094 = vmatmul.msk.f32.vlgmr.msrb.gmra.mxu3 %vm297_vm1, %v357_v41  ;;  %v2918_v41 = vld [vmem:[#allocation4] ss:$0 sm:$0xff] }
 0x356   :  { %v423_v42 = vpop.f32.mrf.mxu2 }
 0x357   :  { %2093 = vmatmul.msk.f32.vlgmr.msrb.gmra.mxu1 %vm297_vm1, %v423_v42 }
 0x35e   :  { %v497_v43 = vpop.f32.mrf.mxu2 }
 0x35f   :  { %v500_v44 = vmul.f32 0.35355338, %v497_v43 }
 0x361   :  { %v501_v45 = vsel %vm297_vm1, %v500_v44, -inf }
 0x362   :  { %502 = vmax.xlane.f32.xlu2 %v501_v45 }
 0x37a   :  { %602 = vrot.lane.b32.xlu2 %v2806_v7, %s2627_s6 }
 0x382   :  { %719 = vrot.lane.b32.xlu2 %v2861_v46, %s2620_s28 }
 0x3cc   :  { %v469_v3 = vpop.f32.mrf.mxu3 }
 0x3d4   :  { %v2878_v62 = vpop.f32.mrf.mxu1 }
 0x3d5   :  { %v503_v47 = vpop.xlane.xlu2 %502 }
 0x3d6   :  { %v504_v48 = vsub.f32 %v500_v44, %v503_v47 }
 0x3d8   :  { %v505_v49 = vmul.f32 1.442695, %v504_v48 }
 0x3da   :  { %2209 = vpow2.f32 %v505_v49 }
 0x3dd   :  { %v603_v50 = vpop.permute.xlu2 %602 }
 0x3de   :  { %623 = vmatpush.msra.mxu2 %v603_v50 }
 0x3e0   :  { %v2210_v51 = vpop.eup %2209 }
 0x3e1   :  { %v507_v52 = vsel %vm297_vm1, %v2210_v51, 0.0 }
 0x3e2   :  { %508 = vadd.xlane.f32.xlu0 %v507_v52 }
 0x3e5   :  { %v720_v53 = vpop.permute.xlu2 %719 }
 0x3e6   :  { %2106 = vmatpush.xpose.msk.msrb.mxu2 %vm297_vm1, %v720_v53 }
 0x3f6   :  { %512 = vrot.lane.b32.xlu0 %v2806_v7, %s2628_s24 }
 0x3fe   :  { %653 = vrot.lane.b32.xlu0 %v2861_v46, %s2619_s9 }
 0x455   :  { %v509_v55 = vpop.xlane.xlu0 %508 }
 0x456   :  { %2211 = vrcp.f32 %v509_v55 }
 0x45c   :  { %v2212_v56 = vpop.eup %2211 }
 0x45d   :  { %v511_v58 = vmul.f32 %v2212_v56, %v2210_v51 }
 0x468   :  { %v513_v59 = vpop.permute.xlu0 %512 }
 0x469   :  { %533 = vmatpush.msra.mxu1 %v513_v59 }
 0x46a   :  { %2097 = vmatmul.msk.f32.vlgmr.msra.gmra.mxu1 %vm297_vm1, %v511_v58 }
 0x46b   :  { %2099 = vmatpush.xpose.msk.msrb.mxu1 %vm297_vm1, %v565_v57 }
 0x46f   :  { %646 = vmatpush.msra.mxu1 %v2905_v26 }
 0x470   :  { %v654_v60 = vpop.permute.xlu0 %653 }
 0x471   :  { %2103 = vmatpush.xpose.msk.msrb.mxu3 %vm297_vm1, %v654_v60 }
 0x472   :  { %2100 = vmatmul.msk.f32.vlgmr.msrb.gmra.mxu1 %vm297_vm1, %v563_v61 }
 0x4e7   :  { %v535_v63 = vpop.f32.mrf.mxu1 }
 0x4e8   :  { %2098 = vmatmul.msk.f32.vlgmr.msra.gmra.mxu3 %vm297_vm1, %v535_v63 }
 0x4e9   :  { %801 = vmatpush.msra.mxu3 %v290_v39  ;;  %v470_v39 = vadd.f32 %v469_v3, %v2878_v62 }
 0x4ef   :  { %v587_v0 = vpop.f32.mrf.mxu1 }
 0x4f0   :  { %v590_v1 = vmul.f32 0.35355338, %v587_v0  ;;  %2104 = vmatmul.msk.f32.vlgmr.msrb.gmra.mxu3 %vm297_vm1, %v2861_v46 }
 0x4f1   :  { %913 = vmatpush.msrb.mxu3 %v291_v54 }
 0x4f2   :  { %v591_v2 = vsel %vm297_vm1, %v590_v1, -inf }
 0x4f3   :  { %592 = vmax.xlane.f32.xlu1 %v591_v2 }
 0x50c   :  { %717 = vrot.lane.b32.xlu1 %v2861_v46, %s2618_s17 }
 0x566   :  { %v593_v5 = vpop.xlane.xlu1 %592 }
 0x567   :  { %v594_v6 = vsub.f32 %v590_v1, %v593_v5 }
 0x569   :  { %v595_v7 = vmul.f32 1.442695, %v594_v6 }
 0x56b   :  { %2213 = vpow2.f32 %v595_v7  ;;  %v558_v8 = vpop.f32.mrf.mxu3 }
 0x56c   :  { %v561_v40 = vadd.f32 %v558_v8, %v470_v39 }
 0x571   :  { %v2214_v9 = vpop.eup %2213 }
 0x572   :  { %v597_v10 = vsel %vm297_vm1, %v2214_v9, 0.0 }
 0x573   :  { %598 = vadd.xlane.f32.xlu0 %v597_v10  ;;  %v676_v11 = vpop.f32.mrf.mxu3 }
 0x574   :  { %v679_v12 = vmul.f32 0.35355338, %v676_v11 }
 0x576   :  { %v680_v13 = vsel %vm297_vm1, %v679_v12, -inf }
 0x577   :  { %681 = vmax.xlane.f32.xlu2 %v680_v13 }
 0x57e   :  { %v718_v22 = vpop.permute.xlu1 %717 }
 0x587   :  { %831 = vrot.lane.b32.xlu0 %v2861_v46, %s2626_s0 }
 0x58f   :  { %691 = vrot.lane.b32.xlu0 %v2861_v46, %s2624_s30  ;;  %829 = vrot.lane.b32.xlu2 %v2861_v46, %s2621_s4 }
 0x5e6   :  { %v599_v14 = vpop.xlane.xlu0 %598 }
 0x5e7   :  { %2215 = vrcp.f32 %v599_v14 }
 0x5ea   :  { %v682_v15 = vpop.xlane.xlu2 %681 }
 0x5eb   :  { %v683_v16 = vsub.f32 %v679_v12, %v682_v15 }
 0x5ed   :  { %v2216_v17 = vpop.eup %2215  ;;  %v684_v18 = vmul.f32 1.442695, %v683_v16 }
 0x5ee   :  { %v601_v19 = vmul.f32 %v2216_v17, %v2214_v9 }
 0x5ef   :  { %2217 = vpow2.f32 %v684_v18 }
 0x5f0   :  { %2101 = vmatmul.msk.f32.vlgmr.msra.gmra.mxu2 %vm297_vm1, %v601_v19 }
 0x5f2   :  { %v830_v24 = vpop.permute.xlu2 %829 }
 0x5f5   :  { %v2218_v20 = vpop.eup %2217 }
 0x5f6   :  { %v686_v21 = vsel %vm297_vm1, %v2218_v20, 0.0 }
 0x5f7   :  { %687 = vadd.xlane.f32.xlu2 %v686_v21  ;;  %v1118_v21 = vld [vmem:[%s3216_s10 + $0x10] sm:$0xff] }
 0x5f8   :  { %2107 = vmatmul.msk.f32.vlgmr.msrb.gmra.mxu2 %vm297_vm1, %v718_v22  ;;  %v1117_v22 = vld [vmem:[%s3216_s10 + $0x8] sm:$0xff] }
 0x5f9   :  { %v832_v23 = vpop.permute.xlu0 %831 }
 0x5fa   :  { %2111 = vmatpush.xpose.msk.msra.mxu2 %vm297_vm1, %v832_v23  ;;  %v1116_v23 = vld [vmem:[%s3216_s10] sm:$0xff] }
 0x600   :  { %2112 = vmatmul.msk.f32.vlgmr.msra.gmra.mxu2 %vm297_vm1, %v830_v24  ;;  %v249_v24 = vld [vmem:[%s3246_s21] sm:$0xff] }
 0x601   :  { %v692_v25 = vpop.permute.xlu0 %691 }
 0x602   :  { %712 = vmatpush.msrb.mxu0 %v692_v25 }
 0x604   :  { %824 = vmatpush.msra.mxu0 %v2849_v38 }
 0x60f   :  { %921 = vrot.lane.b32.xlu2 %v2861_v46, %s2622_s7 }
 0x66a   :  { %v688_v28 = vpop.xlane.xlu2 %687 }
 0x66b   :  { %2219 = vrcp.f32 %v688_v28 }
 0x671   :  { %v2220_v29 = vpop.eup %2219 }
 0x672   :  { %v922_v30 = vpop.permute.xlu2 %921  ;;  %v690_v31 = vmul.f32 %v2220_v29, %v2218_v20  ;;  %v1119_v20 = vld [vmem:[%s3216_s10 + $0x18] sm:$0xff] }
 0x673   :  { %v625_v32 = vpop.f32.mrf.mxu2 }
 0x674   :  { %2102 = vmatmul.msk.f32.vlgmr.msra.gmra.mxu1 %vm297_vm1, %v625_v32  ;;  %2105 = vmatmul.msk.f32.vlgmr.msrb.gmra.mxu0 %vm297_vm1, %v690_v31 }
 0x675   :  { %2115 = vmatpush.xpose.msk.msrb.mxu0 %vm297_vm1, %v922_v30 }
 0x67b   :  { %v742_v33 = vpop.f32.mrf.mxu2 }
 0x67c   :  { %v745_v34 = vmul.f32 0.35355338, %v742_v33 }
 0x67e   :  { %v746_v35 = vsel %vm297_vm1, %v745_v34, -inf }
 0x67f   :  { %747 = vmax.xlane.f32.xlu1 %v746_v35 }
 0x683   :  { %v854_v36 = vpop.f32.mrf.mxu2 }
 0x684   :  { %v857_v37 = vmul.f32 0.35355338, %v854_v36 }
 0x686   :  { %v858_v38 = vsel %vm297_vm1, %v857_v37, -inf }
 0x687   :  { %859 = vmax.xlane.f32.xlu0 %v858_v38 }
 0x698   :  { %919 = vrot.lane.b32.xlu1 %v2861_v46, %s2623_s13 }
 0x6a0   :  { %869 = vrot.lane.b32.xlu1 %v2861_v46, %s2628_s24 }
 0x6f1   :  { %v648_v42 = vpop.f32.mrf.mxu1  ;;  %v714_v43 = vpop.f32.mrf.mxu0 }
 0x6f2   :  { %v651_v44 = vadd.f32 %v648_v42, %v561_v40  ;;  %v748_v45 = vpop.xlane.xlu1 %747  ;;  %2110 = vmatmul.msk.f32.vlgmr.msra.gmra.mxu0 %vm297_vm1, %v714_v43  ;;  %v1081_v40 = vld [vmem:[%s3214_s8 + $0x10] sm:$0xff]  ;;  %v1080_v42 = vld [vmem:[%s3214_s8 + $0x8] sm:$0xff] }
 0x6f3   :  { %v749_v47 = vsub.f32 %v745_v34, %v748_v45  ;;  %1142 = vmatpush.msra.mxu0 %v1119_v20 }
 0x6f4   :  { %v1012_v48 = vadd.f32 %v2918_v41, %v651_v44  ;;  %v1079_v44 = vld [vmem:[%s3214_s8] sm:$0xff] }
 0x6f5   :  { %v750_v49 = vmul.f32 1.442695, %v749_v47  ;;  %1143 = vmatpush.msra.mxu0 %v1118_v21  ;;  %v2969_v47 = vld [vmem:[#allocation6] ss:$0 sm:$0xff] }
 0x6f6   :  { %v1014_v50 = vadd.f32 %v1012_v48, %v2799_v4  ;;  %v2629_v4 = vmov 32.0  }
 0x6f7   :  { %2221 = vpow2.f32 %v750_v49  ;;  %1144 = vmatpush.msra.mxu0 %v1117_v22 }
 0x6f8   :  { %v1018_v51 = vsel %vm259_vm0, %v1014_v50, 0.0 }
 0x6f9   :  { %1019 = vadd.xlane.f32.xlu1 %v1018_v51  ;;  %1145 = vmatpush.msra.mxu0 %v1116_v23 }
 0x6fa   :  { %v860_v52 = vpop.xlane.xlu0 %859 }
 0x6fb   :  { %v861_v53 = vsub.f32 %v857_v37, %v860_v52  ;;  %v1082_v37 = vld [vmem:[%s3214_s8 + $0x18] sm:$0xff]  ;;  %v2974_v52 = vld [vmem:[#allocation7] ss:$0 sm:$0xff] }
 0x6fd   :  { %v2222_v54 = vpop.eup %2221  ;;  %v862_v55 = vmul.f32 1.442695, %v861_v53 }
 0x6fe   :  { %v752_v56 = vsel %vm297_vm1, %v2222_v54, 0.0 }
 0x6ff   :  { %2223 = vpow2.f32 %v862_v55  ;;  %753 = vadd.xlane.f32.xlu0 %v752_v56 }
 0x700   :  { %2225 = vrcp.f32 %v2629_v4 }
 0x705   :  { %v2224_v57 = vpop.eup %2223 }
 0x706   :  { %v864_v58 = vsel %vm297_vm1, %v2224_v57, 0.0  ;;  %v2226_v60 = vpop.eup %2225 }
 0x707   :  { %865 = vadd.xlane.f32.xlu2 %v864_v58  ;;  %v1025_v61 = vmul.f32 32.0, %v2226_v60  ;;  %vm1029_vm2 = vweird.f32 %v2226_v60 }
 0x709   :  { %v1026_v62 = vsub.f32 1.0, %v1025_v61 }
 0x70a   :  { %v920_v59 = vpop.permute.xlu1 %919 }
 0x70b   :  { %2116 = vmatmul.msk.f32.vlgmr.msrb.gmra.mxu0 %vm297_vm1, %v920_v59  ;;  %v1027_v63 = vmul.f32 %v2226_v60, %v1026_v62 }
 0x70d   :  { %v1028_v1 = vadd.f32 %v2226_v60, %v1027_v63  ;;  %v2996_v63 = vld [vmem:[#allocation9] ss:$0 sm:$0xff] }
 0x70f   :  { %v2929_v2 = vsel %vm1029_vm2, %v2226_v60, %v1028_v1 }
 0x712   :  { %v870_v0 = vpop.permute.xlu1 %869 }
 0x713   :  { %757 = vrot.lane.b32.xlu0 %v2861_v46, %s2625_s20  ;;  %2121 = vmatmul.msk.f32.vlgmr.msra.gmra.mxu0 %vm259_vm0, %v249_v24 }
 0x76c   :  { %v1020_v3 = vpop.xlane.xlu1 %1019 }
 0x76d   :  { %v1031_v5 = vmul.f32 %v2929_v2, %v1020_v3 }
 0x76f   :  { %v1033_v6 = vsub.f32 %v1014_v50, %v1031_v5  ;;  %v2933_v10 = vpop.f32.mrf.mxu0 }
 0x771   :  { %v1035_v7 = vmul.f32 %v1033_v6, %v1033_v6 }
 0x772   :  { %v754_v9 = vpop.xlane.xlu0 %753 }
 0x773   :  { %v1037_v8 = vsel %vm259_vm0, %v1035_v7, 0.0  ;;  %2227 = vrcp.f32 %v754_v9 }
 0x774   :  { %1038 = vadd.xlane.f32.xlu0 %v1037_v8 }
 0x779   :  { %v2228_v12 = vpop.eup %2227 }
 0x77a   :  { %v866_v11 = vpop.xlane.xlu2 %865  ;;  %v756_v13 = vmul.f32 %v2228_v12, %v2222_v54  ;;  %v2983_v54 = vld [vmem:[#allocation10] ss:$0 sm:$0xff] }
 0x77b   :  { %2229 = vrcp.f32 %v866_v11 }
 0x781   :  { %v2230_v17 = vpop.eup %2229 }
 0x782   :  { %v868_v19 = vmul.f32 %v2230_v17, %v2224_v57 }
 0x785   :  { %v758_v14 = vpop.permute.xlu0 %757 }
 0x786   :  { %778 = vmatpush.msrb.mxu1 %v758_v14 }
 0x787   :  { %2108 = vmatmul.msk.f32.vlgmr.msrb.gmra.mxu1 %vm297_vm1, %v756_v13 }
 0x788   :  { %890 = vmatpush.msra.mxu1 %v870_v0  ;;  %v944_v15 = vpop.f32.mrf.mxu0 }
 0x789   :  { %v947_v16 = vmul.f32 0.35355338, %v944_v15 }
 0x78a   :  { %1003 = vmatpush.msrb.mxu1 %v2905_v26 }
 0x78b   :  { %v948_v18 = vsel %vm297_vm1, %v947_v16, -inf }
 0x78c   :  { %949 = vmax.xlane.f32.xlu2 %v948_v18 }
 0x78f   :  { %2113 = vmatmul.msk.f32.vlgmr.msra.gmra.mxu1 %vm297_vm1, %v868_v19 }
 0x790   :  { %v1147_v55 = vpop.f32.mrf.mxu0 }
 0x791   :  { %v2986_v56 = vadd.f32 %v2983_v54, %v1147_v55 }
 0x793   :  { %1224 = vrot.lane.b32.xlu1 %v2986_v56, %s2618_s17 }
 0x7e7   :  { %v1039_v25 = vpop.xlane.xlu0 %1038 }
 0x7e8   :  { %v1043_v26 = vmul.f32 %v1039_v25, %v2929_v2 }
 0x7ea   :  { %v1045_v28 = vadd.f32 1e-05, %v1043_v26 }
 0x7ec   :  { %2231 = vrsqrt.f32 %v1045_v28  ;;  %vm1053_vm4 = vweird.f32 %v1045_v28 }
 0x7f2   :  { %v2232_v29 = vpop.eup %2231 }
 0x7f3   :  { %v1048_v30 = vmul.f32 %v2232_v29, %v1045_v28  ;;  %vm1054_vm3 = vweird.f32 %v2232_v29 }
 0x7f4   :  { %vm1055_vm5 = vmor %vm1053_vm4, %vm1054_vm3 }
 0x7f5   :  { %v1049_v31 = vmul.f32 %v2232_v29, %v1048_v30 }
 0x7f7   :  { %v1050_v32 = vmul.f32 0.5, %v1049_v31 }
 0x7f9   :  { %v1051_v34 = vsub.f32 1.5, %v1050_v32 }
 0x7fb   :  { %v1052_v38 = vmul.f32 %v2232_v29, %v1051_v34 }
 0x7fd   :  { %v1056_v43 = vsel %vm1055_vm5, %v2232_v29, %v1052_v38 }
 0x7fe   :  { %v1067_v48 = vmul.f32 %v1056_v43, %v1033_v6  ;;  %v3030_v43 = vld [vmem:[%s3218_s12] sm:$0xff] }
 0x7ff   :  { %v950_v33 = vpop.xlane.xlu2 %949  ;;  %1329 = vmatpush.msrb.mxu0 %v3030_v43 }
 0x800   :  { %v951_v35 = vsub.f32 %v947_v16, %v950_v33  ;;  %v1072_v51 = vmul.f32 %v2969_v47, %v1067_v48 }
 0x802   :  { %v952_v36 = vmul.f32 1.442695, %v951_v35  ;;  %v2977_v53 = vadd.f32 %v2974_v52, %v1072_v51 }
 0x804   :  { %2233 = vpow2.f32 %v952_v36  ;;  %v780_v39 = vpop.f32.mrf.mxu1 }
 0x805   :  { %2109 = vmatmul.msk.f32.vlgmr.msra.gmra.mxu3 %vm297_vm1, %v780_v39  ;;  %v1225_v5 = vpop.permute.xlu1 %1224 }
 0x806   :  { %1105 = vmatpush.msra.mxu3 %v1082_v37 }
 0x808   :  { %1106 = vmatpush.msra.mxu3 %v1081_v40 }
 0x80a   :  { %v2234_v45 = vpop.eup %2233  ;;  %1107 = vmatpush.msra.mxu3 %v1080_v42 }
 0x80b   :  { %v954_v49 = vsel %vm297_vm1, %v2234_v45, 0.0 }
 0x80c   :  { %v892_v50 = vpop.f32.mrf.mxu1  ;;  %955 = vadd.xlane.f32.xlu2 %v954_v49  ;;  %1108 = vmatpush.msra.mxu3 %v1079_v44  ;;  %v250_v49 = vld [vmem:[%s3246_s21 + $0x8] sm:$0xff] }
 0x80d   :  { %2114 = vmatmul.msk.f32.vlgmr.msrb.gmra.mxu3 %vm297_vm1, %v892_v50  ;;  %2122 = vmatmul.msk.f32.gmra.mxu0 %vm259_vm0, %v250_v49 }
 0x815   :  { %2119 = vmatmul.msk.f32.vlgmr.msra.gmra.mxu3 %vm259_vm0, %v2977_v53 }
 0x824   :  { %959 = vrot.lane.b32.xlu2 %v2861_v46, %s2627_s6 }
 0x82c   :  { %1336 = vrot.lane.b32.xlu2 %v2986_v56, %s2621_s4 }
 0x87f   :  { %v956_v57 = vpop.xlane.xlu2 %955 }
 0x880   :  { %2235 = vrcp.f32 %v956_v57 }
 0x886   :  { %v2236_v58 = vpop.eup %2235 }
 0x887   :  { %v958_v59 = vmul.f32 %v2236_v58, %v2234_v45  ;;  %v960_v4 = vpop.permute.xlu2 %959 }
 0x888   :  { %v803_v60 = vpop.f32.mrf.mxu3  ;;  %980 = vmatpush.msrb.mxu2 %v960_v4 }
 0x889   :  { %2117 = vmatmul.msk.f32.vlgmr.msrb.gmra.mxu2 %vm297_vm1, %v958_v59  ;;  %v827_v46 = vadd.f32 %v2933_v10, %v803_v60 }
 0x88a   :  { %2123 = vmatpush.xpose.msk.msra.mxu2 %vm297_vm1, %v2986_v56 }
 0x88e   :  { %2126 = vmatpush.xpose.msk.msrb.mxu2 %vm297_vm1, %v1225_v5 }
 0x88f   :  { %v1337_v3 = vpop.permute.xlu2 %1336 }
 0x890   :  { %v915_v61 = vpop.f32.mrf.mxu3 }
 0x891   :  { %v918_v62 = vadd.f32 %v915_v61, %v827_v46 }
 0x898   :  { %v1110_v0 = vpop.f32.mrf.mxu3 }
 0x899   :  { %v1111_v1 = vadd.f32 %v2996_v63, %v1110_v0 }
 0x89b   :  { %1222 = vrot.lane.b32.xlu0 %v1111_v1, %s2618_s17  ;;  %2124 = vmatmul.msk.f32.vlgmr.msra.gmra.mxu2 %vm297_vm1, %v1111_v1 }
 0x89c   :  { %2131 = vmatpush.xpose.msk.msra.mxu2 %vm297_vm1, %v1337_v3 }
 0x8a3   :  { %1334 = vrot.lane.b32.xlu0 %v1111_v1, %s2621_s4 }
 0x90c   :  { %v982_v6 = vpop.f32.mrf.mxu2 }
 0x90d   :  { %v1223_v7 = vpop.permute.xlu0 %1222  ;;  %2118 = vmatmul.msk.f32.vlgmr.msrb.gmra.mxu1 %vm297_vm1, %v982_v6 }
 0x90e   :  { %2127 = vmatmul.msk.f32.vlgmr.msrb.gmra.mxu2 %vm297_vm1, %v1223_v7 }
 0x915   :  { %v1335_v8 = vpop.permute.xlu0 %1334 }
 0x916   :  { %2132 = vmatmul.msk.f32.vlgmr.msra.gmra.mxu2 %vm297_vm1, %v1335_v8 }
 0x91e   :  { %v1181_v9 = vpop.f32.mrf.mxu2 }
 0x91f   :  { %v1184_v10 = vmul.f32 0.35355338, %v1181_v9 }
 0x921   :  { %v1185_v11 = vsel %vm297_vm1, %v1184_v10, -inf }
 0x922   :  { %1186 = vmax.xlane.f32.xlu2 %v1185_v11 }
 0x98a   :  { %v1005_v12 = vpop.f32.mrf.mxu1 }
 0x98b   :  { %v1008_v13 = vadd.f32 %v1005_v12, %v918_v62 }
 0x98d   :  { %v1013_v14 = vadd.f32 %v2918_v41, %v1008_v13  ;;  %v1155_v13 = vld [vmem:[%s3218_s12 + $0x10] sm:$0xff] }
 0x98f   :  { %v1015_v15 = vadd.f32 %v1013_v14, %v2838_v27  ;;  %v1150_v14 = vpop.f32.mrf.mxu0 }
 0x991   :  { %v1247_v16 = vpop.f32.mrf.mxu2  ;;  %v1021_v17 = vsel %vm259_vm0, %v1015_v15, 0.0 }
 0x992   :  { %v1250_v18 = vmul.f32 0.35355338, %v1247_v16  ;;  %1022 = vadd.xlane.f32.xlu1 %v1021_v17 }
 0x994   :  { %v1251_v19 = vsel %vm297_vm1, %v1250_v18, -inf }
 0x995   :  { %1252 = vmax.xlane.f32.xlu0 %v1251_v19  ;;  %v1187_v20 = vpop.xlane.xlu2 %1186 }
 0x996   :  { %v1188_v21 = vsub.f32 %v1184_v10, %v1187_v20 }
 0x998   :  { %v1189_v22 = vmul.f32 1.442695, %v1188_v21 }
 0x999   :  { %v1359_v23 = vpop.f32.mrf.mxu2 }
 0x99a   :  { %2237 = vpow2.f32 %v1189_v22  ;;  %v1362_v24 = vmul.f32 0.35355338, %v1359_v23 }
 0x99c   :  { %v1363_v25 = vsel %vm297_vm1, %v1362_v24, -inf }
 0x99d   :  { %1364 = vmax.xlane.f32.xlu2 %v1363_v25 }
 0x9a0   :  { %v2238_v41 = vpop.eup %2237 }
 0x9a1   :  { %v1191_v27 = vsel %vm297_vm1, %v2238_v41, 0.0 }
 0x9a2   :  { %1192 = vadd.xlane.f32.xlu0 %v1191_v27 }
 0xa05   :  { %v1023_v26 = vpop.xlane.xlu1 %1022 }
 0xa06   :  { %v1032_v28 = vmul.f32 %v2929_v2, %v1023_v26 }
 0xa08   :  { %v1034_v29 = vsub.f32 %v1015_v15, %v1032_v28  ;;  %v1253_v30 = vpop.xlane.xlu0 %1252  ;;  %v3055_v15 = vadd.f32 %v2983_v54, %v1150_v14 }
 0xa09   :  { %v1254_v31 = vsub.f32 %v1250_v18, %v1253_v30 }
 0xa0a   :  { %v1036_v32 = vmul.f32 %v1034_v29, %v1034_v29 }
 0xa0b   :  { %v1255_v33 = vmul.f32 1.442695, %v1254_v31 }
 0xa0c   :  { %v1040_v34 = vsel %vm259_vm0, %v1036_v32, 0.0 }
 0xa0d   :  { %2239 = vpow2.f32 %v1255_v33  ;;  %1041 = vadd.xlane.f32.xlu1 %v1040_v34 }
 0xa10   :  { %v1365_v35 = vpop.xlane.xlu2 %1364 }
 0xa11   :  { %v1366_v36 = vsub.f32 %v1362_v24, %v1365_v35 }
 0xa13   :  { %v2240_v37 = vpop.eup %2239  ;;  %v1367_v38 = vmul.f32 1.442695, %v1366_v36 }
 0xa14   :  { %v1257_v39 = vsel %vm297_vm1, %v2240_v37, 0.0 }
 0xa15   :  { %2241 = vpow2.f32 %v1367_v38  ;;  %1258 = vadd.xlane.f32.xlu2 %v1257_v39  ;;  %v1193_v51 = vpop.xlane.xlu0 %1192 }
 0xa1b   :  { %v2242_v40 = vpop.eup %2241 }
 0xa1c   :  { %v1369_v42 = vsel %vm297_vm1, %v2242_v40, 0.0 }
 0xa1d   :  { %1370 = vadd.xlane.f32.xlu0 %v1369_v42 }
 0xa26   :  { %1196 = vrot.lane.b32.xlu1 %v2986_v56, %s2619_s9 }
 0xa2d   :  { %1262 = vrot.lane.b32.xlu2 %v2986_v56, %s2620_s28 }
 0xa2e   :  { %1426 = vrot.lane.b32.xlu1 %v2986_v56, %s2623_s13 }
 0xa31   :  { %1374 = vrot.lane.b32.xlu0 %v2986_v56, %s2626_s0 }
 0xa35   :  { %1424 = vrot.lane.b32.xlu2 %v1111_v1, %s2623_s13 }
 0xa3d   :  { %1552 = vrot.lane.b32.xlu2 %v3055_v15, %s2619_s9 }
 0xa80   :  { %v1042_v44 = vpop.xlane.xlu1 %1041 }
 0xa81   :  { %v1044_v45 = vmul.f32 %v1042_v44, %v2929_v2 }
 0xa83   :  { %v1046_v48 = vadd.f32 1e-05, %v1044_v45 }
 0xa85   :  { %2243 = vrsqrt.f32 %v1046_v48  ;;  %vm1063_vm7 = vweird.f32 %v1046_v48 }
 0xa86   :  { %2245 = vrcp.f32 %v1193_v51 }
 0xa88   :  { %v1259_v59 = vpop.xlane.xlu2 %1258 }
 0xa89   :  { %2247 = vrcp.f32 %v1259_v59  ;;  %v3095_v59 = vld [vmem:[%s3218_s12 + $0x18] sm:$0xff] }
 0xa8b   :  { %v2244_v50 = vpop.eup %2243 }
 0xa8c   :  { %v1058_v55 = vmul.f32 %v2244_v50, %v1046_v48  ;;  %vm1064_vm6 = vweird.f32 %v2244_v50  ;;  %v2246_v46 = vpop.eup %2245 }
 0xa8d   :  { %vm1065_vm8 = vmor %vm1063_vm7, %vm1064_vm6  ;;  %v1195_v0 = vmul.f32 %v2246_v46, %v2238_v41 }
 0xa8e   :  { %v1059_v57 = vmul.f32 %v2244_v50, %v1058_v55 }
 0xa8f   :  { %v2248_v8 = vpop.eup %2247 }
 0xa90   :  { %v1060_v58 = vmul.f32 0.5, %v1059_v57  ;;  %v1263_v5 = vpop.permute.xlu2 %1262  ;;  %v1371_v6 = vpop.xlane.xlu0 %1370  ;;  %v1261_v9 = vmul.f32 %v2248_v8, %v2240_v37 }
 0xa91   :  { %2249 = vrcp.f32 %v1371_v6 }
 0xa92   :  { %v1061_v4 = vsub.f32 1.5, %v1060_v58 }
 0xa94   :  { %v1062_v60 = vmul.f32 %v2244_v50, %v1061_v4 }
 0xa96   :  { %v1066_v61 = vsel %vm1065_vm8, %v2244_v50, %v1062_v60 }
 0xa97   :  { %v1068_v62 = vmul.f32 %v1066_v61, %v1034_v29  ;;  %v2250_v11 = vpop.eup %2249 }
 0xa98   :  { %v1197_v1 = vpop.permute.xlu1 %1196  ;;  %v1373_v12 = vmul.f32 %v2250_v11, %v2242_v40  ;;  %v1425_v17 = vpop.permute.xlu2 %1424 }
 0xa99   :  { %1217 = vmatpush.msra.mxu1 %v1197_v1  ;;  %v1073_v3 = vmul.f32 %v2969_v47, %v1068_v62 }
 0xa9a   :  { %2125 = vmatmul.msk.f32.vlgmr.msra.gmra.mxu1 %vm297_vm1, %v1195_v0 }
 0xa9b   :  { %1283 = vmatpush.msrb.mxu1 %v1263_v5  ;;  %v3041_v7 = vadd.f32 %v2974_v52, %v1073_v3  ;;  %v1154_v52 = vld [vmem:[%s3218_s12 + $0x8] sm:$0xff] }
 0xa9c   :  { %1306 = vmatpush.msrb.mxu3 %v1154_v52 }
 0xa9d   :  { %2120 = vmatmul.msk.f32.gmra.mxu3 %vm259_vm0, %v3041_v7 }
 0xa9e   :  { %1418 = vmatpush.msra.mxu3 %v1155_v13 }
 0xaa0   :  { %v1427_v10 = vpop.permute.xlu1 %1426  ;;  %v1553_v21 = vpop.permute.xlu2 %1552 }
 0xaa1   :  { %2135 = vmatpush.xpose.msk.msra.mxu0 %vm297_vm1, %v1427_v10 }
 0xaa2   :  { %2128 = vmatmul.msk.f32.vlgmr.msrb.gmra.mxu1 %vm297_vm1, %v1261_v9 }
 0xaa3   :  { %v1375_v47 = vpop.permute.xlu0 %1374 }
 0xaa4   :  { %1395 = vmatpush.msra.mxu1 %v1375_v47 }
 0xaa6   :  { %1508 = vmatpush.msrb.mxu1 %v3095_v59 }
 0xaaa   :  { %2133 = vmatmul.msk.f32.vlgmr.msra.gmra.mxu1 %vm297_vm1, %v1373_v12 }
 0xb17   :  { %v1219_v16 = vpop.f32.mrf.mxu1 }
 0xb18   :  { %2130 = vmatmul.msk.f32.vlgmr.msrb.gmra.mxu0 %vm297_vm1, %v1219_v16 }
 0xb19   :  { %1573 = vmatpush.msrb.mxu0 %v1553_v21  ;;  %v3111_v21 = vld [vmem:[#allocation12] ss:$0 sm:$0xff] }
 0xb1f   :  { %v1285_v18 = vpop.f32.mrf.mxu1 }
 0xb20   :  { %2129 = vmatmul.msk.f32.vlgmr.msrb.gmra.mxu3 %vm297_vm1, %v1285_v18  ;;  %2136 = vmatmul.msk.f32.vlgmr.msra.gmra.mxu0 %vm297_vm1, %v1425_v17  ;;  %v1113_v54 = vpop.f32.mrf.mxu3 }
 0xb21   :  { %2139 = vmatpush.xpose.msk.msrb.mxu3 %vm297_vm1, %v3055_v15  ;;  %v1114_v20 = vadd.f32 %v2996_v63, %v1113_v54  ;;  %1685 = vmatpush.msra.mxu0 %v3030_v43 }
 0xb27   :  { %v1397_v19 = vpop.f32.mrf.mxu1 }
 0xb28   :  { %2134 = vmatmul.msk.f32.vlgmr.msra.gmra.mxu3 %vm297_vm1, %v1397_v19 }
 0xb29   :  { %1662 = vmatpush.msra.mxu3 %v1154_v52 }
 0xb30   :  { %2140 = vmatmul.msk.f32.vlgmr.msrb.gmra.mxu3 %vm297_vm1, %v1114_v20 }
 0xb31   :  { %1774 = vmatpush.msrb.mxu3 %v1155_v13 }
 0xb95   :  { %v1331_v22 = vpop.f32.mrf.mxu0 }
 0xb9d   :  { %v1449_v23 = vpop.f32.mrf.mxu0 }
 0xb9e   :  { %v1452_v24 = vmul.f32 0.35355338, %v1449_v23 }
 0xba0   :  { %v1453_v25 = vsel %vm297_vm1, %v1452_v24, -inf }
 0xba1   :  { %1454 = vmax.xlane.f32.xlu2 %v1453_v25 }
 0xba3   :  { %v1308_v41 = vpop.f32.mrf.mxu3 }
 0xba4   :  { %v1332_v27 = vadd.f32 %v1331_v22, %v1308_v41 }
 0xbab   :  { %v1420_v26 = vpop.f32.mrf.mxu3 }
 0xbac   :  { %v3069_v28 = vadd.f32 %v1420_v26, %v1332_v27 }
 0xbb3   :  { %v1537_v29 = vpop.f32.mrf.mxu3 }
 0xbb4   :  { %v1540_v63 = vmul.f32 0.35355338, %v1537_v29 }
 0xbb6   :  { %v1541_v30 = vsel %vm297_vm1, %v1540_v63, -inf }
 0xbb7   :  { %1542 = vmax.xlane.f32.xlu0 %v1541_v30 }
 0xbb9   :  { %1578 = vrot.lane.b32.xlu2 %v1114_v20, %s2618_s17 }
 0xc14   :  { %v1455_v31 = vpop.xlane.xlu2 %1454 }
 0xc15   :  { %v1456_v32 = vsub.f32 %v1452_v24, %v1455_v31 }
 0xc17   :  { %v1457_v33 = vmul.f32 1.442695, %v1456_v32 }
 0xc19   :  { %2251 = vpow2.f32 %v1457_v33 }
 0xc1c   :  { %v1579_v55 = vpop.permute.xlu2 %1578 }
 0xc1f   :  { %v2252_v34 = vpop.eup %2251 }
 0xc20   :  { %v1459_v35 = vsel %vm297_vm1, %v2252_v34, 0.0 }
 0xc21   :  { %1460 = vadd.xlane.f32.xlu0 %v1459_v35 }
 0xc2a   :  { %v1543_v36 = vpop.xlane.xlu0 %1542 }
 0xc2b   :  { %v1544_v37 = vsub.f32 %v1540_v63, %v1543_v36 }
 0xc2d   :  { %v1545_v38 = vmul.f32 1.442695, %v1544_v37 }
 0xc2f   :  { %2253 = vpow2.f32 %v1545_v38 }
 0xc35   :  { %v2254_v39 = vpop.eup %2253  ;;  %1580 = vrot.lane.b32.xlu0 %v3055_v15, %s2618_s17 }
 0xc36   :  { %v1547_v40 = vsel %vm297_vm1, %v2254_v39, 0.0 }
 0xc37   :  { %1548 = vadd.xlane.f32.xlu1 %v1547_v40 }
 0xc3d   :  { %1690 = vrot.lane.b32.xlu0 %v1114_v20, %s2621_s4 }
 0xc45   :  { %1780 = vrot.lane.b32.xlu0 %v1114_v20, %s2623_s13 }
 0xc50   :  { %1464 = vrot.lane.b32.xlu1 %v2986_v56, %s2622_s7 }
 0xc58   :  { %1692 = vrot.lane.b32.xlu1 %v3055_v15, %s2621_s4 }
 0xc60   :  { %1782 = vrot.lane.b32.xlu1 %v3055_v15, %s2623_s13 }
 0xc94   :  { %v1461_v45 = vpop.xlane.xlu0 %1460 }
 0xca7   :  { %v1581_v51 = vpop.permute.xlu0 %1580 }
 0xcaa   :  { %v1549_v42 = vpop.xlane.xlu1 %1548 }
 0xcab   :  { %2255 = vrcp.f32 %v1549_v42 }
 0xcac   :  { %2257 = vrcp.f32 %v1461_v45 }
 0xcaf   :  { %v1691_v58 = vpop.permute.xlu0 %1690 }
 0xcb1   :  { %v2256_v43 = vpop.eup %2255 }
 0xcb2   :  { %v1551_v44 = vmul.f32 %v2256_v43, %v2254_v39  ;;  %v2258_v48 = vpop.eup %2257 }
 0xcb3   :  { %v1463_v49 = vmul.f32 %v2258_v48, %v2252_v34  ;;  %v1936_v48 = vld [vmem:[%s3222_s16 + $0x18] sm:$0xff] }
 0xcb4   :  { %2141 = vmatmul.msk.f32.vlgmr.msrb.gmra.mxu0 %vm297_vm1, %v1551_v44 }
 0xcb7   :  { %v1781_v60 = vpop.permute.xlu0 %1780 }
 0xcc2   :  { %v1465_v50 = vpop.permute.xlu1 %1464 }
 0xcc3   :  { %1485 = vmatpush.msrb.mxu2 %v1465_v50  ;;  %v1934_v50 = vld [vmem:[%s3222_s16 + $0x8] sm:$0xff] }
 0xcc4   :  { %2137 = vmatmul.msk.f32.vlgmr.msrb.gmra.mxu2 %vm297_vm1, %v1463_v49  ;;  %v1935_v49 = vld [vmem:[%s3222_s16 + $0x10] sm:$0xff] }
 0xcc5   :  { %2142 = vmatpush.xpose.msk.msra.mxu2 %vm297_vm1, %v1581_v51  ;;  %v1933_v51 = vld [vmem:[%s3222_s16] sm:$0xff] }
 0xcca   :  { %v1693_v56 = vpop.permute.xlu1 %1692 }
 0xccb   :  { %2147 = vmatpush.xpose.msk.msrb.mxu2 %vm297_vm1, %v1693_v56 }
 0xccc   :  { %2143 = vmatmul.msk.f32.vlgmr.msra.gmra.mxu2 %vm297_vm1, %v1579_v55 }
 0xcd2   :  { %v1783_v57 = vpop.permute.xlu1 %1782 }
 0xcd3   :  { %2151 = vmatpush.xpose.msk.msrb.mxu0 %vm297_vm1, %v1783_v57 }
 0xcd4   :  { %2148 = vmatmul.msk.f32.vlgmr.msrb.gmra.mxu2 %vm297_vm1, %v1691_v58 }
 0xd31   :  { %v1575_v4 = vpop.f32.mrf.mxu0 }
 0xd32   :  { %2146 = vmatmul.msk.f32.vlgmr.msra.gmra.mxu0 %vm297_vm1, %v1575_v4 }
 0xd3a   :  { %2152 = vmatmul.msk.f32.vlgmr.msrb.gmra.mxu0 %vm297_vm1, %v1781_v60 }
 0xd47   :  { %v1487_v46 = vpop.f32.mrf.mxu2 }
 0xd48   :  { %2138 = vmatmul.msk.f32.vlgmr.msrb.gmra.mxu1 %vm297_vm1, %v1487_v46 }
 0xd4f   :  { %v1603_v61 = vpop.f32.mrf.mxu2 }
 0xd50   :  { %v1606_v62 = vmul.f32 0.35355338, %v1603_v61 }
 0xd52   :  { %v1607_v0 = vsel %vm297_vm1, %v1606_v62, -inf }
 0xd53   :  { %1608 = vmax.xlane.f32.xlu2 %v1607_v0 }
 0xd57   :  { %v1715_v1 = vpop.f32.mrf.mxu2 }
 0xd58   :  { %v1718_v3 = vmul.f32 0.35355338, %v1715_v1 }
 0xd5a   :  { %v1719_v5 = vsel %vm297_vm1, %v1718_v3, -inf }
 0xd5b   :  { %1720 = vmax.xlane.f32.xlu1 %v1719_v5 }
 0xdaf   :  { %v3103_v6 = vpop.f32.mrf.mxu0 }
 0xdb7   :  { %v1805_v8 = vpop.f32.mrf.mxu0 }
 0xdb8   :  { %v1808_v9 = vmul.f32 0.35355338, %v1805_v8 }
 0xdba   :  { %v1809_v10 = vsel %vm297_vm1, %v1808_v9, -inf }
 0xdbb   :  { %1810 = vmax.xlane.f32.xlu0 %v1809_v10  ;;  %v1979_v10 = vld [vmem:[%s3224_s18 + $0x38] sm:$0xff] }
 0xdbc   :  { %1999 = vmatpush.msra.mxu0 %v1979_v10 }
 0xdc5   :  { %v1510_v54 = vpop.f32.mrf.mxu1 }
 0xdc6   :  { %v1609_v47 = vpop.xlane.xlu2 %1608  ;;  %v1513_v20 = vadd.f32 %v1510_v54, %v3069_v28 }
 0xdc7   :  { %v1610_v11 = vsub.f32 %v1606_v62, %v1609_v47  ;;  %v3142_v62 = vld [vmem:[#allocation13] ss:$0 sm:$0xff]  ;;  %v1978_v47 = vld [vmem:[%s3224_s18 + $0x30] sm:$0xff] }
 0xdc8   :  { %v1873_v22 = vadd.f32 %v3111_v21, %v1513_v20  ;;  %2000 = vmatpush.msra.mxu0 %v1978_v47 }
 0xdc9   :  { %v1611_v12 = vmul.f32 1.442695, %v1610_v11  ;;  %v1977_v11 = vld [vmem:[%s3224_s18 + $0x28] sm:$0xff] }
 0xdca   :  { %v1875_v23 = vadd.f32 %v1873_v22, %v2977_v53  ;;  %2001 = vmatpush.msra.mxu0 %v1977_v11 }
 0xdcb   :  { %2259 = vpow2.f32 %v1611_v12  ;;  %v1976_v12 = vld [vmem:[%s3224_s18 + $0x20] sm:$0xff] }
 0xdcc   :  { %v1879_v24 = vsel %vm259_vm0, %v1875_v23, 0.0  ;;  %2002 = vmatpush.msra.mxu0 %v1976_v12 }
 0xdce   :  { %v1721_v52 = vpop.xlane.xlu1 %1720 }
 0xdcf   :  { %v1722_v13 = vsub.f32 %v1718_v3, %v1721_v52  ;;  %1618 = vrot.lane.b32.xlu0 %v3055_v15, %s2620_s28  ;;  %v3144_v3 = vld [vmem:[#allocation15] ss:$0 sm:$0xff]  ;;  %v1975_v52 = vld [vmem:[%s3224_s18 + $0x18] sm:$0xff] }
 0xdd0   :  { %2003 = vmatpush.msra.mxu0 %v1975_v52 }
 0xdd1   :  { %v2260_v14 = vpop.eup %2259  ;;  %v1723_v16 = vmul.f32 1.442695, %v1722_v13  ;;  %v1974_v13 = vld [vmem:[%s3224_s18 + $0x10] sm:$0xff] }
 0xdd2   :  { %v1613_v17 = vsel %vm297_vm1, %v2260_v14, 0.0  ;;  %2004 = vmatpush.msra.mxu0 %v1974_v13 }
 0xdd3   :  { %2261 = vpow2.f32 %v1723_v16  ;;  %1614 = vadd.xlane.f32.xlu2 %v1613_v17  ;;  %v1972_v16 = vld [vmem:[%s3224_s18] sm:$0xff] }
 0xdd9   :  { %v2262_v18 = vpop.eup %2261 }
 0xdda   :  { %v1725_v19 = vsel %vm297_vm1, %v2262_v18, 0.0 }
 0xddb   :  { %1726 = vadd.xlane.f32.xlu1 %v1725_v19  ;;  %v3174_v19 = vld [vmem:[#allocation16] ss:$0 sm:$0xff] }
 0xdf4   :  { %1730 = vrot.lane.b32.xlu1 %v3055_v15, %s2626_s0 }
 0xdf9   :  { %1880 = vadd.xlane.f32.xlu0 %v1879_v24 }
 0xe2e   :  { %v1811_v25 = vpop.xlane.xlu0 %1810 }
 0xe2f   :  { %v1812_v41 = vsub.f32 %v1808_v9, %v1811_v25 }
 0xe31   :  { %v1813_v27 = vmul.f32 1.442695, %v1812_v41 }
 0xe33   :  { %2263 = vpow2.f32 %v1813_v27 }
 0xe39   :  { %v2264_v26 = vpop.eup %2263 }
 0xe3a   :  { %v1815_v29 = vsel %vm297_vm1, %v2264_v26, 0.0 }
 0xe3b   :  { %1816 = vadd.xlane.f32.xlu2 %v1815_v29 }
 0xe41   :  { %v1619_v28 = vpop.permute.xlu0 %1618 }
 0xe42   :  { %1639 = vmatpush.msra.mxu1 %v1619_v28 }
 0xe46   :  { %v1615_v63 = vpop.xlane.xlu2 %1614 }
 0xe47   :  { %2265 = vrcp.f32 %v1615_v63 }
 0xe4d   :  { %v2266_v30 = vpop.eup %2265 }
 0xe4e   :  { %v1617_v31 = vmul.f32 %v2266_v30, %v2260_v14  ;;  %v1727_v53 = vpop.xlane.xlu1 %1726  ;;  %v1973_v14 = vld [vmem:[%s3224_s18 + $0x8] sm:$0xff]  ;;  %v2198_v30 = vld [vmem:[#allocation18] ss:$0 sm:$0xff] }
 0xe4f   :  { %2267 = vrcp.f32 %v1727_v53  ;;  %2005 = vmatpush.msra.mxu0 %v1973_v14 }
 0xe50   :  { %2144 = vmatmul.msk.f32.vlgmr.msra.gmra.mxu1 %vm297_vm1, %v1617_v31 }
 0xe51   :  { %2006 = vmatpush.msra.mxu0 %v1972_v16 }
 0xe53   :  { %1820 = vrot.lane.b32.xlu2 %v3055_v15, %s2622_s7 }
 0xe55   :  { %v2268_v32 = vpop.eup %2267 }
 0xe56   :  { %v1729_v33 = vmul.f32 %v2268_v32, %v2262_v18 }
 0xe66   :  { %v1731_v34 = vpop.permute.xlu1 %1730 }
 0xe67   :  { %1751 = vmatpush.msrb.mxu1 %v1731_v34 }
 0xe68   :  { %2149 = vmatmul.msk.f32.vlgmr.msrb.gmra.mxu1 %vm297_vm1, %v1729_v33 }
 0xe69   :  { %1864 = vmatpush.msra.mxu1 %v3095_v59 }
 0xe6c   :  { %v1881_v35 = vpop.xlane.xlu0 %1880 }
 0xe6d   :  { %v1885_v36 = vmul.f32 %v1881_v35, %v2929_v2 }
 0xe6f   :  { %v1887_v37 = vsub.f32 %v1875_v23, %v1885_v36 }
 0xe71   :  { %v1889_v38 = vmul.f32 %v1887_v37, %v1887_v37 }
 0xe73   :  { %v1891_v39 = vsel %vm259_vm0, %v1889_v38, 0.0 }
 0xe7c   :  { %1892 = vadd.xlane.f32.xlu2 %v1891_v39 }
 0xeae   :  { %v1817_v40 = vpop.xlane.xlu2 %1816 }
 0xeaf   :  { %2269 = vrcp.f32 %v1817_v40 }
 0xeb5   :  { %v2270_v15 = vpop.eup %2269 }
 0xeb6   :  { %v1819_v42 = vmul.f32 %v2270_v15, %v2264_v26  ;;  %v1821_v43 = vpop.permute.xlu2 %1820 }
 0xeb7   :  { %1841 = vmatpush.msra.mxu2 %v1821_v43 }
 0xeb8   :  { %2153 = vmatmul.msk.f32.vlgmr.msra.gmra.mxu2 %vm297_vm1, %v1819_v42 }
 0xecd   :  { %v1641_v44 = vpop.f32.mrf.mxu1 }
 0xece   :  { %2145 = vmatmul.msk.f32.vlgmr.msra.gmra.mxu3 %vm297_vm1, %v1641_v44 }
 0xecf   :  { %1959 = vmatpush.msra.mxu3 %v1936_v48 }
 0xed1   :  { %1960 = vmatpush.msra.mxu3 %v1935_v49 }
 0xed3   :  { %1961 = vmatpush.msra.mxu3 %v1934_v50 }
 0xed5   :  { %1962 = vmatpush.msra.mxu3 %v1933_v51 }
 0xee5   :  { %v1753_v45 = vpop.f32.mrf.mxu1 }
 0xee6   :  { %2150 = vmatmul.msk.f32.vlgmr.msrb.gmra.mxu3 %vm297_vm1, %v1753_v45 }
 0xeef   :  { %v1893_v56 = vpop.xlane.xlu2 %1892 }
 0xef0   :  { %v1897_v55 = vmul.f32 %v1893_v56, %v2929_v2 }
 0xef2   :  { %v1899_v57 = vadd.f32 1e-05, %v1897_v55 }
 0xef4   :  { %2271 = vrsqrt.f32 %v1899_v57  ;;  %vm1907_vm10 = vweird.f32 %v1899_v57 }
 0xefa   :  { %v2272_v58 = vpop.eup %2271 }
 0xefb   :  { %v1902_v59 = vmul.f32 %v2272_v58, %v1899_v57  ;;  %vm1908_vm9 = vweird.f32 %v2272_v58 }
 0xefc   :  { %vm1909_vm11 = vmor %vm1907_vm10, %vm1908_vm9 }
 0xefd   :  { %v1903_v4 = vmul.f32 %v2272_v58, %v1902_v59 }
 0xeff   :  { %v1904_v60 = vmul.f32 0.5, %v1903_v4 }
 0xf01   :  { %v1905_v46 = vsub.f32 1.5, %v1904_v60 }
 0xf03   :  { %v1906_v61 = vmul.f32 %v2272_v58, %v1905_v46 }
 0xf05   :  { %v1910_v0 = vsel %vm1909_vm11, %v2272_v58, %v1906_v61 }
 0xf06   :  { %v1921_v1 = vmul.f32 %v1910_v0, %v1887_v37 }
 0xf08   :  { %v1926_v5 = vmul.f32 %v3142_v62, %v1921_v1 }
 0xf0a   :  { %v1931_v8 = vadd.f32 %v3144_v3, %v1926_v5  ;;  %v2199_v5 = vld [vmem:[#allocation19] ss:$0 sm:$0xff] }
 0xf0c   :  { %2155 = vmatmul.msk.f32.vlgmr.msra.gmra.mxu3 %vm259_vm0, %v1931_v8 }
 0xf3b   :  { %v1843_v9 = vpop.f32.mrf.mxu2 }
 0xf3c   :  { %2154 = vmatmul.msk.f32.vlgmr.msra.gmra.mxu1 %vm297_vm1, %v1843_v9 }
 0xf51   :  { %v1664_v17 = vpop.f32.mrf.mxu3 }
 0xf52   :  { %v1688_v23 = vadd.f32 %v3103_v6, %v1664_v17 }
 0xf69   :  { %v1776_v18 = vpop.f32.mrf.mxu3 }
 0xf6a   :  { %v1779_v24 = vadd.f32 %v1776_v18, %v1688_v23 }
 0xf8f   :  { %v1964_v54 = vpop.f32.mrf.mxu3 }
 0xf90   :  { %v1965_v20 = vadd.f32 %v3174_v19, %v1964_v54 }
 0xf92   :  { %v1970_v22 = vmax.f32 %v1965_v20, 0.0 }
 0xf94   :  { %2157 = vmatmul.msk.f32.vlgmr.msra.gmra.mxu0 %vm1984_vm12, %v1970_v22 }
 0xfb9   :  { %v1866_v25 = vpop.f32.mrf.mxu1 }
 0xfba   :  { %v1869_v41 = vadd.f32 %v1866_v25, %v1779_v24 }
 0xfbc   :  { %v1874_v27 = vadd.f32 %v3111_v21, %v1869_v41 }
 0xfbe   :  { %v1876_v26 = vadd.f32 %v1874_v27, %v3041_v7 }
 0xfc0   :  { %v1882_v29 = vsel %vm259_vm0, %v1876_v26, 0.0 }
 0xfc1   :  { %1883 = vadd.xlane.f32.xlu1 %v1882_v29 }
0x1011   :  { %v2008_v53 = vpop.f32.mrf.mxu0 }
0x1012   :  { %v2009_v33 = vadd.f32 %v2198_v30, %v2008_v53 }
0x1014   :  { %v2014_v34 = vadd.f32 %v2009_v33, %v1931_v8  ;;  %v2200_v8 = vld [vmem:[#allocation21] ss:$0 sm:$0xff] }
0x1016   :  { %v2018_v35 = vsel %vm259_vm0, %v2014_v34, 0.0 }
0x1034   :  { %v1884_v28 = vpop.xlane.xlu1 %1883 }
0x1035   :  { %v1886_v63 = vmul.f32 %v1884_v28, %v2929_v2 }
0x1037   :  { %v1888_v31 = vsub.f32 %v1876_v26, %v1886_v63 }
0x1039   :  { %v1890_v32 = vmul.f32 %v1888_v31, %v1888_v31 }
0x103b   :  { %v1894_v6 = vsel %vm259_vm0, %v1890_v32, 0.0 }
0x103c   :  { %1895 = vadd.xlane.f32.xlu0 %v1894_v6 }
0x1044   :  { %2019 = vadd.xlane.f32.xlu0 %v2018_v35 }
0x10af   :  { %v1896_v21 = vpop.xlane.xlu0 %1895 }
0x10b0   :  { %v1898_v7 = vmul.f32 %v1896_v21, %v2929_v2 }
0x10b2   :  { %v1900_v36 = vadd.f32 1e-05, %v1898_v7 }
0x10b4   :  { %2273 = vrsqrt.f32 %v1900_v36  ;;  %vm1917_vm14 = vweird.f32 %v1900_v36 }
0x10b7   :  { %v2020_v37 = vpop.xlane.xlu0 %2019 }
0x10b8   :  { %v2024_v38 = vmul.f32 %v2020_v37, %v2929_v2 }
0x10ba   :  { %v2274_v39 = vpop.eup %2273  ;;  %v2026_v40 = vsub.f32 %v2014_v34, %v2024_v38 }
0x10bb   :  { %v1912_v15 = vmul.f32 %v2274_v39, %v1900_v36  ;;  %vm1918_vm13 = vweird.f32 %v2274_v39 }
0x10bc   :  { %v2028_v42 = vmul.f32 %v2026_v40, %v2026_v40  ;;  %vm1919_vm15 = vmor %vm1917_vm14, %vm1918_vm13 }
0x10bd   :  { %v1913_v43 = vmul.f32 %v2274_v39, %v1912_v15 }
0x10be   :  { %v2030_v44 = vsel %vm259_vm0, %v2028_v42, 0.0 }
0x10bf   :  { %v1914_v45 = vmul.f32 0.5, %v1913_v43  ;;  %2031 = vadd.xlane.f32.xlu2 %v2030_v44 }
0x10c1   :  { %v1915_v48 = vsub.f32 1.5, %v1914_v45 }
0x10c3   :  { %v1916_v49 = vmul.f32 %v2274_v39, %v1915_v48 }
0x10c5   :  { %v1920_v50 = vsel %vm1919_vm15, %v2274_v39, %v1916_v49 }
0x10c6   :  { %v1922_v51 = vmul.f32 %v1920_v50, %v1888_v31 }
0x10c8   :  { %v1927_v56 = vmul.f32 %v3142_v62, %v1922_v51 }
0x10ca   :  { %v1932_v55 = vadd.f32 %v3144_v3, %v1927_v56 }
0x10cc   :  { %2156 = vmatmul.msk.f32.gmra.mxu3 %vm259_vm0, %v1932_v55 }
0x1132   :  { %v2032_v57 = vpop.xlane.xlu2 %2031 }
0x1133   :  { %v2036_v58 = vmul.f32 %v2032_v57, %v2929_v2 }
0x1135   :  { %v2038_v59 = vadd.f32 1e-05, %v2036_v58 }
0x1137   :  { %2275 = vrsqrt.f32 %v2038_v59  ;;  %vm2046_vm2 = vweird.f32 %v2038_v59 }
0x113d   :  { %v2276_v4 = vpop.eup %2275 }
0x113e   :  { %v2041_v60 = vmul.f32 %v2276_v4, %v2038_v59  ;;  %vm2047_vm1 = vweird.f32 %v2276_v4 }
0x113f   :  { %vm2048_vm3 = vmor %vm2046_vm2, %vm2047_vm1 }
0x1140   :  { %v2042_v46 = vmul.f32 %v2276_v4, %v2041_v60 }
0x1142   :  { %v2043_v61 = vmul.f32 0.5, %v2042_v46 }
0x1144   :  { %v2044_v0 = vsub.f32 1.5, %v2043_v61 }
0x1146   :  { %v2045_v1 = vmul.f32 %v2276_v4, %v2044_v0 }
0x1148   :  { %v2049_v62 = vsel %vm2048_vm3, %v2276_v4, %v2045_v1 }
0x1149   :  { %v2060_v3 = vmul.f32 %v2049_v62, %v2026_v40 }
0x114b   :  { %v2065_v9 = vmul.f32 %v2199_v5, %v2060_v3 }
0x114d   :  { %v2070_v10 = vadd.f32 %v2200_v8, %v2065_v9 }
0x114f   :  { %2072 = vst.msk [vmem:[%s3228_s22] sm:$0xff] %vm259_vm0, %v2070_v10  ;;  %v1967_v47 = vpop.f32.mrf.mxu3 }
0x1150   :  { %v1968_v11 = vadd.f32 %v3174_v19, %v1967_v47 }
0x1152   :  { %v1971_v12 = vmax.f32 %v1968_v11, 0.0 }
0x1154   :  { %2158 = vmatmul.msk.f32.gmra.mxu0 %vm1984_vm12, %v1971_v12 }
0x11d1   :  { %v2011_v52 = vpop.f32.mrf.mxu0 }
0x11d2   :  { %v2012_v13 = vadd.f32 %v2198_v30, %v2011_v52 }
0x11d4   :  { %v2015_v14 = vadd.f32 %v2012_v13, %v1932_v55 }
0x11d6   :  { %v2021_v16 = vsel %vm259_vm0, %v2015_v14, 0.0 }
0x11d7   :  { %2022 = vadd.xlane.f32.xlu1 %v2021_v16 }
0x124a   :  { %v2023_v17 = vpop.xlane.xlu1 %2022 }
0x124b   :  { %v2025_v18 = vmul.f32 %v2023_v17, %v2929_v2 }
0x124d   :  { %v2027_v54 = vsub.f32 %v2015_v14, %v2025_v18 }
0x124f   :  { %v2029_v20 = vmul.f32 %v2027_v54, %v2027_v54 }
0x1251   :  { %v2033_v22 = vsel %vm259_vm0, %v2029_v20, 0.0 }
0x1252   :  { %2034 = vadd.xlane.f32.xlu0 %v2033_v22 }
0x12c5   :  { %v2035_v23 = vpop.xlane.xlu0 %2034 }
0x12c6   :  { %v2037_v19 = vmul.f32 %v2035_v23, %v2929_v2 }
0x12c8   :  { %v2039_v24 = vadd.f32 1e-05, %v2037_v19 }
0x12ca   :  { %2277 = vrsqrt.f32 %v2039_v24  ;;  %vm2056_vm5 = vweird.f32 %v2039_v24 }
0x12d0   :  { %v2278_v25 = vpop.eup %2277 }
0x12d1   :  { %v2051_v41 = vmul.f32 %v2278_v25, %v2039_v24  ;;  %vm2057_vm4 = vweird.f32 %v2278_v25 }
0x12d2   :  { %vm2058_vm6 = vmor %vm2056_vm5, %vm2057_vm4 }
0x12d3   :  { %v2052_v27 = vmul.f32 %v2278_v25, %v2051_v41 }
0x12d5   :  { %v2053_v26 = vmul.f32 0.5, %v2052_v27 }
0x12d7   :  { %v2054_v29 = vsub.f32 1.5, %v2053_v26 }
0x12d9   :  { %v2055_v28 = vmul.f32 %v2278_v25, %v2054_v29 }
0x12db   :  { %v2059_v63 = vsel %vm2058_vm6, %v2278_v25, %v2055_v28 }
0x12dc   :  { %v2061_v30 = vmul.f32 %v2059_v63, %v2027_v54 }
0x12de   :  { %v2066_v31 = vmul.f32 %v2199_v5, %v2061_v30 }
0x12e0   :  { %v2071_v53 = vadd.f32 %v2200_v8, %v2066_v31 }
0x12e2   :  { %2073 = vst.msk [vmem:[%s3228_s22 + $0x8] sm:$0xff] %vm259_vm0, %v2071_v53 }
0x12e3   :  { %2078 = vsyncpa [#allocation3], 1 }
0x12e4   :  { %2079 = vsyncpa [#allocation5], 1 }
0x12e5   :  { %2080 = vsyncpa [#allocation8], 1 }
0x12e6   :  { %2081 = vsyncpa [#allocation11], 1 }
0x12e7   :  { %2082 = vsyncpa [#allocation14], 1 }
0x12e8   :  { %2083 = vsyncpa [#allocation17], 1 }
0x12e9   :  { %2084 = vsyncpa [#allocation20], 1 }

</bundles_post_ra>
